<compile_context>
chip_gen: v7x
topology: tpu7x:2x2x1
jax: 0.10.0
libtpu: 0.0.40
codegen_flags: <defaults>
</compile_context>

<pallas_src>
import functools

import jax
import jax.numpy as jnp
import numpy as np
from jax.experimental import pallas as pl
from jax.experimental.pallas import tpu as pltpu


def _round_up(v, m):
    return ((v + m - 1) // m) * m


# ----------------------------------------------------------------------------
# Block-Toeplitz conv weights (trace-time).
#   row m = parity*Cout*pb + co*pb + p
#   col c = (kw*Cin + cin)*band_h + h
#   T[m, c] = w[co, cin, h - 2p - parity, kw]  if 0 <= h-2p-parity < K else 0
# ----------------------------------------------------------------------------
def _toeplitz_weights(w, pb_cur, band_h_cur):
    Cout, Cin, K, _ = w.shape
    p_idx = jnp.arange(pb_cur)[:, None]
    h_idx = jnp.arange(band_h_cur)[None, :]
    halves = []
    for parity in (0, 1):
        kh = h_idx - 2 * p_idx - parity                    # (pb, band_h)
        valid = (kh >= 0) & (kh < K)
        kh_c = jnp.clip(kh, 0, K - 1)
        wt = w[:, :, kh_c, :]                              # (Cout,Cin,pb,band_h,K)
        wt = jnp.where(valid[None, None, :, :, None], wt, 0.0)
        wt = jnp.transpose(wt, (0, 2, 4, 1, 3))            # (Cout,pb,K,Cin,band_h)
        halves.append(wt.reshape(Cout * pb_cur, K * Cin * band_h_cur))
    return jnp.concatenate(halves, axis=0)                 # (2*Cout*pb, K*Cin*band_h)


# ----------------------------------------------------------------------------
# Fused conv(KxK, VALID) + bias + ReLU + 2x2 max-pool (NCHW, one image / step)
# ----------------------------------------------------------------------------
def _conv_relu_pool_kernel(x_ref, tf_ref, tt_ref, b_ref, sel_ref, o_ref, *,
                           K, Cin, Cout, Wo, Wp,
                           PB, band_h_full, n_full,
                           PB_tail, band_h_tail, p0_tail):
    sel = sel_ref[...]          # (Wo-1, Wp) exact 0/1 even-column selection
    bias = b_ref[...]           # (Cout, 1, Wp)

    def process_block(p0, r0, pb_cur, band_h_cur, t):
        # Merge all cin bands along the sublane axis (tile-aligned for the
        # pipelined full blocks: band_h_cur % 8 == 0 and r0 % 16 == 0).
        band = jnp.concatenate(
            [x_ref[0, cin, pl.ds(r0, band_h_cur), :] for cin in range(Cin)],
            axis=0)                                            # (Cin*band_h, W)
        # K lane shifts total (hoisted out of any cin loop), one big matmul:
        # (2*Cout*pb, K*Cin*band_h) x (K*Cin*band_h, Wo).
        rhs = jnp.concatenate([band[:, kw:kw + Wo] for kw in range(K)], axis=0)
        acc = jnp.dot(t, rhs, preferred_element_type=jnp.float32)
        half = Cout * pb_cur
        # rows [0, half) = even conv rows, [half, 2*half) = odd conv rows.
        hmax = jnp.maximum(acc[:half, :], acc[half:, :])       # H-direction pool
        cm = jnp.maximum(hmax[:, :Wo - 1], hmax[:, 1:])        # W neighbour max
        pooled = jnp.dot(cm, sel, preferred_element_type=jnp.float32)
        # bias + ReLU after pooling is exact (per-channel bias, monotone max).
        z = pooled.reshape(Cout, pb_cur, Wp) + bias
        o_ref[0, :, pl.ds(p0, pb_cur), :] = jnp.maximum(z, 0.0)

    if n_full > 0:
        t_full = tf_ref[...]    # loaded once, reused by every full block

        def body(blk, carry):
            p0 = blk * PB
            r0 = blk * (2 * PB)
            if PB % 8 == 0:     # alignment hints -> unmasked vld / vst
                p0 = pl.multiple_of(p0, 8)
                r0 = pl.multiple_of(r0, 16)
            process_block(p0, r0, PB, band_h_full, t_full)
            return carry

        jax.lax.fori_loop(0, n_full, body, 0)

    # Ragged tail: static offsets, unpadded band (ends exactly at row H-1),
    # its own (smaller) Toeplitz weight.
    process_block(p0_tail, 2 * p0_tail, PB_tail, band_h_tail, tt_ref[...])


def conv_relu_pool(x, w, b, *, pb=16):
    """x: (N, Cin, H, W) f32; w: (Cout, Cin, K, K) OIHW; b: (Cout,)."""
    N, Cin, H, W = x.shape
    Cout, Cin_w, K, _ = w.shape
    assert Cin_w == Cin
    Ho, Wo = H - K + 1, W - K + 1
    assert Ho % 2 == 0 and Wo % 2 == 0, "2x2 pooling assumes even conv output dims"
    Hp, Wp = Ho // 2, Wo // 2

    PB = min(pb, Hp)                                   # pooled rows per full block
    band_h_full = _round_up(2 * PB + K - 1, 8)         # pad -> tile-aligned merge
    n_full = Hp // PB
    if n_full * PB == Hp:
        n_full -= 1                                    # always keep a tail block
    while n_full > 0 and 2 * (n_full - 1) * PB + band_h_full > H:
        n_full -= 1                                    # never read past row H-1
    PB_tail = Hp - n_full * PB
    p0_tail = n_full * PB
    band_h_tail = 2 * PB_tail + K - 1                  # unpadded: ends exactly at H

    t_full = _toeplitz_weights(w, PB, band_h_full)     # (2*Cout*PB, K*Cin*band_h)
    t_tail = _toeplitz_weights(w, PB_tail, band_h_tail)
    bias = jnp.broadcast_to(b.reshape(Cout, 1, 1).astype(jnp.float32),
                            (Cout, 1, Wp))
    # Exact 0/1 even-column selection: sel[x, wp] = (x == 2*wp).
    sel = (jnp.arange(Wo - 1)[:, None] == 2 * jnp.arange(Wp)[None, :]
           ).astype(jnp.float32)

    kernel = functools.partial(
        _conv_relu_pool_kernel, K=K, Cin=Cin, Cout=Cout, Wo=Wo, Wp=Wp,
        PB=PB, band_h_full=band_h_full, n_full=n_full,
        PB_tail=PB_tail, band_h_tail=band_h_tail, p0_tail=p0_tail)

    return pl.pallas_call(
        kernel,
        out_shape=jax.ShapeDtypeStruct((N, Cout, Hp, Wp), jnp.float32),
        grid_spec=pltpu.PrefetchScalarGridSpec(
            num_scalar_prefetch=0,
            grid=(N,),
            in_specs=[
                pl.BlockSpec((1, Cin, H, W), lambda n: (n, 0, 0, 0)),
                pl.BlockSpec(t_full.shape, lambda n: (0, 0)),
                pl.BlockSpec(t_tail.shape, lambda n: (0, 0)),
                pl.BlockSpec(bias.shape, lambda n: (0, 0, 0)),
                pl.BlockSpec(sel.shape, lambda n: (0, 0)),
            ],
            out_specs=pl.BlockSpec((1, Cout, Hp, Wp), lambda n: (n, 0, 0, 0)),
        ),
        compiler_params=pltpu.CompilerParams(
            dimension_semantics=("parallel",),
            vmem_limit_bytes=32 * 1024 * 1024),
    )(x, t_full, t_tail, bias, sel)


# ----------------------------------------------------------------------------
# Fully-connected layer: whole (Kf, 75) weight resident in VMEM, no padding,
# no K tiling (the layer is DMA-bound; ~5.8 MiB padded fits all generations).
# ----------------------------------------------------------------------------
def _fc_kernel(x_ref, w_ref, b_ref, o_ref):
    o_ref[...] = (jnp.dot(x_ref[...], w_ref[...],
                          preferred_element_type=jnp.float32) + b_ref[...])


def linear(x, w, b):
    """x: (N, Kf) f32, w: (Kf, F), b: (1, F)."""
    N, Kf = x.shape
    F = w.shape[1]
    return pl.pallas_call(
        _fc_kernel,
        out_shape=jax.ShapeDtypeStruct((N, F), jnp.float32),
        grid=(1,),
        in_specs=[
            pl.BlockSpec((N, Kf), lambda i: (0, 0)),
            pl.BlockSpec((Kf, F), lambda i: (0, 0)),
            pl.BlockSpec((1, F), lambda i: (0, 0)),
        ],
        out_specs=pl.BlockSpec((N, F), lambda i: (0, 0)),
        compiler_params=pltpu.CompilerParams(
            vmem_limit_bytes=32 * 1024 * 1024),
    )(x, w, b)


# ----------------------------------------------------------------------------
# Full forward pass (Pallas) and plain-JAX reference
# ----------------------------------------------------------------------------
@jax.jit
def cnn_forward(x_nchw, params):
    w1, b1, w2, b2, wf, bf = params
    h1 = conv_relu_pool(x_nchw, w1, b1, pb=16)   # (N, out_1, 110, 110)
    h2 = conv_relu_pool(h1, w2, b2, pb=16)       # (N, out_2, 53, 53)
    # NCHW flatten == torch's x.view(N, -1): no transpose needed.
    feats = h2.reshape(h2.shape[0], -1)          # (N, out_2*53*53)
    return linear(feats, wf, bf)                 # (N, 75)


@jax.jit
def cnn_reference(x_nchw, params):
    w1, b1, w2, b2, wf, bf = params
    dn = ("NCHW", "OIHW", "NCHW")
    hp = jax.lax.Precision.HIGHEST

    def pool(y):
        return jax.lax.reduce_window(y, -jnp.inf, jax.lax.max,
                                     (1, 1, 2, 2), (1, 1, 2, 2), "VALID")

    y = jax.lax.conv_general_dilated(x_nchw, w1, (1, 1), "VALID",
                                     dimension_numbers=dn, precision=hp)
    y = pool(jnp.maximum(y + b1.reshape(1, -1, 1, 1), 0.0))
    y = jax.lax.conv_general_dilated(y, w2, (1, 1), "VALID",
                                     dimension_numbers=dn, precision=hp)
    y = pool(jnp.maximum(y + b2.reshape(1, -1, 1, 1), 0.0))
    y = y.reshape(y.shape[0], -1)
    return jnp.dot(y, wf, precision=hp) + bf


if __name__ == "__main__":
    out_1, out_2 = 4, 4
    N = 2

    key = jax.random.PRNGKey(0)
    ks = jax.random.split(key, 7)
    # Deterministic synthetic parameters (shapes from the module's __init__),
    # conv weights in PyTorch OIHW layout, fc weight already transposed.
    w1 = 0.1 * jax.random.normal(ks[0], (out_1, 3, 5, 5), jnp.float32)
    b1 = 0.1 * jax.random.normal(ks[1], (out_1,), jnp.float32)
    w2 = 0.1 * jax.random.normal(ks[2], (out_2, out_1, 5, 5), jnp.float32)
    b2 = 0.1 * jax.random.normal(ks[3], (out_2,), jnp.float32)
    wf = 0.01 * jax.random.normal(ks[4], (out_2 * 53 * 53, 75), jnp.float32)
    bf = 0.1 * jax.random.normal(ks[5], (1, 75), jnp.float32)
    params = (w1, b1, w2, b2, wf, bf)

    # fc1 expects out_2*53*53 features, which pins the input to 3x224x224.
    x = jax.random.normal(ks[6], (N, 3, 224, 224), jnp.float32)

    out = jax.block_until_ready(cnn_forward(x, params))
    assert out.shape == (N, 75) and out.dtype == jnp.float32

    ref = jax.block_until_ready(cnn_reference(x, params))
    np.testing.assert_allclose(np.asarray(out), np.asarray(ref),
                               rtol=3e-2, atol=3e-2)
    print("KERNEL_OK")
</pallas_src>

<mosaic_0001>
module attributes {stable_mosaic.version = 11 : i64} {
  func.func @_conv_relu_pool_kernel(%arg0: i32, %arg1: memref<1x3x224x224xf32, #tpu.memory_space<vmem>>, %arg2: memref<128x600xf32, #tpu.memory_space<vmem>>, %arg3: memref<112x480xf32, #tpu.memory_space<vmem>>, %arg4: memref<4x1x110xf32, #tpu.memory_space<vmem>>, %arg5: memref<219x110xf32, #tpu.memory_space<vmem>>, %arg6: memref<1x4x110x110xf32, #tpu.memory_space<vmem>>) attributes {dimension_semantics = [#tpu.dimension_semantics<parallel>], iteration_bounds = array<i64: 2>, scalar_prefetch = 0 : i64, scratch_operands = 0 : i64, tpu.core_type = #tpu.core_type<tc>, window_params = [{transform_indices = @transform_0, window_bounds = array<i64: 1, 3, 224, 224>}, {pipeline_mode = #tpu.pipeline_mode<synchronous>, transform_indices = @transform_1, window_bounds = array<i64: 128, 600>}, {pipeline_mode = #tpu.pipeline_mode<synchronous>, transform_indices = @transform_2, window_bounds = array<i64: 112, 480>}, {pipeline_mode = #tpu.pipeline_mode<synchronous>, transform_indices = @transform_3, window_bounds = array<i64: 4, 1, 110>}, {pipeline_mode = #tpu.pipeline_mode<synchronous>, transform_indices = @transform_4, window_bounds = array<i64: 219, 110>}, {transform_indices = @transform_5, window_bounds = array<i64: 1, 4, 110, 110>}]} {
    %c0 = arith.constant 0 : index
    %c0_0 = arith.constant 0 : index
    %0 = vector.load %arg5[%c0, %c0_0] : memref<219x110xf32, #tpu.memory_space<vmem>>, vector<219x110xf32>
    %c0_1 = arith.constant 0 : index
    %c0_2 = arith.constant 0 : index
    %c0_3 = arith.constant 0 : index
    %1 = vector.load %arg4[%c0_1, %c0_2, %c0_3] : memref<4x1x110xf32, #tpu.memory_space<vmem>>, vector<4x1x110xf32>
    %c0_4 = arith.constant 0 : index
    %c0_5 = arith.constant 0 : index
    %2 = vector.load %arg2[%c0_4, %c0_5] : memref<128x600xf32, #tpu.memory_space<vmem>>, vector<128x600xf32>
    %c0_i32 = arith.constant 0 : i32
    %c6_i32 = arith.constant 6 : i32
    %3 = arith.addi %c0_i32, %c6_i32 : i32
    %c1_i32 = arith.constant 1 : i32
    scf.for %arg7 = %c0_i32 to %3 step %c1_i32  : i32 {
      %c16_i32 = arith.constant 16 : i32
      %34 = arith.muli %arg7, %c16_i32 : i32
      %c32_i32 = arith.constant 32 : i32
      %35 = arith.muli %arg7, %c32_i32 : i32
      %36 = tpu.assume_multiple %34, 8 : i32
      %37 = tpu.assume_multiple %35, 16 : i32
      %c0_23 = arith.constant 0 : index
      %c0_24 = arith.constant 0 : index
      %38 = arith.index_cast %37 : i32 to index
      %c0_25 = arith.constant 0 : index
      %39 = vector.load %arg1[%c0_23, %c0_24, %38, %c0_25] : memref<1x3x224x224xf32, #tpu.memory_space<vmem>>, vector<1x1x40x224xf32>
      %40 = vector.shape_cast %39 : vector<1x1x40x224xf32> to vector<40x224xf32>
      %c0_26 = arith.constant 0 : index
      %c1_27 = arith.constant 1 : index
      %41 = arith.index_cast %37 : i32 to index
      %c0_28 = arith.constant 0 : index
      %42 = vector.load %arg1[%c0_26, %c1_27, %41, %c0_28] : memref<1x3x224x224xf32, #tpu.memory_space<vmem>>, vector<1x1x40x224xf32>
      %43 = vector.shape_cast %42 : vector<1x1x40x224xf32> to vector<40x224xf32>
      %c0_29 = arith.constant 0 : index
      %c2_30 = arith.constant 2 : index
      %44 = arith.index_cast %37 : i32 to index
      %c0_31 = arith.constant 0 : index
      %45 = vector.load %arg1[%c0_29, %c2_30, %44, %c0_31] : memref<1x3x224x224xf32, #tpu.memory_space<vmem>>, vector<1x1x40x224xf32>
      %46 = vector.shape_cast %45 : vector<1x1x40x224xf32> to vector<40x224xf32>
      %47 = tpu.concatenate %40, %43, %46 in 0 : vector<40x224xf32>, vector<40x224xf32>, vector<40x224xf32> -> vector<120x224xf32>
      %48 = vector.extract_strided_slice %47 {offsets = [0, 0], sizes = [120, 220], strides = [1, 1]} : vector<120x224xf32> to vector<120x220xf32>
      %49 = vector.extract_strided_slice %47 {offsets = [0, 1], sizes = [120, 220], strides = [1, 1]} : vector<120x224xf32> to vector<120x220xf32>
      %50 = vector.extract_strided_slice %47 {offsets = [0, 2], sizes = [120, 220], strides = [1, 1]} : vector<120x224xf32> to vector<120x220xf32>
      %51 = vector.extract_strided_slice %47 {offsets = [0, 3], sizes = [120, 220], strides = [1, 1]} : vector<120x224xf32> to vector<120x220xf32>
      %52 = vector.extract_strided_slice %47 {offsets = [0, 4], sizes = [120, 220], strides = [1, 1]} : vector<120x224xf32> to vector<120x220xf32>
      %53 = tpu.concatenate %48, %49, %50, %51, %52 in 0 : vector<120x220xf32>, vector<120x220xf32>, vector<120x220xf32>, vector<120x220xf32>, vector<120x220xf32> -> vector<600x220xf32>
      %cst_32 = arith.constant dense<0.000000e+00> : vector<128x220xf32>
      %54 = tpu.matmul %2, %53, %cst_32 {dimension_numbers = #tpu.dot_dimension_numbers<[1], [0], [0], [1], [0, 0, 1, 1], [], []>} : vector<128x600xf32>, vector<600x220xf32>, vector<128x220xf32> -> vector<128x220xf32>
      %55 = vector.extract_strided_slice %54 {offsets = [0, 0], sizes = [64, 220], strides = [1, 1]} : vector<128x220xf32> to vector<64x220xf32>
      %56 = vector.extract_strided_slice %54 {offsets = [64, 0], sizes = [64, 220], strides = [1, 1]} : vector<128x220xf32> to vector<64x220xf32>
      %57 = arith.maximumf %55, %56 : vector<64x220xf32>
      %58 = vector.extract_strided_slice %57 {offsets = [0, 0], sizes = [64, 219], strides = [1, 1]} : vector<64x220xf32> to vector<64x219xf32>
      %59 = vector.extract_strided_slice %57 {offsets = [0, 1], sizes = [64, 219], strides = [1, 1]} : vector<64x220xf32> to vector<64x219xf32>
      %60 = arith.maximumf %58, %59 : vector<64x219xf32>
      %cst_33 = arith.constant dense<0.000000e+00> : vector<64x110xf32>
      %61 = tpu.matmul %60, %0, %cst_33 {dimension_numbers = #tpu.dot_dimension_numbers<[1], [0], [0], [1], [0, 0, 1, 1], [], []>} : vector<64x219xf32>, vector<219x110xf32>, vector<64x110xf32> -> vector<64x110xf32>
      %62 = vector.shape_cast %61 : vector<64x110xf32> to vector<4x16x110xf32>
      %63 = vector.broadcast %1 : vector<4x1x110xf32> to vector<4x16x110xf32>
      %64 = arith.addf %62, %63 : vector<4x16x110xf32>
      %cst_34 = arith.constant 0.000000e+00 : f32
      %65 = vector.broadcast %cst_34 : f32 to vector<4x16x110xf32>
      %66 = arith.maximumf %64, %65 : vector<4x16x110xf32>
      %c0_35 = arith.constant 0 : index
      %c0_36 = arith.constant 0 : index
      %67 = arith.index_cast %36 : i32 to index
      %c0_37 = arith.constant 0 : index
      %68 = vector.load %arg6[%c0_35, %c0_36, %67, %c0_37] : memref<1x4x110x110xf32, #tpu.memory_space<vmem>>, vector<1x4x16x110xf32>
      %69 = vector.shape_cast %68 : vector<1x4x16x110xf32> to vector<4x16x110xf32>
      %70 = vector.shape_cast %66 : vector<4x16x110xf32> to vector<1x4x16x110xf32>
      tpu.vector_store %arg6[%c0_35, %c0_36, %67, %c0_37], %70 {strides = array<i32>} : memref<1x4x110x110xf32, #tpu.memory_space<vmem>>, vector<1x4x16x110xf32>,
    }
    %c6_i32_6 = arith.constant 6 : i32
    %c0_7 = arith.constant 0 : index
    %c0_8 = arith.constant 0 : index
    %4 = vector.load %arg3[%c0_7, %c0_8] : memref<112x480xf32, #tpu.memory_space<vmem>>, vector<112x480xf32>
    %c0_9 = arith.constant 0 : index
    %c0_10 = arith.constant 0 : index
    %c192 = arith.constant 192 : index
    %c0_11 = arith.constant 0 : index
    %5 = vector.load %arg1[%c0_9, %c0_10, %c192, %c0_11] : memref<1x3x224x224xf32, #tpu.memory_space<vmem>>, vector<1x1x32x224xf32>
    %6 = vector.shape_cast %5 : vector<1x1x32x224xf32> to vector<32x224xf32>
    %c0_12 = arith.constant 0 : index
    %c1 = arith.constant 1 : index
    %c192_13 = arith.constant 192 : index
    %c0_14 = arith.constant 0 : index
    %7 = vector.load %arg1[%c0_12, %c1, %c192_13, %c0_14] : memref<1x3x224x224xf32, #tpu.memory_space<vmem>>, vector<1x1x32x224xf32>
    %8 = vector.shape_cast %7 : vector<1x1x32x224xf32> to vector<32x224xf32>
    %c0_15 = arith.constant 0 : index
    %c2 = arith.constant 2 : index
    %c192_16 = arith.constant 192 : index
    %c0_17 = arith.constant 0 : index
    %9 = vector.load %arg1[%c0_15, %c2, %c192_16, %c0_17] : memref<1x3x224x224xf32, #tpu.memory_space<vmem>>, vector<1x1x32x224xf32>
    %10 = vector.shape_cast %9 : vector<1x1x32x224xf32> to vector<32x224xf32>
    %11 = tpu.concatenate %6, %8, %10 in 0 : vector<32x224xf32>, vector<32x224xf32>, vector<32x224xf32> -> vector<96x224xf32>
    %12 = vector.extract_strided_slice %11 {offsets = [0, 0], sizes = [96, 220], strides = [1, 1]} : vector<96x224xf32> to vector<96x220xf32>
    %13 = vector.extract_strided_slice %11 {offsets = [0, 1], sizes = [96, 220], strides = [1, 1]} : vector<96x224xf32> to vector<96x220xf32>
    %14 = vector.extract_strided_slice %11 {offsets = [0, 2], sizes = [96, 220], strides = [1, 1]} : vector<96x224xf32> to vector<96x220xf32>
    %15 = vector.extract_strided_slice %11 {offsets = [0, 3], sizes = [96, 220], strides = [1, 1]} : vector<96x224xf32> to vector<96x220xf32>
    %16 = vector.extract_strided_slice %11 {offsets = [0, 4], sizes = [96, 220], strides = [1, 1]} : vector<96x224xf32> to vector<96x220xf32>
    %17 = tpu.concatenate %12, %13, %14, %15, %16 in 0 : vector<96x220xf32>, vector<96x220xf32>, vector<96x220xf32>, vector<96x220xf32>, vector<96x220xf32> -> vector<480x220xf32>
    %cst = arith.constant dense<0.000000e+00> : vector<112x220xf32>
    %18 = tpu.matmul %4, %17, %cst {dimension_numbers = #tpu.dot_dimension_numbers<[1], [0], [0], [1], [0, 0, 1, 1], [], []>} : vector<112x480xf32>, vector<480x220xf32>, vector<112x220xf32> -> vector<112x220xf32>
    %19 = vector.extract_strided_slice %18 {offsets = [0, 0], sizes = [56, 220], strides = [1, 1]} : vector<112x220xf32> to vector<56x220xf32>
    %20 = vector.extract_strided_slice %18 {offsets = [56, 0], sizes = [56, 220], strides = [1, 1]} : vector<112x220xf32> to vector<56x220xf32>
    %21 = arith.maximumf %19, %20 : vector<56x220xf32>
    %22 = vector.extract_strided_slice %21 {offsets = [0, 0], sizes = [56, 219], strides = [1, 1]} : vector<56x220xf32> to vector<56x219xf32>
    %23 = vector.extract_strided_slice %21 {offsets = [0, 1], sizes = [56, 219], strides = [1, 1]} : vector<56x220xf32> to vector<56x219xf32>
    %24 = arith.maximumf %22, %23 : vector<56x219xf32>
    %cst_18 = arith.constant dense<0.000000e+00> : vector<56x110xf32>
    %25 = tpu.matmul %24, %0, %cst_18 {dimension_numbers = #tpu.dot_dimension_numbers<[1], [0], [0], [1], [0, 0, 1, 1], [], []>} : vector<56x219xf32>, vector<219x110xf32>, vector<56x110xf32> -> vector<56x110xf32>
    %26 = vector.shape_cast %25 : vector<56x110xf32> to vector<4x14x110xf32>
    %27 = vector.broadcast %1 : vector<4x1x110xf32> to vector<4x14x110xf32>
    %28 = arith.addf %26, %27 : vector<4x14x110xf32>
    %cst_19 = arith.constant 0.000000e+00 : f32
    %29 = vector.broadcast %cst_19 : f32 to vector<4x14x110xf32>
    %30 = arith.maximumf %28, %29 : vector<4x14x110xf32>
    %c0_20 = arith.constant 0 : index
    %c0_21 = arith.constant 0 : index
    %c96 = arith.constant 96 : index
    %c0_22 = arith.constant 0 : index
    %31 = vector.load %arg6[%c0_20, %c0_21, %c96, %c0_22] : memref<1x4x110x110xf32, #tpu.memory_space<vmem>>, vector<1x4x14x110xf32>
    %32 = vector.shape_cast %31 : vector<1x4x14x110xf32> to vector<4x14x110xf32>
    %33 = vector.shape_cast %30 : vector<4x14x110xf32> to vector<1x4x14x110xf32>
    tpu.vector_store %arg6[%c0_20, %c0_21, %c96, %c0_22], %33 {strides = array<i32>} : memref<1x4x110x110xf32, #tpu.memory_space<vmem>>, vector<1x4x14x110xf32>,
    return
  }
  func.func @transform_0(%arg0: i32) -> (i32, i32, i32, i32) {
    %c0_i32 = arith.constant 0 : i32
    %c0_i32_0 = arith.constant 0 : i32
    %c0_i32_1 = arith.constant 0 : i32
    %c0_i32_2 = arith.constant 0 : i32
    return %arg0, %c0_i32, %c0_i32_0, %c0_i32_1 : i32, i32, i32, i32
  }
  func.func @transform_1(%arg0: i32) -> (i32, i32) {
    %c0_i32 = arith.constant 0 : i32
    %c0_i32_0 = arith.constant 0 : i32
    %c0_i32_1 = arith.constant 0 : i32
    return %c0_i32, %c0_i32_0 : i32, i32
  }
  func.func @transform_2(%arg0: i32) -> (i32, i32) {
    %c0_i32 = arith.constant 0 : i32
    %c0_i32_0 = arith.constant 0 : i32
    %c0_i32_1 = arith.constant 0 : i32
    return %c0_i32, %c0_i32_0 : i32, i32
  }
  func.func @transform_3(%arg0: i32) -> (i32, i32, i32) {
    %c0_i32 = arith.constant 0 : i32
    %c0_i32_0 = arith.constant 0 : i32
    %c0_i32_1 = arith.constant 0 : i32
    %c0_i32_2 = arith.constant 0 : i32
    return %c0_i32, %c0_i32_0, %c0_i32_1 : i32, i32, i32
  }
  func.func @transform_4(%arg0: i32) -> (i32, i32) {
    %c0_i32 = arith.constant 0 : i32
    %c0_i32_0 = arith.constant 0 : i32
    %c0_i32_1 = arith.constant 0 : i32
    return %c0_i32, %c0_i32_0 : i32, i32
  }
  func.func @transform_5(%arg0: i32) -> (i32, i32, i32, i32) {
    %c0_i32 = arith.constant 0 : i32
    %c0_i32_0 = arith.constant 0 : i32
    %c0_i32_1 = arith.constant 0 : i32
    %c0_i32_2 = arith.constant 0 : i32
    return %arg0, %c0_i32, %c0_i32_0, %c0_i32_1 : i32, i32, i32, i32
  }
}

module attributes {stable_mosaic.version = 11 : i64} {
  func.func @_conv_relu_pool_kernel(%arg0: i32, %arg1: memref<1x4x110x110xf32, #tpu.memory_space<vmem>>, %arg2: memref<128x800xf32, #tpu.memory_space<vmem>>, %arg3: memref<40x280xf32, #tpu.memory_space<vmem>>, %arg4: memref<4x1x53xf32, #tpu.memory_space<vmem>>, %arg5: memref<105x53xf32, #tpu.memory_space<vmem>>, %arg6: memref<1x4x53x53xf32, #tpu.memory_space<vmem>>) attributes {dimension_semantics = [#tpu.dimension_semantics<parallel>], iteration_bounds = array<i64: 2>, scalar_prefetch = 0 : i64, scratch_operands = 0 : i64, tpu.core_type = #tpu.core_type<tc>, window_params = [{transform_indices = @transform_0, window_bounds = array<i64: 1, 4, 110, 110>}, {pipeline_mode = #tpu.pipeline_mode<synchronous>, transform_indices = @transform_1, window_bounds = array<i64: 128, 800>}, {pipeline_mode = #tpu.pipeline_mode<synchronous>, transform_indices = @transform_2, window_bounds = array<i64: 40, 280>}, {pipeline_mode = #tpu.pipeline_mode<synchronous>, transform_indices = @transform_3, window_bounds = array<i64: 4, 1, 53>}, {pipeline_mode = #tpu.pipeline_mode<synchronous>, transform_indices = @transform_4, window_bounds = array<i64: 105, 53>}, {transform_indices = @transform_5, window_bounds = array<i64: 1, 4, 53, 53>}]} {
    %c0 = arith.constant 0 : index
    %c0_0 = arith.constant 0 : index
    %0 = vector.load %arg5[%c0, %c0_0] : memref<105x53xf32, #tpu.memory_space<vmem>>, vector<105x53xf32>
    %c0_1 = arith.constant 0 : index
    %c0_2 = arith.constant 0 : index
    %c0_3 = arith.constant 0 : index
    %1 = vector.load %arg4[%c0_1, %c0_2, %c0_3] : memref<4x1x53xf32, #tpu.memory_space<vmem>>, vector<4x1x53xf32>
    %c0_4 = arith.constant 0 : index
    %c0_5 = arith.constant 0 : index
    %2 = vector.load %arg2[%c0_4, %c0_5] : memref<128x800xf32, #tpu.memory_space<vmem>>, vector<128x800xf32>
    %c0_i32 = arith.constant 0 : i32
    %c3_i32 = arith.constant 3 : i32
    %3 = arith.addi %c0_i32, %c3_i32 : i32
    %c1_i32 = arith.constant 1 : i32
    scf.for %arg7 = %c0_i32 to %3 step %c1_i32  : i32 {
      %c16_i32 = arith.constant 16 : i32
      %36 = arith.muli %arg7, %c16_i32 : i32
      %c32_i32 = arith.constant 32 : i32
      %37 = arith.muli %arg7, %c32_i32 : i32
      %38 = tpu.assume_multiple %36, 8 : i32
      %39 = tpu.assume_multiple %37, 16 : i32
      %c0_26 = arith.constant 0 : index
      %c0_27 = arith.constant 0 : index
      %40 = arith.index_cast %39 : i32 to index
      %c0_28 = arith.constant 0 : index
      %41 = vector.load %arg1[%c0_26, %c0_27, %40, %c0_28] : memref<1x4x110x110xf32, #tpu.memory_space<vmem>>, vector<1x1x40x110xf32>
      %42 = vector.shape_cast %41 : vector<1x1x40x110xf32> to vector<40x110xf32>
      %c0_29 = arith.constant 0 : index
      %c1_30 = arith.constant 1 : index
      %43 = arith.index_cast %39 : i32 to index
      %c0_31 = arith.constant 0 : index
      %44 = vector.load %arg1[%c0_29, %c1_30, %43, %c0_31] : memref<1x4x110x110xf32, #tpu.memory_space<vmem>>, vector<1x1x40x110xf32>
      %45 = vector.shape_cast %44 : vector<1x1x40x110xf32> to vector<40x110xf32>
      %c0_32 = arith.constant 0 : index
      %c2_33 = arith.constant 2 : index
      %46 = arith.index_cast %39 : i32 to index
      %c0_34 = arith.constant 0 : index
      %47 = vector.load %arg1[%c0_32, %c2_33, %46, %c0_34] : memref<1x4x110x110xf32, #tpu.memory_space<vmem>>, vector<1x1x40x110xf32>
      %48 = vector.shape_cast %47 : vector<1x1x40x110xf32> to vector<40x110xf32>
      %c0_35 = arith.constant 0 : index
      %c3_36 = arith.constant 3 : index
      %49 = arith.index_cast %39 : i32 to index
      %c0_37 = arith.constant 0 : index
      %50 = vector.load %arg1[%c0_35, %c3_36, %49, %c0_37] : memref<1x4x110x110xf32, #tpu.memory_space<vmem>>, vector<1x1x40x110xf32>
      %51 = vector.shape_cast %50 : vector<1x1x40x110xf32> to vector<40x110xf32>
      %52 = tpu.concatenate %42, %45, %48, %51 in 0 : vector<40x110xf32>, vector<40x110xf32>, vector<40x110xf32>, vector<40x110xf32> -> vector<160x110xf32>
      %53 = vector.extract_strided_slice %52 {offsets = [0, 0], sizes = [160, 106], strides = [1, 1]} : vector<160x110xf32> to vector<160x106xf32>
      %54 = vector.extract_strided_slice %52 {offsets = [0, 1], sizes = [160, 106], strides = [1, 1]} : vector<160x110xf32> to vector<160x106xf32>
      %55 = vector.extract_strided_slice %52 {offsets = [0, 2], sizes = [160, 106], strides = [1, 1]} : vector<160x110xf32> to vector<160x106xf32>
      %56 = vector.extract_strided_slice %52 {offsets = [0, 3], sizes = [160, 106], strides = [1, 1]} : vector<160x110xf32> to vector<160x106xf32>
      %57 = vector.extract_strided_slice %52 {offsets = [0, 4], sizes = [160, 106], strides = [1, 1]} : vector<160x110xf32> to vector<160x106xf32>
      %58 = tpu.concatenate %53, %54, %55, %56, %57 in 0 : vector<160x106xf32>, vector<160x106xf32>, vector<160x106xf32>, vector<160x106xf32>, vector<160x106xf32> -> vector<800x106xf32>
      %cst_38 = arith.constant dense<0.000000e+00> : vector<128x106xf32>
      %59 = tpu.matmul %2, %58, %cst_38 {dimension_numbers = #tpu.dot_dimension_numbers<[1], [0], [0], [1], [0, 0, 1, 1], [], []>} : vector<128x800xf32>, vector<800x106xf32>, vector<128x106xf32> -> vector<128x106xf32>
      %60 = vector.extract_strided_slice %59 {offsets = [0, 0], sizes = [64, 106], strides = [1, 1]} : vector<128x106xf32> to vector<64x106xf32>
      %61 = vector.extract_strided_slice %59 {offsets = [64, 0], sizes = [64, 106], strides = [1, 1]} : vector<128x106xf32> to vector<64x106xf32>
      %62 = arith.maximumf %60, %61 : vector<64x106xf32>
      %63 = vector.extract_strided_slice %62 {offsets = [0, 0], sizes = [64, 105], strides = [1, 1]} : vector<64x106xf32> to vector<64x105xf32>
      %64 = vector.extract_strided_slice %62 {offsets = [0, 1], sizes = [64, 105], strides = [1, 1]} : vector<64x106xf32> to vector<64x105xf32>
      %65 = arith.maximumf %63, %64 : vector<64x105xf32>
      %cst_39 = arith.constant dense<0.000000e+00> : vector<64x53xf32>
      %66 = tpu.matmul %65, %0, %cst_39 {dimension_numbers = #tpu.dot_dimension_numbers<[1], [0], [0], [1], [0, 0, 1, 1], [], []>} : vector<64x105xf32>, vector<105x53xf32>, vector<64x53xf32> -> vector<64x53xf32>
      %67 = vector.shape_cast %66 : vector<64x53xf32> to vector<4x16x53xf32>
      %68 = vector.broadcast %1 : vector<4x1x53xf32> to vector<4x16x53xf32>
      %69 = arith.addf %67, %68 : vector<4x16x53xf32>
      %cst_40 = arith.constant 0.000000e+00 : f32
      %70 = vector.broadcast %cst_40 : f32 to vector<4x16x53xf32>
      %71 = arith.maximumf %69, %70 : vector<4x16x53xf32>
      %c0_41 = arith.constant 0 : index
      %c0_42 = arith.constant 0 : index
      %72 = arith.index_cast %38 : i32 to index
      %c0_43 = arith.constant 0 : index
      %73 = vector.load %arg6[%c0_41, %c0_42, %72, %c0_43] : memref<1x4x53x53xf32, #tpu.memory_space<vmem>>, vector<1x4x16x53xf32>
      %74 = vector.shape_cast %73 : vector<1x4x16x53xf32> to vector<4x16x53xf32>
      %75 = vector.shape_cast %71 : vector<4x16x53xf32> to vector<1x4x16x53xf32>
      tpu.vector_store %arg6[%c0_41, %c0_42, %72, %c0_43], %75 {strides = array<i32>} : memref<1x4x53x53xf32, #tpu.memory_space<vmem>>, vector<1x4x16x53xf32>,
    }
    %c3_i32_6 = arith.constant 3 : i32
    %c0_7 = arith.constant 0 : index
    %c0_8 = arith.constant 0 : index
    %4 = vector.load %arg3[%c0_7, %c0_8] : memref<40x280xf32, #tpu.memory_space<vmem>>, vector<40x280xf32>
    %c0_9 = arith.constant 0 : index
    %c0_10 = arith.constant 0 : index
    %c96 = arith.constant 96 : index
    %c0_11 = arith.constant 0 : index
    %5 = vector.load %arg1[%c0_9, %c0_10, %c96, %c0_11] : memref<1x4x110x110xf32, #tpu.memory_space<vmem>>, vector<1x1x14x110xf32>
    %6 = vector.shape_cast %5 : vector<1x1x14x110xf32> to vector<14x110xf32>
    %c0_12 = arith.constant 0 : index
    %c1 = arith.constant 1 : index
    %c96_13 = arith.constant 96 : index
    %c0_14 = arith.constant 0 : index
    %7 = vector.load %arg1[%c0_12, %c1, %c96_13, %c0_14] : memref<1x4x110x110xf32, #tpu.memory_space<vmem>>, vector<1x1x14x110xf32>
    %8 = vector.shape_cast %7 : vector<1x1x14x110xf32> to vector<14x110xf32>
    %c0_15 = arith.constant 0 : index
    %c2 = arith.constant 2 : index
    %c96_16 = arith.constant 96 : index
    %c0_17 = arith.constant 0 : index
    %9 = vector.load %arg1[%c0_15, %c2, %c96_16, %c0_17] : memref<1x4x110x110xf32, #tpu.memory_space<vmem>>, vector<1x1x14x110xf32>
    %10 = vector.shape_cast %9 : vector<1x1x14x110xf32> to vector<14x110xf32>
    %c0_18 = arith.constant 0 : index
    %c3 = arith.constant 3 : index
    %c96_19 = arith.constant 96 : index
    %c0_20 = arith.constant 0 : index
    %11 = vector.load %arg1[%c0_18, %c3, %c96_19, %c0_20] : memref<1x4x110x110xf32, #tpu.memory_space<vmem>>, vector<1x1x14x110xf32>
    %12 = vector.shape_cast %11 : vector<1x1x14x110xf32> to vector<14x110xf32>
    %13 = tpu.concatenate %6, %8, %10, %12 in 0 : vector<14x110xf32>, vector<14x110xf32>, vector<14x110xf32>, vector<14x110xf32> -> vector<56x110xf32>
    %14 = vector.extract_strided_slice %13 {offsets = [0, 0], sizes = [56, 106], strides = [1, 1]} : vector<56x110xf32> to vector<56x106xf32>
    %15 = vector.extract_strided_slice %13 {offsets = [0, 1], sizes = [56, 106], strides = [1, 1]} : vector<56x110xf32> to vector<56x106xf32>
    %16 = vector.extract_strided_slice %13 {offsets = [0, 2], sizes = [56, 106], strides = [1, 1]} : vector<56x110xf32> to vector<56x106xf32>
    %17 = vector.extract_strided_slice %13 {offsets = [0, 3], sizes = [56, 106], strides = [1, 1]} : vector<56x110xf32> to vector<56x106xf32>
    %18 = vector.extract_strided_slice %13 {offsets = [0, 4], sizes = [56, 106], strides = [1, 1]} : vector<56x110xf32> to vector<56x106xf32>
    %19 = tpu.concatenate %14, %15, %16, %17, %18 in 0 : vector<56x106xf32>, vector<56x106xf32>, vector<56x106xf32>, vector<56x106xf32>, vector<56x106xf32> -> vector<280x106xf32>
    %cst = arith.constant dense<0.000000e+00> : vector<40x106xf32>
    %20 = tpu.matmul %4, %19, %cst {dimension_numbers = #tpu.dot_dimension_numbers<[1], [0], [0], [1], [0, 0, 1, 1], [], []>} : vector<40x280xf32>, vector<280x106xf32>, vector<40x106xf32> -> vector<40x106xf32>
    %21 = vector.extract_strided_slice %20 {offsets = [0, 0], sizes = [20, 106], strides = [1, 1]} : vector<40x106xf32> to vector<20x106xf32>
    %22 = vector.extract_strided_slice %20 {offsets = [20, 0], sizes = [20, 106], strides = [1, 1]} : vector<40x106xf32> to vector<20x106xf32>
    %23 = arith.maximumf %21, %22 : vector<20x106xf32>
    %24 = vector.extract_strided_slice %23 {offsets = [0, 0], sizes = [20, 105], strides = [1, 1]} : vector<20x106xf32> to vector<20x105xf32>
    %25 = vector.extract_strided_slice %23 {offsets = [0, 1], sizes = [20, 105], strides = [1, 1]} : vector<20x106xf32> to vector<20x105xf32>
    %26 = arith.maximumf %24, %25 : vector<20x105xf32>
    %cst_21 = arith.constant dense<0.000000e+00> : vector<20x53xf32>
    %27 = tpu.matmul %26, %0, %cst_21 {dimension_numbers = #tpu.dot_dimension_numbers<[1], [0], [0], [1], [0, 0, 1, 1], [], []>} : vector<20x105xf32>, vector<105x53xf32>, vector<20x53xf32> -> vector<20x53xf32>
    %28 = vector.shape_cast %27 : vector<20x53xf32> to vector<4x5x53xf32>
    %29 = vector.broadcast %1 : vector<4x1x53xf32> to vector<4x5x53xf32>
    %30 = arith.addf %28, %29 : vector<4x5x53xf32>
    %cst_22 = arith.constant 0.000000e+00 : f32
    %31 = vector.broadcast %cst_22 : f32 to vector<4x5x53xf32>
    %32 = arith.maximumf %30, %31 : vector<4x5x53xf32>
    %c0_23 = arith.constant 0 : index
    %c0_24 = arith.constant 0 : index
    %c48 = arith.constant 48 : index
    %c0_25 = arith.constant 0 : index
    %33 = vector.load %arg6[%c0_23, %c0_24, %c48, %c0_25] : memref<1x4x53x53xf32, #tpu.memory_space<vmem>>, vector<1x4x5x53xf32>
    %34 = vector.shape_cast %33 : vector<1x4x5x53xf32> to vector<4x5x53xf32>
    %35 = vector.shape_cast %32 : vector<4x5x53xf32> to vector<1x4x5x53xf32>
    tpu.vector_store %arg6[%c0_23, %c0_24, %c48, %c0_25], %35 {strides = array<i32>} : memref<1x4x53x53xf32, #tpu.memory_space<vmem>>, vector<1x4x5x53xf32>,
    return
  }
  func.func @transform_0(%arg0: i32) -> (i32, i32, i32, i32) {
    %c0_i32 = arith.constant 0 : i32
    %c0_i32_0 = arith.constant 0 : i32
    %c0_i32_1 = arith.constant 0 : i32
    %c0_i32_2 = arith.constant 0 : i32
    return %arg0, %c0_i32, %c0_i32_0, %c0_i32_1 : i32, i32, i32, i32
  }
  func.func @transform_1(%arg0: i32) -> (i32, i32) {
    %c0_i32 = arith.constant 0 : i32
    %c0_i32_0 = arith.constant 0 : i32
    %c0_i32_1 = arith.constant 0 : i32
    return %c0_i32, %c0_i32_0 : i32, i32
  }
  func.func @transform_2(%arg0: i32) -> (i32, i32) {
    %c0_i32 = arith.constant 0 : i32
    %c0_i32_0 = arith.constant 0 : i32
    %c0_i32_1 = arith.constant 0 : i32
    return %c0_i32, %c0_i32_0 : i32, i32
  }
  func.func @transform_3(%arg0: i32) -> (i32, i32, i32) {
    %c0_i32 = arith.constant 0 : i32
    %c0_i32_0 = arith.constant 0 : i32
    %c0_i32_1 = arith.constant 0 : i32
    %c0_i32_2 = arith.constant 0 : i32
    return %c0_i32, %c0_i32_0, %c0_i32_1 : i32, i32, i32
  }
  func.func @transform_4(%arg0: i32) -> (i32, i32) {
    %c0_i32 = arith.constant 0 : i32
    %c0_i32_0 = arith.constant 0 : i32
    %c0_i32_1 = arith.constant 0 : i32
    return %c0_i32, %c0_i32_0 : i32, i32
  }
  func.func @transform_5(%arg0: i32) -> (i32, i32, i32, i32) {
    %c0_i32 = arith.constant 0 : i32
    %c0_i32_0 = arith.constant 0 : i32
    %c0_i32_1 = arith.constant 0 : i32
    %c0_i32_2 = arith.constant 0 : i32
    return %arg0, %c0_i32, %c0_i32_0, %c0_i32_1 : i32, i32, i32, i32
  }
}

module attributes {stable_mosaic.version = 11 : i64} {
  func.func @_fc_kernel(%arg0: i32, %arg1: memref<2x11236xf32, #tpu.memory_space<vmem>>, %arg2: memref<11236x75xf32, #tpu.memory_space<vmem>>, %arg3: memref<1x75xf32, #tpu.memory_space<vmem>>, %arg4: memref<2x75xf32, #tpu.memory_space<vmem>>) attributes {dimension_semantics = [#tpu.dimension_semantics<arbitrary>], iteration_bounds = array<i64: 1>, scalar_prefetch = 0 : i64, scratch_operands = 0 : i64, tpu.core_type = #tpu.core_type<tc>, window_params = [{pipeline_mode = #tpu.pipeline_mode<synchronous>, transform_indices = @transform_0, window_bounds = array<i64: 2, 11236>}, {pipeline_mode = #tpu.pipeline_mode<synchronous>, transform_indices = @transform_1, window_bounds = array<i64: 11236, 75>}, {pipeline_mode = #tpu.pipeline_mode<synchronous>, transform_indices = @transform_2, window_bounds = array<i64: 1, 75>}, {pipeline_mode = #tpu.pipeline_mode<synchronous>, transform_indices = @transform_3, window_bounds = array<i64: 2, 75>}]} {
    %c0 = arith.constant 0 : index
    %c0_0 = arith.constant 0 : index
    %0 = vector.load %arg1[%c0, %c0_0] : memref<2x11236xf32, #tpu.memory_space<vmem>>, vector<2x11236xf32>
    %c0_1 = arith.constant 0 : index
    %c0_2 = arith.constant 0 : index
    %1 = vector.load %arg2[%c0_1, %c0_2] : memref<11236x75xf32, #tpu.memory_space<vmem>>, vector<11236x75xf32>
    %cst = arith.constant dense<0.000000e+00> : vector<2x75xf32>
    %2 = tpu.matmul %0, %1, %cst {dimension_numbers = #tpu.dot_dimension_numbers<[1], [0], [0], [1], [0, 0, 1, 1], [], []>} : vector<2x11236xf32>, vector<11236x75xf32>, vector<2x75xf32> -> vector<2x75xf32>
    %c0_3 = arith.constant 0 : index
    %c0_4 = arith.constant 0 : index
    %3 = vector.load %arg3[%c0_3, %c0_4] : memref<1x75xf32, #tpu.memory_space<vmem>>, vector<1x75xf32>
    %4 = vector.broadcast %3 : vector<1x75xf32> to vector<2x75xf32>
    %5 = arith.addf %2, %4 : vector<2x75xf32>
    %c0_5 = arith.constant 0 : index
    %c0_6 = arith.constant 0 : index
    %6 = vector.load %arg4[%c0_5, %c0_6] : memref<2x75xf32, #tpu.memory_space<vmem>>, vector<2x75xf32>
    tpu.vector_store %arg4[%c0_5, %c0_6], %5 {strides = array<i32>} : memref<2x75xf32, #tpu.memory_space<vmem>>, vector<2x75xf32>,
    return
  }
  func.func @transform_0(%arg0: i32) -> (i32, i32) {
    %c0_i32 = arith.constant 0 : i32
    %c0_i32_0 = arith.constant 0 : i32
    %c0_i32_1 = arith.constant 0 : i32
    return %c0_i32, %c0_i32_0 : i32, i32
  }
  func.func @transform_1(%arg0: i32) -> (i32, i32) {
    %c0_i32 = arith.constant 0 : i32
    %c0_i32_0 = arith.constant 0 : i32
    %c0_i32_1 = arith.constant 0 : i32
    return %c0_i32, %c0_i32_0 : i32, i32
  }
  func.func @transform_2(%arg0: i32) -> (i32, i32) {
    %c0_i32 = arith.constant 0 : i32
    %c0_i32_0 = arith.constant 0 : i32
    %c0_i32_1 = arith.constant 0 : i32
    return %c0_i32, %c0_i32_0 : i32, i32
  }
  func.func @transform_3(%arg0: i32) -> (i32, i32) {
    %c0_i32 = arith.constant 0 : i32
    %c0_i32_0 = arith.constant 0 : i32
    %c0_i32_1 = arith.constant 0 : i32
    return %c0_i32, %c0_i32_0 : i32, i32
  }
}

</mosaic_0001>

<bundles_post_ra>
// kernel: cnn_forward.3
= control target key start
LH: loop header
LB: loop body
LE: loop exit
PB: predicated region body
PF: predicated region fallthrough
CT: control target
= control target key end

     0   :  { %s4449_s18 = smov 0   ;;  %s6295_s0 = inlined_call_operand.vmem [shape: f32[2,3,224,224], index: 0, kind: input, shape index: {}]   ;;  %s6296_s1 = inlined_call_operand.vmem [shape: f32[128,600], index: 1, kind: input, shape index: {}]   ;;  %s6297_s2 = inlined_call_operand.vmem [shape: f32[112,480], index: 2, kind: input, shape index: {}]   ;;  %s6298_s3 = inlined_call_operand.vmem [shape: f32[4,1,110], index: 3, kind: input, shape index: {}]   ;;  %s6299_s4 = inlined_call_operand.vmem [shape: f32[219,110], index: 4, kind: input, shape index: {}]   ;;  %s6300_s5 = inlined_call_operand.vmem [shape: f32[2,4,110,110], index: 5, kind: output, shape index: {}]  }
   0x1 LB: > { %s3228_s19 = sadd.s32 4294967295, %s4400_s18   ;;  %p3232_p0 = scmp.ge.s32.totalorder %s4400_s18, 1  ;;  %s4400_s18 = sphi %s4449_s18, %s15_s18  }
   0x2   : > { %p187_p1 = scmp.lt.s32.totalorder %s4400_s18, 3 }
   0x4   : > { %p188_p2 = pnand %p3232_p0, %p187_p1 }
   0x6   : > { %191 = sbr.rel (%p188_p2) target bundleno = 1761 (0x6e1), region = 40 }
   0xd   : > { %p215_p3 = scmp.lt.s32.totalorder %s3228_s19, 1  ;;  %v4460_v0 = vld [vmem:[%s6299_s4] sm:$0xff]  ;;  %v4465_v1 = vld [vmem:[%s6299_s4 + $0x8] sm:$0xff]  ;;  %v4470_v2 = vld [vmem:[%s6299_s4 + $0x10] sm:$0xff]  ;;  %s5027_s30 = smov 0  }
   0xe   : > { %6309 = vst [vmem:[#allocation2_spill] sm:$0xff] %v4460_v0  ;;  %6310 = vst [vmem:[#allocation3_spill] sm:$0xff] %v4465_v1  ;;  %v4475_v3 = vld [vmem:[%s6299_s4 + $0x18] sm:$0xff]  ;;  %v4480_v4 = vld [vmem:[%s6299_s4 + $0x20] sm:$0xff] }
   0xf   : > { %6311 = vst [vmem:[#allocation4_spill] sm:$0xff] %v4470_v2  ;;  %6312 = vst [vmem:[#allocation5_spill] sm:$0xff] %v4475_v3  ;;  %v4485_v5 = vld [vmem:[%s6299_s4 + $0x28] sm:$0xff]  ;;  %s6518_s19 = smov (!%p215_p3, %s3228_s19), 1  ;;  %v4490_v6 = vld [vmem:[%s6299_s4 + $0x30] sm:$0xff] }
  0x10   : > { %6313 = vst [vmem:[#allocation6_spill] sm:$0xff] %v4480_v4  ;;  %6314 = vst [vmem:[#allocation7_spill] sm:$0xff] %v4485_v5  ;;  %v4495_v7 = vld [vmem:[%s6299_s4 + $0x38] sm:$0xff]  ;;  %v4500_v8 = vld [vmem:[%s6299_s4 + $0x40] sm:$0xff]  ;;  %s3809_s21 = smul.u32 1344, %s6518_s19 }
  0x11   : > { %6315 = vst [vmem:[#allocation8_spill] sm:$0xff] %v4490_v6  ;;  %6316 = vst [vmem:[#allocation9_spill] sm:$0xff] %v4495_v7  ;;  %v4505_v9 = vld [vmem:[%s6299_s4 + $0x48] sm:$0xff]  ;;  %v4510_v10 = vld [vmem:[%s6299_s4 + $0x50] sm:$0xff]  ;;  %s3810_s28 = smul.u32 448, %s6518_s19 }
  0x12   : > { %6317 = vst [vmem:[#allocation10_spill] sm:$0xff] %v4500_v8  ;;  %6318 = vst [vmem:[#allocation11_spill] sm:$0xff] %v4505_v9  ;;  %v4515_v11 = vld [vmem:[%s6299_s4 + $0x58] sm:$0xff]  ;;  %v4520_v12 = vld [vmem:[%s6299_s4 + $0x60] sm:$0xff]  ;;  %s4550_s12 = scalar_lea.vmem %s6295_s0, %s3809_s21 }
  0x13   : > { %6319 = vst [vmem:[#allocation12_spill] sm:$0xff] %v4510_v10  ;;  %6320 = vst [vmem:[#allocation13_spill] sm:$0xff] %v4515_v11  ;;  %v4525_v13 = vld [vmem:[%s6299_s4 + $0x68] sm:$0xff]  ;;  %v4530_v14 = vld [vmem:[%s6299_s4 + $0x70] sm:$0xff]  ;;  %s4570_s21 = scalar_lea.vmem %s6300_s5, %s3810_s28 }
  0x14   : > { %6321 = vst [vmem:[#allocation14_spill] sm:$0xff] %v4520_v12  ;;  %6322 = vst [vmem:[#allocation15_spill] sm:$0xff] %v4525_v13  ;;  %v4535_v15 = vld [vmem:[%s6299_s4 + $0x78] sm:$0xff]  ;;  %v4540_v16 = vld [vmem:[%s6299_s4 + $0x80] sm:$0xff] }
  0x15   : > { %6323 = vst [vmem:[#allocation16_spill] sm:$0xff] %v4530_v14  ;;  %6324 = vst [vmem:[#allocation17_spill] sm:$0xff] %v4535_v15  ;;  %v4545_v17 = vld [vmem:[%s6299_s4 + $0x88] sm:$0xff]  ;;  %v4555_v18 = vld [vmem:[%s6299_s4 + $0x90] sm:$0xff] }
  0x16   : > { %6325 = vst [vmem:[#allocation18_spill] sm:$0xff] %v4540_v16  ;;  %6326 = vst [vmem:[#allocation19_spill] sm:$0xff] %v4545_v17  ;;  %v4560_v19 = vld [vmem:[%s6299_s4 + $0x98] sm:$0xff]  ;;  %v4565_v20 = vld [vmem:[%s6299_s4 + $0xa0] sm:$0xff] }
  0x17   : > { %6327 = vst [vmem:[#allocation20_spill] sm:$0xff] %v4555_v18  ;;  %6328 = vst [vmem:[#allocation21_spill] sm:$0xff] %v4560_v19  ;;  %v4575_v21 = vld [vmem:[%s6299_s4 + $0xa8] sm:$0xff]  ;;  %v4580_v22 = vld [vmem:[%s6299_s4 + $0xb0] sm:$0xff] }
  0x18   : > { %6329 = vst [vmem:[#allocation22_spill] sm:$0xff] %v4565_v20  ;;  %6330 = vst [vmem:[#allocation23_spill] sm:$0xff] %v4575_v21  ;;  %v4585_v23 = vld [vmem:[%s6299_s4 + $0xb8] sm:$0xff]  ;;  %v4590_v24 = vld [vmem:[%s6299_s4 + $0xc0] sm:$0xff] }
  0x19   : > { %6331 = vst [vmem:[#allocation24_spill] sm:$0xff] %v4580_v22  ;;  %6332 = vst [vmem:[#allocation25_spill] sm:$0xff] %v4585_v23  ;;  %v4595_v25 = vld [vmem:[%s6299_s4 + $0xc8] sm:$0xff]  ;;  %v4600_v26 = vld [vmem:[%s6299_s4 + $0xd0] sm:$0xff] }
  0x1a   : > { %6333 = vst [vmem:[#allocation26_spill] sm:$0xff] %v4590_v24  ;;  %6334 = vst [vmem:[#allocation27_spill] sm:$0xff] %v4595_v25  ;;  %v4605_v27 = vld [vmem:[%s6299_s4 + $0xd8] sm:$0x7]  ;;  %v4610_v28 = vld [vmem:[%s6298_s3] ss:$0 sm:$0xff] }
  0x1b   : > { %6335 = vst [vmem:[#allocation28_spill] sm:$0xff] %v4600_v26  ;;  %6336 = vst [vmem:[#allocation29_spill] sm:$0xff] %v4605_v27  ;;  %v4615_v29 = vld [vmem:[%s6298_s3 + $0x1] ss:$0 sm:$0xff]  ;;  %v4620_v30 = vld [vmem:[%s6298_s3 + $0x2] ss:$0 sm:$0xff] }
  0x1c   : > { %6337 = vst [vmem:[#allocation30_spill] sm:$0xff] %v4610_v28  ;;  %6338 = vst [vmem:[#allocation31_spill] sm:$0xff] %v4615_v29  ;;  %v4625_v31 = vld [vmem:[%s6298_s3 + $0x3] ss:$0 sm:$0xff]  ;;  %v4635_v33 = vld [vmem:[%s6296_s1 + $0x8] sm:$0xff] }
  0x1d   : > { %6339 = vst [vmem:[#allocation32_spill] sm:$0xff] %v4620_v30  ;;  %6340 = vst [vmem:[#allocation33_spill] sm:$0xff] %v4625_v31  ;;  %v4630_v32 = vld [vmem:[%s6296_s1] sm:$0xff]  ;;  %v4640_v34 = vld [vmem:[%s6296_s1 + $0x10] sm:$0xff] }
  0x1e   : > { %6341 = vst [vmem:[#allocation34_spill] sm:$0xff] %v4630_v32  ;;  %6342 = vst [vmem:[#allocation35_spill] sm:$0xff] %v4635_v33  ;;  %v4645_v35 = vld [vmem:[%s6296_s1 + $0x18] sm:$0xff]  ;;  %v4650_v36 = vld [vmem:[%s6296_s1 + $0x20] sm:$0xff] }
  0x1f   : > { %6343 = vst [vmem:[#allocation36_spill] sm:$0xff] %v4645_v35  ;;  %6344 = vst [vmem:[#allocation37_spill] sm:$0xff] %v4650_v36  ;;  %v4655_v37 = vld [vmem:[%s6296_s1 + $0x28] sm:$0xff]  ;;  %v4660_v38 = vld [vmem:[%s6296_s1 + $0x30] sm:$0xff] }
  0x20   : > { %6345 = vst [vmem:[#allocation38_spill] sm:$0xff] %v4655_v37  ;;  %6346 = vst [vmem:[#allocation39_spill] sm:$0xff] %v4660_v38  ;;  %v4665_v39 = vld [vmem:[%s6296_s1 + $0x38] sm:$0xff]  ;;  %v4670_v40 = vld [vmem:[%s6296_s1 + $0x40] sm:$0xff] }
  0x21   : > { %v4675_v41 = vld [vmem:[%s6296_s1 + $0x48] sm:$0xff]  ;;  %v4680_v42 = vld [vmem:[%s6296_s1 + $0x50] sm:$0xff]  ;;  %v4685_v43 = vld [vmem:[%s6296_s1 + $0x58] sm:$0xff] }
  0x22   : > { %6347 = vst [vmem:[#allocation40_spill] sm:$0xff] %v4675_v41  ;;  %6348 = vst [vmem:[#allocation41_spill] sm:$0xff] %v4680_v42  ;;  %v4690_v44 = vld [vmem:[%s6296_s1 + $0x60] sm:$0xff]  ;;  %v4695_v45 = vld [vmem:[%s6296_s1 + $0x68] sm:$0xff] }
  0x23   : > { %6349 = vst [vmem:[#allocation42_spill] sm:$0xff] %v4685_v43  ;;  %v4700_v46 = vld [vmem:[%s6296_s1 + $0x70] sm:$0xff]  ;;  %v4705_v47 = vld [vmem:[%s6296_s1 + $0x78] sm:$0xff]  ;;  %v4710_v48 = vld [vmem:[%s6296_s1 + $0x80] sm:$0xff] }
  0x24   : > { %6350 = vst [vmem:[#allocation43_spill] sm:$0xff] %v4700_v46  ;;  %6351 = vst [vmem:[#allocation44_spill] sm:$0xff] %v4705_v47  ;;  %v4715_v49 = vld [vmem:[%s6296_s1 + $0x88] sm:$0xff]  ;;  %v4720_v50 = vld [vmem:[%s6296_s1 + $0x90] sm:$0xff] }
  0x25   : > { %6352 = vst [vmem:[#allocation45_spill] sm:$0xff] %v4710_v48  ;;  %v4725_v51 = vld [vmem:[%s6296_s1 + $0x98] sm:$0xff]  ;;  %v4730_v52 = vld [vmem:[%s6296_s1 + $0xa0] sm:$0xff]  ;;  %v4735_v53 = vld [vmem:[%s6296_s1 + $0xa8] sm:$0xff] }
  0x26   : > { %6353 = vst [vmem:[#allocation46_spill] sm:$0xff] %v4725_v51  ;;  %6354 = vst [vmem:[#allocation47_spill] sm:$0xff] %v4730_v52  ;;  %v4740_v54 = vld [vmem:[%s6296_s1 + $0xb0] sm:$0xff]  ;;  %v4745_v55 = vld [vmem:[%s6296_s1 + $0xb8] sm:$0xff] }
  0x27   : > { %6355 = vst [vmem:[#allocation48_spill] sm:$0xff] %v4735_v53  ;;  %v4750_v56 = vld [vmem:[%s6296_s1 + $0xc0] sm:$0xff]  ;;  %v4755_v57 = vld [vmem:[%s6296_s1 + $0xc8] sm:$0xff]  ;;  %v4760_v58 = vld [vmem:[%s6296_s1 + $0xd0] sm:$0xff] }
  0x28   : > { %6356 = vst [vmem:[#allocation49_spill] sm:$0xff] %v4750_v56  ;;  %6357 = vst [vmem:[#allocation50_spill] sm:$0xff] %v4755_v57  ;;  %v4765_v59 = vld [vmem:[%s6296_s1 + $0xd8] sm:$0xff]  ;;  %v4770_v60 = vld [vmem:[%s6296_s1 + $0xe0] sm:$0xff] }
  0x29   : > { %6358 = vst [vmem:[#allocation51_spill] sm:$0xff] %v4760_v58  ;;  %v4775_v61 = vld [vmem:[%s6296_s1 + $0xe8] sm:$0xff]  ;;  %v4780_v62 = vld [vmem:[%s6296_s1 + $0xf0] sm:$0xff]  ;;  %v4785_v63 = vld [vmem:[%s6296_s1 + $0xf8] sm:$0xff] }
  0x2a   : > { %6359 = vst [vmem:[#allocation52_spill] sm:$0xff] %v4775_v61  ;;  %6360 = vst [vmem:[#allocation53_spill] sm:$0xff] %v4780_v62  ;;  %v4790_v31 = vld [vmem:[%s6296_s1 + $0x100] sm:$0xff]  ;;  %v4795_v30 = vld [vmem:[%s6296_s1 + $0x108] sm:$0xff] }
  0x2b   : > { %6361 = vst [vmem:[#allocation54_spill] sm:$0xff] %v4785_v63  ;;  %6362 = vst [vmem:[#allocation55_spill] sm:$0xff] %v4790_v31  ;;  %v4800_v29 = vld [vmem:[%s6296_s1 + $0x110] sm:$0xff]  ;;  %v4805_v28 = vld [vmem:[%s6296_s1 + $0x118] sm:$0xff] }
  0x2c   : > { %6363 = vst [vmem:[#allocation56_spill] sm:$0xff] %v4795_v30  ;;  %6364 = vst [vmem:[#allocation57_spill] sm:$0xff] %v4800_v29  ;;  %v4810_v27 = vld [vmem:[%s6296_s1 + $0x120] sm:$0xff]  ;;  %v4815_v26 = vld [vmem:[%s6296_s1 + $0x128] sm:$0xff] }
  0x2d   : > { %6365 = vst [vmem:[#allocation58_spill] sm:$0xff] %v4805_v28  ;;  %6366 = vst [vmem:[#allocation59_spill] sm:$0xff] %v4810_v27  ;;  %v4820_v25 = vld [vmem:[%s6296_s1 + $0x130] sm:$0xff]  ;;  %v4825_v24 = vld [vmem:[%s6296_s1 + $0x138] sm:$0xff] }
  0x2e   : > { %6367 = vst [vmem:[#allocation60_spill] sm:$0xff] %v4815_v26  ;;  %6368 = vst [vmem:[#allocation61_spill] sm:$0xff] %v4820_v25  ;;  %v4830_v23 = vld [vmem:[%s6296_s1 + $0x140] sm:$0xff]  ;;  %v4835_v22 = vld [vmem:[%s6296_s1 + $0x148] sm:$0xff] }
  0x2f   : > { %6369 = vst [vmem:[#allocation62_spill] sm:$0xff] %v4825_v24  ;;  %6370 = vst [vmem:[#allocation63_spill] sm:$0xff] %v4830_v23  ;;  %v4840_v21 = vld [vmem:[%s6296_s1 + $0x150] sm:$0xff]  ;;  %v4845_v20 = vld [vmem:[%s6296_s1 + $0x158] sm:$0xff] }
  0x30   : > { %6371 = vst [vmem:[#allocation64_spill] sm:$0xff] %v4835_v22  ;;  %6372 = vst [vmem:[#allocation65_spill] sm:$0xff] %v4840_v21  ;;  %v4850_v19 = vld [vmem:[%s6296_s1 + $0x160] sm:$0xff]  ;;  %v4855_v18 = vld [vmem:[%s6296_s1 + $0x168] sm:$0xff] }
  0x31   : > { %6373 = vst [vmem:[#allocation66_spill] sm:$0xff] %v4845_v20  ;;  %6374 = vst [vmem:[#allocation67_spill] sm:$0xff] %v4850_v19  ;;  %v4860_v17 = vld [vmem:[%s6296_s1 + $0x170] sm:$0xff]  ;;  %v4865_v16 = vld [vmem:[%s6296_s1 + $0x178] sm:$0xff] }
  0x32   : > { %6375 = vst [vmem:[#allocation68_spill] sm:$0xff] %v4855_v18  ;;  %6376 = vst [vmem:[#allocation69_spill] sm:$0xff] %v4860_v17  ;;  %v4870_v15 = vld [vmem:[%s6296_s1 + $0x180] sm:$0xff]  ;;  %v4875_v14 = vld [vmem:[%s6296_s1 + $0x188] sm:$0xff] }
  0x33   : > { %6377 = vst [vmem:[#allocation70_spill] sm:$0xff] %v4865_v16  ;;  %6378 = vst [vmem:[#allocation71_spill] sm:$0xff] %v4870_v15  ;;  %v4880_v13 = vld [vmem:[%s6296_s1 + $0x190] sm:$0xff]  ;;  %v4885_v12 = vld [vmem:[%s6296_s1 + $0x198] sm:$0xff] }
  0x34   : > { %6379 = vst [vmem:[#allocation72_spill] sm:$0xff] %v4875_v14  ;;  %6380 = vst [vmem:[#allocation73_spill] sm:$0xff] %v4880_v13  ;;  %v4890_v11 = vld [vmem:[%s6296_s1 + $0x1a0] sm:$0xff]  ;;  %v4895_v10 = vld [vmem:[%s6296_s1 + $0x1a8] sm:$0xff] }
  0x35   : > { %6381 = vst [vmem:[#allocation74_spill] sm:$0xff] %v4885_v12  ;;  %6382 = vst [vmem:[#allocation75_spill] sm:$0xff] %v4890_v11  ;;  %v4900_v9 = vld [vmem:[%s6296_s1 + $0x1b0] sm:$0xff]  ;;  %v4905_v8 = vld [vmem:[%s6296_s1 + $0x1b8] sm:$0xff] }
  0x36   : > { %6383 = vst [vmem:[#allocation76_spill] sm:$0xff] %v4895_v10  ;;  %6384 = vst [vmem:[#allocation77_spill] sm:$0xff] %v4900_v9  ;;  %v4910_v7 = vld [vmem:[%s6296_s1 + $0x1c0] sm:$0xff]  ;;  %v4915_v6 = vld [vmem:[%s6296_s1 + $0x1c8] sm:$0xff] }
  0x37   : > { %6385 = vst [vmem:[#allocation78_spill] sm:$0xff] %v4905_v8  ;;  %6386 = vst [vmem:[#allocation79_spill] sm:$0xff] %v4910_v7  ;;  %v4920_v5 = vld [vmem:[%s6296_s1 + $0x1d0] sm:$0xff]  ;;  %v4925_v4 = vld [vmem:[%s6296_s1 + $0x1d8] sm:$0xff] }
  0x38   : > { %6387 = vst [vmem:[#allocation80_spill] sm:$0xff] %v4915_v6  ;;  %6388 = vst [vmem:[#allocation81_spill] sm:$0xff] %v4920_v5  ;;  %v4930_v3 = vld [vmem:[%s6296_s1 + $0x1e0] sm:$0xff]  ;;  %v4935_v2 = vld [vmem:[%s6296_s1 + $0x1e8] sm:$0xff] }
  0x39   : > { %6389 = vst [vmem:[#allocation82_spill] sm:$0xff] %v4925_v4  ;;  %6390 = vst [vmem:[#allocation83_spill] sm:$0xff] %v4930_v3  ;;  %v4940_v1 = vld [vmem:[%s6296_s1 + $0x1f0] sm:$0xff]  ;;  %v4945_v0 = vld [vmem:[%s6296_s1 + $0x1f8] sm:$0xff] }
  0x3a   : > { %6391 = vst [vmem:[#allocation84_spill] sm:$0xff] %v4935_v2  ;;  %6392 = vst [vmem:[#allocation85_spill] sm:$0xff] %v4940_v1  ;;  %v4950_v4 = vld [vmem:[%s6296_s1 + $0x200] sm:$0xff]  ;;  %v4955_v9 = vld [vmem:[%s6296_s1 + $0x208] sm:$0xff] }
  0x3b   : > { %6393 = vst [vmem:[#allocation86_spill] sm:$0xff] %v4945_v0  ;;  %6394 = vst [vmem:[#allocation87_spill] sm:$0xff] %v4950_v4  ;;  %v4960_v3 = vld [vmem:[%s6296_s1 + $0x210] sm:$0xff]  ;;  %v4965_v14 = vld [vmem:[%s6296_s1 + $0x218] sm:$0xff] }
  0x3c   : > { %6395 = vst [vmem:[#allocation88_spill] sm:$0xff] %v4955_v9  ;;  %6396 = vst [vmem:[#allocation89_spill] sm:$0xff] %v4960_v3  ;;  %v4970_v2 = vld [vmem:[%s6296_s1 + $0x220] sm:$0xff]  ;;  %v4975_v4 = vld [vmem:[%s6296_s1 + $0x228] sm:$0xff] }
  0x3d   : > { %6397 = vst [vmem:[#allocation90_spill] sm:$0xff] %v4965_v14  ;;  %6398 = vst [vmem:[#allocation91_spill] sm:$0xff] %v4970_v2  ;;  %v4980_v9 = vld [vmem:[%s6296_s1 + $0x230] sm:$0xff]  ;;  %v4985_v3 = vld [vmem:[%s6296_s1 + $0x238] sm:$0xff] }
  0x3e   : > { %6399 = vst [vmem:[#allocation92_spill] sm:$0xff] %v4975_v4  ;;  %6400 = vst [vmem:[#allocation93_spill] sm:$0xff] %v4980_v9  ;;  %v4990_v8 = vld [vmem:[%s6296_s1 + $0x240] sm:$0xff]  ;;  %v4995_v19 = vld [vmem:[%s6296_s1 + $0x248] sm:$0xff] }
  0x3f   : > { %6401 = vst [vmem:[#allocation94_spill] sm:$0xff] %v4985_v3  ;;  %6402 = vst [vmem:[#allocation95_spill] sm:$0xff] %v4990_v8  ;;  %v5000_v4 = vld [vmem:[%s6296_s1 + $0x250] sm:$0xff]  ;;  %v5005_v9 = vld [vmem:[%s6296_s1 + $0x258] sm:$0xff] }
  0x40   : > { %6403 = vst [vmem:[#allocation96_spill] sm:$0xff] %v4995_v19  ;;  %6404 = vst [vmem:[#allocation97_spill] sm:$0xff] %v5000_v4  ;;  %v5010_v3 = vld [vmem:[%s6296_s1 + $0x260] sm:$0xff]  ;;  %v5015_v7 = vld [vmem:[%s6296_s1 + $0x268] sm:$0xff] }
  0x41   : > { %6405 = vst [vmem:[#allocation98_spill] sm:$0xff] %v5005_v9  ;;  %6406 = vst [vmem:[#allocation99_spill] sm:$0xff] %v5010_v3  ;;  %v5020_v13 = vld [vmem:[%s6296_s1 + $0x270] sm:$0xff]  ;;  %v5025_v4 = vld [vmem:[%s6296_s1 + $0x278] sm:$0xff] }
  0x42   : > { %6407 = vst [vmem:[#allocation100_spill] sm:$0xff] %v5015_v7  ;;  %6408 = vst [vmem:[#allocation101_spill] sm:$0xff] %v5020_v13 }
  0x43   : > { %6409 = vst [vmem:[#allocation102_spill] sm:$0xff] %v5025_v4 }
  0x44 LB: >> { %v6410_v35 = vld [vmem:[#allocation36_spill] sm:$0xff]  ;;  %v6411_v33 = vld [vmem:[#allocation35_spill] sm:$0xff]  ;;  %s3236_s6 = sshll.u32 %s4404_s30, 5  ;;  %s4406_s9 = smov 126   ;;  %vm582_vm0 = vcmask 1031168   ;;  %vm688_vm1 = vcmask 1022976   ;;  %s4404_s30 = sphi %s5027_s30, %s342_s30  }
  0x45   : >> { %1114 = vmatprep.mubr.f32.mxu0 %v6410_v35  ;;  %953 = vmatprep.mubr.f32.mxu1 %v6411_v33  ;;  %s345_s28 = sshra.s32 %s3236_s6, 3  ;;  %s4407_s10 = smov 125   ;;  %vm794_vm2 = vcmask 1014784   ;;  %vm476_vm3 = vcmask 1039360   ;;  %v6412_v30 = vld [vmem:[#allocation56_spill] sm:$0xff]  ;;  %v6413_v31 = vld [vmem:[#allocation55_spill] sm:$0xff] }
  0x46   : >> { %s3328_s7 = sshll.u32 %s345_s28, 4  ;;  %s4408_s11 = smov 124   ;;  %v6414_v25 = vld [vmem:[#allocation61_spill] sm:$0xff]  ;;  %v6415_v26 = vld [vmem:[#allocation60_spill] sm:$0xff]  ;;  %vm840_vm4 = vcmask 719872   ;;  %vm1501_vm5 = vcmask 1042432  }
  0x47   : >> { %s5036_s8 = scalar_lea.vmem %s4550_s12, %s3328_s7  ;;  %s4409_s19 = smov 127   ;;  %vm4412_vm6 = vmmov 1   ;;  %vm1476_vm8 = vcmask 744448   ;;  %vm1651_vm9 = vcmask 900096  }
  0x48   : >> { %v5039_v4 = vld [vmem:[%s5036_s8 + $0x40] sm:$0xff]  ;;  %v5042_v35 = vld [vmem:[%s5036_s8 + $0x48] sm:$0xff]  ;;  %v5065_v29 = vld [vmem:[%s5036_s8 + $0x30] sm:$0xff]  ;;  %s3235_s13 = sshll.u32 %s4404_s30, 4  ;;  %s342_s30 = sadd.s32 1, %s4404_s30  }
  0x49   : >> { %v5045_v33 = vld [vmem:[%s5036_s8 + $0x20] sm:$0xff]  ;;  %v5049_v9 = vpack.i.bf16 %v5042_v35, %v5039_v4  ;;  %v5052_v3 = vld [vmem:[%s5036_s8 + $0x28] sm:$0xff]  ;;  %v5068_v17 = vld [vmem:[%s5036_s8 + $0x38] sm:$0xff]  ;;  %s5663_s14 = scalar_lea.vmem %s4570_s21, %s3235_s13  ;;  %p339_p4 = scmp.ge.s32.totalorder %s342_s30, 6  }
  0x4a   : >> { %v5055_v24 = vld [vmem:[%s5036_s8 + $0x1c0] sm:$0xff]  ;;  %v5058_v12 = vld [vmem:[%s5036_s8 + $0x1c8] sm:$0xff]  ;;  %v5062_v18 = vpack.i.bf16 %v5052_v3, %v5045_v33  ;;  %v5080_v61 = vpack.i.bf16 %v5068_v17, %v5065_v29  ;;  %v5089_v56 = vld [vmem:[%s5036_s8 + $0x1d0] sm:$0xff]  ;;  %v3339_v21 = vpack.c.bf16 %v5068_v17, %v5052_v3  ;;  %v3341_v20 = vpack.c.bf16 %v5065_v29, %v5045_v33  ;;  %s4413_s15 = smov (%p339_p4), 126   ;;  %s4414_s16 = smov (%p339_p4), 125  }
  0x4b   : >> { %3851 = vrot.lane.b32.xlu1 %v5049_v9, %s4406_s9  ;;  %v5074_v23 = vpack.i.bf16 %v5058_v12, %v5055_v24  ;;  %v5083_v22 = vld [vmem:[%s5036_s8 + $0x1e0] sm:$0xff]  ;;  %v5086_v28 = vld [vmem:[%s5036_s8 + $0x1e8] sm:$0xff]  ;;  %v5092_v27 = vld [vmem:[%s5036_s8 + $0x1d8] sm:$0xff]  ;;  %s4415_s17 = smov (%p339_p4), 127   ;;  %vm2106_vm10 = vcmask (%p339_p4), 785408   ;;  %vm3148_vm11 = vcmask (%p339_p4), 898048  }
  0x4c   : >> { %3841 = vrot.lane.b32.xlu0 %v5062_v18, %s4406_s9  ;;  %v5098_v62 = vpack.i.bf16 %v5086_v28, %v5083_v22  ;;  %v5101_v51 = vld [vmem:[%s5036_s8 + $0x200] sm:$0xff]  ;;  %v5105_v63 = vpack.i.bf16 %v5092_v27, %v5089_v56  ;;  %v5110_v57 = vld [vmem:[%s5036_s8 + $0x208] sm:$0xff]  ;;  %v5113_v46 = vld [vmem:[%s5036_s8 + $0x1f0] sm:$0xff]  ;;  %v3347_v3 = vpack.c.bf16 %v5086_v28, %v5092_v27 }
  0x4d   : >> { %v5116_v58 = vld [vmem:[%s5036_s8 + $0x1f8] sm:$0xff]  ;;  %v5126_v41 = vpack.i.bf16 %v5110_v57, %v5101_v51  ;;  %v5129_v53 = vld [vmem:[%s5036_s8 + $0x390] sm:$0xff]  ;;  %v5132_v47 = vld [vmem:[%s5036_s8 + $0x380] sm:$0xff] }
  0x4e   : >> { %v5120_v52 = vpack.i.bf16 %v5116_v58, %v5113_v46  ;;  %v5135_v36 = vld [vmem:[%s5036_s8 + $0x388] sm:$0xff]  ;;  %v3256_v48 = vld [vmem:[%s5036_s8 + $0x398] sm:$0xff]  ;;  %v5141_v42 = vld [vmem:[%s5036_s8 + $0x3a0] sm:$0xff] }
  0x4f   : >> { %3856 = vrot.lane.b32.xlu1 %v5074_v23, %s4406_s9  ;;  %v5144_v7 = vld [vmem:[%s5036_s8 + $0x3a8] sm:$0xff]  ;;  %v5148_v43 = vpack.i.bf16 %v5135_v36, %v5132_v47  ;;  %v5151_v13 = vld [vmem:[%s5036_s8 + $0x3b0] sm:$0xff]  ;;  %v5154_v37 = vld [vmem:[%s5036_s8 + $0x3b8] sm:$0xff]  ;;  %v5162_v19 = vpack.i.bf16 %v3256_v48, %v5129_v53 }
  0x50   : >> { %3846 = vrot.lane.b32.xlu0 %v5080_v61, %s4406_s9  ;;  %v350_v8 = vld [vmem:[%s5036_s8] sm:$0xff]  ;;  %v5159_v38 = vpack.i.bf16 %v5144_v7, %v5141_v42  ;;  %v351_v32 = vld [vmem:[%s5036_s8 + $0x8] sm:$0xff]  ;;  %v352_v14 = vld [vmem:[%s5036_s8 + $0x10] sm:$0xff]  ;;  %v5169_v1 = vpack.i.bf16 %v5154_v37, %v5151_v13  ;;  %v3359_v17 = vpack.c.bf16 %v5154_v37, %v5144_v7 }
  0x51   : >> { %v353_v2 = vld [vmem:[%s5036_s8 + $0x18] sm:$0xff]  ;;  %v5175_v6 = vpack.i.bf16 %v351_v32, %v350_v8  ;;  %v5184_v5 = vld [vmem:[%s5036_s8 + $0x3c0] sm:$0xff]  ;;  %v5187_v11 = vld [vmem:[%s5036_s8 + $0x3c8] sm:$0xff]  ;;  %v3337_v15 = vpack.c.bf16 %v352_v14, %v350_v8  ;;  %v3345_v8 = vpack.c.bf16 %v5055_v24, %v5039_v4  ;;  %v3351_v4 = vpack.c.bf16 %v5110_v57, %v5116_v58 }
  0x52   : >> { %v5173_v0 = vpack.i.bf16 %v353_v2, %v352_v14  ;;  %v5195_v10 = vpack.i.bf16 %v5187_v11, %v5184_v5  ;;  %v3335_v16 = vpack.c.bf16 %v353_v2, %v351_v32  ;;  %v3343_v2 = vpack.c.bf16 %v5058_v12, %v5042_v35  ;;  %vm5559_vm7 = vmpackc.low %vm1501_vm5, %vm4412_vm6 }
  0x53   : >> { %3866 = vrot.lane.b32.xlu1 %v5098_v62, %s4406_s9  ;;  %v3349_v14 = vpack.c.bf16 %v5083_v22, %v5089_v56  ;;  %v3353_v12 = vpack.c.bf16 %v5101_v51, %v5113_v46 }
  0x54   : >> { %3861 = vrot.lane.b32.xlu0 %v5105_v63, %s4406_s9  ;;  %3336 = vmatprep.subr.bf16.mxu1 %v3335_v16  ;;  %v3357_v16 = vpack.c.bf16 %v5129_v53, %v5132_v47 }
  0x55   : >> { %3338 = vmatpush1.bf16.msra.mxu1 %v3337_v15  ;;  %v3355_v15 = vpack.c.bf16 %v3256_v48, %v5135_v36 }
  0x56   : >> { %3340 = vmatprep.subr.bf16.mxu1 %v3339_v21 }
  0x57   : >> { %3876 = vrot.lane.b32.xlu1 %v5126_v41, %s4406_s9 }
  0x58   : >> { %3871 = vrot.lane.b32.xlu0 %v5120_v52, %s4406_s9 }
  0x59   : >> { %3342 = vmatpush1.bf16.msra.mxu1 %v3341_v20  ;;  %v3361_v20 = vpack.c.bf16 %v5151_v13, %v5141_v42 }
  0x5a   : >> { %3344 = vmatprep.subr.bf16.mxu1 %v3343_v2 }
  0x5b   : >> { %3886 = vrot.lane.b32.xlu1 %v5162_v19, %s4406_s9 }
  0x5c   : >> { %3881 = vrot.lane.b32.xlu0 %v5148_v43, %s4406_s9 }
  0x5d   : >> { %3346 = vmatpush1.bf16.msra.mxu1 %v3345_v8 }
  0x5e   : >> { %3348 = vmatprep.subr.bf16.mxu1 %v3347_v3 }
  0x5f   : >> { %3896 = vrot.lane.b32.xlu1 %v5169_v1, %s4406_s9 }
  0x60   : >> { %3891 = vrot.lane.b32.xlu0 %v5159_v38, %s4406_s9 }
  0x61   : >> { %3350 = vmatpush1.bf16.msra.mxu1 %v3349_v14 }
  0x62   : >> { %3352 = vmatprep.subr.bf16.mxu1 %v3351_v4 }
  0x63   : >> { %3906 = vrot.lane.b32.xlu1 %v5175_v6, %s4407_s10 }
  0x64   : >> { %3901 = vrot.lane.b32.xlu0 %v5195_v10, %s4406_s9 }
  0x65   : >> { %3354 = vmatpush1.bf16.msra.mxu1 %v3353_v12 }
  0x66   : >> { %3356 = vmatprep.subr.bf16.mxu1 %v3355_v15 }
  0x67   : >> { %3916 = vrot.lane.b32.xlu1 %v5062_v18, %s4407_s10 }
  0x68   : >> { %3911 = vrot.lane.b32.xlu0 %v5173_v0, %s4407_s10 }
  0x69   : >> { %3358 = vmatpush1.bf16.msra.mxu1 %v3357_v16 }
  0x6a   : >> { %3360 = vmatprep.subr.bf16.mxu1 %v3359_v17 }
  0x6b   : >> { %3926 = vrot.lane.b32.xlu1 %v5049_v9, %s4407_s10 }
  0x6c   : >> { %3921 = vrot.lane.b32.xlu0 %v5080_v61, %s4407_s10 }
  0x6d   : >> { %3362 = vmatpush1.bf16.msra.mxu1 %v3361_v20 }
  0x6f   : >> { %3936 = vrot.lane.b32.xlu1 %v5105_v63, %s4407_s10 }
  0x70   : >> { %3931 = vrot.lane.b32.xlu0 %v5074_v23, %s4407_s10 }
  0x73   : >> { %3946 = vrot.lane.b32.xlu1 %v5120_v52, %s4407_s10 }
  0x74   : >> { %3941 = vrot.lane.b32.xlu0 %v5098_v62, %s4407_s10 }
  0x77   : >> { %3956 = vrot.lane.b32.xlu1 %v5148_v43, %s4407_s10 }
  0x78   : >> { %3951 = vrot.lane.b32.xlu0 %v5126_v41, %s4407_s10 }
  0x7b   : >> { %3966 = vrot.lane.b32.xlu1 %v5159_v38, %s4407_s10 }
  0x7c   : >> { %3961 = vrot.lane.b32.xlu0 %v5162_v19, %s4407_s10 }
  0x7f   : >> { %3976 = vrot.lane.b32.xlu1 %v5195_v10, %s4407_s10 }
  0x80   : >> { %3971 = vrot.lane.b32.xlu0 %v5169_v1, %s4407_s10 }
  0x83   : >> { %3986 = vrot.lane.b32.xlu1 %v5173_v0, %s4408_s11 }
  0x84   : >> { %3981 = vrot.lane.b32.xlu0 %v5175_v6, %s4408_s11 }
  0x87   : >> { %3996 = vrot.lane.b32.xlu1 %v5080_v61, %s4408_s11 }
  0x88   : >> { %3991 = vrot.lane.b32.xlu0 %v5062_v18, %s4408_s11 }
  0x8b   : >> { %4006 = vrot.lane.b32.xlu1 %v5173_v0, %s4409_s19 }
  0x8c   : >> { %4001 = vrot.lane.b32.xlu0 %v5175_v6, %s4409_s19 }
  0x8f   : >> { %4016 = vrot.lane.b32.xlu1 %v5080_v61, %s4409_s19 }
  0x90   : >> { %4011 = vrot.lane.b32.xlu0 %v5062_v18, %s4409_s19 }
  0x93   : >> { %4026 = vrot.lane.b32.xlu1 %v5074_v23, %s4409_s19 }
  0x94   : >> { %4021 = vrot.lane.b32.xlu0 %v5049_v9, %s4409_s19 }
  0x97   : >> { %4036 = vrot.lane.b32.xlu1 %v5049_v9, %s4408_s11 }
  0x98   : >> { %4031 = vrot.lane.b32.xlu0 %v5105_v63, %s4409_s19 }
  0x9b   : >> { %4046 = vrot.lane.b32.xlu1 %v5098_v62, %s4409_s19 }
  0x9c   : >> { %4041 = vrot.lane.b32.xlu0 %v5074_v23, %s4408_s11 }
  0x9f   : >> { %4056 = vrot.lane.b32.xlu1 %v5105_v63, %s4408_s11 }
  0xa0   : >> { %4051 = vrot.lane.b32.xlu0 %v5120_v52, %s4409_s19 }
  0xa3   : >> { %4066 = vrot.lane.b32.xlu1 %v5126_v41, %s4409_s19 }
  0xa4   : >> { %4061 = vrot.lane.b32.xlu0 %v5098_v62, %s4408_s11 }
  0xa7   : >> { %4076 = vrot.lane.b32.xlu1 %v5120_v52, %s4408_s11 }
  0xa8   : >> { %4071 = vrot.lane.b32.xlu0 %v5148_v43, %s4409_s19 }
  0xab   : >> { %4086 = vrot.lane.b32.xlu1 %v5162_v19, %s4409_s19 }
  0xac   : >> { %4081 = vrot.lane.b32.xlu0 %v5126_v41, %s4408_s11 }
  0xaf   : >> { %4096 = vrot.lane.b32.xlu1 %v5148_v43, %s4408_s11 }
  0xb0   : >> { %4091 = vrot.lane.b32.xlu0 %v5159_v38, %s4409_s19 }
  0xb3   : >> { %4106 = vrot.lane.b32.xlu1 %v5169_v1, %s4409_s19 }
  0xb4   : >> { %4101 = vrot.lane.b32.xlu0 %v5162_v19, %s4408_s11 }
  0xb7   : >> { %4116 = vrot.lane.b32.xlu1 %v5159_v38, %s4408_s11 }
  0xb8   : >> { %4111 = vrot.lane.b32.xlu0 %v5195_v10, %s4409_s19 }
  0xbb   : >> { %4126 = vrot.lane.b32.xlu1 %v5175_v6, %s4406_s9 }
  0xbc   : >> { %4121 = vrot.lane.b32.xlu0 %v5169_v1, %s4408_s11 }
  0xbd   : >> { %v3852_v7 = vpop.permute.xlu1 %3851 }
  0xbe   : >> { %v3842_v9 = vpop.permute.xlu0 %3841  ;;  %v3854_v21 = vunpack.i.h.bf16 %v3852_v7  ;;  %v3853_v22 = vunpack.i.l.bf16 %v3852_v7 }
  0xbf   : >> { %790 = vrot.lane.b32.xlu1 %v5184_v5, %s4408_s11  ;;  %v3844_v13 = vunpack.i.h.bf16 %v3842_v9  ;;  %v3843_v18 = vunpack.i.l.bf16 %v3842_v9 }
  0xc0   : >> { %4131 = vrot.lane.b32.xlu0 %v5173_v0, %s4406_s9  ;;  %v587_v37 = vsel %vm582_vm0, %v3853_v22, %v3854_v21 }
  0xc1   : >> { %v3857_v19 = vpop.permute.xlu1 %3856  ;;  %v585_v29 = vsel %vm582_vm0, %v3843_v18, %v3844_v13 }
  0xc2   : >> { %v3847_v10 = vpop.permute.xlu0 %3846  ;;  %v3859_v23 = vunpack.i.h.bf16 %v3857_v19  ;;  %v3858_v6 = vunpack.i.l.bf16 %v3857_v19 }
  0xc3   : >> { %v3849_v24 = vunpack.i.h.bf16 %v3847_v10  ;;  %v3848_v27 = vunpack.i.l.bf16 %v3847_v10 }
  0xc4   : >> { %792 = vrot.lane.b32.xlu0 %v5187_v11, %s4408_s11  ;;  %v3403_v38 = vpack.c.bf16 %v3859_v23, %v3854_v21  ;;  %v588_v43 = vsel %vm582_vm0, %v3858_v6, %v3859_v23 }
  0xc5   : >> { %v3867_v1 = vpop.permute.xlu1 %3866  ;;  %v3399_v28 = vpack.c.bf16 %v3849_v24, %v3844_v13  ;;  %v586_v0 = vsel %vm582_vm0, %v3848_v27, %v3849_v24  ;;  %v3405_v57 = vpack.c.bf16 %v588_v43, %v587_v37 }
  0xc6   : >> { %v3869_v32 = vunpack.i.h.bf16 %v3867_v1  ;;  %v3868_v33 = vunpack.i.l.bf16 %v3867_v1  ;;  %v3862_v35 = vpop.permute.xlu0 %3861  ;;  %v3401_v36 = vpack.c.bf16 %v586_v0, %v585_v29 }
  0xc7   : >> { %v3864_v41 = vunpack.i.h.bf16 %v3862_v35  ;;  %v3863_v42 = vunpack.i.l.bf16 %v3862_v35  ;;  %3400 = vmatprep.subr.bf16.mxu0 %v3399_v28 }
  0xc8   : >> { %3402 = vmatpush1.bf16.msra.mxu0 %v3401_v36  ;;  %v590_v51 = vsel %vm582_vm0, %v3868_v33, %v3869_v32 }
  0xc9   : >> { %v3407_v46 = vpack.c.bf16 %v3869_v32, %v3864_v41  ;;  %3404 = vmatprep.subr.bf16.mxu0 %v3403_v38  ;;  %v3877_v47 = vpop.permute.xlu1 %3876  ;;  %v589_v48 = vsel %vm582_vm0, %v3863_v42, %v3864_v41 }
  0xca   : >> { %v3879_v52 = vunpack.i.h.bf16 %v3877_v47  ;;  %v3878_v53 = vunpack.i.l.bf16 %v3877_v47  ;;  %v3872_v56 = vpop.permute.xlu0 %3871  ;;  %v3409_v62 = vpack.c.bf16 %v590_v51, %v589_v48 }
  0xcb   : >> { %v3874_v58 = vunpack.i.h.bf16 %v3872_v56  ;;  %v3873_v61 = vunpack.i.l.bf16 %v3872_v56 }
  0xcc   : >> { %3406 = vmatpush1.bf16.msra.mxu0 %v3405_v57  ;;  %v592_v3 = vsel %vm582_vm0, %v3878_v53, %v3879_v52 }
  0xcd   : >> { %v3411_v63 = vpack.c.bf16 %v3879_v52, %v3874_v58  ;;  %3408 = vmatprep.subr.bf16.mxu0 %v3407_v46  ;;  %v3887_v2 = vpop.permute.xlu1 %3886  ;;  %v591_v8 = vsel %vm582_vm0, %v3873_v61, %v3874_v58 }
  0xce   : >> { %v3889_v14 = vunpack.i.h.bf16 %v3887_v2  ;;  %v3888_v4 = vunpack.i.l.bf16 %v3887_v2  ;;  %v3882_v12 = vpop.permute.xlu0 %3881  ;;  %v3413_v17 = vpack.c.bf16 %v592_v3, %v591_v8 }
  0xcf   : >> { %v3884_v15 = vunpack.i.h.bf16 %v3882_v12  ;;  %v3883_v16 = vunpack.i.l.bf16 %v3882_v12 }
  0xd0   : >> { %3410 = vmatpush1.bf16.msra.mxu0 %v3409_v62  ;;  %v594_v13 = vsel %vm582_vm0, %v3888_v4, %v3889_v14 }
  0xd1   : >> { %v3415_v20 = vpack.c.bf16 %v3889_v14, %v3884_v15  ;;  %3412 = vmatprep.subr.bf16.mxu0 %v3411_v63  ;;  %v3897_v7 = vpop.permute.xlu1 %3896  ;;  %v593_v9 = vsel %vm582_vm0, %v3883_v16, %v3884_v15 }
  0xd2   : >> { %v3899_v18 = vunpack.i.h.bf16 %v3897_v7  ;;  %v3898_v19 = vunpack.i.l.bf16 %v3897_v7  ;;  %v3892_v21 = vpop.permute.xlu0 %3891  ;;  %v3417_v23 = vpack.c.bf16 %v594_v13, %v593_v9 }
  0xd3   : >> { %v3894_v22 = vunpack.i.h.bf16 %v3892_v21  ;;  %v3893_v10 = vunpack.i.l.bf16 %v3892_v21 }
  0xd4   : >> { %3414 = vmatpush1.bf16.msra.mxu0 %v3413_v17  ;;  %v596_v1 = vsel %vm582_vm0, %v3898_v19, %v3899_v18 }
  0xd5   : >> { %v3419_v6 = vpack.c.bf16 %v3899_v18, %v3894_v22  ;;  %3416 = vmatprep.subr.bf16.mxu0 %v3415_v20  ;;  %v3907_v24 = vpop.permute.xlu1 %3906  ;;  %v595_v27 = vsel %vm582_vm0, %v3893_v10, %v3894_v22 }
  0xd6   : >> { %v3902_v28 = vpop.permute.xlu0 %3901  ;;  %v3909_v29 = vunpack.i.h.bf16 %v3907_v24  ;;  %v3908_v0 = vunpack.i.l.bf16 %v3907_v24  ;;  %v3421_v35 = vpack.c.bf16 %v596_v1, %v595_v27 }
  0xd7   : >> { %v3904_v32 = vunpack.i.h.bf16 %v3902_v28  ;;  %v3903_v33 = vunpack.i.l.bf16 %v3902_v28 }
  0xd8   : >> { %3418 = vmatpush1.bf16.msra.mxu0 %v3417_v23  ;;  %v689_v41 = vsel %vm688_vm1, %v3908_v0, %v3909_v29 }
  0xd9   : >> { %v3423_v36 = vpack.c.bf16 %v3909_v29, %v3904_v32  ;;  %3420 = vmatprep.subr.bf16.mxu0 %v3419_v6  ;;  %v3917_v37 = vpop.permute.xlu1 %3916  ;;  %v597_v38 = vsel %vm582_vm0, %v3903_v33, %v3904_v32 }
  0xda   : >> { %v3912_v42 = vpop.permute.xlu0 %3911  ;;  %v3919_v43 = vunpack.i.h.bf16 %v3917_v37  ;;  %v3918_v46 = vunpack.i.l.bf16 %v3917_v37  ;;  %v3425_v51 = vpack.c.bf16 %v689_v41, %v597_v38 }
  0xdb   : >> { %v3914_v47 = vunpack.i.h.bf16 %v3912_v42  ;;  %v3913_v48 = vunpack.i.l.bf16 %v3912_v42 }
  0xdc   : >> { %3422 = vmatpush1.bf16.msra.mxu0 %v3421_v35  ;;  %v691_v57 = vsel %vm688_vm1, %v3918_v46, %v3919_v43 }
  0xdd   : >> { %v3427_v52 = vpack.c.bf16 %v3919_v43, %v3914_v47  ;;  %3424 = vmatprep.subr.bf16.mxu0 %v3423_v36  ;;  %v3927_v53 = vpop.permute.xlu1 %3926  ;;  %v690_v56 = vsel %vm688_vm1, %v3913_v48, %v3914_v47 }
  0xde   : >> { %v3922_v58 = vpop.permute.xlu0 %3921  ;;  %v3929_v61 = vunpack.i.h.bf16 %v3927_v53  ;;  %v3928_v62 = vunpack.i.l.bf16 %v3927_v53  ;;  %v3429_v8 = vpack.c.bf16 %v691_v57, %v690_v56 }
  0xdf   : >> { %v3924_v63 = vunpack.i.h.bf16 %v3922_v58  ;;  %v3923_v2 = vunpack.i.l.bf16 %v3922_v58 }
  0xe0   : >> { %3426 = vmatpush1.bf16.msra.mxu0 %v3425_v51  ;;  %v693_v12 = vsel %vm688_vm1, %v3928_v62, %v3929_v61 }
  0xe1   : >> { %v3431_v3 = vpack.c.bf16 %v3929_v61, %v3924_v63  ;;  %3428 = vmatprep.subr.bf16.mxu0 %v3427_v52  ;;  %v3937_v14 = vpop.permute.xlu1 %3936  ;;  %v692_v4 = vsel %vm688_vm1, %v3923_v2, %v3924_v63 }
  0xe2   : >> { %v3932_v15 = vpop.permute.xlu0 %3931  ;;  %v3939_v16 = vunpack.i.h.bf16 %v3937_v14  ;;  %v3938_v17 = vunpack.i.l.bf16 %v3937_v14  ;;  %v3433_v9 = vpack.c.bf16 %v693_v12, %v692_v4 }
  0xe3   : >> { %v3934_v20 = vunpack.i.h.bf16 %v3932_v15  ;;  %v3933_v7 = vunpack.i.l.bf16 %v3932_v15 }
  0xe4   : >> { %3430 = vmatpush1.bf16.msra.mxu0 %v3429_v8  ;;  %v695_v21 = vsel %vm688_vm1, %v3938_v17, %v3939_v16 }
  0xe5   : >> { %v3435_v13 = vpack.c.bf16 %v3939_v16, %v3934_v20  ;;  %3432 = vmatprep.subr.bf16.mxu0 %v3431_v3  ;;  %v3947_v18 = vpop.permute.xlu1 %3946  ;;  %v694_v19 = vsel %vm688_vm1, %v3933_v7, %v3934_v20 }
  0xe6   : >> { %v3942_v22 = vpop.permute.xlu0 %3941  ;;  %v3949_v10 = vunpack.i.h.bf16 %v3947_v18  ;;  %v3948_v23 = vunpack.i.l.bf16 %v3947_v18  ;;  %v3437_v27 = vpack.c.bf16 %v695_v21, %v694_v19 }
  0xe7   : >> { %v3944_v6 = vunpack.i.h.bf16 %v3942_v22  ;;  %v3943_v24 = vunpack.i.l.bf16 %v3942_v22 }
  0xe8   : >> { %3434 = vmatpush1.bf16.msra.mxu0 %v3433_v9  ;;  %v697_v0 = vsel %vm688_vm1, %v3948_v23, %v3949_v10 }
  0xe9   : >> { %v3439_v1 = vpack.c.bf16 %v3949_v10, %v3944_v6  ;;  %3436 = vmatprep.subr.bf16.mxu0 %v3435_v13  ;;  %v3957_v28 = vpop.permute.xlu1 %3956  ;;  %v696_v29 = vsel %vm688_vm1, %v3943_v24, %v3944_v6 }
  0xea   : >> { %v3952_v32 = vpop.permute.xlu0 %3951  ;;  %v3959_v33 = vunpack.i.h.bf16 %v3957_v28  ;;  %v3958_v35 = vunpack.i.l.bf16 %v3957_v28  ;;  %v3441_v38 = vpack.c.bf16 %v697_v0, %v696_v29 }
  0xeb   : >> { %v3954_v36 = vunpack.i.h.bf16 %v3952_v32  ;;  %v3953_v37 = vunpack.i.l.bf16 %v3952_v32 }
  0xec   : >> { %3438 = vmatpush1.bf16.msra.mxu0 %v3437_v27  ;;  %v699_v46 = vsel %vm688_vm1, %v3958_v35, %v3959_v33 }
  0xed   : >> { %v3443_v41 = vpack.c.bf16 %v3959_v33, %v3954_v36  ;;  %3440 = vmatprep.subr.bf16.mxu0 %v3439_v1  ;;  %v3967_v42 = vpop.permute.xlu1 %3966  ;;  %v698_v43 = vsel %vm688_vm1, %v3953_v37, %v3954_v36 }
  0xee   : >> { %v3962_v47 = vpop.permute.xlu0 %3961  ;;  %v3969_v48 = vunpack.i.h.bf16 %v3967_v42  ;;  %v3968_v51 = vunpack.i.l.bf16 %v3967_v42  ;;  %v3445_v56 = vpack.c.bf16 %v699_v46, %v698_v43 }
  0xef   : >> { %v3964_v52 = vunpack.i.h.bf16 %v3962_v47  ;;  %v3963_v53 = vunpack.i.l.bf16 %v3962_v47 }
  0xf0   : >> { %3442 = vmatpush1.bf16.msra.mxu0 %v3441_v38  ;;  %v701_v62 = vsel %vm688_vm1, %v3968_v51, %v3969_v48 }
  0xf1   : >> { %v3447_v57 = vpack.c.bf16 %v3969_v48, %v3964_v52  ;;  %3444 = vmatprep.subr.bf16.mxu0 %v3443_v41  ;;  %v3977_v58 = vpop.permute.xlu1 %3976  ;;  %v700_v61 = vsel %vm688_vm1, %v3963_v53, %v3964_v52 }
  0xf2   : >> { %v3972_v63 = vpop.permute.xlu0 %3971  ;;  %v3979_v2 = vunpack.i.h.bf16 %v3977_v58  ;;  %v3978_v8 = vunpack.i.l.bf16 %v3977_v58  ;;  %v3449_v4 = vpack.c.bf16 %v701_v62, %v700_v61 }
  0xf3   : >> { %v3974_v3 = vunpack.i.h.bf16 %v3972_v63  ;;  %v3973_v14 = vunpack.i.l.bf16 %v3972_v63 }
  0xf4   : >> { %3446 = vmatpush1.bf16.msra.mxu0 %v3445_v56  ;;  %v703_v17 = vsel %vm688_vm1, %v3978_v8, %v3979_v2 }
  0xf5   : >> { %v3451_v12 = vpack.c.bf16 %v3979_v2, %v3974_v3  ;;  %3448 = vmatprep.subr.bf16.mxu0 %v3447_v57  ;;  %v3987_v15 = vpop.permute.xlu1 %3986  ;;  %v702_v16 = vsel %vm688_vm1, %v3973_v14, %v3974_v3 }
  0xf6   : >> { %v3982_v20 = vpop.permute.xlu0 %3981  ;;  %v3989_v7 = vunpack.i.h.bf16 %v3987_v15  ;;  %v3988_v9 = vunpack.i.l.bf16 %v3987_v15  ;;  %v3453_v19 = vpack.c.bf16 %v703_v17, %v702_v16 }
  0xf7   : >> { %v3984_v13 = vunpack.i.h.bf16 %v3982_v20  ;;  %v3983_v18 = vunpack.i.l.bf16 %v3982_v20 }
  0xf8   : >> { %3450 = vmatpush1.bf16.msra.mxu0 %v3449_v4  ;;  %v796_v23 = vsel %vm794_vm2, %v3988_v9, %v3989_v7 }
  0xf9   : >> { %v3455_v21 = vpack.c.bf16 %v3989_v7, %v3984_v13  ;;  %3452 = vmatprep.subr.bf16.mxu0 %v3451_v12  ;;  %v3997_v22 = vpop.permute.xlu1 %3996  ;;  %v795_v10 = vsel %vm794_vm2, %v3983_v18, %v3984_v13 }
  0xfa   : >> { %v3992_v6 = vpop.permute.xlu0 %3991  ;;  %v3999_v24 = vunpack.i.h.bf16 %v3997_v22  ;;  %v3998_v27 = vunpack.i.l.bf16 %v3997_v22  ;;  %v3457_v29 = vpack.c.bf16 %v796_v23, %v795_v10 }
  0xfb   : >> { %v3994_v1 = vunpack.i.h.bf16 %v3992_v6  ;;  %v3993_v28 = vunpack.i.l.bf16 %v3992_v6 }
  0xfc   : >> { %3454 = vmatpush1.bf16.msra.mxu0 %v3453_v19  ;;  %v798_v35 = vsel %vm794_vm2, %v3998_v27, %v3999_v24 }
  0xfd   : >> { %v3459_v0 = vpack.c.bf16 %v3999_v24, %v3994_v1  ;;  %3456 = vmatprep.subr.bf16.mxu0 %v3455_v21  ;;  %v4007_v32 = vpop.permute.xlu1 %4006  ;;  %v797_v33 = vsel %vm794_vm2, %v3993_v28, %v3994_v1 }
  0xfe   : >> { %v4002_v36 = vpop.permute.xlu0 %4001  ;;  %v4009_v41 = vunpack.i.h.bf16 %v4007_v32  ;;  %v4008_v42 = vunpack.i.l.bf16 %v4007_v32  ;;  %v3461_v43 = vpack.c.bf16 %v798_v35, %v797_v33 }
  0xff   : >> { %v4004_v37 = vunpack.i.h.bf16 %v4002_v36  ;;  %v4003_v38 = vunpack.i.l.bf16 %v4002_v36 }
 0x100   : >> { %3458 = vmatpush1.bf16.msra.mxu0 %v3457_v29  ;;  %v478_v61 = vsel %vm476_vm3, %v4008_v42, %v4009_v41 }
 0x101   : >> { %v3363_v46 = vpack.c.bf16 %v4004_v37, %v5187_v11  ;;  %3460 = vmatprep.subr.bf16.mxu0 %v3459_v0  ;;  %v477_v47 = vsel %vm476_vm3, %v4003_v38, %v4004_v37  ;;  %v4017_v48 = vpop.permute.xlu1 %4016 }
 0x102   : >> { %v4012_v51 = vpop.permute.xlu0 %4011  ;;  %v3365_v52 = vpack.c.bf16 %v477_v47, %v5184_v5  ;;  %v4019_v53 = vunpack.i.h.bf16 %v4017_v48  ;;  %v4018_v56 = vunpack.i.l.bf16 %v4017_v48 }
 0x103   : >> { %v4014_v57 = vunpack.i.h.bf16 %v4012_v51  ;;  %v4013_v58 = vunpack.i.l.bf16 %v4012_v51  ;;  %3364 = vmatprep.subr.bf16.mxu1 %v3363_v46 }
 0x104   : >> { %3366 = vmatpush1.bf16.msra.mxu1 %v3365_v52  ;;  %3462 = vmatpush1.bf16.msra.mxu0 %v3461_v43  ;;  %v480_v3 = vsel %vm476_vm3, %v4018_v56, %v4019_v53 }
 0x105   : >> { %v3367_v62 = vpack.c.bf16 %v4014_v57, %v4009_v41  ;;  %v479_v63 = vsel %vm476_vm3, %v4013_v58, %v4014_v57  ;;  %v4027_v11 = vpop.permute.xlu1 %4026 }
 0x106   : >> { %v4022_v2 = vpop.permute.xlu0 %4021  ;;  %v3369_v8 = vpack.c.bf16 %v479_v63, %v478_v61  ;;  %v4029_v5 = vunpack.i.h.bf16 %v4027_v11  ;;  %v4028_v12 = vunpack.i.l.bf16 %v4027_v11 }
 0x107   : >> { %v4024_v14 = vunpack.i.h.bf16 %v4022_v2  ;;  %v4023_v4 = vunpack.i.l.bf16 %v4022_v2  ;;  %3368 = vmatprep.subr.bf16.mxu1 %v3367_v62  ;;  %1115 = vmatmul.mubr.f32.vlgmr.msra.gmra.mrb[0].mxu0 %v4640_v34 }
 0x108   : >> { %3370 = vmatpush1.bf16.msra.mxu1 %v3369_v8  ;;  %1120 = vmatprep.mubr.f32.mxu0 %v4670_v40  ;;  %v482_v21 = vsel %vm476_vm3, %v4028_v12, %v4029_v5  ;;  %v5708_v40 = vld [vmem:[%s4550_s12 + $0x530] sm:$0xff] (%p339_p4) }
 0x109   : >> { %v3371_v15 = vpack.c.bf16 %v4024_v14, %v4019_v53  ;;  %v481_v16 = vsel %vm476_vm3, %v4023_v4, %v4024_v14  ;;  %v4037_v17 = vpop.permute.xlu1 %4036 }
 0x10a   : >> { %v4032_v20 = vpop.permute.xlu0 %4031  ;;  %v3373_v7 = vpack.c.bf16 %v481_v16, %v480_v3  ;;  %v4039_v9 = vunpack.i.h.bf16 %v4037_v17  ;;  %v4038_v13 = vunpack.i.l.bf16 %v4037_v17 }
 0x10b   : >> { %v4034_v18 = vunpack.i.h.bf16 %v4032_v20  ;;  %v4033_v19 = vunpack.i.l.bf16 %v4032_v20  ;;  %3372 = vmatprep.subr.bf16.mxu1 %v3371_v15  ;;  %1121 = vmatmul.mubr.f32.gmra.mrb[2].mxu0 %v4665_v39  ;;  %v5705_v39 = vld [vmem:[%s4550_s12 + $0x508] sm:$0xff] (%p339_p4) }
 0x10c   : >> { %3374 = vmatpush1.bf16.msra.mxu1 %v3373_v7  ;;  %1126 = vmatprep.mubr.f32.mxu0 %v4695_v45  ;;  %v799_v24 = vsel %vm794_vm2, %v4038_v13, %v4039_v9 }
 0x10d   : >> { %v3375_v22 = vpack.c.bf16 %v4034_v18, %v4029_v5  ;;  %v483_v10 = vsel %vm476_vm3, %v4033_v19, %v4034_v18  ;;  %v4047_v23 = vpop.permute.xlu1 %4046 }
 0x10e   : >> { %v4042_v6 = vpop.permute.xlu0 %4041  ;;  %v3377_v27 = vpack.c.bf16 %v483_v10, %v482_v21  ;;  %v4049_v29 = vunpack.i.h.bf16 %v4047_v23  ;;  %v4048_v0 = vunpack.i.l.bf16 %v4047_v23 }
 0x10f   : >> { %v4044_v1 = vunpack.i.h.bf16 %v4042_v6  ;;  %v4043_v28 = vunpack.i.l.bf16 %v4042_v6  ;;  %3376 = vmatprep.subr.bf16.mxu1 %v3375_v22  ;;  %1127 = vmatmul.mubr.f32.gmra.mrb[4].mxu0 %v4690_v44  ;;  %v5711_v44 = vld [vmem:[%s4550_s12 + $0x538] sm:$0xff] (%p339_p4) }
 0x110   : >> { %3378 = vmatpush1.bf16.msra.mxu1 %v3377_v27  ;;  %1132 = vmatprep.mubr.f32.mxu0 %v4720_v50  ;;  %v484_v46 = vsel %vm476_vm3, %v4048_v0, %v4049_v29  ;;  %v3299_v50 = vld [vmem:[%s4550_s12 + $0x518] sm:$0xff] (%p339_p4) }
 0x111   : >> { %v800_v32 = vsel %vm794_vm2, %v4043_v28, %v4044_v1  ;;  %v3463_v33 = vpack.c.bf16 %v4044_v1, %v4039_v9  ;;  %v4057_v35 = vpop.permute.xlu1 %4056 }
 0x112   : >> { %v3465_v36 = vpack.c.bf16 %v800_v32, %v799_v24  ;;  %v4052_v37 = vpop.permute.xlu0 %4051  ;;  %v4059_v38 = vunpack.i.h.bf16 %v4057_v35  ;;  %v4058_v41 = vunpack.i.l.bf16 %v4057_v35 }
 0x113   : >> { %1133 = vmatmul.mubr.f32.gmra.mrb[6].mxu0 %v4715_v49  ;;  %3464 = vmatprep.subr.bf16.mxu0 %v3463_v33  ;;  %v4054_v42 = vunpack.i.h.bf16 %v4052_v37  ;;  %v4053_v43 = vunpack.i.l.bf16 %v4052_v37  ;;  %v6416_v33 = vld [vmem:[#allocation66_spill] sm:$0xff]  ;;  %v5718_v49 = vld [vmem:[%s4550_s12 + $0x510] sm:$0xff] (%p339_p4) }
 0x114   : >> { %3466 = vmatpush1.bf16.msra.mxu0 %v3465_v36  ;;  %1138 = vmatprep.mubr.f32.mxu0 %v4745_v55  ;;  %v801_v53 = vsel %vm794_vm2, %v4058_v41, %v4059_v38  ;;  %v5730_v55 = vpack.i.bf16 (%p339_p4), %v3299_v50, %v5718_v49 }
 0x115   : >> { %v3379_v47 = vpack.c.bf16 %v4054_v42, %v4049_v29  ;;  %v485_v48 = vsel %vm476_vm3, %v4053_v43, %v4054_v42  ;;  %v4067_v51 = vpop.permute.xlu1 %4066  ;;  %v6417_v43 = vld [vmem:[#allocation65_spill] sm:$0xff] }
 0x116   : >> { %v4062_v52 = vpop.permute.xlu0 %4061  ;;  %v3381_v56 = vpack.c.bf16 %v485_v48, %v484_v46  ;;  %v4069_v61 = vunpack.i.h.bf16 %v4067_v51  ;;  %v4068_v62 = vunpack.i.l.bf16 %v4067_v51 }
 0x117   : >> { %1139 = vmatmul.mubr.f32.gmra.mrb[8].mxu0 %v4740_v54  ;;  %v4064_v57 = vunpack.i.h.bf16 %v4062_v52  ;;  %v4063_v58 = vunpack.i.l.bf16 %v4062_v52  ;;  %3380 = vmatprep.subr.bf16.mxu1 %v3379_v47  ;;  %v6418_v52 = vld [vmem:[#allocation71_spill] sm:$0xff]  ;;  %v5725_v54 = vpack.i.bf16 (%p339_p4), %v5711_v44, %v5708_v40 }
 0x118   : >> { %1144 = vmatprep.mubr.f32.mxu0 %v4770_v60  ;;  %3382 = vmatpush1.bf16.msra.mxu1 %v3381_v56  ;;  %v486_v15 = vsel %vm476_vm3, %v4068_v62, %v4069_v61  ;;  %v1719_v60 = vld [vmem:[%s4550_s12 + $0x198] sm:$0xff] (%p339_p4) }
 0x119   : >> { %v802_v63 = vsel %vm794_vm2, %v4063_v58, %v4064_v57  ;;  %v3467_v11 = vpack.c.bf16 %v4064_v57, %v4059_v38  ;;  %v4077_v2 = vpop.permute.xlu1 %4076 }
 0x11a   : >> { %v3469_v8 = vpack.c.bf16 %v802_v63, %v801_v53  ;;  %v4072_v3 = vpop.permute.xlu0 %4071  ;;  %v4079_v14 = vunpack.i.h.bf16 %v4077_v2  ;;  %v4078_v4 = vunpack.i.l.bf16 %v4077_v2 }
 0x11b   : >> { %1145 = vmatmul.mubr.f32.gmra.mrb[10].mxu0 %v4765_v59  ;;  %3468 = vmatprep.subr.bf16.mxu0 %v3467_v11  ;;  %v4074_v5 = vunpack.i.h.bf16 %v4072_v3  ;;  %v4073_v12 = vunpack.i.l.bf16 %v4072_v3  ;;  %v6419_v11 = vld [vmem:[#allocation70_spill] sm:$0xff]  ;;  %v1718_v59 = vld [vmem:[%s4550_s12 + $0x190] sm:$0xff] (%p339_p4) }
 0x11c   : >> { %1150 = vmatprep.mubr.f32.mxu0 %v6412_v30  ;;  %3470 = vmatpush1.bf16.msra.mxu0 %v3469_v8  ;;  %v803_v9 = vsel %vm794_vm2, %v4078_v4, %v4079_v14 }
 0x11d   : >> { %v3383_v16 = vpack.c.bf16 %v4074_v5, %v4069_v61  ;;  %v487_v17 = vsel %vm476_vm3, %v4073_v12, %v4074_v5  ;;  %v4087_v20 = vpop.permute.xlu1 %4086 }
 0x11e   : >> { %v4082_v7 = vpop.permute.xlu0 %4081  ;;  %v3385_v13 = vpack.c.bf16 %v487_v17, %v486_v15  ;;  %v4089_v21 = vunpack.i.h.bf16 %v4087_v20  ;;  %v4088_v22 = vunpack.i.l.bf16 %v4087_v20  ;;  %v6421_v20 = vld [vmem:[#allocation75_spill] sm:$0xff] }
 0x11f   : >> { %1151 = vmatmul.mubr.f32.gmra.mrb[12].mxu0 %v6413_v31  ;;  %v4084_v18 = vunpack.i.h.bf16 %v4082_v7  ;;  %v4083_v19 = vunpack.i.l.bf16 %v4082_v7  ;;  %3384 = vmatprep.subr.bf16.mxu1 %v3383_v16 }
 0x120   : >> { %1156 = vmatprep.mubr.f32.mxu0 %v6414_v25  ;;  %3386 = vmatpush1.bf16.msra.mxu1 %v3385_v13  ;;  %v488_v32 = vsel %vm476_vm3, %v4088_v22, %v4089_v21 }
 0x121   : >> { %v804_v10 = vsel %vm794_vm2, %v4083_v19, %v4084_v18  ;;  %v3471_v23 = vpack.c.bf16 %v4084_v18, %v4079_v14  ;;  %v4097_v6 = vpop.permute.xlu1 %4096  ;;  %v6420_v14 = vld [vmem:[#allocation76_spill] sm:$0xff]  ;;  %v6422_v19 = vld [vmem:[#allocation81_spill] sm:$0xff] }
 0x122   : >> { %v3473_v24 = vpack.c.bf16 %v804_v10, %v803_v9  ;;  %v4092_v27 = vpop.permute.xlu0 %4091  ;;  %v4099_v1 = vunpack.i.h.bf16 %v4097_v6  ;;  %v4098_v28 = vunpack.i.l.bf16 %v4097_v6  ;;  %v6423_v6 = vld [vmem:[#allocation80_spill] sm:$0xff] }
 0x123   : >> { %1157 = vmatmul.mubr.f32.gmra.mrb[14].mxu0 %v6415_v26  ;;  %3472 = vmatprep.subr.bf16.mxu0 %v3471_v23  ;;  %v4094_v29 = vunpack.i.h.bf16 %v4092_v27  ;;  %v4093_v0 = vunpack.i.l.bf16 %v4092_v27 }
 0x124   : >> { %1162 = vmatprep.mubr.f32.mxu0 %v6416_v33  ;;  %3474 = vmatpush1.bf16.msra.mxu0 %v3473_v24  ;;  %v805_v41 = vsel %vm794_vm2, %v4098_v28, %v4099_v1  ;;  %v6424_v28 = vld [vmem:[#allocation86_spill] sm:$0xff] }
 0x125   : >> { %v3387_v35 = vpack.c.bf16 %v4094_v29, %v4089_v21  ;;  %v489_v36 = vsel %vm476_vm3, %v4093_v0, %v4094_v29  ;;  %v4107_v37 = vpop.permute.xlu1 %4106 }
 0x126   : >> { %v4102_v38 = vpop.permute.xlu0 %4101  ;;  %v3389_v42 = vpack.c.bf16 %v489_v36, %v488_v32  ;;  %v4109_v48 = vunpack.i.h.bf16 %v4107_v37  ;;  %v4108_v51 = vunpack.i.l.bf16 %v4107_v37  ;;  %v6425_v36 = vld [vmem:[#allocation85_spill] sm:$0xff] }
 0x127   : >> { %1163 = vmatmul.mubr.f32.gmra.mrb[16].mxu0 %v6417_v43  ;;  %v4104_v46 = vunpack.i.h.bf16 %v4102_v38  ;;  %v4103_v47 = vunpack.i.l.bf16 %v4102_v38  ;;  %3388 = vmatprep.subr.bf16.mxu1 %v3387_v35  ;;  %v6426_v38 = vld [vmem:[#allocation91_spill] sm:$0xff]  ;;  %v6429_v43 = vld [vmem:[#allocation96_spill] sm:$0xff] }
 0x128   : >> { %1168 = vmatprep.mubr.f32.mxu0 %v6418_v52  ;;  %3390 = vmatpush1.bf16.msra.mxu1 %v3389_v42  ;;  %v490_v3 = vsel %vm476_vm3, %v4108_v51, %v4109_v48  ;;  %v6428_v42 = vld [vmem:[#allocation34_spill] sm:$0xff]  ;;  %v6433_v51 = vld [vmem:[#allocation101_spill] sm:$0xff] }
 0x129   : >> { %v806_v53 = vsel %vm794_vm2, %v4103_v47, %v4104_v46  ;;  %v3475_v56 = vpack.c.bf16 %v4104_v46, %v4099_v1  ;;  %v4117_v57 = vpop.permute.xlu1 %4116  ;;  %v6430_v46 = vld [vmem:[#allocation39_spill] sm:$0xff]  ;;  %v6434_v52 = vld [vmem:[#allocation42_spill] sm:$0xff] }
 0x12a   : >> { %v3477_v58 = vpack.c.bf16 %v806_v53, %v805_v41  ;;  %v4112_v61 = vpop.permute.xlu0 %4111  ;;  %v4119_v62 = vunpack.i.h.bf16 %v4117_v57  ;;  %v4118_v63 = vunpack.i.l.bf16 %v4117_v57  ;;  %v6427_v41 = vld [vmem:[#allocation90_spill] sm:$0xff]  ;;  %v6431_v47 = vld [vmem:[#allocation95_spill] sm:$0xff]  ;;  %v6435_v53 = vld [vmem:[#allocation100_spill] sm:$0xff]  ;;  %v4410_v57 = vmov 0.0  }
 0x12b   : >> { %1169 = vmatmul.mubr.f32.gmra.mrb[18].mxu0 %v6419_v11  ;;  %3476 = vmatprep.subr.bf16.mxu0 %v3475_v56  ;;  %v4114_v2 = vunpack.i.h.bf16 %v4112_v61  ;;  %v4113_v8 = vunpack.i.l.bf16 %v4112_v61  ;;  %v6436_v56 = vld [vmem:[#allocation41_spill] sm:$0xff]  ;;  %v6441_v11 = vld [vmem:[#allocation40_spill] sm:$0xff] }
 0x12c   : >> { %1174 = vmatprep.mubr.f32.mxu0 %v6420_v14  ;;  %3478 = vmatpush1.bf16.msra.mxu0 %v3477_v58  ;;  %v807_v16 = vsel %vm794_vm2, %v4118_v63, %v4119_v62  ;;  %v6437_v58 = vld [vmem:[#allocation45_spill] sm:$0xff]  ;;  %v6440_v63 = vld [vmem:[#allocation48_spill] sm:$0xff]  ;;  %v6445_v14 = vld [vmem:[#allocation50_spill] sm:$0xff] }
 0x12d   : >> { %v3391_v4 = vpack.c.bf16 %v4114_v2, %v4109_v48  ;;  %v491_v5 = vsel %vm476_vm3, %v4113_v8, %v4114_v2  ;;  %v4127_v12 = vpop.permute.xlu1 %4126  ;;  %v6432_v48 = vld [vmem:[#allocation38_spill] sm:$0xff]  ;;  %v6438_v61 = vld [vmem:[#allocation37_spill] sm:$0xff]  ;;  %v6442_v2 = vld [vmem:[#allocation47_spill] sm:$0xff] }
 0x12e   : >> { %v4122_v15 = vpop.permute.xlu0 %4121  ;;  %v3393_v17 = vpack.c.bf16 %v491_v5, %v490_v3  ;;  %v4129_v13 = vunpack.i.h.bf16 %v4127_v12  ;;  %v4128_v18 = vunpack.i.l.bf16 %v4127_v12  ;;  %v6443_v8 = vld [vmem:[#allocation51_spill] sm:$0xff]  ;;  %v6447_v5 = vld [vmem:[#allocation46_spill] sm:$0xff]  ;;  %v6448_v12 = vld [vmem:[#allocation53_spill] sm:$0xff] }
 0x12f   : >> { %1175 = vmatmul.mubr.f32.gmra.mrb[20].mxu0 %v6421_v20  ;;  %v4124_v7 = vunpack.i.h.bf16 %v4122_v15  ;;  %v4123_v9 = vunpack.i.l.bf16 %v4122_v15  ;;  %3392 = vmatprep.subr.bf16.mxu1 %v3391_v4  ;;  %v6444_v3 = vld [vmem:[#allocation43_spill] sm:$0xff]  ;;  %v6446_v4 = vld [vmem:[#allocation54_spill] sm:$0xff]  ;;  %v6452_v20 = vld [vmem:[#allocation64_spill] sm:$0xff] }
 0x130   : >> { %1180 = vmatprep.mubr.f32.mxu0 %v6422_v19  ;;  %3394 = vmatpush1.bf16.msra.mxu1 %v3393_v17  ;;  %v583_v1 = vsel %vm582_vm0, %v4128_v18, %v4129_v13  ;;  %v6449_v15 = vld [vmem:[#allocation59_spill] sm:$0xff]  ;;  %v6451_v17 = vld [vmem:[#allocation58_spill] sm:$0xff]  ;;  %v6456_v18 = vld [vmem:[#allocation57_spill] sm:$0xff] }
 0x131   : >> { %v808_v21 = vsel %vm794_vm2, %v4123_v9, %v4124_v7  ;;  %v3479_v22 = vpack.c.bf16 %v4124_v7, %v4119_v62  ;;  %v791_v29 = vpop.permute.xlu1 %790  ;;  %v6439_v62 = vld [vmem:[#allocation44_spill] sm:$0xff]  ;;  %v6454_v9 = vld [vmem:[#allocation63_spill] sm:$0xff] }
 0x132   : >> { %v3481_v10 = vpack.c.bf16 %v808_v21, %v807_v16  ;;  %v4132_v23 = vpop.permute.xlu0 %4131  ;;  %v6450_v16 = vld [vmem:[#allocation49_spill] sm:$0xff]  ;;  %v6453_v7 = vld [vmem:[#allocation52_spill] sm:$0xff]  ;;  %v6458_v21 = vld [vmem:[#allocation74_spill] sm:$0xff] }
 0x133   : >> { %1181 = vmatmul.mubr.f32.gmra.mrb[22].mxu0 %v6423_v6  ;;  %v4134_v24 = vunpack.i.h.bf16 %v4132_v23  ;;  %v4133_v27 = vunpack.i.l.bf16 %v4132_v23  ;;  %3480 = vmatprep.subr.bf16.mxu0 %v3479_v22  ;;  %v6457_v19 = vld [vmem:[#allocation68_spill] sm:$0xff]  ;;  %v6459_v22 = vld [vmem:[#allocation62_spill] sm:$0xff]  ;;  %v6461_v23 = vld [vmem:[#allocation79_spill] sm:$0xff] }
 0x134   : >> { %1186 = vmatprep.mubr.f32.mxu0 %v6424_v28  ;;  %3482 = vmatpush1.bf16.msra.mxu0 %v3481_v10  ;;  %v6460_v10 = vld [vmem:[#allocation73_spill] sm:$0xff]  ;;  %v6462_v6 = vld [vmem:[#allocation67_spill] sm:$0xff] }
 0x135   : >> { %v3395_v0 = vpack.c.bf16 %v4134_v24, %v4129_v13  ;;  %v584_v32 = vsel %vm582_vm0, %v4133_v27, %v4134_v24  ;;  %v6455_v13 = vld [vmem:[#allocation69_spill] sm:$0xff]  ;;  %v6463_v24 = vld [vmem:[#allocation78_spill] sm:$0xff]  ;;  %v6464_v27 = vld [vmem:[#allocation84_spill] sm:$0xff] }
 0x136   : >> { %v793_v33 = vpop.permute.xlu0 %792  ;;  %v3397_v35 = vpack.c.bf16 %v584_v32, %v583_v1  ;;  %v6465_v1 = vld [vmem:[#allocation72_spill] sm:$0xff]  ;;  %v6466_v28 = vld [vmem:[#allocation83_spill] sm:$0xff] }
 0x137   : >> { %1187 = vmatmul.mubr.f32.gmra.mrb[24].mxu0 %v6425_v36  ;;  %3396 = vmatprep.subr.bf16.mxu1 %v3395_v0  ;;  %v809_v37 = vsel %vm794_vm2, %v791_v29, %v793_v33  ;;  %v6467_v29 = vld [vmem:[#allocation89_spill] sm:$0xff]  ;;  %v6469_v32 = vld [vmem:[#allocation88_spill] sm:$0xff] }
 0x138   : >> { %1192 = vmatprep.mubr.f32.mxu0 %v6426_v38  ;;  %3398 = vmatpush1.bf16.msra.mxu1 %v3397_v35  ;;  %v6468_v0 = vld [vmem:[#allocation77_spill] sm:$0xff]  ;;  %v6471_v35 = vld [vmem:[#allocation82_spill] sm:$0xff]  ;;  %v6474_v38 = vld [vmem:[#allocation87_spill] sm:$0xff] }
 0x139   : >> { %1231 = vmatprep.subr.mxu0 %v793_v33  ;;  %v6470_v33 = vld [vmem:[#allocation94_spill] sm:$0xff]  ;;  %v6472_v36 = vld [vmem:[#allocation93_spill] sm:$0xff] }
 0x13a   : >> { %1232 = vmatpush1.msra.mxu0 %v809_v37  ;;  %v6473_v37 = vld [vmem:[#allocation99_spill] sm:$0xff] }
 0x13b   : >> { %1193 = vmatmul.mubr.f32.gmra.mrb[26].mxu0 %v6427_v41  ;;  %954 = vmatmul.mubr.f32.vlgmr.msra.gmra.mrb[0].mxu1 %v6428_v42  ;;  %v6475_v41 = vld [vmem:[#allocation98_spill] sm:$0xff]  ;;  %v6476_v42 = vld [vmem:[#allocation92_spill] sm:$0xff] }
 0x13c   : >> { %1198 = vmatprep.mubr.f32.mxu0 %v6429_v43  ;;  %959 = vmatprep.mubr.f32.mxu1 %v6430_v46  ;;  %v6477_v43 = vld [vmem:[#allocation97_spill] sm:$0xff]  ;;  %v6478_v46 = vld [vmem:[#allocation102_spill] sm:$0xff] }
 0x13f   : >> { %1199 = vmatmul.mubr.f32.gmra.mrb[28].mxu0 %v6431_v47  ;;  %960 = vmatmul.mubr.f32.gmra.mrb[2].mxu1 %v6432_v48  ;;  %v6479_v47 = vld [vmem:[#allocation2_spill] sm:$0xff]  ;;  %v6480_v48 = vld [vmem:[#allocation3_spill] sm:$0xff] }
 0x140   : >> { %1204 = vmatprep.mubr.f32.mxu0 %v6433_v51  ;;  %965 = vmatprep.mubr.f32.mxu1 %v6434_v52  ;;  %v5476_v51 = vpack.c.bf16 %v6480_v48, %v6479_v47  ;;  %v4411_v52 = vmov 0.0|0.0  }
 0x141   : >> { %3483 = vmatprep.subr.bf16.mxu1 %v4411_v52 }
 0x142   : >> { %3485 = vmatpush1.bf16.msra.mxu1 %v5476_v51 }
 0x143   : >> { %1205 = vmatmul.mubr.f32.gmra.mrb[30].mxu0 %v6435_v53  ;;  %966 = vmatmul.mubr.f32.gmra.mrb[4].mxu1 %v6436_v56  ;;  %v6481_v53 = vld [vmem:[#allocation4_spill] sm:$0xff]  ;;  %v6482_v56 = vld [vmem:[#allocation5_spill] sm:$0xff] }
 0x144   : >> { %1275 = vmatprep.mubr.f32.mxu0 %v4410_v57  ;;  %971 = vmatprep.mubr.f32.mxu1 %v6437_v58  ;;  %v5481_v58 = vpack.c.bf16 %v6482_v56, %v6481_v53 }
 0x145   : >> { %3486 = vmatprep.subr.bf16.mxu1 %v4411_v52 }
 0x146   : >> { %3488 = vmatpush1.bf16.msra.mxu1 %v5481_v58 }
 0x147   : >> { %3263 = vmatmul.mubr.msk.f32.vlgmr.msra.gmra.mrb[0].mxu0 %vm840_vm4, %v6438_v61  ;;  %972 = vmatmul.mubr.f32.gmra.mrb[6].mxu1 %v6439_v62  ;;  %v6483_v61 = vld [vmem:[#allocation6_spill] sm:$0xff] }
 0x148   : >> { %1281 = vmatprep.mubr.f32.mxu0 %v4410_v57  ;;  %977 = vmatprep.mubr.f32.mxu1 %v6440_v63  ;;  %v6485_v63 = vld [vmem:[#allocation8_spill] sm:$0xff] }
 0x149   : >> { %3489 = vmatprep.subr.bf16.mxu1 %v4411_v52 }
 0x14b   : >> { %3264 = vmatmul.mubr.msk.f32.gmra.mrb[2].mxu0 %vm840_vm4, %v6441_v11  ;;  %978 = vmatmul.mubr.f32.gmra.mrb[8].mxu1 %v6442_v2  ;;  %v6486_v11 = vld [vmem:[#allocation9_spill] sm:$0xff] }
 0x14c   : >> { %1287 = vmatprep.mubr.f32.mxu0 %v4410_v57  ;;  %983 = vmatprep.mubr.f32.mxu1 %v6443_v8  ;;  %v5491_v2 = vpack.c.bf16 %v6486_v11, %v6485_v63  ;;  %v6487_v8 = vld [vmem:[#allocation10_spill] sm:$0xff] }
 0x14f   : >> { %3265 = vmatmul.mubr.msk.f32.gmra.mrb[4].mxu0 %vm840_vm4, %v6444_v3  ;;  %984 = vmatmul.mubr.f32.gmra.mrb[10].mxu1 %v6445_v14  ;;  %v6488_v3 = vld [vmem:[#allocation11_spill] sm:$0xff] }
 0x150   : >> { %1293 = vmatprep.mubr.f32.mxu0 %v4410_v57  ;;  %989 = vmatprep.mubr.f32.mxu1 %v6446_v4  ;;  %v5496_v14 = vpack.c.bf16 %v6488_v3, %v6487_v8  ;;  %v6489_v4 = vld [vmem:[#allocation12_spill] sm:$0xff] }
 0x153   : >> { %3266 = vmatmul.mubr.msk.f32.gmra.mrb[6].mxu0 %vm840_vm4, %v6447_v5  ;;  %990 = vmatmul.mubr.f32.gmra.mrb[12].mxu1 %v6448_v12  ;;  %v6490_v5 = vld [vmem:[#allocation13_spill] sm:$0xff] }
 0x154   : >> { %1299 = vmatprep.mubr.f32.mxu0 %v4410_v57  ;;  %995 = vmatprep.mubr.f32.mxu1 %v6449_v15  ;;  %v5501_v12 = vpack.c.bf16 %v6490_v5, %v6489_v4  ;;  %v6491_v15 = vld [vmem:[#allocation14_spill] sm:$0xff] }
 0x157   : >> { %3267 = vmatmul.mubr.msk.f32.gmra.mrb[8].mxu0 %vm840_vm4, %v6450_v16  ;;  %996 = vmatmul.mubr.f32.gmra.mrb[14].mxu1 %v6451_v17  ;;  %v6492_v16 = vld [vmem:[#allocation15_spill] sm:$0xff] }
 0x158   : >> { %1305 = vmatprep.mubr.f32.mxu0 %v4410_v57  ;;  %1001 = vmatprep.mubr.f32.mxu1 %v6452_v20  ;;  %v5506_v17 = vpack.c.bf16 %v6492_v16, %v6491_v15  ;;  %v6493_v20 = vld [vmem:[#allocation16_spill] sm:$0xff] }
 0x15b   : >> { %3268 = vmatmul.mubr.msk.f32.gmra.mrb[10].mxu0 %vm840_vm4, %v6453_v7  ;;  %1002 = vmatmul.mubr.f32.gmra.mrb[16].mxu1 %v6454_v9  ;;  %v6494_v7 = vld [vmem:[#allocation17_spill] sm:$0xff] }
 0x15c   : >> { %1311 = vmatprep.mubr.f32.mxu0 %v4410_v57  ;;  %1007 = vmatprep.mubr.f32.mxu1 %v6455_v13  ;;  %v5511_v9 = vpack.c.bf16 %v6494_v7, %v6493_v20  ;;  %v6495_v13 = vld [vmem:[#allocation18_spill] sm:$0xff] }
 0x15f   : >> { %3269 = vmatmul.mubr.msk.f32.gmra.mrb[12].mxu0 %vm840_vm4, %v6456_v18  ;;  %1008 = vmatmul.mubr.f32.gmra.mrb[18].mxu1 %v6457_v19  ;;  %v6496_v18 = vld [vmem:[#allocation19_spill] sm:$0xff] }
 0x160   : >> { %1317 = vmatprep.mubr.f32.mxu0 %v4410_v57  ;;  %1013 = vmatprep.mubr.f32.mxu1 %v6458_v21  ;;  %v5516_v19 = vpack.c.bf16 %v6496_v18, %v6495_v13  ;;  %v6497_v21 = vld [vmem:[#allocation20_spill] sm:$0xff] }
 0x163   : >> { %3270 = vmatmul.mubr.msk.f32.gmra.mrb[14].mxu0 %vm840_vm4, %v6459_v22  ;;  %1014 = vmatmul.mubr.f32.gmra.mrb[20].mxu1 %v6460_v10  ;;  %v6498_v22 = vld [vmem:[#allocation21_spill] sm:$0xff] }
 0x164   : >> { %1323 = vmatprep.mubr.f32.mxu0 %v4410_v57  ;;  %1019 = vmatprep.mubr.f32.mxu1 %v6461_v23  ;;  %v5521_v10 = vpack.c.bf16 %v6498_v22, %v6497_v21  ;;  %v6499_v23 = vld [vmem:[#allocation22_spill] sm:$0xff] }
 0x167   : >> { %3271 = vmatmul.mubr.msk.f32.gmra.mrb[16].mxu0 %vm840_vm4, %v6462_v6  ;;  %1020 = vmatmul.mubr.f32.gmra.mrb[22].mxu1 %v6463_v24  ;;  %v6500_v6 = vld [vmem:[#allocation23_spill] sm:$0xff] }
 0x168   : >> { %1329 = vmatprep.mubr.f32.mxu0 %v4410_v57  ;;  %1025 = vmatprep.mubr.f32.mxu1 %v6464_v27  ;;  %v5526_v24 = vpack.c.bf16 %v6500_v6, %v6499_v23  ;;  %v6501_v27 = vld [vmem:[#allocation24_spill] sm:$0xff] }
 0x16b   : >> { %3272 = vmatmul.mubr.msk.f32.gmra.mrb[18].mxu0 %vm840_vm4, %v6465_v1  ;;  %1026 = vmatmul.mubr.f32.gmra.mrb[24].mxu1 %v6466_v28  ;;  %v6502_v1 = vld [vmem:[#allocation25_spill] sm:$0xff] }
 0x16c   : >> { %1335 = vmatprep.mubr.f32.mxu0 %v4410_v57  ;;  %1031 = vmatprep.mubr.f32.mxu1 %v6467_v29  ;;  %v5531_v28 = vpack.c.bf16 %v6502_v1, %v6501_v27  ;;  %v6503_v29 = vld [vmem:[#allocation26_spill] sm:$0xff] }
 0x16f   : >> { %3273 = vmatmul.mubr.msk.f32.gmra.mrb[20].mxu0 %vm840_vm4, %v6468_v0  ;;  %1032 = vmatmul.mubr.f32.gmra.mrb[26].mxu1 %v6469_v32  ;;  %v6504_v0 = vld [vmem:[#allocation27_spill] sm:$0xff] }
 0x170   : >> { %1341 = vmatprep.mubr.f32.mxu0 %v4410_v57  ;;  %1037 = vmatprep.mubr.f32.mxu1 %v6470_v33  ;;  %v5536_v32 = vpack.c.bf16 %v6504_v0, %v6503_v29 }
 0x173   : >> { %3274 = vmatmul.mubr.msk.f32.gmra.mrb[22].mxu0 %vm840_vm4, %v6471_v35  ;;  %1038 = vmatmul.mubr.f32.gmra.mrb[28].mxu1 %v6472_v36 }
 0x174   : >> { %1347 = vmatprep.mubr.f32.mxu0 %v4410_v57  ;;  %1043 = vmatprep.mubr.f32.mxu1 %v6473_v37 }
 0x177   : >> { %3275 = vmatmul.mubr.msk.f32.gmra.mrb[24].mxu0 %vm840_vm4, %v6474_v38  ;;  %1044 = vmatmul.mubr.f32.gmra.mrb[30].mxu1 %v6475_v41 }
 0x178   : >> { %1353 = vmatprep.mubr.f32.mxu0 %v4410_v57 }
 0x17b   : >> { %3276 = vmatmul.mubr.msk.f32.gmra.mrb[26].mxu0 %vm840_vm4, %v6476_v42 }
 0x17c   : >> { %1359 = vmatprep.mubr.f32.mxu0 %v4410_v57 }
 0x17f   : >> { %3277 = vmatmul.mubr.msk.f32.gmra.mrb[28].mxu0 %vm840_vm4, %v6477_v43 }
 0x180   : >> { %1365 = vmatprep.mubr.f32.mxu0 %v4410_v57  ;;  %v6484_v57 = vld [vmem:[#allocation7_spill] sm:$0xff] }
 0x181   : >> { %v5486_v62 = vpack.c.bf16 %v6484_v57, %v6483_v61 }
 0x183   : >> { %3278 = vmatmul.mubr.msk.f32.gmra.mrb[30].mxu0 %vm840_vm4, %v6478_v46  ;;  %3491 = vmatpush1.bf16.msra.mxu1 %v5486_v62 }
 0x184   : >> { %3492 = vmatprep.subr.bf16.mxu1 %v4411_v52 }
 0x187   : >> { %3494 = vmatpush1.bf16.msra.mxu1 %v5491_v2 }
 0x188   : >> { %3495 = vmatprep.subr.bf16.mxu1 %v4411_v52 }
 0x18b   : >> { %3497 = vmatpush1.bf16.msra.mxu1 %v5496_v14 }
 0x18c   : >> { %3498 = vmatprep.subr.bf16.mxu1 %v4411_v52 }
 0x18f   : >> { %3500 = vmatpush1.bf16.msra.mxu1 %v5501_v12 }
 0x190   : >> { %3501 = vmatprep.subr.bf16.mxu1 %v4411_v52 }
 0x193   : >> { %3503 = vmatpush1.bf16.msra.mxu1 %v5506_v17 }
 0x194   : >> { %3504 = vmatprep.subr.bf16.mxu1 %v4411_v52 }
 0x197   : >> { %3506 = vmatpush1.bf16.msra.mxu1 %v5511_v9 }
 0x198   : >> { %3507 = vmatprep.subr.bf16.mxu1 %v4411_v52 }
 0x19b   : >> { %3509 = vmatpush1.bf16.msra.mxu1 %v5516_v19 }
 0x19c   : >> { %3510 = vmatprep.subr.bf16.mxu1 %v4411_v52 }
 0x19f   : >> { %3512 = vmatpush1.bf16.msra.mxu1 %v5521_v10 }
 0x1a0   : >> { %3513 = vmatprep.subr.bf16.mxu1 %v4411_v52 }
 0x1a3   : >> { %3515 = vmatpush1.bf16.msra.mxu1 %v5526_v24 }
 0x1a4   : >> { %3516 = vmatprep.subr.bf16.mxu1 %v4411_v52 }
 0x1a7   : >> { %3518 = vmatpush1.bf16.msra.mxu1 %v5531_v28 }
 0x1a8   : >> { %3519 = vmatprep.subr.bf16.mxu1 %v4411_v52 }
 0x1ab   : >> { %3521 = vmatpush1.bf16.msra.mxu1 %v5536_v32 }
 0x1ac   : >> { %3522 = vmatprep.subr.bf16.mxu1 %v4411_v52 }
 0x20e   : >> { %v955_v33 = vpop.f32.mrb[0].mxu1 }
 0x20f   : >> { %v957_v35 = vpop.f32.mrb[1].mxu1 }
 0x212   : >> { %v961_v36 = vpop.f32.mrb[2].mxu1 }
 0x213   : >> { %v963_v37 = vpop.f32.mrb[3].mxu1 }
 0x216   : >> { %v967_v38 = vpop.f32.mrb[4].mxu1 }
 0x217   : >> { %v969_v41 = vpop.f32.mrb[5].mxu1 }
 0x21a   : >> { %v1277_v42 = vpop.f32.mrb[0].mxu0  ;;  %v973_v43 = vpop.f32.mrb[6].mxu1 }
 0x21b   : >> { %v3689_v46 = vadd.f32 %v1277_v42, %v955_v33  ;;  %v1279_v47 = vpop.f32.mrb[1].mxu0  ;;  %v975_v48 = vpop.f32.mrb[7].mxu1  ;;  %v6505_v42 = vld [vmem:[#allocation28_spill] sm:$0xff] }
 0x21c   : >> { %v3690_v53 = vadd.f32 %v1279_v47, %v957_v35 }
 0x21e   : >> { %v1283_v56 = vpop.f32.mrb[2].mxu0  ;;  %v979_v61 = vpop.f32.mrb[8].mxu1 }
 0x21f   : >> { %v3691_v57 = vadd.f32 %v1283_v56, %v961_v36  ;;  %v1285_v63 = vpop.f32.mrb[3].mxu0  ;;  %v981_v11 = vpop.f32.mrb[9].mxu1 }
 0x220   : >> { %v3692_v8 = vadd.f32 %v1285_v63, %v963_v37 }
 0x222   : >> { %v1289_v3 = vpop.f32.mrb[4].mxu0  ;;  %v985_v4 = vpop.f32.mrb[10].mxu1 }
 0x223   : >> { %v5539_v5 = vadd.f32 %v1289_v3, %v967_v38  ;;  %v1291_v52 = vpop.f32.mrb[5].mxu0  ;;  %v987_v15 = vpop.f32.mrb[11].mxu1 }
 0x224   : >> { %v5541_v16 = vadd.f32 %v1291_v52, %v969_v41 }
 0x226   : >> { %v1295_v20 = vpop.f32.mrb[6].mxu0  ;;  %v991_v7 = vpop.f32.mrb[12].mxu1 }
 0x227   : >> { %v5543_v13 = vadd.f32 %v1295_v20, %v973_v43  ;;  %v1297_v18 = vpop.f32.mrb[7].mxu0  ;;  %v993_v21 = vpop.f32.mrb[13].mxu1  ;;  %v6506_v43 = vld [vmem:[#allocation29_spill] sm:$0xff] }
 0x228   : >> { %v5545_v22 = vadd.f32 %v1297_v18, %v975_v48  ;;  %v5557_v47 = vpack.c.bf16 %v6506_v43, %v6505_v42 }
 0x22a   : >> { %v1301_v23 = vpop.f32.mrb[8].mxu0  ;;  %v997_v6 = vpop.f32.mrb[14].mxu1  ;;  %3525 = vmatpush1.bf16.msk.msra.mxu1 %vm5559_vm7, %v5557_v47 }
 0x22b   : >> { %v5547_v27 = vadd.f32 %v1301_v23, %v979_v61  ;;  %v1303_v1 = vpop.f32.mrb[9].mxu0  ;;  %v999_v29 = vpop.f32.mrb[15].mxu1 }
 0x22c   : >> { %v5549_v0 = vadd.f32 %v1303_v1, %v981_v11 }
 0x22e   : >> { %v1307_v33 = vpop.f32.mrb[10].mxu0  ;;  %v1003_v35 = vpop.f32.mrb[16].mxu1 }
 0x22f   : >> { %v5551_v36 = vadd.f32 %v1307_v33, %v985_v4  ;;  %v1309_v37 = vpop.f32.mrb[11].mxu0  ;;  %v1005_v38 = vpop.f32.mrb[17].mxu1 }
 0x230   : >> { %v5553_v41 = vadd.f32 %v1309_v37, %v987_v15 }
 0x232   : >> { %v1313_v48 = vpop.f32.mrb[12].mxu0  ;;  %v1009_v56 = vpop.f32.mrb[18].mxu1 }
 0x233   : >> { %v5563_v63 = vadd.f32 %v1313_v48, %v991_v7  ;;  %v1315_v11 = vpop.f32.mrb[13].mxu0  ;;  %v1011_v3 = vpop.f32.mrb[19].mxu1 }
 0x234   : >> { %v5568_v4 = vadd.f32 %v1315_v11, %v993_v21 }
 0x236   : >> { %v1319_v52 = vpop.f32.mrb[14].mxu0  ;;  %v1015_v15 = vpop.f32.mrb[20].mxu1 }
 0x237   : >> { %v5570_v20 = vadd.f32 %v1319_v52, %v997_v6  ;;  %v1321_v18 = vpop.f32.mrb[15].mxu0  ;;  %v1017_v23 = vpop.f32.mrb[21].mxu1 }
 0x238   : >> { %v5572_v1 = vadd.f32 %v1321_v18, %v999_v29 }
 0x23a   : >> { %v1325_v33 = vpop.f32.mrb[16].mxu0  ;;  %v1021_v37 = vpop.f32.mrb[22].mxu1 }
 0x23b   : >> { %v3705_v7 = vadd.f32 %v1325_v33, %v1003_v35  ;;  %v1327_v42 = vpop.f32.mrb[17].mxu0  ;;  %v1023_v43 = vpop.f32.mrb[23].mxu1 }
 0x23c   : >> { %v3706_v48 = vadd.f32 %v1327_v42, %v1005_v38 }
 0x23d   : >> { %v5574_v25 = vmax.f32 %v3689_v46, %v3705_v7 }
 0x23e   : >> { %v5576_v26 = vmax.f32 %v3690_v53, %v3706_v48  ;;  %v1331_v21 = vpop.f32.mrb[18].mxu0  ;;  %v1027_v11 = vpop.f32.mrb[24].mxu1 }
 0x23f   : >> { %v3707_v30 = vadd.f32 %v1331_v21, %v1009_v56  ;;  %v1333_v31 = vpop.f32.mrb[19].mxu0  ;;  %1404 = vrot.lane.b32.xlu1 %v5574_v25, %s4409_s19  ;;  %v1029_v6 = vpop.f32.mrb[25].mxu1 }
 0x240   : >> { %v3708_v29 = vadd.f32 %v1333_v31, %v1011_v3  ;;  %1406 = vrot.lane.b32.xlu0 %v5576_v26, %s4409_s19 }
 0x241   : >> { %v5582_v35 = vmax.f32 %v3691_v57, %v3707_v30 }
 0x242   : >> { %v5584_v52 = vmax.f32 %v3692_v8, %v3708_v29  ;;  %v1337_v46 = vpop.f32.mrb[20].mxu0  ;;  %v1033_v38 = vpop.f32.mrb[26].mxu1 }
 0x243   : >> { %v3709_v53 = vadd.f32 %v1337_v46, %v1015_v15  ;;  %v1339_v18 = vpop.f32.mrb[21].mxu0  ;;  %1408 = vrot.lane.b32.xlu1 %v5582_v35, %s4409_s19  ;;  %v1035_v56 = vpop.f32.mrb[27].mxu1 }
 0x244   : >> { %v3710_v33 = vadd.f32 %v1339_v18, %v1017_v23  ;;  %1410 = vrot.lane.b32.xlu0 %v5584_v52, %s4409_s19 }
 0x245   : >> { %v5591_v31 = vmax.f32 %v5539_v5, %v3709_v53 }
 0x246   : >> { %v5594_v30 = vmax.f32 %v5541_v16, %v3710_v33  ;;  %v1343_v57 = vpop.f32.mrb[22].mxu0  ;;  %v1039_v8 = vpop.f32.mrb[28].mxu1 }
 0x247   : >> { %v3711_v3 = vadd.f32 %v1343_v57, %v1021_v37  ;;  %v1345_v7 = vpop.f32.mrb[23].mxu0  ;;  %1412 = vrot.lane.b32.xlu1 %v5591_v31, %s4409_s19  ;;  %v1041_v15 = vpop.f32.mrb[29].mxu1 }
 0x248   : >> { %v3712_v42 = vadd.f32 %v1345_v7, %v1023_v43  ;;  %1414 = vrot.lane.b32.xlu0 %v5594_v30, %s4409_s19 }
 0x249   : >> { %v5601_v23 = vmax.f32 %v5543_v13, %v3711_v3 }
 0x24a   : >> { %v5604_v5 = vmax.f32 %v5545_v22, %v3712_v42  ;;  %v1349_v16 = vpop.f32.mrb[24].mxu0  ;;  %v1045_v48 = vpop.f32.mrb[30].mxu1 }
 0x24b   : >> { %v3713_v21 = vadd.f32 %v1349_v16, %v1027_v11  ;;  %v1351_v29 = vpop.f32.mrb[25].mxu0  ;;  %1416 = vrot.lane.b32.xlu1 %v5601_v23, %s4409_s19  ;;  %v1047_v37 = vpop.f32.mrb[31].mxu1 }
 0x24c   : >> { %v3714_v46 = vadd.f32 %v1351_v29, %v1029_v6  ;;  %1418 = vrot.lane.b32.xlu0 %v5604_v5, %s4409_s19 }
 0x24d   : >> { %v5611_v43 = vmax.f32 %v5547_v27, %v3713_v21 }
 0x24e   : >> { %v1381_v13 = vmax.f32 %v5549_v0, %v3714_v46  ;;  %v1355_v53 = vpop.f32.mrb[26].mxu0 }
 0x24f   : >> { %v3715_v22 = vadd.f32 %v1355_v53, %v1033_v38  ;;  %v1357_v18 = vpop.f32.mrb[27].mxu0  ;;  %1420 = vrot.lane.b32.xlu1 %v5611_v43, %s4409_s19 }
 0x250   : >> { %v3716_v11 = vadd.f32 %v1357_v18, %v1035_v56  ;;  %1422 = vrot.lane.b32.xlu0 %v1381_v13, %s4409_s19 }
 0x251   : >> { %v5618_v33 = vmax.f32 %v5551_v36, %v3715_v22 }
 0x252   : >> { %v1383_v6 = vmax.f32 %v5553_v41, %v3716_v11  ;;  %v1361_v57 = vpop.f32.mrb[28].mxu0 }
 0x253   : >> { %v3717_v3 = vadd.f32 %v1361_v57, %v1039_v8  ;;  %v1363_v27 = vpop.f32.mrb[29].mxu0  ;;  %1424 = vrot.lane.b32.xlu1 %v5618_v33, %s4409_s19 }
 0x254   : >> { %v3718_v0 = vadd.f32 %v1363_v27, %v1041_v15  ;;  %1426 = vrot.lane.b32.xlu0 %v1383_v6, %s4409_s19 }
 0x255   : >> { %v1384_v38 = vmax.f32 %v5563_v63, %v3717_v3 }
 0x256   : >> { %v1385_v56 = vmax.f32 %v5568_v4, %v3718_v0  ;;  %v1367_v7 = vpop.f32.mrb[30].mxu0 }
 0x257   : >> { %v3719_v42 = vadd.f32 %v1367_v7, %v1045_v48  ;;  %v1369_v16 = vpop.f32.mrb[31].mxu0  ;;  %1428 = vrot.lane.b32.xlu1 %v1384_v38, %s4409_s19 }
 0x258   : >> { %v3720_v36 = vadd.f32 %v1369_v16, %v1047_v37  ;;  %1430 = vrot.lane.b32.xlu0 %v1385_v56, %s4409_s19 }
 0x259   : >> { %v1386_v41 = vmax.f32 %v5570_v20, %v3719_v42 }
 0x25a   : >> { %v1387_v8 = vmax.f32 %v5572_v1, %v3720_v36 }
 0x25b   : >> { %1432 = vrot.lane.b32.xlu1 %v1386_v41, %s4409_s19 }
 0x25c   : >> { %1434 = vrot.lane.b32.xlu0 %v1387_v8, %s4409_s19 }
 0x2b1   : >> { %v1405_v15 = vpop.permute.xlu1 %1404 }
 0x2b2   : >> { %v1407_v63 = vpop.permute.xlu0 %1406 }
 0x2b3   : >> { %v1436_v4 = vsel %vm476_vm3, %v1405_v15, %v1407_v63  ;;  %v1461_v48 = vmax.f32 %v5576_v26, %v1407_v63 }
 0x2b4   : >> { %v1460_v21 = vmax.f32 %v5574_v25, %v1436_v4 }
 0x2b5   : >> { %3280 = vmatprep.mubr.msk.f32.mxu1 %vm1476_vm8, %v1461_v48  ;;  %v1409_v29 = vpop.permute.xlu1 %1408 }
 0x2b6   : >> { %1570 = vmatmul.mubr.f32.vlgmr.msra.gmra.mrb[32].mxu1 %v1460_v21  ;;  %v1411_v20 = vpop.permute.xlu0 %1410 }
 0x2b7   : >> { %v1437_v1 = vsel %vm476_vm3, %v1409_v29, %v1411_v20  ;;  %v1463_v37 = vmax.f32 %v5584_v52, %v1411_v20  ;;  %v1614_v20 = vlaneseq }
 0x2b8   : >> { %v1462_v46 = vmax.f32 %v5582_v35, %v1437_v1 }
 0x2b9   : >> { %3281 = vmatprep.mubr.msk.f32.mxu1 %vm1476_vm8, %v1463_v37  ;;  %v1413_v53 = vpop.permute.xlu1 %1412  ;;  %v5658_v1 = vshrl.u32 %v1614_v20, 7  ;;  %v5692_v20 = vld [vmem:[%s4550_s12 + $0x520] sm:$0xff] (%p339_p4) }
 0x2ba   : >> { %1575 = vmatmul.mubr.f32.gmra.mrb[34].mxu1 %v1462_v46  ;;  %v1415_v22 = vpop.permute.xlu0 %1414 }
 0x2bb   : >> { %v1438_v26 = vsel %vm476_vm3, %v1413_v53, %v1415_v22  ;;  %v1465_v25 = vmax.f32 %v5594_v30, %v1415_v22 }
 0x2bc   : >> { %v1464_v18 = vmax.f32 %v5591_v31, %v1438_v26 }
 0x2bd   : >> { %3282 = vmatprep.mubr.msk.f32.mxu1 %vm1476_vm8, %v1465_v25  ;;  %v1417_v11 = vpop.permute.xlu1 %1416 }
 0x2be   : >> { %1580 = vmatmul.mubr.f32.gmra.mrb[36].mxu1 %v1464_v18  ;;  %v1419_v57 = vpop.permute.xlu0 %1418  ;;  %v6510_v18 = vld [vmem:[#allocation31_spill] sm:$0xff] }
 0x2bf   : >> { %v1439_v52 = vsel %vm476_vm3, %v1417_v11, %v1419_v57  ;;  %v1467_v35 = vmax.f32 %v5604_v5, %v1419_v57 }
 0x2c0   : >> { %v1466_v3 = vmax.f32 %v5601_v23, %v1439_v52 }
 0x2c1   : >> { %3283 = vmatprep.mubr.msk.f32.mxu1 %vm1476_vm8, %v1467_v35  ;;  %v1421_v27 = vpop.permute.xlu1 %1420 }
 0x2c2   : >> { %1585 = vmatmul.mubr.f32.gmra.mrb[38].mxu1 %v1466_v3  ;;  %v1423_v0 = vpop.permute.xlu0 %1422 }
 0x2c3   : >> { %v1440_v30 = vsel %vm476_vm3, %v1421_v27, %v1423_v0  ;;  %v1469_v7 = vmax.f32 %v1381_v13, %v1423_v0 }
 0x2c4   : >> { %v1468_v31 = vmax.f32 %v5611_v43, %v1440_v30 }
 0x2c5   : >> { %3284 = vmatprep.mubr.msk.f32.mxu1 %vm1476_vm8, %v1469_v7  ;;  %v1425_v42 = vpop.permute.xlu1 %1424  ;;  %v6511_v7 = vld [vmem:[#allocation32_spill] sm:$0xff] }
 0x2c6   : >> { %1590 = vmatmul.mubr.f32.gmra.mrb[40].mxu1 %v1468_v31  ;;  %v1427_v16 = vpop.permute.xlu0 %1426 }
 0x2c7   : >> { %v1441_v36 = vsel %vm476_vm3, %v1425_v42, %v1427_v16  ;;  %v1471_v5 = vmax.f32 %v1383_v6, %v1427_v16 }
 0x2c8   : >> { %v1470_v23 = vmax.f32 %v5618_v33, %v1441_v36 }
 0x2c9   : >> { %3285 = vmatprep.mubr.msk.f32.mxu1 %vm1476_vm8, %v1471_v5  ;;  %v1429_v15 = vpop.permute.xlu1 %1428 }
 0x2ca   : >> { %1595 = vmatmul.mubr.f32.gmra.mrb[42].mxu1 %v1470_v23  ;;  %v1431_v63 = vpop.permute.xlu0 %1430 }
 0x2cb   : >> { %v1442_v13 = vsel %vm476_vm3, %v1429_v15, %v1431_v63  ;;  %v1473_v4 = vmax.f32 %v1385_v56, %v1431_v63  ;;  %v6509_v56 = vld [vmem:[#allocation30_spill] sm:$0xff] }
 0x2cc   : >> { %v1472_v43 = vmax.f32 %v1384_v38, %v1442_v13  ;;  %v6512_v13 = vld [vmem:[#allocation33_spill] sm:$0xff] }
 0x2cd   : >> { %3286 = vmatprep.mubr.msk.f32.mxu1 %vm1476_vm8, %v1473_v4  ;;  %v1433_v48 = vpop.permute.xlu1 %1432 }
 0x2ce   : >> { %1600 = vmatmul.mubr.f32.gmra.mrb[44].mxu1 %v1472_v43  ;;  %v1435_v21 = vpop.permute.xlu0 %1434 }
 0x2cf   : >> { %v1443_v6 = vsel %vm476_vm3, %v1433_v48, %v1435_v21  ;;  %v1475_v29 = vmax.f32 %v1387_v8, %v1435_v21 }
 0x2d0   : >> { %v1474_v33 = vmax.f32 %v1386_v41, %v1443_v6 }
 0x2d1   : >> { %3287 = vmatprep.mubr.msk.f32.mxu1 %vm1476_vm8, %v1475_v29 }
 0x2d2   : >> { %1605 = vmatmul.mubr.f32.gmra.mrb[46].mxu1 %v1474_v33 }
 0x389   : >> { %v1571_v37 = vpop.f32.mrb[32].mxu1 }
 0x38a   : >> { %v1634_v38 = vadd.f32 %v6509_v56, %v1571_v37  ;;  %v1573_v46 = vpop.f32.mrb[33].mxu1  ;;  %v5695_v37 = vld [vmem:[%s4550_s12 + $0x528] sm:$0xff] (%p339_p4) }
 0x38b   : > { %v5702_v34 = vpack.i.bf16 (%p339_p4), %v5695_v37, %v5692_v20  ;;  %v1717_v46 = vld [vmem:[%s4550_s12 + $0x188] sm:$0xff] (%p339_p4) }
 0x38c   : >> { %v1642_v53 = vmax.f32 %v1634_v38, 0.0  ;;  %v1716_v38 = vld [vmem:[%s4550_s12 + $0x180] sm:$0xff] (%p339_p4) }
 0x38d   : >> { %v1576_v8 = vpop.f32.mrb[34].mxu1  ;;  %4146 = vrot.lane.b32.xlu1 (%p339_p4), %v5702_v34, %s4413_s15 }
 0x38e   : >> { %1652 = vst.msk [vmem:[%s5663_s14] sm:$0xff] %vm1651_vm9, %v1642_v53  ;;  %v1635_v41 = vadd.f32 %v6509_v56, %v1576_v8  ;;  %v1578_v22 = vpop.f32.mrb[35].mxu1  ;;  %v5698_v56 = vld [vmem:[%s4550_s12 + $0x500] sm:$0xff] (%p339_p4)  ;;  %v5738_v53 = vpack.i.bf16 (%p339_p4), %v1719_v60, %v1718_v59  ;;  %v5742_v8 = vpack.i.bf16 (%p339_p4), %v1717_v46, %v1716_v38 }
 0x38f   : > { %v5715_v45 = vpack.i.bf16 (%p339_p4), %v5705_v39, %v5698_v56  ;;  %v1723_v22 = vld [vmem:[%s4550_s12 + $0x1b8] sm:$0xff] (%p339_p4) }
 0x390   : >> { %v1643_v26 = vmax.f32 %v1635_v41, 0.0  ;;  %v1722_v41 = vld [vmem:[%s4550_s12 + $0x1b0] sm:$0xff] (%p339_p4) }
 0x391   : >> { %v1581_v25 = vpop.f32.mrb[36].mxu1  ;;  %4136 = vrot.lane.b32.xlu0 (%p339_p4), %v5715_v45, %s4413_s15  ;;  %4151 = vrot.lane.b32.xlu1 (%p339_p4), %v5725_v54, %s4413_s15 }
 0x392   : >> { %1653 = vst.msk [vmem:[%s5663_s14 + $0x8] sm:$0xff] %vm1651_vm9, %v1643_v26  ;;  %v1636_v11 = vadd.f32 %v6510_v18, %v1581_v25  ;;  %v1583_v57 = vpop.f32.mrb[37].mxu1  ;;  %v1720_v26 = vld [vmem:[%s4550_s12 + $0x1a0] sm:$0xff] (%p339_p4)  ;;  %v1721_v25 = vld [vmem:[%s4550_s12 + $0x1a8] sm:$0xff] (%p339_p4) }
 0x393   : > { %v3293_v57 = vld [vmem:[%s4550_s12 + $0x368] sm:$0xff] (%p339_p4) }
 0x394   : >> { %v1644_v52 = vmax.f32 %v1636_v11, 0.0  ;;  %v3292_v11 = vld [vmem:[%s4550_s12 + $0x360] sm:$0xff] (%p339_p4) }
 0x395   : >> { %v1586_v35 = vpop.f32.mrb[38].mxu1  ;;  %4141 = vrot.lane.b32.xlu0 (%p339_p4), %v5730_v55, %s4413_s15  ;;  %4161 = vrot.lane.b32.xlu1 (%p339_p4), %v5738_v53, %s4414_s16 }
 0x396   : >> { %1654 = vst.msk [vmem:[%s5663_s14 + $0x70] sm:$0xff] %vm1651_vm9, %v1644_v52  ;;  %v1637_v3 = vadd.f32 %v6510_v18, %v1586_v35  ;;  %v1588_v27 = vpop.f32.mrb[39].mxu1  ;;  %v5750_v18 = vpack.i.bf16 (%p339_p4), %v1723_v22, %v1722_v41  ;;  %v5756_v52 = vpack.i.bf16 (%p339_p4), %v1721_v25, %v1720_v26  ;;  %v5758_v35 = vpack.i.bf16 (%p339_p4), %v3293_v57, %v3292_v11 }
 0x397   : > { %v3528_v27 = vpack.c.bf16 (%p339_p4), %v1718_v59, %v1716_v38 }
 0x398   : >> { %v1645_v0 = vmax.f32 %v1637_v3, 0.0  ;;  %v3526_v3 = vpack.c.bf16 (%p339_p4), %v1719_v60, %v1717_v46 }
 0x399   : >> { %v1591_v30 = vpop.f32.mrb[40].mxu1  ;;  %4156 = vrot.lane.b32.xlu0 (%p339_p4), %v5742_v8, %s4414_s16  ;;  %4171 = vrot.lane.b32.xlu1 (%p339_p4), %v5750_v18, %s4414_s16 }
 0x39a   : >> { %1655 = vst.msk [vmem:[%s5663_s14 + $0x78] sm:$0xff] %vm1651_vm9, %v1645_v0  ;;  %v1638_v31 = vadd.f32 %v6511_v7, %v1591_v30  ;;  %v1593_v42 = vpop.f32.mrb[41].mxu1  ;;  %v3530_v0 = vpack.c.bf16 (%p339_p4), %v1723_v22, %v1721_v25  ;;  %3527 = vmatprep.subr.bf16.mxu0 (%p339_p4), %v3526_v3  ;;  %v3290_v30 = vld [vmem:[%s4550_s12 + $0x350] sm:$0xff] (%p339_p4) }
 0x39b   : > { %3529 = vmatpush1.bf16.msra.mxu0 (%p339_p4), %v3528_v27  ;;  %v3532_v42 = vpack.c.bf16 (%p339_p4), %v1722_v41, %v1720_v26 }
 0x39c   : >> { %v1646_v16 = vmax.f32 %v1638_v31, 0.0  ;;  %v3289_v31 = vld [vmem:[%s4550_s12 + $0x348] sm:$0xff] (%p339_p4)  ;;  %3531 = vmatprep.subr.bf16.mxu0 (%p339_p4), %v3530_v0 }
 0x39d   : >> { %v1596_v36 = vpop.f32.mrb[42].mxu1  ;;  %4166 = vrot.lane.b32.xlu0 (%p339_p4), %v5756_v52, %s4414_s16  ;;  %4181 = vrot.lane.b32.xlu1 (%p339_p4), %v5738_v53, %s4415_s17 }
 0x39e   : >> { %1656 = vst.msk [vmem:[%s5663_s14 + $0xe0] sm:$0xff] %vm1651_vm9, %v1646_v16  ;;  %v1639_v5 = vadd.f32 %v6511_v7, %v1596_v36  ;;  %v1598_v23 = vpop.f32.mrb[43].mxu1  ;;  %v3291_v7 = vld [vmem:[%s4550_s12 + $0x358] sm:$0xff] (%p339_p4)  ;;  %v3288_v16 = vld [vmem:[%s4550_s12 + $0x340] sm:$0xff] (%p339_p4) }
 0x39f   : > { %v3534_v36 = vpack.c.bf16 (%p339_p4), %v3291_v7, %v3289_v31  ;;  %v4185_v23 = vpack.i.bf16 (%p339_p4), %v3289_v31, %v3288_v16  ;;  %3533 = vmatpush1.bf16.msra.mxu0 (%p339_p4), %v3532_v42 }
 0x3a0   : >> { %v1647_v15 = vmax.f32 %v1639_v5, 0.0  ;;  %v4190_v5 = vpack.i.bf16 (%p339_p4), %v3291_v7, %v3290_v30 }
 0x3a1   : >> { %v1601_v63 = vpop.f32.mrb[44].mxu1  ;;  %4176 = vrot.lane.b32.xlu0 (%p339_p4), %v5742_v8, %s4415_s17  ;;  %3535 = vmatprep.subr.bf16.mxu0 (%p339_p4), %v3534_v36 }
 0x3a2   : >> { %1657 = vst.msk [vmem:[%s5663_s14 + $0xe8] sm:$0xff] %vm1651_vm9, %v1647_v15  ;;  %v1640_v4 = vadd.f32 %v6512_v13, %v1601_v63  ;;  %v1603_v43 = vpop.f32.mrb[45].mxu1  ;;  %v3295_v15 = vld [vmem:[%s4550_s12 + $0x378] sm:$0xff] (%p339_p4)  ;;  %v3536_v63 = vpack.c.bf16 (%p339_p4), %v3290_v30, %v3288_v16  ;;  %4191 = vrot.lane.b32.xlu1 (%p339_p4), %v4190_v5, %s4414_s16 }
 0x3a4   : >> { %v1648_v48 = vmax.f32 %v1640_v4, 0.0  ;;  %341 = sbr.rel (!%p339_p4) target bundleno = 68 (0x44), region = 83  ;;  %v3294_v4 = vld [vmem:[%s4550_s12 + $0x370] sm:$0xff] (%p339_p4)  ;;  %3537 = vmatpush1.bf16.msra.mxu0 (%p339_p4), %v3536_v63  ;;  %s4416_s12 = smov (%p339_p4), 124  }
 0x3a5   : >> { %v1606_v21 = vpop.f32.mrb[46].mxu1  ;;  %4186 = vrot.lane.b32.xlu0 (%p339_p4), %v4185_v23, %s4414_s16  ;;  %v3540_v43 = vpack.c.bf16 (%p339_p4), %v3294_v4, %v3292_v11 }
 0x3a6   : >> { %1658 = vst.msk [vmem:[%s5663_s14 + $0x150] sm:$0xff] %vm1651_vm9, %v1648_v48  ;;  %v1641_v6 = vadd.f32 %v6512_v13, %v1606_v21  ;;  %v1608_v29 = vpop.f32.mrb[47].mxu1  ;;  %v3538_v13 = vpack.c.bf16 (%p339_p4), %v3295_v15, %v3293_v57  ;;  %v3542_v48 = vpack.c.bf16 (%p339_p4), %v3299_v50, %v5705_v39  ;;  %4201 = vrot.lane.b32.xlu1 (%p339_p4), %v5750_v18, %s4415_s17 }
 0x3a7   : > { %v4210_v21 = vpack.i.bf16 (%p339_p4), %v3295_v15, %v3294_v4  ;;  %v3546_v29 = vpack.c.bf16 (%p339_p4), %v5711_v44, %v5695_v37  ;;  %v1663_v37 = vld [vmem:[%s6297_s2 + $0x18] sm:$0xff] (%p339_p4) }
 0x3a8   : >> { %v1649_v33 = vmax.f32 %v1641_v6, 0.0  ;;  %3539 = vmatprep.subr.bf16.mxu0 (%p339_p4), %v3538_v13  ;;  %v3544_v6 = vpack.c.bf16 (%p339_p4), %v5718_v49, %v5698_v56  ;;  %3304 = vmatprep.mubr.msk.f32.mxu1 (%p339_p4), %vm2106_vm10, %v1663_v37 }
 0x3a9   : > { %4196 = vrot.lane.b32.xlu0 (%p339_p4), %v5756_v52, %s4415_s17  ;;  %3541 = vmatpush1.bf16.msra.mxu0 (%p339_p4), %v3540_v43 }
 0x3aa   : >> { %1659 = vst.msk [vmem:[%s5663_s14 + $0x158] sm:$0xff] %vm1651_vm9, %v1649_v33  ;;  %3543 = vmatprep.subr.bf16.mxu0 (%p339_p4), %v3542_v48  ;;  %4211 = vrot.lane.b32.xlu1 (%p339_p4), %v4210_v21, %s4414_s16  ;;  %v3548_v33 = vpack.c.bf16 (%p339_p4), %v5708_v40, %v5692_v20  ;;  %v1661_v20 = vld [vmem:[%s6297_s2 + $0x8] sm:$0xff] (%p339_p4) }
 0x3ab   : > { %2213 = vmatprep.mubr.f32.mxu0 %v1661_v20 }
 0x3ad   : > { %4206 = vrot.lane.b32.xlu0 %v5758_v35, %s4414_s16  ;;  %3545 = vmatpush1.bf16.msra.mxu0 %v3544_v6 }
 0x3ae   : > { %3547 = vmatprep.subr.bf16.mxu0 %v3546_v29  ;;  %4221 = vrot.lane.b32.xlu1 %v4190_v5, %s4415_s17 }
 0x3b1   : > { %4216 = vrot.lane.b32.xlu0 %v4185_v23, %s4415_s17  ;;  %3549 = vmatpush1.bf16.msra.mxu0 %v3548_v33 }
 0x3b2   : > { %4231 = vrot.lane.b32.xlu1 %v5730_v55, %s4414_s16 }
 0x3b5   : > { %4226 = vrot.lane.b32.xlu0 %v5715_v45, %s4414_s16 }
 0x3b6   : > { %4241 = vrot.lane.b32.xlu1 %v4210_v21, %s4415_s17 }
 0x3b9   : > { %4236 = vrot.lane.b32.xlu0 %v5758_v35, %s4415_s17 }
 0x3ba   : > { %4251 = vrot.lane.b32.xlu1 %v5725_v54, %s4414_s16 }
 0x3bd   : > { %4246 = vrot.lane.b32.xlu0 %v5702_v34, %s4414_s16 }
 0x3be   : > { %4261 = vrot.lane.b32.xlu1 %v5730_v55, %s4415_s17 }
 0x3c1   : > { %4256 = vrot.lane.b32.xlu0 %v5715_v45, %s4415_s17 }
 0x3c2   : > { %4271 = vrot.lane.b32.xlu1 %v5738_v53, %s4416_s12 }
 0x3c5   : > { %4266 = vrot.lane.b32.xlu0 %v5742_v8, %s4416_s12 }
 0x3c6   : > { %4281 = vrot.lane.b32.xlu1 %v5725_v54, %s4415_s17 }
 0x3c9   : > { %4276 = vrot.lane.b32.xlu0 %v5702_v34, %s4415_s17 }
 0x3ca   : > { %4291 = vrot.lane.b32.xlu1 %v5750_v18, %s4416_s12 }
 0x3cd   : > { %4286 = vrot.lane.b32.xlu0 %v5756_v52, %s4416_s12 }
 0x3ce   : > { %4301 = vrot.lane.b32.xlu1 %v5738_v53, %s4413_s15 }
 0x3d1   : > { %4296 = vrot.lane.b32.xlu0 %v5742_v8, %s4413_s15 }
 0x3d2   : > { %4311 = vrot.lane.b32.xlu1 %v4190_v5, %s4416_s12 }
 0x3d5   : > { %4306 = vrot.lane.b32.xlu0 %v4185_v23, %s4416_s12 }
 0x3d6   : > { %4321 = vrot.lane.b32.xlu1 %v5750_v18, %s4413_s15 }
 0x3d9   : > { %4316 = vrot.lane.b32.xlu0 %v5756_v52, %s4413_s15 }
 0x3da   : > { %4331 = vrot.lane.b32.xlu1 %v4210_v21, %s4416_s12 }
 0x3dd   : > { %4326 = vrot.lane.b32.xlu0 %v5758_v35, %s4416_s12 }
 0x3de   : > { %4341 = vrot.lane.b32.xlu1 %v4190_v5, %s4413_s15 }
 0x3e1   : > { %4336 = vrot.lane.b32.xlu0 %v4185_v23, %s4413_s15 }
 0x3e2   : > { %4351 = vrot.lane.b32.xlu1 %v5730_v55, %s4416_s12 }
 0x3e5   : > { %4346 = vrot.lane.b32.xlu0 %v5715_v45, %s4416_s12 }
 0x3e6   : > { %4361 = vrot.lane.b32.xlu1 %v4210_v21, %s4413_s15 }
 0x3e9   : > { %4356 = vrot.lane.b32.xlu0 %v5758_v35, %s4413_s15 }
 0x3ea   : > { %4371 = vrot.lane.b32.xlu1 %v5725_v54, %s4416_s12 }
 0x3ed   : > { %4366 = vrot.lane.b32.xlu0 %v5702_v34, %s4416_s12 }
 0x3ff   : > { %v4147_v56 = vpop.permute.xlu1 %4146 }
 0x400   : > { %v4149_v38 = vunpack.i.h.bf16 %v4147_v56  ;;  %v4148_v46 = vunpack.i.l.bf16 %v4147_v56 }
 0x402   : > { %v1910_v35 = vsel %vm582_vm0, %v4148_v46, %v4149_v38 }
 0x403   : > { %v4137_v39 = vpop.permute.xlu0 %4136  ;;  %v4152_v45 = vpop.permute.xlu1 %4151 }
 0x404   : > { %v4139_v40 = vunpack.i.h.bf16 %v4137_v39  ;;  %v4138_v44 = vunpack.i.l.bf16 %v4137_v39  ;;  %v4154_v50 = vunpack.i.h.bf16 %v4152_v45  ;;  %v4153_v55 = vunpack.i.l.bf16 %v4152_v45 }
 0x406   : > { %v1908_v41 = vsel %vm582_vm0, %v4138_v44, %v4139_v40  ;;  %v1911_v18 = vsel %vm582_vm0, %v4153_v55, %v4154_v50  ;;  %v3594_v11 = vpack.c.bf16 %v4154_v50, %v4149_v38 }
 0x407   : > { %v4142_v49 = vpop.permute.xlu0 %4141  ;;  %v4162_v53 = vpop.permute.xlu1 %4161  ;;  %v3596_v31 = vpack.c.bf16 %v1911_v18, %v1910_v35 }
 0x408   : > { %v4144_v59 = vunpack.i.h.bf16 %v4142_v49  ;;  %v4143_v60 = vunpack.i.l.bf16 %v4142_v49  ;;  %v4164_v22 = vunpack.i.h.bf16 %v4162_v53  ;;  %v4163_v34 = vunpack.i.l.bf16 %v4162_v53 }
 0x40a   : > { %v3590_v8 = vpack.c.bf16 %v4144_v59, %v4139_v40  ;;  %v1909_v54 = vsel %vm582_vm0, %v4143_v60, %v4144_v59  ;;  %v1986_v27 = vsel %vm688_vm1, %v4163_v34, %v4164_v22 }
 0x40b   : > { %v4157_v26 = vpop.permute.xlu0 %4156  ;;  %v3592_v25 = vpack.c.bf16 %v1909_v54, %v1908_v41  ;;  %v4172_v3 = vpop.permute.xlu1 %4171 }
 0x40c   : > { %v4159_v57 = vunpack.i.h.bf16 %v4157_v26  ;;  %v4158_v52 = vunpack.i.l.bf16 %v4157_v26  ;;  %3591 = vmatprep.subr.bf16.mxu1 %v3590_v8  ;;  %v4174_v0 = vunpack.i.h.bf16 %v4172_v3  ;;  %v4173_v30 = vunpack.i.l.bf16 %v4172_v3 }
 0x40d   : > { %3593 = vmatpush1.bf16.msra.mxu1 %v3592_v25 }
 0x40e   : > { %3595 = vmatprep.subr.bf16.mxu1 %v3594_v11  ;;  %v3598_v42 = vpack.c.bf16 %v4164_v22, %v4159_v57  ;;  %v1985_v16 = vsel %vm688_vm1, %v4158_v52, %v4159_v57  ;;  %v1988_v15 = vsel %vm688_vm1, %v4173_v30, %v4174_v0 }
 0x40f   : > { %v4167_v7 = vpop.permute.xlu0 %4166  ;;  %v4182_v23 = vpop.permute.xlu1 %4181  ;;  %v3600_v43 = vpack.c.bf16 %v1986_v27, %v1985_v16 }
 0x410   : > { %v4169_v36 = vunpack.i.h.bf16 %v4167_v7  ;;  %v4168_v5 = vunpack.i.l.bf16 %v4167_v7  ;;  %v4184_v63 = vunpack.i.h.bf16 %v4182_v23  ;;  %v4183_v13 = vunpack.i.l.bf16 %v4182_v23 }
 0x411   : > { %3597 = vmatpush1.bf16.msra.mxu1 %v3596_v31 }
 0x412   : > { %3599 = vmatprep.subr.bf16.mxu1 %v3598_v42  ;;  %v3602_v48 = vpack.c.bf16 %v4174_v0, %v4169_v36  ;;  %v1987_v21 = vsel %vm688_vm1, %v4168_v5, %v4169_v36  ;;  %v1816_v33 = vsel %vm476_vm3, %v4183_v13, %v4184_v63 }
 0x413   : > { %v4177_v4 = vpop.permute.xlu0 %4176  ;;  %v3604_v49 = vpack.c.bf16 %v1988_v15, %v1987_v21 }
 0x414   : > { %v4179_v6 = vunpack.i.h.bf16 %v4177_v4  ;;  %v4178_v29 = vunpack.i.l.bf16 %v4177_v4  ;;  %v4192_v56 = vpop.permute.xlu1 %4191 }
 0x415   : > { %3601 = vmatpush1.bf16.msra.mxu1 %v3600_v43  ;;  %v4194_v39 = vunpack.i.h.bf16 %v4192_v56  ;;  %v4193_v40 = vunpack.i.l.bf16 %v4192_v56 }
 0x416   : > { %v3550_v20 = vpack.c.bf16 %v4184_v63, %v4179_v6  ;;  %v1815_v37 = vsel %vm476_vm3, %v4178_v29, %v4179_v6  ;;  %3603 = vmatprep.subr.bf16.mxu1 %v3602_v48 }
 0x417   : > { %v4187_v44 = vpop.permute.xlu0 %4186  ;;  %v3552_v45 = vpack.c.bf16 %v1816_v33, %v1815_v37  ;;  %v1990_v59 = vsel %vm688_vm1, %v4193_v40, %v4194_v39 }
 0x418   : > { %v4189_v50 = vunpack.i.h.bf16 %v4187_v44  ;;  %v4188_v55 = vunpack.i.l.bf16 %v4187_v44  ;;  %3551 = vmatprep.subr.bf16.mxu0 %v3550_v20  ;;  %v4202_v46 = vpop.permute.xlu1 %4201 }
 0x419   : > { %3553 = vmatpush1.bf16.msra.mxu0 %v3552_v45  ;;  %3605 = vmatpush1.bf16.msra.mxu1 %v3604_v49  ;;  %v4204_v53 = vunpack.i.h.bf16 %v4202_v46  ;;  %v4203_v8 = vunpack.i.l.bf16 %v4202_v46 }
 0x41a   : > { %v3606_v60 = vpack.c.bf16 %v4194_v39, %v4189_v50  ;;  %v1989_v38 = vsel %vm688_vm1, %v4188_v55, %v4189_v50 }
 0x41b   : > { %v4197_v41 = vpop.permute.xlu0 %4196  ;;  %v3608_v54 = vpack.c.bf16 %v1990_v59, %v1989_v38  ;;  %v1818_v26 = vsel %vm476_vm3, %v4203_v8, %v4204_v53 }
 0x41c   : > { %v4199_v22 = vunpack.i.h.bf16 %v4197_v41  ;;  %v4198_v34 = vunpack.i.l.bf16 %v4197_v41  ;;  %3607 = vmatprep.subr.bf16.mxu1 %v3606_v60  ;;  %v4212_v11 = vpop.permute.xlu1 %4211 }
 0x41d   : > { %3609 = vmatpush1.bf16.msra.mxu1 %v3608_v54  ;;  %v4214_v57 = vunpack.i.h.bf16 %v4212_v11  ;;  %v4213_v52 = vunpack.i.l.bf16 %v4212_v11 }
 0x41e   : > { %v3554_v25 = vpack.c.bf16 %v4204_v53, %v4199_v22  ;;  %v1817_v18 = vsel %vm476_vm3, %v4198_v34, %v4199_v22 }
 0x41f   : > { %v4207_v35 = vpop.permute.xlu0 %4206  ;;  %v3556_v3 = vpack.c.bf16 %v1818_v26, %v1817_v18  ;;  %v1992_v30 = vsel %vm688_vm1, %v4213_v52, %v4214_v57 }
 0x420   : > { %v4209_v27 = vunpack.i.h.bf16 %v4207_v35  ;;  %v4208_v0 = vunpack.i.l.bf16 %v4207_v35  ;;  %3555 = vmatprep.subr.bf16.mxu0 %v3554_v25  ;;  %v4222_v42 = vpop.permute.xlu1 %4221 }
 0x421   : > { %3557 = vmatpush1.bf16.msra.mxu0 %v3556_v3  ;;  %v4224_v16 = vunpack.i.h.bf16 %v4222_v42  ;;  %v4223_v36 = vunpack.i.l.bf16 %v4222_v42 }
 0x422   : > { %v3610_v7 = vpack.c.bf16 %v4214_v57, %v4209_v27  ;;  %v1991_v31 = vsel %vm688_vm1, %v4208_v0, %v4209_v27 }
 0x423   : > { %v4217_v5 = vpop.permute.xlu0 %4216  ;;  %v3612_v23 = vpack.c.bf16 %v1992_v30, %v1991_v31  ;;  %v1820_v13 = vsel %vm476_vm3, %v4223_v36, %v4224_v16 }
 0x424   : > { %v4219_v15 = vunpack.i.h.bf16 %v4217_v5  ;;  %v4218_v63 = vunpack.i.l.bf16 %v4217_v5  ;;  %3611 = vmatprep.subr.bf16.mxu1 %v3610_v7  ;;  %v4232_v48 = vpop.permute.xlu1 %4231 }
 0x425   : > { %3613 = vmatpush1.bf16.msra.mxu1 %v3612_v23  ;;  %v4234_v21 = vunpack.i.h.bf16 %v4232_v48  ;;  %v4233_v6 = vunpack.i.l.bf16 %v4232_v48 }
 0x426   : > { %v3558_v4 = vpack.c.bf16 %v4224_v16, %v4219_v15  ;;  %v1819_v43 = vsel %vm476_vm3, %v4218_v63, %v4219_v15 }
 0x427   : > { %v4227_v29 = vpop.permute.xlu0 %4226  ;;  %v3560_v33 = vpack.c.bf16 %v1820_v13, %v1819_v43  ;;  %v1994_v56 = vsel %vm688_vm1, %v4233_v6, %v4234_v21 }
 0x428   : > { %v4229_v20 = vunpack.i.h.bf16 %v4227_v29  ;;  %v4228_v37 = vunpack.i.l.bf16 %v4227_v29  ;;  %3559 = vmatprep.subr.bf16.mxu0 %v3558_v4  ;;  %v4242_v44 = vpop.permute.xlu1 %4241 }
 0x429   : > { %3561 = vmatpush1.bf16.msra.mxu0 %v3560_v33  ;;  %v4244_v45 = vunpack.i.h.bf16 %v4242_v44  ;;  %v4243_v49 = vunpack.i.l.bf16 %v4242_v44 }
 0x42a   : > { %v3614_v39 = vpack.c.bf16 %v4234_v21, %v4229_v20  ;;  %v1993_v40 = vsel %vm688_vm1, %v4228_v37, %v4229_v20 }
 0x42b   : > { %v4237_v50 = vpop.permute.xlu0 %4236  ;;  %v3616_v55 = vpack.c.bf16 %v1994_v56, %v1993_v40  ;;  %v1822_v38 = vsel %vm476_vm3, %v4243_v49, %v4244_v45 }
 0x42c   : > { %v4239_v59 = vunpack.i.h.bf16 %v4237_v50  ;;  %v4238_v60 = vunpack.i.l.bf16 %v4237_v50  ;;  %3615 = vmatprep.subr.bf16.mxu1 %v3614_v39  ;;  %v4252_v8 = vpop.permute.xlu1 %4251 }
 0x42d   : > { %3617 = vmatpush1.bf16.msra.mxu1 %v3616_v55  ;;  %v4254_v41 = vunpack.i.h.bf16 %v4252_v8  ;;  %v4253_v54 = vunpack.i.l.bf16 %v4252_v8 }
 0x42e   : > { %v3562_v46 = vpack.c.bf16 %v4244_v45, %v4239_v59  ;;  %v1821_v53 = vsel %vm476_vm3, %v4238_v60, %v4239_v59 }
 0x42f   : > { %v4247_v22 = vpop.permute.xlu0 %4246  ;;  %v3564_v34 = vpack.c.bf16 %v1822_v38, %v1821_v53  ;;  %v1996_v18 = vsel %vm688_vm1, %v4253_v54, %v4254_v41 }
 0x430   : > { %v4249_v26 = vunpack.i.h.bf16 %v4247_v22  ;;  %v4248_v25 = vunpack.i.l.bf16 %v4247_v22  ;;  %3563 = vmatprep.subr.bf16.mxu0 %v3562_v46  ;;  %v4262_v52 = vpop.permute.xlu1 %4261 }
 0x431   : > { %3565 = vmatpush1.bf16.msra.mxu0 %v3564_v34  ;;  %v4264_v35 = vunpack.i.h.bf16 %v4262_v52  ;;  %v4263_v3 = vunpack.i.l.bf16 %v4262_v52 }
 0x432   : > { %v3618_v11 = vpack.c.bf16 %v4254_v41, %v4249_v26  ;;  %v1995_v57 = vsel %vm688_vm1, %v4248_v25, %v4249_v26 }
 0x433   : > { %v4257_v27 = vpop.permute.xlu0 %4256  ;;  %v3620_v0 = vpack.c.bf16 %v1996_v18, %v1995_v57  ;;  %v1824_v31 = vsel %vm476_vm3, %v4263_v3, %v4264_v35 }
 0x434   : > { %v4259_v30 = vunpack.i.h.bf16 %v4257_v27  ;;  %v4258_v7 = vunpack.i.l.bf16 %v4257_v27  ;;  %3619 = vmatprep.subr.bf16.mxu1 %v3618_v11  ;;  %v4272_v36 = vpop.permute.xlu1 %4271 }
 0x435   : > { %3621 = vmatpush1.bf16.msra.mxu1 %v3620_v0  ;;  %v4274_v5 = vunpack.i.h.bf16 %v4272_v36  ;;  %v4273_v23 = vunpack.i.l.bf16 %v4272_v36 }
 0x436   : > { %v3566_v42 = vpack.c.bf16 %v4264_v35, %v4259_v30  ;;  %v1823_v16 = vsel %vm476_vm3, %v4258_v7, %v4259_v30 }
 0x437   : > { %v4267_v15 = vpop.permute.xlu0 %4266  ;;  %v3568_v63 = vpack.c.bf16 %v1824_v31, %v1823_v16  ;;  %v2071_v43 = vsel %vm794_vm2, %v4273_v23, %v4274_v5 }
 0x438   : > { %v4269_v13 = vunpack.i.h.bf16 %v4267_v15  ;;  %v4268_v4 = vunpack.i.l.bf16 %v4267_v15  ;;  %3567 = vmatprep.subr.bf16.mxu0 %v3566_v42  ;;  %v4282_v6 = vpop.permute.xlu1 %4281 }
 0x439   : > { %3569 = vmatpush1.bf16.msra.mxu0 %v3568_v63  ;;  %v4284_v29 = vunpack.i.h.bf16 %v4282_v6  ;;  %v4283_v33 = vunpack.i.l.bf16 %v4282_v6 }
 0x43a   : > { %v3622_v48 = vpack.c.bf16 %v4274_v5, %v4269_v13  ;;  %v2070_v21 = vsel %vm794_vm2, %v4268_v4, %v4269_v13 }
 0x43b   : > { %v4277_v20 = vpop.permute.xlu0 %4276  ;;  %v3624_v37 = vpack.c.bf16 %v2071_v43, %v2070_v21  ;;  %v1826_v40 = vsel %vm476_vm3, %v4283_v33, %v4284_v29 }
 0x43c   : > { %v4279_v56 = vunpack.i.h.bf16 %v4277_v20  ;;  %v4278_v39 = vunpack.i.l.bf16 %v4277_v20  ;;  %3623 = vmatprep.subr.bf16.mxu1 %v3622_v48  ;;  %v4292_v49 = vpop.permute.xlu1 %4291 }
 0x43d   : > { %3625 = vmatpush1.bf16.msra.mxu1 %v3624_v37  ;;  %v4294_v50 = vunpack.i.h.bf16 %v4292_v49  ;;  %v4293_v55 = vunpack.i.l.bf16 %v4292_v49 }
 0x43e   : > { %v3570_v44 = vpack.c.bf16 %v4284_v29, %v4279_v56  ;;  %v1825_v45 = vsel %vm476_vm3, %v4278_v39, %v4279_v56 }
 0x43f   : > { %v4287_v59 = vpop.permute.xlu0 %4286  ;;  %v3572_v60 = vpack.c.bf16 %v1826_v40, %v1825_v45  ;;  %v2073_v53 = vsel %vm794_vm2, %v4293_v55, %v4294_v50 }
 0x440   : > { %v4289_v38 = vunpack.i.h.bf16 %v4287_v59  ;;  %v4288_v46 = vunpack.i.l.bf16 %v4287_v59  ;;  %3571 = vmatprep.subr.bf16.mxu0 %v3570_v44  ;;  %v4302_v54 = vpop.permute.xlu1 %4301 }
 0x441   : > { %3573 = vmatpush1.bf16.msra.mxu0 %v3572_v60  ;;  %v4304_v22 = vunpack.i.h.bf16 %v4302_v54  ;;  %v4303_v34 = vunpack.i.l.bf16 %v4302_v54 }
 0x442   : > { %v3626_v8 = vpack.c.bf16 %v4294_v50, %v4289_v38  ;;  %v2072_v41 = vsel %vm794_vm2, %v4288_v46, %v4289_v38 }
 0x443   : > { %v4297_v26 = vpop.permute.xlu0 %4296  ;;  %v3628_v25 = vpack.c.bf16 %v2073_v53, %v2072_v41  ;;  %v1901_v57 = vsel %vm582_vm0, %v4303_v34, %v4304_v22 }
 0x444   : > { %v4299_v18 = vunpack.i.h.bf16 %v4297_v26  ;;  %v4298_v11 = vunpack.i.l.bf16 %v4297_v26  ;;  %3627 = vmatprep.subr.bf16.mxu1 %v3626_v8  ;;  %v4312_v3 = vpop.permute.xlu1 %4311 }
 0x445   : > { %3629 = vmatpush1.bf16.msra.mxu1 %v3628_v25  ;;  %v4314_v27 = vunpack.i.h.bf16 %v4312_v3  ;;  %v4313_v0 = vunpack.i.l.bf16 %v4312_v3 }
 0x446   : > { %v3574_v52 = vpack.c.bf16 %v4304_v22, %v4299_v18  ;;  %v1900_v35 = vsel %vm582_vm0, %v4298_v11, %v4299_v18 }
 0x447   : > { %v4307_v30 = vpop.permute.xlu0 %4306  ;;  %v3576_v7 = vpack.c.bf16 %v1901_v57, %v1900_v35  ;;  %v2075_v16 = vsel %vm794_vm2, %v4313_v0, %v4314_v27 }
 0x448   : > { %v4309_v31 = vunpack.i.h.bf16 %v4307_v30  ;;  %v4308_v42 = vunpack.i.l.bf16 %v4307_v30  ;;  %3575 = vmatprep.subr.bf16.mxu0 %v3574_v52  ;;  %v4322_v23 = vpop.permute.xlu1 %4321 }
 0x449   : > { %3577 = vmatpush1.bf16.msra.mxu0 %v3576_v7  ;;  %v4324_v15 = vunpack.i.h.bf16 %v4322_v23  ;;  %v4323_v63 = vunpack.i.l.bf16 %v4322_v23 }
 0x44a   : > { %v3630_v36 = vpack.c.bf16 %v4314_v27, %v4309_v31  ;;  %v2074_v5 = vsel %vm794_vm2, %v4308_v42, %v4309_v31 }
 0x44b   : > { %v4317_v13 = vpop.permute.xlu0 %4316  ;;  %v3632_v4 = vpack.c.bf16 %v2075_v16, %v2074_v5  ;;  %v1903_v21 = vsel %vm582_vm0, %v4323_v63, %v4324_v15 }
 0x44c   : > { %v4319_v43 = vunpack.i.h.bf16 %v4317_v13  ;;  %v4318_v48 = vunpack.i.l.bf16 %v4317_v13  ;;  %3631 = vmatprep.subr.bf16.mxu1 %v3630_v36  ;;  %v4332_v33 = vpop.permute.xlu1 %4331 }
 0x44d   : > { %3633 = vmatpush1.bf16.msra.mxu1 %v3632_v4  ;;  %v4334_v20 = vunpack.i.h.bf16 %v4332_v33  ;;  %v4333_v37 = vunpack.i.l.bf16 %v4332_v33  ;;  %v1660_v33 = vld [vmem:[%s6297_s2] sm:$0xff] }
 0x44e   : > { %v3578_v6 = vpack.c.bf16 %v4324_v15, %v4319_v43  ;;  %v1902_v29 = vsel %vm582_vm0, %v4318_v48, %v4319_v43 }
 0x44f   : > { %v4327_v56 = vpop.permute.xlu0 %4326  ;;  %v3580_v39 = vpack.c.bf16 %v1903_v21, %v1902_v29  ;;  %v2077_v45 = vsel %vm794_vm2, %v4333_v37, %v4334_v20 }
 0x450   : > { %v4329_v40 = vunpack.i.h.bf16 %v4327_v56  ;;  %v4328_v44 = vunpack.i.l.bf16 %v4327_v56  ;;  %3579 = vmatprep.subr.bf16.mxu0 %v3578_v6  ;;  %v4342_v55 = vpop.permute.xlu1 %4341  ;;  %v1665_v56 = vld [vmem:[%s6297_s2 + $0x28] sm:$0xff] }
 0x451   : > { %3581 = vmatpush1.bf16.msra.mxu0 %v3580_v39  ;;  %v4344_v59 = vunpack.i.h.bf16 %v4342_v55  ;;  %v4343_v60 = vunpack.i.l.bf16 %v4342_v55  ;;  %v1668_v55 = vld [vmem:[%s6297_s2 + $0x40] sm:$0xff] }
 0x452   : > { %v3634_v49 = vpack.c.bf16 %v4334_v20, %v4329_v40  ;;  %v2076_v50 = vsel %vm794_vm2, %v4328_v44, %v4329_v40  ;;  %v1662_v40 = vld [vmem:[%s6297_s2 + $0x10] sm:$0xff]  ;;  %v1664_v44 = vld [vmem:[%s6297_s2 + $0x20] sm:$0xff] }
 0x453   : > { %v4337_v38 = vpop.permute.xlu0 %4336  ;;  %v3636_v46 = vpack.c.bf16 %v2077_v45, %v2076_v50  ;;  %v1905_v41 = vsel %vm582_vm0, %v4343_v60, %v4344_v59  ;;  %v1667_v45 = vld [vmem:[%s6297_s2 + $0x38] sm:$0xff]  ;;  %v1666_v50 = vld [vmem:[%s6297_s2 + $0x30] sm:$0xff]  ;;  %v1673_v60 = vld [vmem:[%s6297_s2 + $0x68] sm:$0xff] }
 0x454   : > { %v4339_v53 = vunpack.i.h.bf16 %v4337_v38  ;;  %v4338_v8 = vunpack.i.l.bf16 %v4337_v38  ;;  %3635 = vmatprep.subr.bf16.mxu1 %v3634_v49  ;;  %v4352_v34 = vpop.permute.xlu1 %4351  ;;  %v1669_v49 = vld [vmem:[%s6297_s2 + $0x48] sm:$0xff]  ;;  %v1670_v38 = vld [vmem:[%s6297_s2 + $0x50] sm:$0xff] }
 0x455   : > { %3637 = vmatpush1.bf16.msra.mxu1 %v3636_v46  ;;  %v4354_v26 = vunpack.i.h.bf16 %v4352_v34  ;;  %v4353_v25 = vunpack.i.l.bf16 %v4352_v34  ;;  %v1672_v46 = vld [vmem:[%s6297_s2 + $0x60] sm:$0xff]  ;;  %v1681_v34 = vld [vmem:[%s6297_s2 + $0xa8] sm:$0xff] }
 0x456   : > { %v3582_v54 = vpack.c.bf16 %v4344_v59, %v4339_v53  ;;  %v1904_v22 = vsel %vm582_vm0, %v4338_v8, %v4339_v53  ;;  %v1671_v59 = vld [vmem:[%s6297_s2 + $0x58] sm:$0xff]  ;;  %v1677_v8 = vld [vmem:[%s6297_s2 + $0x88] sm:$0xff] }
 0x457   : > { %v4347_v18 = vpop.permute.xlu0 %4346  ;;  %v3584_v11 = vpack.c.bf16 %v1905_v41, %v1904_v22  ;;  %v2079_v35 = vsel %vm794_vm2, %v4353_v25, %v4354_v26  ;;  %v1675_v53 = vld [vmem:[%s6297_s2 + $0x78] sm:$0xff]  ;;  %v1674_v41 = vld [vmem:[%s6297_s2 + $0x70] sm:$0xff]  ;;  %v1680_v25 = vld [vmem:[%s6297_s2 + $0xa0] sm:$0xff] }
 0x458   : > { %v4349_v57 = vunpack.i.h.bf16 %v4347_v18  ;;  %v4348_v52 = vunpack.i.l.bf16 %v4347_v18  ;;  %3583 = vmatprep.subr.bf16.mxu0 %v3582_v54  ;;  %v4362_v0 = vpop.permute.xlu1 %4361  ;;  %v1676_v54 = vld [vmem:[%s6297_s2 + $0x80] sm:$0xff]  ;;  %v1679_v22 = vld [vmem:[%s6297_s2 + $0x98] sm:$0xff] }
 0x459   : > { %3585 = vmatpush1.bf16.msra.mxu0 %v3584_v11  ;;  %v4364_v30 = vunpack.i.h.bf16 %v4362_v0  ;;  %v4363_v7 = vunpack.i.l.bf16 %v4362_v0  ;;  %v1683_v18 = vld [vmem:[%s6297_s2 + $0xb8] sm:$0xff]  ;;  %v1685_v11 = vld [vmem:[%s6297_s2 + $0xc8] sm:$0xff]  ;;  %v1688_v0 = vld [vmem:[%s6297_s2 + $0xe0] sm:$0xff] }
 0x45a   : > { %v3638_v3 = vpack.c.bf16 %v4354_v26, %v4349_v57  ;;  %v2078_v27 = vsel %vm794_vm2, %v4348_v52, %v4349_v57  ;;  %v1678_v26 = vld [vmem:[%s6297_s2 + $0x90] sm:$0xff]  ;;  %v1684_v52 = vld [vmem:[%s6297_s2 + $0xc0] sm:$0xff] }
 0x45b   : > { %v4357_v31 = vpop.permute.xlu0 %4356  ;;  %v3640_v42 = vpack.c.bf16 %v2079_v35, %v2078_v27  ;;  %v1907_v5 = vsel %vm582_vm0, %v4363_v7, %v4364_v30  ;;  %v1682_v57 = vld [vmem:[%s6297_s2 + $0xb0] sm:$0xff]  ;;  %v1687_v35 = vld [vmem:[%s6297_s2 + $0xd8] sm:$0xff]  ;;  %v1693_v7 = vld [vmem:[%s6297_s2 + $0x108] sm:$0xff] }
 0x45c   : > { %v4359_v16 = vunpack.i.h.bf16 %v4357_v31  ;;  %v4358_v36 = vunpack.i.l.bf16 %v4357_v31  ;;  %3639 = vmatprep.subr.bf16.mxu1 %v3638_v3  ;;  %v4372_v63 = vpop.permute.xlu1 %4371  ;;  %v1689_v3 = vld [vmem:[%s6297_s2 + $0xe8] sm:$0xff]  ;;  %v1686_v27 = vld [vmem:[%s6297_s2 + $0xd0] sm:$0xff] }
 0x45d   : > { %3641 = vmatpush1.bf16.msra.mxu1 %v3640_v42  ;;  %v4374_v13 = vunpack.i.h.bf16 %v4372_v63  ;;  %v4373_v4 = vunpack.i.l.bf16 %v4372_v63  ;;  %v1690_v31 = vld [vmem:[%s6297_s2 + $0xf0] sm:$0xff]  ;;  %v1692_v42 = vld [vmem:[%s6297_s2 + $0x100] sm:$0xff]  ;;  %v1701_v63 = vld [vmem:[%s6297_s2 + $0x148] sm:$0xff] }
 0x45e   : > { %v3586_v23 = vpack.c.bf16 %v4364_v30, %v4359_v16  ;;  %v1906_v15 = vsel %vm582_vm0, %v4358_v36, %v4359_v16  ;;  %v1691_v30 = vld [vmem:[%s6297_s2 + $0xf8] sm:$0xff]  ;;  %v1697_v36 = vld [vmem:[%s6297_s2 + $0x128] sm:$0xff] }
 0x45f   : > { %v4367_v43 = vpop.permute.xlu0 %4366  ;;  %v3588_v48 = vpack.c.bf16 %v1907_v5, %v1906_v15  ;;  %v2081_v29 = vsel %vm794_vm2, %v4373_v4, %v4374_v13  ;;  %v1695_v16 = vld [vmem:[%s6297_s2 + $0x118] sm:$0xff]  ;;  %v1694_v5 = vld [vmem:[%s6297_s2 + $0x110] sm:$0xff]  ;;  %v1700_v4 = vld [vmem:[%s6297_s2 + $0x140] sm:$0xff] }
 0x460   : > { %v4369_v21 = vunpack.i.h.bf16 %v4367_v43  ;;  %v4368_v6 = vunpack.i.l.bf16 %v4367_v43  ;;  %3587 = vmatprep.subr.bf16.mxu0 %v3586_v23  ;;  %v1696_v23 = vld [vmem:[%s6297_s2 + $0x120] sm:$0xff]  ;;  %v1699_v15 = vld [vmem:[%s6297_s2 + $0x138] sm:$0xff] }
 0x461   : > { %3589 = vmatpush1.bf16.msra.mxu0 %v3588_v48  ;;  %v1703_v43 = vld [vmem:[%s6297_s2 + $0x158] sm:$0xff]  ;;  %v1705_v48 = vld [vmem:[%s6297_s2 + $0x168] sm:$0xff] }
 0x462   : > { %v3642_v20 = vpack.c.bf16 %v4374_v13, %v4369_v21  ;;  %v2080_v37 = vsel %vm794_vm2, %v4368_v6, %v4369_v21  ;;  %v1698_v13 = vld [vmem:[%s6297_s2 + $0x130] sm:$0xff]  ;;  %v1704_v6 = vld [vmem:[%s6297_s2 + $0x160] sm:$0xff] }
 0x463   : > { %v3644_v39 = vpack.c.bf16 %v2081_v29, %v2080_v37  ;;  %v1702_v21 = vld [vmem:[%s6297_s2 + $0x150] sm:$0xff]  ;;  %v1707_v29 = vld [vmem:[%s6297_s2 + $0x178] sm:$0xff]  ;;  %v1708_v37 = vld [vmem:[%s6297_s2 + $0x180] sm:$0xff] }
 0x464   : > { %3643 = vmatprep.subr.bf16.mxu1 %v3642_v20  ;;  %2214 = vmatmul.mubr.f32.vlgmr.msra.gmra.mrb[0].mxu0 %v1660_v33  ;;  %v1709_v33 = vld [vmem:[%s6297_s2 + $0x188] sm:$0xff]  ;;  %v1706_v20 = vld [vmem:[%s6297_s2 + $0x170] sm:$0xff] }
 0x465   : > { %3645 = vmatpush1.bf16.msra.mxu1 %v3644_v39  ;;  %2219 = vmatprep.mubr.f32.mxu0 %v1665_v56  ;;  %v1711_v56 = vld [vmem:[%s6297_s2 + $0x198] sm:$0xff]  ;;  %v1713_v39 = vld [vmem:[%s6297_s2 + $0x1a8] sm:$0xff] }
 0x468   : > { %2363 = vmatmul.mubr.f32.vlgmr.msra.gmra.mrb[0].mxu1 %v1662_v40  ;;  %2220 = vmatmul.mubr.f32.gmra.mrb[2].mxu0 %v1664_v44  ;;  %v1710_v40 = vld [vmem:[%s6297_s2 + $0x190] sm:$0xff]  ;;  %v1712_v44 = vld [vmem:[%s6297_s2 + $0x1a0] sm:$0xff] }
 0x469   : > { %3305 = vmatprep.mubr.msk.f32.mxu1 %vm2106_vm10, %v1667_v45  ;;  %2225 = vmatprep.mubr.f32.mxu0 %v1669_v49  ;;  %v1715_v45 = vld [vmem:[%s6297_s2 + $0x1b8] sm:$0xff]  ;;  %v1714_v49 = vld [vmem:[%s6297_s2 + $0x1b0] sm:$0xff] }
 0x46c   : > { %2369 = vmatmul.mubr.f32.gmra.mrb[2].mxu1 %v1666_v50  ;;  %2226 = vmatmul.mubr.f32.gmra.mrb[4].mxu0 %v1668_v55  ;;  %v4417_v50 = vmov 0.0|0.0  }
 0x46d   : > { %3306 = vmatprep.mubr.msk.f32.mxu1 %vm2106_vm10, %v1671_v59  ;;  %2231 = vmatprep.mubr.f32.mxu0 %v1673_v60 }
 0x46e   : > { %3753 = vmatprep.subr.bf16.mxu1 %v4417_v50  ;;  %3646 = vmatprep.subr.bf16.mxu0 %v4417_v50 }
 0x46f   : > { %3767 = vmatpush1.bf16.msra.mxu1 %v5476_v51  ;;  %3648 = vmatpush1.bf16.msra.mxu0 %v5476_v51 }
 0x470   : > { %2375 = vmatmul.mubr.f32.gmra.mrb[4].mxu1 %v1670_v38  ;;  %2232 = vmatmul.mubr.f32.gmra.mrb[6].mxu0 %v1672_v46 }
 0x471   : > { %3307 = vmatprep.mubr.msk.f32.mxu1 %vm2106_vm10, %v1675_v53  ;;  %2237 = vmatprep.mubr.f32.mxu0 %v1677_v8 }
 0x472   : > { %3754 = vmatprep.subr.bf16.mxu1 %v4417_v50  ;;  %3649 = vmatprep.subr.bf16.mxu0 %v4417_v50 }
 0x473   : > { %3768 = vmatpush1.bf16.msra.mxu1 %v5481_v58  ;;  %3651 = vmatpush1.bf16.msra.mxu0 %v5481_v58 }
 0x474   : > { %2381 = vmatmul.mubr.f32.gmra.mrb[6].mxu1 %v1674_v41  ;;  %2238 = vmatmul.mubr.f32.gmra.mrb[8].mxu0 %v1676_v54 }
 0x475   : > { %3308 = vmatprep.mubr.msk.f32.mxu1 %vm2106_vm10, %v1679_v22  ;;  %2243 = vmatprep.mubr.f32.mxu0 %v1681_v34 }
 0x476   : > { %3755 = vmatprep.subr.bf16.mxu1 %v4417_v50  ;;  %3652 = vmatprep.subr.bf16.mxu0 %v4417_v50 }
 0x477   : > { %3769 = vmatpush1.bf16.msra.mxu1 %v5486_v62  ;;  %3654 = vmatpush1.bf16.msra.mxu0 %v5486_v62 }
 0x478   : > { %2387 = vmatmul.mubr.f32.gmra.mrb[8].mxu1 %v1678_v26  ;;  %2244 = vmatmul.mubr.f32.gmra.mrb[10].mxu0 %v1680_v25 }
 0x479   : > { %3309 = vmatprep.mubr.msk.f32.mxu1 %vm2106_vm10, %v1683_v18  ;;  %2249 = vmatprep.mubr.f32.mxu0 %v1685_v11 }
 0x47a   : > { %3756 = vmatprep.subr.bf16.mxu1 %v4417_v50  ;;  %3655 = vmatprep.subr.bf16.mxu0 %v4417_v50 }
 0x47b   : > { %3770 = vmatpush1.bf16.msra.mxu1 %v5491_v2  ;;  %3657 = vmatpush1.bf16.msra.mxu0 %v5491_v2 }
 0x47c   : > { %2393 = vmatmul.mubr.f32.gmra.mrb[10].mxu1 %v1682_v57  ;;  %2250 = vmatmul.mubr.f32.gmra.mrb[12].mxu0 %v1684_v52 }
 0x47d   : > { %3310 = vmatprep.mubr.msk.f32.mxu1 %vm2106_vm10, %v1687_v35  ;;  %2255 = vmatprep.mubr.f32.mxu0 %v1689_v3 }
 0x47e   : > { %3757 = vmatprep.subr.bf16.mxu1 %v4417_v50  ;;  %3658 = vmatprep.subr.bf16.mxu0 %v4417_v50 }
 0x47f   : > { %3771 = vmatpush1.bf16.msra.mxu1 %v5496_v14  ;;  %3660 = vmatpush1.bf16.msra.mxu0 %v5496_v14 }
 0x480   : > { %2399 = vmatmul.mubr.f32.gmra.mrb[12].mxu1 %v1686_v27  ;;  %2256 = vmatmul.mubr.f32.gmra.mrb[14].mxu0 %v1688_v0 }
 0x481   : > { %3311 = vmatprep.mubr.msk.f32.mxu1 %vm2106_vm10, %v1691_v30  ;;  %2261 = vmatprep.mubr.f32.mxu0 %v1693_v7 }
 0x482   : > { %3758 = vmatprep.subr.bf16.mxu1 %v4417_v50  ;;  %3661 = vmatprep.subr.bf16.mxu0 %v4417_v50 }
 0x483   : > { %3772 = vmatpush1.bf16.msra.mxu1 %v5501_v12  ;;  %3663 = vmatpush1.bf16.msra.mxu0 %v5501_v12 }
 0x484   : > { %2405 = vmatmul.mubr.f32.gmra.mrb[14].mxu1 %v1690_v31  ;;  %2262 = vmatmul.mubr.f32.gmra.mrb[16].mxu0 %v1692_v42 }
 0x485   : > { %3312 = vmatprep.mubr.msk.f32.mxu1 %vm2106_vm10, %v1695_v16  ;;  %2267 = vmatprep.mubr.f32.mxu0 %v1697_v36 }
 0x486   : > { %3759 = vmatprep.subr.bf16.mxu1 %v4417_v50  ;;  %3664 = vmatprep.subr.bf16.mxu0 %v4417_v50 }
 0x487   : > { %3773 = vmatpush1.bf16.msra.mxu1 %v5506_v17  ;;  %3666 = vmatpush1.bf16.msra.mxu0 %v5506_v17 }
 0x488   : > { %2411 = vmatmul.mubr.f32.gmra.mrb[16].mxu1 %v1694_v5  ;;  %2268 = vmatmul.mubr.f32.gmra.mrb[18].mxu0 %v1696_v23 }
 0x489   : > { %3313 = vmatprep.mubr.msk.f32.mxu1 %vm2106_vm10, %v1699_v15  ;;  %2273 = vmatprep.mubr.f32.mxu0 %v1701_v63 }
 0x48a   : > { %3760 = vmatprep.subr.bf16.mxu1 %v4417_v50  ;;  %3667 = vmatprep.subr.bf16.mxu0 %v4417_v50 }
 0x48b   : > { %3774 = vmatpush1.bf16.msra.mxu1 %v5511_v9  ;;  %3669 = vmatpush1.bf16.msra.mxu0 %v5511_v9 }
 0x48c   : > { %2417 = vmatmul.mubr.f32.gmra.mrb[18].mxu1 %v1698_v13  ;;  %2274 = vmatmul.mubr.f32.gmra.mrb[20].mxu0 %v1700_v4 }
 0x48d   : > { %3314 = vmatprep.mubr.msk.f32.mxu1 %vm2106_vm10, %v1703_v43  ;;  %2279 = vmatprep.mubr.f32.mxu0 %v1705_v48 }
 0x48e   : > { %3761 = vmatprep.subr.bf16.mxu1 %v4417_v50  ;;  %3670 = vmatprep.subr.bf16.mxu0 %v4417_v50 }
 0x48f   : > { %3775 = vmatpush1.bf16.msra.mxu1 %v5516_v19  ;;  %3672 = vmatpush1.bf16.msra.mxu0 %v5516_v19 }
 0x490   : > { %2423 = vmatmul.mubr.f32.gmra.mrb[20].mxu1 %v1702_v21  ;;  %2280 = vmatmul.mubr.f32.gmra.mrb[22].mxu0 %v1704_v6 }
 0x491   : > { %3315 = vmatprep.mubr.msk.f32.mxu1 %vm2106_vm10, %v1707_v29  ;;  %2285 = vmatprep.mubr.f32.mxu0 %v1709_v33 }
 0x492   : > { %3762 = vmatprep.subr.bf16.mxu1 %v4417_v50  ;;  %3673 = vmatprep.subr.bf16.mxu0 %v4417_v50 }
 0x493   : > { %3776 = vmatpush1.bf16.msra.mxu1 %v5521_v10  ;;  %3675 = vmatpush1.bf16.msra.mxu0 %v5521_v10 }
 0x494   : > { %2429 = vmatmul.mubr.f32.gmra.mrb[22].mxu1 %v1706_v20  ;;  %2286 = vmatmul.mubr.f32.gmra.mrb[24].mxu0 %v1708_v37 }
 0x495   : > { %3316 = vmatprep.mubr.msk.f32.mxu1 %vm2106_vm10, %v1711_v56  ;;  %2291 = vmatprep.mubr.f32.mxu0 %v1713_v39 }
 0x496   : > { %3763 = vmatprep.subr.bf16.mxu1 %v4417_v50  ;;  %3676 = vmatprep.subr.bf16.mxu0 %v4417_v50 }
 0x497   : > { %3777 = vmatpush1.bf16.msra.mxu1 %v5526_v24  ;;  %3678 = vmatpush1.bf16.msra.mxu0 %v5526_v24 }
 0x498   : > { %2435 = vmatmul.mubr.f32.gmra.mrb[24].mxu1 %v1710_v40  ;;  %2292 = vmatmul.mubr.f32.gmra.mrb[26].mxu0 %v1712_v44 }
 0x499   : > { %3317 = vmatprep.mubr.msk.f32.mxu1 %vm2106_vm10, %v1715_v45  ;;  %3764 = vmatprep.subr.bf16.mxu1 %v4417_v50 }
 0x49a   : > { %3679 = vmatprep.subr.bf16.mxu0 %v4417_v50 }
 0x49b   : > { %3778 = vmatpush1.bf16.msra.mxu1 %v5531_v28  ;;  %3681 = vmatpush1.bf16.msra.mxu0 %v5531_v28 }
 0x49c   : > { %2441 = vmatmul.mubr.f32.gmra.mrb[26].mxu1 %v1714_v49  ;;  %3765 = vmatprep.subr.bf16.mxu1 %v4417_v50 }
 0x49d   : > { %3682 = vmatprep.subr.bf16.mxu0 %v4417_v50 }
 0x49f   : > { %3779 = vmatpush1.bf16.msra.mxu1 %v5536_v32  ;;  %3684 = vmatpush1.bf16.msra.mxu0 %v5536_v32 }
 0x4a0   : > { %3766 = vmatprep.subr.bf16.mxu1 %v4417_v50  ;;  %3685 = vmatprep.subr.bf16.mxu0 %v4417_v50 }
 0x4a3   : > { %3780 = vmatpush1.bf16.msk.msra.mxu1 %vm5559_vm7, %v5557_v47  ;;  %3688 = vmatpush1.bf16.msk.msra.mxu0 %vm5559_vm7, %v5557_v47 }
 0x537   : > { %v2215_v51 = vpop.f32.mrb[0].mxu0 }
 0x538   : > { %v2217_v58 = vpop.f32.mrb[1].mxu0 }
 0x53b   : > { %v2364_v62 = vpop.f32.mrb[0].mxu1  ;;  %v2221_v2 = vpop.f32.mrb[2].mxu0 }
 0x53c   : > { %v2365_v14 = vadd.f32 %v2364_v62, %v2215_v51  ;;  %v2366_v12 = vpop.f32.mrb[1].mxu1  ;;  %v2223_v17 = vpop.f32.mrb[3].mxu0 }
 0x53d   : > { %v2367_v9 = vadd.f32 %v2366_v12, %v2217_v58 }
 0x53f   : > { %v2370_v19 = vpop.f32.mrb[2].mxu1  ;;  %v2227_v10 = vpop.f32.mrb[4].mxu0 }
 0x540   : > { %v2371_v24 = vadd.f32 %v2370_v19, %v2221_v2  ;;  %v2372_v28 = vpop.f32.mrb[3].mxu1  ;;  %v2229_v32 = vpop.f32.mrb[5].mxu0 }
 0x541   : > { %v2373_v55 = vadd.f32 %v2372_v28, %v2223_v17 }
 0x543   : > { %v2376_v59 = vpop.f32.mrb[4].mxu1  ;;  %v2233_v60 = vpop.f32.mrb[6].mxu0 }
 0x544   : > { %v2377_v38 = vadd.f32 %v2376_v59, %v2227_v10  ;;  %v2378_v46 = vpop.f32.mrb[5].mxu1  ;;  %v2235_v61 = vpop.f32.mrb[7].mxu0 }
 0x545   : > { %v2379_v47 = vadd.f32 %v2378_v46, %v2229_v32 }
 0x547   : > { %v2382_v53 = vpop.f32.mrb[6].mxu1  ;;  %v2239_v8 = vpop.f32.mrb[8].mxu0 }
 0x548   : > { %v2383_v41 = vadd.f32 %v2382_v53, %v2233_v60  ;;  %v2384_v54 = vpop.f32.mrb[7].mxu1  ;;  %v2241_v22 = vpop.f32.mrb[9].mxu0 }
 0x549   : > { %v2385_v34 = vadd.f32 %v2384_v54, %v2235_v61 }
 0x54b   : > { %v2388_v26 = vpop.f32.mrb[8].mxu1  ;;  %v2245_v25 = vpop.f32.mrb[10].mxu0 }
 0x54c   : > { %v2389_v18 = vadd.f32 %v2388_v26, %v2239_v8  ;;  %v2390_v11 = vpop.f32.mrb[9].mxu1  ;;  %v2247_v57 = vpop.f32.mrb[11].mxu0 }
 0x54d   : > { %v2391_v52 = vadd.f32 %v2390_v11, %v2241_v22 }
 0x54f   : > { %v2394_v35 = vpop.f32.mrb[10].mxu1  ;;  %v2251_v3 = vpop.f32.mrb[12].mxu0 }
 0x550   : > { %v2395_v27 = vadd.f32 %v2394_v35, %v2245_v25  ;;  %v2396_v0 = vpop.f32.mrb[11].mxu1  ;;  %v2253_v30 = vpop.f32.mrb[13].mxu0 }
 0x551   : > { %v2397_v7 = vadd.f32 %v2396_v0, %v2247_v57 }
 0x553   : > { %v2400_v31 = vpop.f32.mrb[12].mxu1  ;;  %v2257_v42 = vpop.f32.mrb[14].mxu0 }
 0x554   : > { %v6095_v16 = vadd.f32 %v2400_v31, %v2251_v3  ;;  %v2402_v36 = vpop.f32.mrb[13].mxu1  ;;  %v2259_v5 = vpop.f32.mrb[15].mxu0 }
 0x555   : > { %v6097_v23 = vadd.f32 %v2402_v36, %v2253_v30 }
 0x557   : > { %v2406_v15 = vpop.f32.mrb[14].mxu1  ;;  %v2263_v63 = vpop.f32.mrb[16].mxu0 }
 0x558   : > { %v2407_v13 = vadd.f32 %v2406_v15, %v2257_v42  ;;  %v2408_v4 = vpop.f32.mrb[15].mxu1  ;;  %v2265_v43 = vpop.f32.mrb[17].mxu0 }
 0x559   : > { %v2409_v48 = vadd.f32 %v2408_v4, %v2259_v5 }
 0x55a   : > { %v6099_v21 = vmax.f32 %v2365_v14, %v2407_v13 }
 0x55b   : > { %v6101_v6 = vmax.f32 %v2367_v9, %v2409_v48  ;;  %v2412_v29 = vpop.f32.mrb[16].mxu1  ;;  %v2269_v33 = vpop.f32.mrb[18].mxu0 }
 0x55c   : > { %v2413_v20 = vadd.f32 %v2412_v29, %v2263_v63  ;;  %v2414_v37 = vpop.f32.mrb[17].mxu1  ;;  %v2271_v56 = vpop.f32.mrb[19].mxu0 }
 0x55d   : > { %v2415_v39 = vadd.f32 %v2414_v37, %v2265_v43 }
 0x55e   : > { %v6103_v40 = vmax.f32 %v2371_v24, %v2413_v20 }
 0x55f   : > { %v6105_v44 = vmax.f32 %v2373_v55, %v2415_v39  ;;  %v2418_v45 = vpop.f32.mrb[18].mxu1  ;;  %v2275_v49 = vpop.f32.mrb[20].mxu0 }
 0x560   : > { %v2419_v50 = vadd.f32 %v2418_v45, %v2269_v33  ;;  %v2420_v51 = vpop.f32.mrb[19].mxu1  ;;  %v2277_v58 = vpop.f32.mrb[21].mxu0 }
 0x561   : > { %v2421_v62 = vadd.f32 %v2420_v51, %v2271_v56  ;;  %2481 = vrot.lane.b32.xlu0 %v6105_v44, %s4415_s17 }
 0x562   : > { %v2451_v2 = vmax.f32 %v2377_v38, %v2419_v50 }
 0x563   : > { %v2452_v14 = vmax.f32 %v2379_v47, %v2421_v62  ;;  %v2424_v12 = vpop.f32.mrb[20].mxu1  ;;  %v2281_v17 = vpop.f32.mrb[22].mxu0 }
 0x564   : > { %v2425_v9 = vadd.f32 %v2424_v12, %v2275_v49  ;;  %v2426_v19 = vpop.f32.mrb[21].mxu1  ;;  %v2283_v10 = vpop.f32.mrb[23].mxu0 }
 0x565   : > { %v2427_v24 = vadd.f32 %v2426_v19, %v2277_v58  ;;  %2485 = vrot.lane.b32.xlu1 %v2452_v14, %s4415_s17 }
 0x566   : > { %v6110_v28 = vmax.f32 %v2383_v41, %v2425_v9 }
 0x567   : > { %v2454_v32 = vmax.f32 %v2385_v34, %v2427_v24  ;;  %v2430_v55 = vpop.f32.mrb[22].mxu1  ;;  %v2287_v59 = vpop.f32.mrb[24].mxu0 }
 0x568   : > { %v2431_v60 = vadd.f32 %v2430_v55, %v2281_v17  ;;  %v2432_v46 = vpop.f32.mrb[23].mxu1  ;;  %v4375_v61 = vpack.i.bf16 %v6110_v28, %v2451_v2  ;;  %v2289_v53 = vpop.f32.mrb[25].mxu0 }
 0x569   : > { %v2433_v38 = vadd.f32 %v2432_v46, %v2283_v10  ;;  %2477 = vrot.lane.b32.xlu1 %v6101_v6, %s4415_s17 }
 0x56a   : > { %v6115_v47 = vmax.f32 %v2389_v18, %v2431_v60  ;;  %4376 = vrot.lane.b32.xlu0 %v4375_v61, %s4415_s17 }
 0x56b   : > { %v2456_v8 = vmax.f32 %v2391_v52, %v2433_v38  ;;  %v2436_v54 = vpop.f32.mrb[24].mxu1  ;;  %v2293_v41 = vpop.f32.mrb[26].mxu0 }
 0x56c   : > { %v2437_v22 = vadd.f32 %v2436_v54, %v2287_v59  ;;  %v2438_v34 = vpop.f32.mrb[25].mxu1  ;;  %v4380_v26 = vpack.i.bf16 %v6099_v21, %v6115_v47  ;;  %v2295_v25 = vpop.f32.mrb[27].mxu0  ;;  %v4418_v59 = vmov 1983009808  }
 0x56d   : > { %v2439_v11 = vadd.f32 %v2438_v34, %v2289_v53  ;;  %v2673_v60 = vunpack.c.l.s4 %v4418_v59  ;;  %v6513_v53 = vld [vmem:[#allocation31_spill] sm:$0xff] }
 0x56e   : > { %v6120_v57 = vmax.f32 %v2395_v27, %v2437_v22  ;;  %2489 = vrot.lane.b32.xlu0 %v2454_v32, %s4415_s17  ;;  %4381 = vrot.lane.b32.xlu1 %v4380_v26, %s4415_s17 }
 0x56f   : > { %v2458_v18 = vmax.f32 %v2397_v7, %v2439_v11  ;;  %v2442_v35 = vpop.f32.mrb[26].mxu1  ;;  %v2674_v46 = vunpack.c.0.s8 %v2673_v60 }
 0x570   : > { %v2443_v3 = vadd.f32 %v2442_v35, %v2293_v41  ;;  %v2444_v0 = vpop.f32.mrb[27].mxu1  ;;  %v4385_v27 = vpack.i.bf16 %v6103_v40, %v6120_v57  ;;  %v6515_v41 = vld [vmem:[#allocation32_spill] sm:$0xff] }
 0x571   : > { %v2445_v52 = vadd.f32 %v2444_v0, %v2295_v25  ;;  %v6155_v61 = vsub.s32 %v2674_v46, %v5658_v1  ;;  %v2872_v22 = vcombine.high %v6515_v41, %v6515_v41 }
 0x572   : > { %v2459_v30 = vmax.f32 %v6095_v16, %v2443_v3  ;;  %2493 = vrot.lane.b32.xlu0 %v2456_v8, %s4415_s17  ;;  %2497 = vrot.lane.b32.xlu1 %v2458_v18, %s4415_s17 }
 0x573   : > { %v2460_v31 = vmax.f32 %v6097_v23, %v2445_v52  ;;  %v6161_v38 = vrot.slane %v6513_v53, %v6155_v61  ;;  %v6179_v11 = vrot.slane %v6515_v41, %v6155_v61  ;;  %v6183_v0 = vrot.slane %v2872_v22, %v6155_v61  ;;  %v6516_v52 = vld [vmem:[#allocation33_spill] sm:$0xff] }
 0x575   : > { %v2870_v34 = vcombine.high %v6161_v38, %v6161_v38 }
 0x576   : > { %4386 = vrot.lane.b32.xlu0 %v4385_v27, %s4415_s17  ;;  %2499 = vrot.lane.b32.xlu1 %v2459_v30, %s4415_s17 }
 0x57a   : > { %2501 = vrot.lane.b32.xlu0 %v2460_v31, %s4415_s17 }
 0x5d3   : > { %v2482_v42 = vpop.permute.xlu0 %2481 }
 0x5d4   : > { %v2527_v49 = vmax.f32 %v6105_v44, %v2482_v42 }
 0x5d7   : > { %v2486_v7 = vpop.permute.xlu1 %2485 }
 0x5d8   : > { %v2529_v36 = vmax.f32 %v2452_v14, %v2486_v7 }
 0x5da   : > { %3321 = vmatprep.mubr.msk.f32.mxu1 %vm1476_vm8, %v2529_v36 }
 0x5db   : > { %v2478_v16 = vpop.permute.xlu1 %2477 }
 0x5dc   : > { %v2525_v5 = vmax.f32 %v6101_v6, %v2478_v16  ;;  %v4377_v15 = vpop.permute.xlu0 %4376 }
 0x5dd   : > { %v4378_v63 = vunpack.i.l.bf16 %v4377_v15  ;;  %v4379_v23 = vunpack.i.h.bf16 %v4377_v15 }
 0x5de   : > { %3319 = vmatprep.mubr.msk.f32.mxu0 %vm1476_vm8, %v2525_v5 }
 0x5df   : > { %v2505_v13 = vsel %vm476_vm3, %v4378_v63, %v2486_v7  ;;  %v6202_v63 = vcombine.high %v6179_v11, %v6179_v11 }
 0x5e0   : > { %v2528_v4 = vmax.f32 %v2451_v2, %v2505_v13  ;;  %v2490_v43 = vpop.permute.xlu0 %2489  ;;  %v4382_v48 = vpop.permute.xlu1 %4381 }
 0x5e1   : > { %v2506_v29 = vsel %vm476_vm3, %v4379_v23, %v2490_v43  ;;  %v2531_v33 = vmax.f32 %v2454_v32, %v2490_v43  ;;  %v4384_v20 = vunpack.i.h.bf16 %v4382_v48  ;;  %v4383_v56 = vunpack.i.l.bf16 %v4382_v48 }
 0x5e2   : > { %2639 = vmatmul.mubr.f32.vlgmr.msra.gmra.mrb[28].mxu1 %v2528_v4  ;;  %v2530_v6 = vmax.f32 %v6110_v28, %v2506_v29  ;;  %v2888_v29 = vcombine.high %v6183_v0, %v6183_v0 }
 0x5e3   : > { %v2503_v37 = vsel %vm476_vm3, %v4384_v20, %v2478_v16  ;;  %3322 = vmatprep.mubr.msk.f32.mxu1 %vm1476_vm8, %v2531_v33 }
 0x5e4   : > { %v2524_v39 = vmax.f32 %v6099_v21, %v2503_v37  ;;  %v2494_v45 = vpop.permute.xlu0 %2493  ;;  %v2498_v58 = vpop.permute.xlu1 %2497 }
 0x5e5   : > { %v2507_v50 = vsel %vm476_vm3, %v4383_v56, %v2494_v45  ;;  %v2533_v51 = vmax.f32 %v2456_v8, %v2494_v45  ;;  %v2535_v14 = vmax.f32 %v2458_v18, %v2498_v58 }
 0x5e6   : > { %2629 = vmatmul.mubr.f32.vlgmr.msra.gmra.mrb[28].mxu0 %v2524_v39  ;;  %2644 = vmatmul.mubr.f32.gmra.mrb[30].mxu1 %v2530_v6  ;;  %v2532_v62 = vmax.f32 %v6115_v47, %v2507_v50  ;;  %v6514_v47 = vld [vmem:[#allocation30_spill] sm:$0xff] }
 0x5e7   : > { %3320 = vmatprep.mubr.msk.f32.mxu0 %vm1476_vm8, %v2527_v49  ;;  %3323 = vmatprep.mubr.msk.f32.mxu1 %vm1476_vm8, %v2533_v51  ;;  %v2838_v8 = vcombine.high %v6514_v47, %v6514_v47  ;;  %v6172_v26 = vrot.slane %v6514_v47, %v6155_v61 }
 0x5e8   : > { %v4387_v2 = vpop.permute.xlu0 %4386  ;;  %v2500_v9 = vpop.permute.xlu1 %2499 }
 0x5e9   : > { %v4389_v12 = vunpack.i.h.bf16 %v4387_v2  ;;  %v4388_v17 = vunpack.i.l.bf16 %v4387_v2  ;;  %v6175_v25 = vrot.slane %v2838_v8, %v6155_v61  ;;  %v6196_v16 = vcombine.high %v6172_v26, %v6172_v26 }
 0x5ea   : > { %2649 = vmatmul.mubr.f32.gmra.mrb[32].mxu1 %v2532_v62 }
 0x5eb   : > { %v2504_v21 = vsel %vm476_vm3, %v4389_v12, %v2482_v42  ;;  %v2508_v44 = vsel %vm476_vm3, %v4388_v17, %v2498_v58  ;;  %3324 = vmatprep.mubr.msk.f32.mxu1 %vm1476_vm8, %v2535_v14  ;;  %v6192_v42 = vrot.slane %v6516_v52, %v6155_v61  ;;  %v2854_v5 = vcombine.high %v6175_v25, %v6175_v25 }
 0x5ec   : > { %v2502_v19 = vpop.permute.xlu0 %2501  ;;  %v2526_v10 = vmax.f32 %v6103_v40, %v2504_v21  ;;  %v2534_v24 = vmax.f32 %v6120_v57, %v2508_v44  ;;  %v2855_v40 = vcombine.high %v6513_v53, %v6513_v53 }
 0x5ed   : > { %v2509_v28 = vsel %vm476_vm3, %v2500_v9, %v2502_v19  ;;  %v2537_v32 = vmax.f32 %v2460_v31, %v2502_v19  ;;  %v6219_v49 = vcombine.high %v6192_v42, %v6192_v42 }
 0x5ee   : > { %2634 = vmatmul.mubr.f32.gmra.mrb[30].mxu0 %v2526_v10  ;;  %2654 = vmatmul.mubr.f32.gmra.mrb[34].mxu1 %v2534_v24  ;;  %v2536_v55 = vmax.f32 %v2459_v30, %v2509_v28  ;;  %v2869_v54 = vrot.slane %v2855_v40, %v6155_v61  ;;  %v2889_v30 = vcombine.high %v6516_v52, %v6516_v52 }
 0x5ef   : > { %3325 = vmatprep.mubr.msk.f32.mxu1 %vm1476_vm8, %v2537_v32 }
 0x5f0   : > { %v2871_v35 = vcombine.high %v2869_v54, %v2869_v54  ;;  %v6215_v45 = vrot.slane %v2889_v30, %v6155_v61 }
 0x5f2   : > { %2659 = vmatmul.mubr.f32.gmra.mrb[36].mxu1 %v2536_v55 }
 0x6b5   : > { %v2640_v1 = vpop.f32.mrb[28].mxu1 }
 0x6b6   : > { %v2705_v57 = vcombine.high %v2640_v1, %v2640_v1  ;;  %v2712_v18 = vrot.slane %v2640_v1, %v6155_v61  ;;  %v2642_v3 = vpop.f32.mrb[29].mxu1 }
 0x6b8   : > { %v2719_v31 = vrot.slane %v2705_v57, %v6155_v61  ;;  %v2720_v27 = vcombine.high %v2712_v18, %v2712_v18  ;;  %v6188_v7 = vadd.f32 %v2870_v34, %v2712_v18 }
 0x6b9   : > { %v2630_v36 = vpop.f32.mrb[28].mxu0  ;;  %v2645_v15 = vpop.f32.mrb[30].mxu1 }
 0x6ba   : > { %v2721_v23 = vcombine.high %v2719_v31, %v2719_v31  ;;  %v6204_v13 = vadd.f32 %v2869_v54, %v2720_v27  ;;  %v6206_v4 = vadd.f32 %v2871_v35, %v2719_v31  ;;  %v2632_v43 = vpop.f32.mrb[29].mxu0  ;;  %v2647_v48 = vpop.f32.mrb[31].mxu1  ;;  %v2671_v33 = vcombine.high %v2630_v36, %v2630_v36 }
 0x6bb   : > { %v2678_v20 = vrot.slane %v2630_v36, %v6155_v61  ;;  %v2722_v37 = vcombine.high %v2645_v15, %v2645_v15  ;;  %v2729_v56 = vrot.slane %v2645_v15, %v6155_v61  ;;  %v2958_v39 = vmax.f32 %v6188_v7, 0.0 }
 0x6bc   : > { %v2933_v6 = vadd.f32 %v6161_v38, %v2721_v23  ;;  %v2685_v50 = vrot.slane %v2671_v33, %v6155_v61  ;;  %v2959_v14 = vmax.f32 %v6204_v13, 0.0  ;;  %v2960_v12 = vmax.f32 %v6206_v4, 0.0 }
 0x6bd   : > { %v2686_v51 = vcombine.high %v2678_v20, %v2678_v20  ;;  %v2922_v58 = vadd.f32 %v6172_v26, %v2678_v20  ;;  %v2736_v62 = vrot.slane %v2722_v37, %v6155_v61  ;;  %v2650_v2 = vpop.f32.mrb[32].mxu1  ;;  %v2737_v17 = vcombine.high %v2729_v56, %v2729_v56 }
 0x6be   : > { %v2934_v21 = vadd.f32 %v2870_v34, %v2729_v56  ;;  %v2652_v44 = vpop.f32.mrb[33].mxu1  ;;  %v2687_v9 = vcombine.high %v2685_v50, %v2685_v50  ;;  %v2924_v10 = vadd.f32 %v6175_v25, %v2685_v50  ;;  %v2961_v24 = vmax.f32 %v2933_v6, 0.0 }
 0x6bf   : > { %v2923_v19 = vadd.f32 %v6196_v16, %v2686_v51  ;;  %v2950_v28 = vmax.f32 %v2922_v58, 0.0  ;;  %v2738_v32 = vcombine.high %v2736_v62, %v2736_v62  ;;  %v2935_v55 = vadd.f32 %v2869_v54, %v2737_v17 }
 0x6c0   : > { %v2936_v59 = vadd.f32 %v6179_v11, %v2736_v62  ;;  %v2925_v60 = vadd.f32 %v2854_v5, %v2687_v9  ;;  %v2952_v53 = vmax.f32 %v2924_v10, 0.0  ;;  %v2962_v40 = vmax.f32 %v2934_v21, 0.0 }
 0x6c1   : > { %v2951_v46 = vmax.f32 %v2923_v19, 0.0  ;;  %v2635_v47 = vpop.f32.mrb[30].mxu0  ;;  %v2655_v8 = vpop.f32.mrb[34].mxu1  ;;  %v2937_v41 = vadd.f32 %v6202_v63, %v2738_v32  ;;  %v2963_v22 = vmax.f32 %v2935_v55, 0.0  ;;  %v2739_v1 = vcombine.high %v2650_v2, %v2650_v2 }
 0x6c2   : > { %v2964_v34 = vmax.f32 %v2936_v59, 0.0  ;;  %v2637_v57 = vpop.f32.mrb[31].mxu0  ;;  %v2657_v18 = vpop.f32.mrb[35].mxu1  ;;  %v2953_v35 = vmax.f32 %v2925_v60, 0.0  ;;  %v3056_v52 = vcombine.low %v2961_v24, %v2962_v40  ;;  %v2746_v54 = vrot.slane %v2650_v2, %v6155_v61 }
 0x6c3   : > { %v3006_v3 = vcombine.low %v2950_v28, %v2951_v46  ;;  %v2965_v30 = vmax.f32 %v2937_v41, 0.0  ;;  %v3070_v31 = vrot.slane %v2963_v22, %v6155_v61  ;;  %v2753_v27 = vrot.slane %v2739_v1, %v6155_v61 }
 0x6c4   : > { %v2688_v36 = vcombine.high %v2635_v47, %v2635_v47  ;;  %v3007_v5 = vcombine.low %v2952_v53, %v2953_v35  ;;  %v3063_v23 = vrot.slane %v3056_v52, %v6155_v61  ;;  %v2754_v43 = vcombine.high %v2746_v54, %v2746_v54 }
 0x6c5   : > { %v3014_v15 = vrot.slane %v3006_v3, %v6155_v61  ;;  %v2660_v48 = vpop.f32.mrb[36].mxu1  ;;  %v3072_v33 = vcombine.low %v2964_v34, %v2965_v30  ;;  %v2755_v20 = vcombine.high %v2753_v27, %v2753_v27  ;;  %v2938_v37 = vadd.f32 %v6183_v0, %v2746_v54 }
 0x6c6   : > { %v2940_v56 = vadd.f32 %v6179_v11, %v2753_v27  ;;  %v2662_v6 = vpop.f32.mrb[37].mxu1  ;;  %v3021_v50 = vrot.slane %v3007_v5, %v6155_v61  ;;  %v3071_v51 = vcombine.low %v3063_v23, %v3070_v31  ;;  %v2939_v58 = vadd.f32 %v2888_v29, %v2754_v43 }
 0x6c7   : > { %v2695_v62 = vrot.slane %v2635_v47, %v6155_v61  ;;  %v3080_v2 = vrot.slane %v3072_v33, %v6155_v61  ;;  %v2941_v17 = vadd.f32 %v6202_v63, %v2755_v20  ;;  %v2966_v21 = vmax.f32 %v2938_v37, 0.0 }
 0x6c8   : > { %v2968_v44 = vmax.f32 %v2940_v56, 0.0  ;;  %v3022_v9 = vcombine.low %v3014_v15, %v3021_v50  ;;  %3151 = vst.msk [vmem:[%s4570_s21 + $0xd8] sm:$0x3f] %vm3148_vm11, %v3071_v51  ;;  %v2967_v19 = vmax.f32 %v2939_v58, 0.0  ;;  %v2702_v11 = vrot.slane %v2688_v36, %v6155_v61 }
 0x6c9   : > { %v2703_v10 = vcombine.high %v2695_v62, %v2695_v62  ;;  %v2969_v24 = vmax.f32 %v2941_v17, 0.0  ;;  %v2926_v28 = vadd.f32 %v6172_v26, %v2695_v62  ;;  %v2756_v32 = vcombine.high %v2655_v8, %v2655_v8 }
 0x6ca   : > { %v2763_v29 = vrot.slane %v2655_v8, %v6155_v61  ;;  %3147 = vst.msk [vmem:[%s4570_s21 + $0x60] sm:$0xff] %vm1651_vm9, %v3022_v9  ;;  %v3073_v55 = vcombine.low %v2966_v21, %v2967_v19  ;;  %v2704_v59 = vcombine.high %v2702_v11, %v2702_v11  ;;  %v2928_v60 = vadd.f32 %v6175_v25, %v2702_v11 }
 0x6cb   : > { %v2927_v63 = vadd.f32 %v6196_v16, %v2703_v10  ;;  %v3089_v46 = vcombine.low %v2968_v44, %v2969_v24  ;;  %v2954_v53 = vmax.f32 %v2926_v28, 0.0  ;;  %v2770_v40 = vrot.slane %v2756_v32, %v6155_v61 }
 0x6cc   : > { %v2771_v47 = vcombine.high %v2763_v29, %v2763_v29  ;;  %v3087_v41 = vrot.slane %v3073_v55, %v6155_v61  ;;  %v2929_v26 = vadd.f32 %v6161_v38, %v2704_v59  ;;  %v2956_v8 = vmax.f32 %v2928_v60, 0.0 }
 0x6cd   : > { %v2955_v22 = vmax.f32 %v2927_v63, 0.0  ;;  %v2772_v34 = vcombine.high %v2770_v40, %v2770_v40  ;;  %v2942_v1 = vadd.f32 %v6183_v0, %v2763_v29  ;;  %v2944_v16 = vadd.f32 %v6219_v49, %v2770_v40 }
 0x6ce   : > { %v2943_v57 = vadd.f32 %v6192_v42, %v2771_v47  ;;  %v3040_v25 = vcombine.low %v2959_v14, %v2960_v12  ;;  %v3088_v18 = vcombine.low %v3080_v2, %v3087_v41  ;;  %v2957_v35 = vmax.f32 %v2929_v26, 0.0 }
 0x6cf   : > { %v3023_v3 = vcombine.low %v2954_v53, %v2955_v22  ;;  %v3037_v52 = vrot.slane %v2956_v8, %v6155_v61  ;;  %v2945_v38 = vadd.f32 %v6215_v45, %v2772_v34  ;;  %v2970_v54 = vmax.f32 %v2942_v1, 0.0 }
 0x6d0   : > { %v2905_v0 = vcombine.high %v6215_v45, %v6215_v45  ;;  %3152 = vst.msk [vmem:[%s4570_s21 + $0x140] sm:$0xff] %vm1651_vm9, %v3088_v18  ;;  %v3039_v4 = vcombine.low %v2957_v35, %v2958_v39  ;;  %v3096_v13 = vrot.slane %v3089_v46, %v6155_v61  ;;  %v2773_v14 = vcombine.high %v2660_v48, %v2660_v48 }
 0x6d1   : > { %v3030_v30 = vrot.slane %v3023_v3, %v6155_v61  ;;  %v2971_v12 = vmax.f32 %v2943_v57, 0.0  ;;  %v2972_v31 = vmax.f32 %v2944_v16, 0.0  ;;  %v3103_v27 = vrot.slane %v2970_v54, %v6155_v61 }
 0x6d2   : > { %v2780_v36 = vrot.slane %v2660_v48, %v6155_v61  ;;  %v3054_v5 = vrot.slane %v3040_v25, %v6155_v61  ;;  %v3047_v23 = vrot.slane %v3039_v4, %v6155_v61  ;;  %v2787_v7 = vrot.slane %v2773_v14, %v6155_v61 }
 0x6d3   : > { %v3038_v15 = vcombine.low %v3030_v30, %v3037_v52  ;;  %v3104_v39 = vcombine.low %v3096_v13, %v3103_v27  ;;  %v2973_v20 = vmax.f32 %v2945_v38, 0.0  ;;  %v3105_v50 = vcombine.low %v2971_v12, %v2972_v31 }
 0x6d4   : > { %v2788_v43 = vcombine.high %v2780_v36, %v2780_v36  ;;  %v2946_v33 = vadd.f32 %v2905_v0, %v2780_v36  ;;  %v3055_v37 = vcombine.low %v3047_v23, %v3054_v5  ;;  %v2789_v56 = vcombine.high %v2787_v7, %v2787_v7 }
 0x6d5   : > { %3149 = vst.msk [vmem:[%s4570_s21 + $0x68] sm:$0x3f] %vm3148_vm11, %v3038_v15  ;;  %v2948_v6 = vadd.f32 %v6219_v49, %v2787_v7  ;;  %3153 = vst.msk [vmem:[%s4570_s21 + $0x148] sm:$0x3f] %vm3148_vm11, %v3104_v39  ;;  %v3113_v44 = vrot.slane %v3105_v50, %v6155_v61 }
 0x6d6   : > { %v2947_v48 = vadd.f32 %v6192_v42, %v2788_v43  ;;  %v2974_v51 = vmax.f32 %v2946_v33, 0.0  ;;  %3150 = vst.msk [vmem:[%s4570_s21 + $0xd0] sm:$0xff] %vm1651_vm9, %v3055_v37  ;;  %v2949_v58 = vadd.f32 %v6215_v45, %v2789_v56 }
 0x6d7   : > { %v2976_v62 = vmax.f32 %v2948_v6, 0.0 }
 0x6d8   : > { %v2975_v2 = vmax.f32 %v2947_v48, 0.0  ;;  %v3106_v17 = vcombine.low %v2973_v20, %v2974_v51  ;;  %v2977_v21 = vmax.f32 %v2949_v58, 0.0 }
 0x6da   : > { %v3120_v49 = vrot.slane %v3106_v17, %v6155_v61  ;;  %v3122_v9 = vcombine.low %v2975_v2, %v2976_v62  ;;  %v3136_v19 = vrot.slane %v2977_v21, %v6155_v61 }
 0x6dc   : > { %v3121_v11 = vcombine.low %v3113_v44, %v3120_v49  ;;  %v3129_v42 = vrot.slane %v3122_v9, %v6155_v61 }
 0x6de   : > { %v3137_v10 = vcombine.low %v3129_v42, %v3136_v19  ;;  %3154 = vst.msk [vmem:[%s4570_s21 + $0x1b0] sm:$0xff] %vm1651_vm9, %v3121_v11 }
 0x6e0   : > { %3155 = vst.msk [vmem:[%s4570_s21 + $0x1b8] sm:$0x3f] %vm3148_vm11, %v3137_v10 }
 0x6e1 PF: > { %s15_s18 = sadd.s32 1, %s4400_s18  }
 0x6e2   : > { %p12_p5 = scmp.ge.s32.totalorder %s15_s18, 4  }
 0x6e4   :  { %14 = sbr.rel (!%p12_p5) target bundleno = 1 (0x1), region = 94 }

// kernel: cnn_forward.4
= control target key start
LH: loop header
LB: loop body
LE: loop exit
PB: predicated region body
PF: predicated region fallthrough
CT: control target
= control target key end

     0   :  { %s3726_s18 = smov 0   ;;  %s5025_s0 = inlined_call_operand.vmem [shape: f32[2,4,110,110], index: 0, kind: input, shape index: {}]   ;;  %s5026_s1 = inlined_call_operand.vmem [shape: f32[128,800], index: 1, kind: input, shape index: {}]   ;;  %s5027_s2 = inlined_call_operand.vmem [shape: f32[40,280], index: 2, kind: input, shape index: {}]   ;;  %s5028_s3 = inlined_call_operand.vmem [shape: f32[4,1,53], index: 3, kind: input, shape index: {}]   ;;  %s5029_s4 = inlined_call_operand.vmem [shape: f32[105,53], index: 4, kind: input, shape index: {}]   ;;  %s5030_s5 = inlined_call_operand.vmem [shape: f32[2,4,53,53], index: 5, kind: output, shape index: {}]  }
   0x1 LB: > { %s2612_s19 = sadd.s32 4294967295, %s3677_s18   ;;  %p2616_p0 = scmp.ge.s32.totalorder %s3677_s18, 1  ;;  %s3677_s18 = sphi %s3726_s18, %s15_s18  }
   0x2   : > { %p187_p1 = scmp.lt.s32.totalorder %s3677_s18, 3 }
   0x4   : > { %p188_p2 = pnand %p2616_p0, %p187_p1 }
   0x6   : > { %191 = sbr.rel (%p188_p2) target bundleno = 1638 (0x666), region = 40 }
   0xd   : > { %p215_p3 = scmp.lt.s32.totalorder %s2612_s19, 1  ;;  %v3737_v0 = vld [vmem:[%s5029_s4] sm:$0xff]  ;;  %v3742_v1 = vld [vmem:[%s5029_s4 + $0x8] sm:$0xff]  ;;  %v3747_v2 = vld [vmem:[%s5029_s4 + $0x10] sm:$0xff]  ;;  %s4394_s20 = smov 0  }
   0xe   : > { %5039 = vst [vmem:[#allocation2_spill] sm:$0xff] %v3737_v0  ;;  %5040 = vst [vmem:[#allocation3_spill] sm:$0xff] %v3742_v1  ;;  %v3752_v3 = vld [vmem:[%s5029_s4 + $0x18] sm:$0xff]  ;;  %v3757_v4 = vld [vmem:[%s5029_s4 + $0x20] sm:$0xff] }
   0xf   : > { %5041 = vst [vmem:[#allocation4_spill] sm:$0xff] %v3747_v2  ;;  %5042 = vst [vmem:[#allocation5_spill] sm:$0xff] %v3752_v3  ;;  %v3762_v5 = vld [vmem:[%s5029_s4 + $0x28] sm:$0xff]  ;;  %s5269_s19 = smov (!%p215_p3, %s2612_s19), 1  ;;  %v3767_v6 = vld [vmem:[%s5029_s4 + $0x30] sm:$0xff] }
  0x10   : > { %5043 = vst [vmem:[#allocation6_spill] sm:$0xff] %v3757_v4  ;;  %5044 = vst [vmem:[#allocation7_spill] sm:$0xff] %v3762_v5  ;;  %v3772_v7 = vld [vmem:[%s5029_s4 + $0x38] sm:$0xff]  ;;  %v3777_v8 = vld [vmem:[%s5029_s4 + $0x40] sm:$0xff]  ;;  %s3376_s21 = smul.u32 448, %s5269_s19 }
  0x11   : > { %5045 = vst [vmem:[#allocation8_spill] sm:$0xff] %v3767_v6  ;;  %5046 = vst [vmem:[#allocation9_spill] sm:$0xff] %v3772_v7  ;;  %v3782_v9 = vld [vmem:[%s5029_s4 + $0x48] sm:$0xff]  ;;  %v3787_v10 = vld [vmem:[%s5029_s4 + $0x50] sm:$0xff]  ;;  %s3377_s28 = smul.u32 224, %s5269_s19 }
  0x12   : > { %5047 = vst [vmem:[#allocation10_spill] sm:$0xff] %v3777_v8  ;;  %5048 = vst [vmem:[#allocation11_spill] sm:$0xff] %v3782_v9  ;;  %v3792_v11 = vld [vmem:[%s5029_s4 + $0x58] sm:$0xff]  ;;  %v3797_v12 = vld [vmem:[%s5029_s4 + $0x60] sm:$0xff]  ;;  %s3827_s12 = scalar_lea.vmem %s5025_s0, %s3376_s21 }
  0x13   : > { %5049 = vst [vmem:[#allocation12_spill] sm:$0xff] %v3787_v10  ;;  %5050 = vst [vmem:[#allocation13_spill] sm:$0xff] %v3792_v11  ;;  %v3802_v13 = vld [vmem:[%s5029_s4 + $0x68] sm:$0x1]  ;;  %v3807_v14 = vld [vmem:[%s5028_s3] ss:$0 sm:$0xff]  ;;  %s3847_s21 = scalar_lea.vmem %s5030_s5, %s3377_s28 }
  0x14   : > { %5051 = vst [vmem:[#allocation14_spill] sm:$0xff] %v3797_v12  ;;  %5052 = vst [vmem:[#allocation15_spill] sm:$0xff] %v3802_v13  ;;  %v3812_v15 = vld [vmem:[%s5028_s3 + $0x1] ss:$0 sm:$0xff]  ;;  %v3817_v16 = vld [vmem:[%s5028_s3 + $0x2] ss:$0 sm:$0xff] }
  0x15   : > { %5053 = vst [vmem:[#allocation16_spill] sm:$0xff] %v3807_v14  ;;  %5054 = vst [vmem:[#allocation17_spill] sm:$0xff] %v3812_v15  ;;  %v3822_v17 = vld [vmem:[%s5026_s1] sm:$0xff]  ;;  %v3837_v19 = vld [vmem:[%s5026_s1 + $0x8] sm:$0xff] }
  0x16   : > { %5055 = vst [vmem:[#allocation18_spill] sm:$0xff] %v3817_v16  ;;  %5056 = vst [vmem:[#allocation19_spill] sm:$0xff] %v3822_v17  ;;  %v3832_v18 = vld [vmem:[%s5028_s3 + $0x3] ss:$0 sm:$0xff]  ;;  %v3842_v20 = vld [vmem:[%s5026_s1 + $0x10] sm:$0xff] }
  0x17   : > { %5057 = vst [vmem:[#allocation20_spill] sm:$0xff] %v3832_v18  ;;  %5058 = vst [vmem:[#allocation21_spill] sm:$0xff] %v3837_v19  ;;  %v3852_v21 = vld [vmem:[%s5026_s1 + $0x18] sm:$0xff]  ;;  %v3857_v22 = vld [vmem:[%s5026_s1 + $0x20] sm:$0xff] }
  0x18   : > { %5059 = vst [vmem:[#allocation22_spill] sm:$0xff] %v3842_v20  ;;  %5060 = vst [vmem:[#allocation23_spill] sm:$0xff] %v3852_v21  ;;  %v3862_v23 = vld [vmem:[%s5026_s1 + $0x28] sm:$0xff]  ;;  %v3867_v24 = vld [vmem:[%s5026_s1 + $0x30] sm:$0xff] }
  0x19   : > { %5061 = vst [vmem:[#allocation24_spill] sm:$0xff] %v3857_v22  ;;  %5062 = vst [vmem:[#allocation25_spill] sm:$0xff] %v3862_v23  ;;  %v3872_v25 = vld [vmem:[%s5026_s1 + $0x38] sm:$0xff]  ;;  %v3877_v26 = vld [vmem:[%s5026_s1 + $0x40] sm:$0xff] }
  0x1a   : > { %5063 = vst [vmem:[#allocation26_spill] sm:$0xff] %v3867_v24  ;;  %5064 = vst [vmem:[#allocation27_spill] sm:$0xff] %v3872_v25  ;;  %v3882_v27 = vld [vmem:[%s5026_s1 + $0x48] sm:$0xff]  ;;  %v3887_v28 = vld [vmem:[%s5026_s1 + $0x50] sm:$0xff] }
  0x1b   : > { %5065 = vst [vmem:[#allocation28_spill] sm:$0xff] %v3877_v26  ;;  %5066 = vst [vmem:[#allocation29_spill] sm:$0xff] %v3882_v27  ;;  %v3892_v29 = vld [vmem:[%s5026_s1 + $0x58] sm:$0xff]  ;;  %v3897_v30 = vld [vmem:[%s5026_s1 + $0x60] sm:$0xff] }
  0x1c   : > { %5067 = vst [vmem:[#allocation30_spill] sm:$0xff] %v3892_v29  ;;  %5068 = vst [vmem:[#allocation31_spill] sm:$0xff] %v3897_v30  ;;  %v3902_v31 = vld [vmem:[%s5026_s1 + $0x68] sm:$0xff]  ;;  %v3907_v32 = vld [vmem:[%s5026_s1 + $0x70] sm:$0xff] }
  0x1d   : > { %5069 = vst [vmem:[#allocation32_spill] sm:$0xff] %v3902_v31  ;;  %v3912_v33 = vld [vmem:[%s5026_s1 + $0x78] sm:$0xff]  ;;  %v3917_v34 = vld [vmem:[%s5026_s1 + $0x80] sm:$0xff]  ;;  %v3922_v35 = vld [vmem:[%s5026_s1 + $0x88] sm:$0xff] }
  0x1e   : > { %v3927_v36 = vld [vmem:[%s5026_s1 + $0x90] sm:$0xff]  ;;  %v3932_v37 = vld [vmem:[%s5026_s1 + $0x98] sm:$0xff]  ;;  %v3937_v38 = vld [vmem:[%s5026_s1 + $0xa0] sm:$0xff] }
  0x1f   : > { %5070 = vst [vmem:[#allocation33_spill] sm:$0xff] %v3927_v36  ;;  %5071 = vst [vmem:[#allocation34_spill] sm:$0xff] %v3932_v37  ;;  %v3942_v39 = vld [vmem:[%s5026_s1 + $0xa8] sm:$0xff]  ;;  %v3947_v40 = vld [vmem:[%s5026_s1 + $0xb0] sm:$0xff] }
  0x20   : > { %5072 = vst [vmem:[#allocation35_spill] sm:$0xff] %v3937_v38  ;;  %v3952_v41 = vld [vmem:[%s5026_s1 + $0xb8] sm:$0xff]  ;;  %v3957_v42 = vld [vmem:[%s5026_s1 + $0xc0] sm:$0xff]  ;;  %v3962_v43 = vld [vmem:[%s5026_s1 + $0xc8] sm:$0xff] }
  0x21   : > { %5073 = vst [vmem:[#allocation36_spill] sm:$0xff] %v3962_v43  ;;  %v3967_v44 = vld [vmem:[%s5026_s1 + $0xd0] sm:$0xff]  ;;  %v3972_v45 = vld [vmem:[%s5026_s1 + $0xd8] sm:$0xff]  ;;  %v3977_v46 = vld [vmem:[%s5026_s1 + $0xe0] sm:$0xff] }
  0x22   : > { %5074 = vst [vmem:[#allocation37_spill] sm:$0xff] %v3967_v44  ;;  %5075 = vst [vmem:[#allocation38_spill] sm:$0xff] %v3972_v45  ;;  %v3982_v47 = vld [vmem:[%s5026_s1 + $0xe8] sm:$0xff]  ;;  %v3987_v48 = vld [vmem:[%s5026_s1 + $0xf0] sm:$0xff] }
  0x23   : > { %v3992_v49 = vld [vmem:[%s5026_s1 + $0xf8] sm:$0xff]  ;;  %v3997_v50 = vld [vmem:[%s5026_s1 + $0x100] sm:$0xff]  ;;  %v4002_v51 = vld [vmem:[%s5026_s1 + $0x108] sm:$0xff] }
  0x24   : > { %5076 = vst [vmem:[#allocation39_spill] sm:$0xff] %v3997_v50  ;;  %5077 = vst [vmem:[#allocation40_spill] sm:$0xff] %v4002_v51  ;;  %v4007_v52 = vld [vmem:[%s5026_s1 + $0x110] sm:$0xff]  ;;  %v4012_v53 = vld [vmem:[%s5026_s1 + $0x118] sm:$0xff] }
  0x25   : > { %5078 = vst [vmem:[#allocation41_spill] sm:$0xff] %v4007_v52  ;;  %v4017_v54 = vld [vmem:[%s5026_s1 + $0x120] sm:$0xff]  ;;  %v4022_v55 = vld [vmem:[%s5026_s1 + $0x128] sm:$0xff]  ;;  %v4027_v56 = vld [vmem:[%s5026_s1 + $0x130] sm:$0xff] }
  0x26   : > { %5079 = vst [vmem:[#allocation42_spill] sm:$0xff] %v4022_v55  ;;  %v4032_v57 = vld [vmem:[%s5026_s1 + $0x138] sm:$0xff]  ;;  %v4037_v58 = vld [vmem:[%s5026_s1 + $0x140] sm:$0xff]  ;;  %v4042_v59 = vld [vmem:[%s5026_s1 + $0x148] sm:$0xff] }
  0x27   : > { %5080 = vst [vmem:[#allocation43_spill] sm:$0xff] %v4032_v57  ;;  %5081 = vst [vmem:[#allocation44_spill] sm:$0xff] %v4037_v58  ;;  %v4047_v60 = vld [vmem:[%s5026_s1 + $0x150] sm:$0xff]  ;;  %v4052_v61 = vld [vmem:[%s5026_s1 + $0x158] sm:$0xff] }
  0x28   : > { %5082 = vst [vmem:[#allocation45_spill] sm:$0xff] %v4042_v59  ;;  %v4057_v62 = vld [vmem:[%s5026_s1 + $0x160] sm:$0xff]  ;;  %v4062_v63 = vld [vmem:[%s5026_s1 + $0x168] sm:$0xff]  ;;  %v4067_v18 = vld [vmem:[%s5026_s1 + $0x170] sm:$0xff] }
  0x29   : > { %5083 = vst [vmem:[#allocation46_spill] sm:$0xff] %v4057_v62  ;;  %5084 = vst [vmem:[#allocation47_spill] sm:$0xff] %v4062_v63  ;;  %v4072_v16 = vld [vmem:[%s5026_s1 + $0x178] sm:$0xff]  ;;  %v4077_v15 = vld [vmem:[%s5026_s1 + $0x180] sm:$0xff] }
  0x2a   : > { %5085 = vst [vmem:[#allocation48_spill] sm:$0xff] %v4067_v18  ;;  %5086 = vst [vmem:[#allocation49_spill] sm:$0xff] %v4072_v16  ;;  %v4082_v14 = vld [vmem:[%s5026_s1 + $0x188] sm:$0xff]  ;;  %v4087_v13 = vld [vmem:[%s5026_s1 + $0x190] sm:$0xff] }
  0x2b   : > { %5087 = vst [vmem:[#allocation50_spill] sm:$0xff] %v4077_v15  ;;  %5088 = vst [vmem:[#allocation51_spill] sm:$0xff] %v4082_v14  ;;  %v4092_v12 = vld [vmem:[%s5026_s1 + $0x198] sm:$0xff]  ;;  %v4097_v11 = vld [vmem:[%s5026_s1 + $0x1a0] sm:$0xff] }
  0x2c   : > { %5089 = vst [vmem:[#allocation52_spill] sm:$0xff] %v4087_v13  ;;  %5090 = vst [vmem:[#allocation53_spill] sm:$0xff] %v4092_v12  ;;  %v4102_v10 = vld [vmem:[%s5026_s1 + $0x1a8] sm:$0xff]  ;;  %v4107_v9 = vld [vmem:[%s5026_s1 + $0x1b0] sm:$0xff] }
  0x2d   : > { %5091 = vst [vmem:[#allocation54_spill] sm:$0xff] %v4097_v11  ;;  %5092 = vst [vmem:[#allocation55_spill] sm:$0xff] %v4102_v10  ;;  %v4112_v8 = vld [vmem:[%s5026_s1 + $0x1b8] sm:$0xff]  ;;  %v4117_v7 = vld [vmem:[%s5026_s1 + $0x1c0] sm:$0xff] }
  0x2e   : > { %5093 = vst [vmem:[#allocation56_spill] sm:$0xff] %v4107_v9  ;;  %5094 = vst [vmem:[#allocation57_spill] sm:$0xff] %v4112_v8  ;;  %v4122_v6 = vld [vmem:[%s5026_s1 + $0x1c8] sm:$0xff]  ;;  %v4127_v5 = vld [vmem:[%s5026_s1 + $0x1d0] sm:$0xff] }
  0x2f   : > { %5095 = vst [vmem:[#allocation58_spill] sm:$0xff] %v4117_v7  ;;  %5096 = vst [vmem:[#allocation59_spill] sm:$0xff] %v4122_v6  ;;  %v4132_v4 = vld [vmem:[%s5026_s1 + $0x1d8] sm:$0xff]  ;;  %v4137_v3 = vld [vmem:[%s5026_s1 + $0x1e0] sm:$0xff] }
  0x30   : > { %5097 = vst [vmem:[#allocation60_spill] sm:$0xff] %v4127_v5  ;;  %5098 = vst [vmem:[#allocation61_spill] sm:$0xff] %v4132_v4  ;;  %v4142_v2 = vld [vmem:[%s5026_s1 + $0x1e8] sm:$0xff]  ;;  %v4147_v1 = vld [vmem:[%s5026_s1 + $0x1f0] sm:$0xff] }
  0x31   : > { %5099 = vst [vmem:[#allocation62_spill] sm:$0xff] %v4137_v3  ;;  %5100 = vst [vmem:[#allocation63_spill] sm:$0xff] %v4142_v2  ;;  %v4152_v0 = vld [vmem:[%s5026_s1 + $0x1f8] sm:$0xff]  ;;  %v4157_v8 = vld [vmem:[%s5026_s1 + $0x200] sm:$0xff] }
  0x32   : > { %5101 = vst [vmem:[#allocation64_spill] sm:$0xff] %v4147_v1  ;;  %5102 = vst [vmem:[#allocation65_spill] sm:$0xff] %v4152_v0  ;;  %v4162_v15 = vld [vmem:[%s5026_s1 + $0x208] sm:$0xff]  ;;  %v4167_v59 = vld [vmem:[%s5026_s1 + $0x210] sm:$0xff] }
  0x33   : > { %5103 = vst [vmem:[#allocation66_spill] sm:$0xff] %v4157_v8  ;;  %5104 = vst [vmem:[#allocation67_spill] sm:$0xff] %v4162_v15  ;;  %v4172_v1 = vld [vmem:[%s5026_s1 + $0x218] sm:$0xff]  ;;  %v4177_v52 = vld [vmem:[%s5026_s1 + $0x220] sm:$0xff] }
  0x34   : > { %5105 = vst [vmem:[#allocation68_spill] sm:$0xff] %v4167_v59  ;;  %5106 = vst [vmem:[#allocation69_spill] sm:$0xff] %v4172_v1  ;;  %v4182_v45 = vld [vmem:[%s5026_s1 + $0x228] sm:$0xff]  ;;  %v4187_v3 = vld [vmem:[%s5026_s1 + $0x230] sm:$0xff] }
  0x35   : > { %5107 = vst [vmem:[#allocation70_spill] sm:$0xff] %v4177_v52  ;;  %5108 = vst [vmem:[#allocation71_spill] sm:$0xff] %v4182_v45  ;;  %v4192_v38 = vld [vmem:[%s5026_s1 + $0x238] sm:$0xff]  ;;  %v4197_v1 = vld [vmem:[%s5026_s1 + $0x240] sm:$0xff] }
  0x36   : > { %5109 = vst [vmem:[#allocation72_spill] sm:$0xff] %v4187_v3  ;;  %5110 = vst [vmem:[#allocation73_spill] sm:$0xff] %v4197_v1  ;;  %v4202_v52 = vld [vmem:[%s5026_s1 + $0x248] sm:$0xff]  ;;  %v4207_v45 = vld [vmem:[%s5026_s1 + $0x250] sm:$0xff] }
  0x37   : > { %5111 = vst [vmem:[#allocation74_spill] sm:$0xff] %v4202_v52  ;;  %5112 = vst [vmem:[#allocation75_spill] sm:$0xff] %v4207_v45  ;;  %v4212_v2 = vld [vmem:[%s5026_s1 + $0x258] sm:$0xff]  ;;  %v4217_v31 = vld [vmem:[%s5026_s1 + $0x260] sm:$0xff] }
  0x38   : > { %5113 = vst [vmem:[#allocation76_spill] sm:$0xff] %v4212_v2  ;;  %5114 = vst [vmem:[#allocation77_spill] sm:$0xff] %v4217_v31  ;;  %v4222_v10 = vld [vmem:[%s5026_s1 + $0x268] sm:$0xff]  ;;  %v4227_v24 = vld [vmem:[%s5026_s1 + $0x270] sm:$0xff] }
  0x39   : > { %5115 = vst [vmem:[#allocation78_spill] sm:$0xff] %v4222_v10  ;;  %5116 = vst [vmem:[#allocation79_spill] sm:$0xff] %v4227_v24  ;;  %v4232_v45 = vld [vmem:[%s5026_s1 + $0x278] sm:$0xff]  ;;  %v4237_v2 = vld [vmem:[%s5026_s1 + $0x280] sm:$0xff] }
  0x3a   : > { %5117 = vst [vmem:[#allocation80_spill] sm:$0xff] %v4232_v45  ;;  %5118 = vst [vmem:[#allocation81_spill] sm:$0xff] %v4237_v2  ;;  %v4242_v31 = vld [vmem:[%s5026_s1 + $0x288] sm:$0xff]  ;;  %v4247_v9 = vld [vmem:[%s5026_s1 + $0x290] sm:$0xff] }
  0x3b   : > { %5119 = vst [vmem:[#allocation82_spill] sm:$0xff] %v4242_v31  ;;  %5120 = vst [vmem:[#allocation83_spill] sm:$0xff] %v4247_v9  ;;  %v4252_v18 = vld [vmem:[%s5026_s1 + $0x298] sm:$0xff]  ;;  %v4257_v16 = vld [vmem:[%s5026_s1 + $0x2a0] sm:$0xff] }
  0x3c   : > { %5121 = vst [vmem:[#allocation84_spill] sm:$0xff] %v4252_v18  ;;  %5122 = vst [vmem:[#allocation85_spill] sm:$0xff] %v4257_v16  ;;  %v4262_v57 = vld [vmem:[%s5026_s1 + $0x2a8] sm:$0xff]  ;;  %v4267_v31 = vld [vmem:[%s5026_s1 + $0x2b0] sm:$0xff] }
  0x3d   : > { %5123 = vst [vmem:[#allocation86_spill] sm:$0xff] %v4262_v57  ;;  %5124 = vst [vmem:[#allocation87_spill] sm:$0xff] %v4267_v31  ;;  %v4272_v9 = vld [vmem:[%s5026_s1 + $0x2b8] sm:$0xff]  ;;  %v4277_v18 = vld [vmem:[%s5026_s1 + $0x2c0] sm:$0xff] }
  0x3e   : > { %5125 = vst [vmem:[#allocation88_spill] sm:$0xff] %v4272_v9  ;;  %5126 = vst [vmem:[#allocation89_spill] sm:$0xff] %v4277_v18  ;;  %v4282_v58 = vld [vmem:[%s5026_s1 + $0x2c8] sm:$0xff]  ;;  %v4287_v50 = vld [vmem:[%s5026_s1 + $0x2d0] sm:$0xff] }
  0x3f   : > { %5127 = vst [vmem:[#allocation90_spill] sm:$0xff] %v4282_v58  ;;  %5128 = vst [vmem:[#allocation91_spill] sm:$0xff] %v4287_v50  ;;  %v4292_v51 = vld [vmem:[%s5026_s1 + $0x2d8] sm:$0xff]  ;;  %v4297_v43 = vld [vmem:[%s5026_s1 + $0x2e0] sm:$0xff] }
  0x40   : > { %5129 = vst [vmem:[#allocation92_spill] sm:$0xff] %v4292_v51  ;;  %5130 = vst [vmem:[#allocation93_spill] sm:$0xff] %v4297_v43  ;;  %v4302_v18 = vld [vmem:[%s5026_s1 + $0x2e8] sm:$0xff]  ;;  %v4307_v58 = vld [vmem:[%s5026_s1 + $0x2f0] sm:$0xff] }
  0x41   : > { %5131 = vst [vmem:[#allocation94_spill] sm:$0xff] %v4302_v18  ;;  %5132 = vst [vmem:[#allocation95_spill] sm:$0xff] %v4307_v58  ;;  %v4312_v50 = vld [vmem:[%s5026_s1 + $0x2f8] sm:$0xff]  ;;  %v4317_v44 = vld [vmem:[%s5026_s1 + $0x300] sm:$0xff] }
  0x42   : > { %5133 = vst [vmem:[#allocation96_spill] sm:$0xff] %v4312_v50  ;;  %5134 = vst [vmem:[#allocation97_spill] sm:$0xff] %v4317_v44  ;;  %v4322_v36 = vld [vmem:[%s5026_s1 + $0x308] sm:$0xff]  ;;  %v4327_v18 = vld [vmem:[%s5026_s1 + $0x310] sm:$0xff] }
  0x43   : > { %5135 = vst [vmem:[#allocation98_spill] sm:$0xff] %v4322_v36  ;;  %5136 = vst [vmem:[#allocation99_spill] sm:$0xff] %v4327_v18  ;;  %v4332_v37 = vld [vmem:[%s5026_s1 + $0x318] sm:$0xff]  ;;  %v4337_v50 = vld [vmem:[%s5026_s1 + $0x320] sm:$0xff] }
  0x44   : > { %5137 = vst [vmem:[#allocation100_spill] sm:$0xff] %v4332_v37  ;;  %5138 = vst [vmem:[#allocation101_spill] sm:$0xff] %v4337_v50  ;;  %v4342_v44 = vld [vmem:[%s5026_s1 + $0x328] sm:$0xff]  ;;  %v4347_v36 = vld [vmem:[%s5026_s1 + $0x330] sm:$0xff] }
  0x45   : > { %5139 = vst [vmem:[#allocation102_spill] sm:$0xff] %v4342_v44  ;;  %5140 = vst [vmem:[#allocation103_spill] sm:$0xff] %v4347_v36  ;;  %v4352_v58 = vld [vmem:[%s5026_s1 + $0x338] sm:$0xff]  ;;  %v4357_v29 = vld [vmem:[%s5026_s1 + $0x340] sm:$0xff] }
  0x46   : > { %5141 = vst [vmem:[#allocation104_spill] sm:$0xff] %v4352_v58  ;;  %5142 = vst [vmem:[#allocation105_spill] sm:$0xff] %v4357_v29  ;;  %v4362_v50 = vld [vmem:[%s5026_s1 + $0x348] sm:$0xff]  ;;  %v4367_v44 = vld [vmem:[%s5026_s1 + $0x350] sm:$0xff] }
  0x47   : > { %5143 = vst [vmem:[#allocation106_spill] sm:$0xff] %v4362_v50  ;;  %5144 = vst [vmem:[#allocation107_spill] sm:$0xff] %v4367_v44  ;;  %v4372_v36 = vld [vmem:[%s5026_s1 + $0x358] sm:$0xff]  ;;  %v4377_v58 = vld [vmem:[%s5026_s1 + $0x360] sm:$0xff] }
  0x48   : > { %5145 = vst [vmem:[#allocation108_spill] sm:$0xff] %v4372_v36  ;;  %5146 = vst [vmem:[#allocation109_spill] sm:$0xff] %v4377_v58  ;;  %v4382_v29 = vld [vmem:[%s5026_s1 + $0x368] sm:$0xff]  ;;  %v4387_v31 = vld [vmem:[%s5026_s1 + $0x370] sm:$0xff] }
  0x49   : > { %5147 = vst [vmem:[#allocation110_spill] sm:$0xff] %v4382_v29  ;;  %5148 = vst [vmem:[#allocation111_spill] sm:$0xff] %v4387_v31  ;;  %v4392_v30 = vld [vmem:[%s5026_s1 + $0x378] sm:$0xff] }
  0x4a   : > { %5149 = vst [vmem:[#allocation112_spill] sm:$0xff] %v4392_v30 }
  0x4b LB: >> { %v5150_v19 = vld [vmem:[#allocation21_spill] sm:$0xff]  ;;  %v5151_v21 = vld [vmem:[#allocation23_spill] sm:$0xff]  ;;  %s2620_s22 = sshll.u32 %s3681_s20, 5  ;;  %s3683_s24 = smov 127   ;;  %v5154_v26 = vld [vmem:[#allocation28_spill] sm:$0xff]  ;;  %vm650_vm0 = vcmask 261120   ;;  %s3681_s20 = sphi %s4394_s20, %s360_s20  }
  0x4c   : >> { %763 = vmatprep.mubr.f32.mxu0 %v5150_v19  ;;  %908 = vmatprep.mubr.f32.mxu1 %v5151_v21  ;;  %s4403_s23 = scalar_lea.vmem %s3827_s12, %s2620_s22  ;;  %s3684_s25 = smov 126   ;;  %v5153_v17 = vld [vmem:[#allocation19_spill] sm:$0xff]  ;;  %v5156_v20 = vld [vmem:[#allocation22_spill] sm:$0xff]  ;;  %v5157_v27 = vld [vmem:[#allocation29_spill] sm:$0xff]  ;;  %vm1352_vm1 = vcmask 1040384   ;;  %vm3687_vm2 = vmmov 1  }
  0x4d   : >> { %v364_v30 = vld [vmem:[%s4403_s23] sm:$0xff]  ;;  %v365_v29 = vld [vmem:[%s4403_s23 + $0x8] sm:$0xff]  ;;  %v4413_v21 = vld [vmem:[%s4403_s23 + $0x70] sm:$0xff]  ;;  %s3685_s26 = smov 125   ;;  %s3686_s27 = smov 124   ;;  %vm1327_vm4 = vcmask 859136  }
  0x4e   : >> { %v4408_v31 = vld [vmem:[%s4403_s23 + $0x20] sm:$0xff]  ;;  %v4410_v19 = vpack.i.bf16 %v365_v29, %v364_v30  ;;  %v366_v36 = vld [vmem:[%s4403_s23 + $0x10] sm:$0xff]  ;;  %v367_v58 = vld [vmem:[%s4403_s23 + $0x18] sm:$0xff]  ;;  %v3171_v62 = vpack.c.bf16 %v365_v29, %v364_v30  ;;  %s2619_s29 = sshll.u32 %s3681_s20, 4  ;;  %vm1502_vm5 = vcmask 433152   ;;  %s360_s20 = sadd.s32 1, %s3681_s20  }
  0x4f   : >> { %v4419_v9 = vpack.i.bf16 %v4413_v21, %v4408_v31  ;;  %v4422_v22 = vld [vmem:[%s4403_s23 + $0x78] sm:$0xff]  ;;  %v4425_v45 = vld [vmem:[%s4403_s23 + $0x80] sm:$0xff]  ;;  %v3412_v23 = vpack.i.bf16 %v367_v58, %v366_v36  ;;  %v4434_v1 = vld [vmem:[%s4403_s23 + $0x88] sm:$0xff]  ;;  %v3179_v55 = vpack.c.bf16 %v4413_v21, %v4408_v31  ;;  %v3175_v3 = vpack.c.bf16 %v367_v58, %v366_v36  ;;  %s1501_s30 = scalar_lea.vmem %s3847_s21, %s2619_s29  ;;  %p357_p4 = scmp.ge.s32.totalorder %s360_s20, 3  }
  0x50   : >> { %3408 = vrot.lane.b32.xlu0 %v4410_v19, %s3683_s24  ;;  %v3422_v2 = vpack.i.bf16 %v4425_v45, %v4422_v22  ;;  %v4437_v50 = vld [vmem:[%s4403_s23 + $0x90] sm:$0xff]  ;;  %v4446_v15 = vld [vmem:[%s4403_s23 + $0xf8] sm:$0xff]  ;;  %v4450_v18 = vld [vmem:[%s4403_s23 + $0xe0] sm:$0xff]  ;;  %vm1557_vm6 = vcmask (%p357_p4), 1041408   ;;  %vm1539_vm7 = vcmask (%p357_p4), 1045504   ;;  %vm1548_vm8 = vcmask (%p357_p4), 1043456  }
  0x51   : >> { %3418 = vrot.lane.b32.xlu1 %v4419_v9, %s3683_s24  ;;  %v3427_v52 = vpack.i.bf16 %v4437_v50, %v4434_v1  ;;  %v4443_v44 = vld [vmem:[%s4403_s23 + $0xf0] sm:$0xff]  ;;  %v4453_v59 = vld [vmem:[%s4403_s23 + $0xe8] sm:$0xff]  ;;  %v2635_v37 = vld [vmem:[%s4403_s23 + $0x158] sm:$0xff]  ;;  %s3688_s6 = smov (%p357_p4), 126   ;;  %s3689_s28 = smov (%p357_p4), 125   ;;  %vm3693_vm9 = vmmov (%p357_p4), 0  }
  0x52   : >> { %v2636_v5 = vld [vmem:[%s4403_s23 + $0x160] sm:$0xff]  ;;  %v3437_v51 = vpack.i.bf16 %v4446_v15, %v4443_v44  ;;  %v2637_v4 = vld [vmem:[%s4403_s23 + $0x168] sm:$0xff]  ;;  %v2638_v43 = vld [vmem:[%s4403_s23 + $0x170] sm:$0xff]  ;;  %v3442_v11 = vpack.i.bf16 %v4453_v59, %v4450_v18  ;;  %v3195_v29 = vpack.c.bf16 %v4446_v15, %v4443_v44  ;;  %s3692_s7 = smov (%p357_p4), 124   ;;  %vm1654_vm10 = vcmask (%p357_p4), 195584  }
  0x53   : >> { %v3597_v12 = vpack.i.bf16 %v2636_v5, %v2635_v37  ;;  %v3169_v16 = vpack.c.bf16 %v2636_v5, %v2635_v37  ;;  %v3602_v57 = vpack.i.bf16 %v2638_v43, %v2637_v4  ;;  %v3173_v10 = vpack.c.bf16 %v2638_v43, %v2637_v4  ;;  %v4466_v63 = vld [vmem:[%s4403_s23 + $0x100] sm:$0xff]  ;;  %v4469_v24 = vld [vmem:[%s4403_s23 + $0x150] sm:$0xff]  ;;  %v5155_v25 = vld [vmem:[#allocation27_spill] sm:$0xff] }
  0x54   : >> { %3413 = vrot.lane.b32.xlu0 %v3412_v23, %s3683_s24  ;;  %v3183_v5 = vpack.c.bf16 %v4425_v45, %v4422_v22  ;;  %v3187_v37 = vpack.c.bf16 %v4437_v50, %v4434_v1  ;;  %v3191_v4 = vpack.c.bf16 %v4453_v59, %v4450_v18  ;;  %v3452_v21 = vpack.i.bf16 %v4469_v24, %v4466_v63  ;;  %v5158_v13 = vld [vmem:[#allocation52_spill] sm:$0xff]  ;;  %v5159_v14 = vld [vmem:[#allocation51_spill] sm:$0xff]  ;;  %v5161_v7 = vld [vmem:[#allocation58_spill] sm:$0xff] }
  0x55   : >> { %3423 = vrot.lane.b32.xlu1 %v3422_v2, %s3683_s24  ;;  %3170 = vmatprep.subr.bf16.mxu0 %v3169_v16  ;;  %v5160_v6 = vld [vmem:[#allocation59_spill] sm:$0xff]  ;;  %v5162_v8 = vld [vmem:[#allocation66_spill] sm:$0xff]  ;;  %v5163_v0 = vld [vmem:[#allocation65_spill] sm:$0xff]  ;;  %vm2534_vm11 = vcmask (%p357_p4), 430080  }
  0x56   : >> { %3172 = vmatpush3.bf16.msra.mxu0 %v3171_v62  ;;  %vm4727_vm3 = vmpackc.low %vm1352_vm1, %vm3687_vm2 }
  0x57   : >> { %3174 = vmatprep.subr.bf16.mxu0 %v3173_v10 }
  0x58   : >> { %3428 = vrot.lane.b32.xlu0 %v3427_v52, %s3684_s25 }
  0x59   : >> { %3433 = vrot.lane.b32.xlu1 %v3427_v52, %s3683_s24 }
  0x5a   : >> { %3176 = vmatpush3.bf16.msra.mxu0 %v3175_v3 }
  0x5c   : >> { %3438 = vrot.lane.b32.xlu0 %v3437_v51, %s3683_s24 }
  0x5d   : >> { %3443 = vrot.lane.b32.xlu1 %v3442_v11, %s3684_s25 }
  0x60   : >> { %3448 = vrot.lane.b32.xlu0 %v3442_v11, %s3683_s24 }
  0x61   : >> { %3453 = vrot.lane.b32.xlu1 %v3452_v21, %s3683_s24 }
  0x64   : >> { %3458 = vrot.lane.b32.xlu0 %v3437_v51, %s3684_s25 }
  0x65   : >> { %3463 = vrot.lane.b32.xlu1 %v3597_v12, %s3683_s24 }
  0x68   : >> { %3468 = vrot.lane.b32.xlu0 %v3452_v21, %s3684_s25 }
  0x69   : >> { %3473 = vrot.lane.b32.xlu1 %v3602_v57, %s3683_s24 }
  0x6c   : >> { %3478 = vrot.lane.b32.xlu0 %v3597_v12, %s3684_s25 }
  0x6d   : >> { %3483 = vrot.lane.b32.xlu1 %v4410_v19, %s3684_s25 }
  0x70   : >> { %3488 = vrot.lane.b32.xlu0 %v3602_v57, %s3684_s25 }
  0x71   : >> { %3493 = vrot.lane.b32.xlu1 %v3412_v23, %s3684_s25 }
  0x74   : >> { %3498 = vrot.lane.b32.xlu0 %v4410_v19, %s3685_s26 }
  0x75   : >> { %3503 = vrot.lane.b32.xlu1 %v4419_v9, %s3684_s25 }
  0x78   : >> { %3508 = vrot.lane.b32.xlu0 %v3412_v23, %s3685_s26 }
  0x79   : >> { %3513 = vrot.lane.b32.xlu1 %v3422_v2, %s3684_s25 }
  0x7c   : >> { %3518 = vrot.lane.b32.xlu0 %v4410_v19, %s3686_s27 }
  0x7d   : >> { %3523 = vrot.lane.b32.xlu1 %v4419_v9, %s3685_s26 }
  0x80   : >> { %3528 = vrot.lane.b32.xlu0 %v3412_v23, %s3686_s27 }
  0x81   : >> { %3533 = vrot.lane.b32.xlu1 %v3422_v2, %s3685_s26 }
  0x84   : >> { %3538 = vrot.lane.b32.xlu0 %v4419_v9, %s3686_s27 }
  0x85   : >> { %3543 = vrot.lane.b32.xlu1 %v3427_v52, %s3685_s26 }
  0x88   : >> { %3548 = vrot.lane.b32.xlu0 %v3422_v2, %s3686_s27 }
  0x89   : >> { %3553 = vrot.lane.b32.xlu1 %v3442_v11, %s3685_s26 }
  0x8c   : >> { %3558 = vrot.lane.b32.xlu0 %v3427_v52, %s3686_s27 }
  0x8d   : >> { %3563 = vrot.lane.b32.xlu1 %v3437_v51, %s3685_s26 }
  0x90   : >> { %3568 = vrot.lane.b32.xlu0 %v3442_v11, %s3686_s27 }
  0x91   : >> { %3573 = vrot.lane.b32.xlu1 %v3452_v21, %s3685_s26 }
  0x94   : >> { %3578 = vrot.lane.b32.xlu0 %v3437_v51, %s3686_s27 }
  0x95   : >> { %3583 = vrot.lane.b32.xlu1 %v3597_v12, %s3685_s26 }
  0x98   : >> { %3588 = vrot.lane.b32.xlu0 %v3452_v21, %s3686_s27 }
  0x99   : >> { %3593 = vrot.lane.b32.xlu1 %v3602_v57, %s3685_s26 }
  0x9c   : >> { %3598 = vrot.lane.b32.xlu0 %v3597_v12, %s3686_s27 }
  0x9d   : >> { %3603 = vrot.lane.b32.xlu1 %v3602_v57, %s3686_s27 }
  0xc2   : >> { %v3409_v3 = vpop.permute.xlu0 %3408 }
  0xc3   : >> { %v3411_v10 = vunpack.i.h.bf16 %v3409_v3  ;;  %v3410_v19 = vunpack.i.l.bf16 %v3409_v3  ;;  %v3419_v23 = vpop.permute.xlu1 %3418 }
  0xc4   : >> { %v3421_v9 = vunpack.i.h.bf16 %v3419_v23  ;;  %v3420_v36 = vunpack.i.l.bf16 %v3419_v23 }
  0xc5   : >> { %v3177_v30 = vpack.c.bf16 %v3411_v10, %v3410_v19 }
  0xc6   : >> { %v3414_v31 = vpop.permute.xlu0 %3413  ;;  %v3185_v21 = vpack.c.bf16 %v3421_v9, %v3420_v36 }
  0xc7   : >> { %v3416_v2 = vunpack.i.h.bf16 %v3414_v31  ;;  %v3415_v43 = vunpack.i.l.bf16 %v3414_v31  ;;  %v3424_v52 = vpop.permute.xlu1 %3423  ;;  %3178 = vmatprep.subr.bf16.mxu0 %v3177_v30 }
  0xc8   : >> { %3180 = vmatpush3.bf16.msra.mxu0 %v3179_v55  ;;  %v3426_v51 = vunpack.i.h.bf16 %v3424_v52  ;;  %v3425_v58 = vunpack.i.l.bf16 %v3424_v52 }
  0xc9   : >> { %v3181_v11 = vpack.c.bf16 %v3416_v2, %v3415_v43 }
  0xca   : >> { %v3429_v62 = vpop.permute.xlu0 %3428  ;;  %v3189_v10 = vpack.c.bf16 %v3426_v51, %v3425_v58 }
  0xcb   : >> { %v3431_v12 = vunpack.i.h.bf16 %v3429_v62  ;;  %v3430_v57 = vunpack.i.l.bf16 %v3429_v62  ;;  %v3434_v16 = vpop.permute.xlu1 %3433  ;;  %3182 = vmatprep.subr.bf16.mxu0 %v3181_v11 }
  0xcc   : >> { %3184 = vmatpush3.bf16.msra.mxu0 %v3183_v5  ;;  %v3436_v23 = vunpack.i.h.bf16 %v3434_v16  ;;  %v3435_v30 = vunpack.i.l.bf16 %v3434_v16 }
  0xcd   : >> { %3186 = vmatprep.subr.bf16.mxu0 %v3185_v21  ;;  %v3201_v3 = vpack.c.bf16 %v3431_v12, %v3430_v57 }
  0xce   : >> { %v3439_v19 = vpop.permute.xlu0 %3438  ;;  %v3193_v5 = vpack.c.bf16 %v3436_v23, %v3435_v30 }
  0xcf   : >> { %v3441_v55 = vunpack.i.h.bf16 %v3439_v19  ;;  %v3440_v31 = vunpack.i.l.bf16 %v3439_v19  ;;  %v3444_v2 = vpop.permute.xlu1 %3443  ;;  %3202 = vmatprep.subr.bf16.mxu1 %v3201_v3 }
  0xd0   : >> { %v3446_v43 = vunpack.i.h.bf16 %v3444_v2  ;;  %v3445_v9 = vunpack.i.l.bf16 %v3444_v2  ;;  %3188 = vmatpush3.bf16.msra.mxu0 %v3187_v37 }
  0xd1   : >> { %3190 = vmatprep.subr.bf16.mxu0 %v3189_v10  ;;  %v3203_v36 = vpack.c.bf16 %v3441_v55, %v3440_v31  ;;  %v5152_v31 = vpack.c.bf16 %v4469_v24, %v4466_v63 }
  0xd2   : >> { %v3205_v22 = vpack.c.bf16 %v3446_v43, %v3445_v9  ;;  %v3449_v45 = vpop.permute.xlu0 %3448 }
  0xd3   : >> { %v3451_v52 = vunpack.i.h.bf16 %v3449_v45  ;;  %v3450_v11 = vunpack.i.l.bf16 %v3449_v45  ;;  %v3454_v51 = vpop.permute.xlu1 %3453  ;;  %3204 = vmatpush3.bf16.msra.mxu1 %v3203_v36 }
  0xd4   : >> { %v3456_v16 = vunpack.i.h.bf16 %v3454_v51  ;;  %v3455_v58 = vunpack.i.l.bf16 %v3454_v51  ;;  %3192 = vmatpush3.bf16.msra.mxu0 %v3191_v4  ;;  %3206 = vmatprep.subr.bf16.mxu1 %v3205_v22 }
  0xd5   : >> { %v3197_v62 = vpack.c.bf16 %v3451_v52, %v3450_v11  ;;  %3194 = vmatprep.subr.bf16.mxu0 %v3193_v5 }
  0xd6   : >> { %v3207_v1 = vpack.c.bf16 %v3456_v16, %v3455_v58  ;;  %v3459_v50 = vpop.permute.xlu0 %3458 }
  0xd7   : >> { %v3461_v37 = vunpack.i.h.bf16 %v3459_v50  ;;  %v3460_v21 = vunpack.i.l.bf16 %v3459_v50  ;;  %v3464_v12 = vpop.permute.xlu1 %3463 }
  0xd8   : >> { %v3466_v57 = vunpack.i.h.bf16 %v3464_v12  ;;  %v3465_v3 = vunpack.i.l.bf16 %v3464_v12  ;;  %3196 = vmatpush3.bf16.msra.mxu0 %v3195_v29  ;;  %3208 = vmatpush3.bf16.msra.mxu1 %v3207_v1 }
  0xd9   : >> { %v3209_v10 = vpack.c.bf16 %v3461_v37, %v3460_v21  ;;  %3198 = vmatprep.subr.bf16.mxu0 %v3197_v62 }
  0xda   : >> { %v3211_v19 = vpack.c.bf16 %v3466_v57, %v3465_v3  ;;  %v3469_v18 = vpop.permute.xlu0 %3468 }
  0xdb   : >> { %v3471_v59 = vunpack.i.h.bf16 %v3469_v18  ;;  %v3470_v4 = vunpack.i.l.bf16 %v3469_v18  ;;  %v3474_v23 = vpop.permute.xlu1 %3473  ;;  %3210 = vmatprep.subr.bf16.mxu1 %v3209_v10 }
  0xdc   : >> { %v3476_v30 = vunpack.i.h.bf16 %v3474_v23  ;;  %v3475_v55 = vunpack.i.l.bf16 %v3474_v23  ;;  %3200 = vmatpush3.bf16.msra.mxu0 %v5152_v31  ;;  %3212 = vmatpush3.bf16.msra.mxu1 %v3211_v19 }
  0xdd   : >> { %v3213_v2 = vpack.c.bf16 %v3471_v59, %v3470_v4 }
  0xde   : >> { %v3215_v43 = vpack.c.bf16 %v3476_v30, %v3475_v55  ;;  %v3479_v15 = vpop.permute.xlu0 %3478 }
  0xdf   : >> { %v3481_v44 = vunpack.i.h.bf16 %v3479_v15  ;;  %v3480_v29 = vunpack.i.l.bf16 %v3479_v15  ;;  %v3484_v9 = vpop.permute.xlu1 %3483  ;;  %764 = vmatmul.mubr.f32.vlgmr.msra.gmra.mrb[0].mxu0 %v5153_v17  ;;  %3214 = vmatprep.subr.bf16.mxu1 %v3213_v2 }
  0xe0   : >> { %v3486_v36 = vunpack.i.h.bf16 %v3484_v9  ;;  %v3485_v22 = vunpack.i.l.bf16 %v3484_v9  ;;  %3216 = vmatpush3.bf16.msra.mxu1 %v3215_v43  ;;  %768 = vmatprep.mubr.f32.mxu0 %v5154_v26 }
  0xe1   : >> { %v3217_v45 = vpack.c.bf16 %v3481_v44, %v3480_v29 }
  0xe2   : >> { %v3219_v5 = vpack.c.bf16 %v3486_v36, %v3485_v22  ;;  %v3489_v52 = vpop.permute.xlu0 %3488 }
  0xe3   : >> { %v3491_v24 = vunpack.i.h.bf16 %v3489_v52  ;;  %v3490_v63 = vunpack.i.l.bf16 %v3489_v52  ;;  %v3494_v11 = vpop.permute.xlu1 %3493  ;;  %769 = vmatmul.mubr.f32.gmra.mrb[2].mxu0 %v5155_v25  ;;  %3218 = vmatprep.subr.bf16.mxu1 %v3217_v45 }
  0xe4   : >> { %v3496_v51 = vunpack.i.h.bf16 %v3494_v11  ;;  %v3495_v16 = vunpack.i.l.bf16 %v3494_v11  ;;  %3220 = vmatpush3.bf16.msra.mxu1 %v3219_v5  ;;  %773 = vmatprep.mubr.f32.mxu0 %v3912_v33 }
  0xe5   : >> { %v3221_v58 = vpack.c.bf16 %v3491_v24, %v3490_v63 }
  0xe6   : >> { %v3223_v62 = vpack.c.bf16 %v3496_v51, %v3495_v16  ;;  %v3499_v1 = vpop.permute.xlu0 %3498 }
  0xe7   : >> { %v3501_v50 = vunpack.i.h.bf16 %v3499_v1  ;;  %v3500_v37 = vunpack.i.l.bf16 %v3499_v1  ;;  %v3504_v21 = vpop.permute.xlu1 %3503  ;;  %774 = vmatmul.mubr.f32.gmra.mrb[4].mxu0 %v3907_v32  ;;  %3222 = vmatprep.subr.bf16.mxu1 %v3221_v58  ;;  %v1526_v32 = vld [vmem:[%s3827_s12 + $0x60] sm:$0xff] (%p357_p4) }
  0xe8   : >> { %v3506_v12 = vunpack.i.h.bf16 %v3504_v21  ;;  %v3505_v57 = vunpack.i.l.bf16 %v3504_v21  ;;  %3224 = vmatpush3.bf16.msra.mxu1 %v3223_v62  ;;  %778 = vmatprep.mubr.f32.mxu0 %v3947_v40 }
  0xe9   : >> { %v3225_v3 = vpack.c.bf16 %v3501_v50, %v3500_v37 }
  0xea   : >> { %v3227_v10 = vpack.c.bf16 %v3506_v12, %v3505_v57  ;;  %v3509_v19 = vpop.permute.xlu0 %3508 }
  0xeb   : >> { %v3511_v18 = vunpack.i.h.bf16 %v3509_v19  ;;  %v3510_v59 = vunpack.i.l.bf16 %v3509_v19  ;;  %v3514_v4 = vpop.permute.xlu1 %3513  ;;  %779 = vmatmul.mubr.f32.gmra.mrb[6].mxu0 %v3942_v39  ;;  %3226 = vmatprep.subr.bf16.mxu1 %v3225_v3 }
  0xec   : >> { %v3516_v23 = vunpack.i.h.bf16 %v3514_v4  ;;  %v3515_v30 = vunpack.i.l.bf16 %v3514_v4  ;;  %3228 = vmatpush3.bf16.msra.mxu1 %v3227_v10  ;;  %783 = vmatprep.mubr.f32.mxu0 %v3982_v47 }
  0xed   : >> { %v3229_v55 = vpack.c.bf16 %v3511_v18, %v3510_v59 }
  0xee   : >> { %v3231_v31 = vpack.c.bf16 %v3516_v23, %v3515_v30  ;;  %v3519_v2 = vpop.permute.xlu0 %3518 }
  0xef   : >> { %v3521_v43 = vunpack.i.h.bf16 %v3519_v2  ;;  %v3520_v15 = vunpack.i.l.bf16 %v3519_v2  ;;  %v3524_v44 = vpop.permute.xlu1 %3523  ;;  %784 = vmatmul.mubr.f32.gmra.mrb[8].mxu0 %v3977_v46  ;;  %3230 = vmatprep.subr.bf16.mxu1 %v3229_v55 }
  0xf0   : >> { %v3526_v29 = vunpack.i.h.bf16 %v3524_v44  ;;  %v3525_v9 = vunpack.i.l.bf16 %v3524_v44  ;;  %3232 = vmatpush3.bf16.msra.mxu1 %v3231_v31  ;;  %788 = vmatprep.mubr.f32.mxu0 %v4017_v54 }
  0xf1   : >> { %v3233_v36 = vpack.c.bf16 %v3521_v43, %v3520_v15 }
  0xf2   : >> { %v3235_v22 = vpack.c.bf16 %v3526_v29, %v3525_v9  ;;  %v3529_v45 = vpop.permute.xlu0 %3528 }
  0xf3   : >> { %789 = vmatmul.mubr.f32.gmra.mrb[10].mxu0 %v4012_v53  ;;  %909 = vmatmul.mubr.f32.vlgmr.msra.gmra.mrb[0].mxu1 %v5156_v20  ;;  %v3531_v5 = vunpack.i.h.bf16 %v3529_v45  ;;  %v3530_v52 = vunpack.i.l.bf16 %v3529_v45  ;;  %v3534_v24 = vpop.permute.xlu1 %3533 }
  0xf4   : >> { %3234 = vmatprep.subr.bf16.mxu0 %v3233_v36  ;;  %3360 = vmatprep.subr.bf16.mxu1 %v3233_v36  ;;  %v3536_v63 = vunpack.i.h.bf16 %v3534_v24  ;;  %v3535_v11 = vunpack.i.l.bf16 %v3534_v24 }
  0xf5   : >> { %3236 = vmatpush3.bf16.msra.mxu0 %v3235_v22  ;;  %3368 = vmatpush3.bf16.msra.mxu1 %v3235_v22  ;;  %v3237_v51 = vpack.c.bf16 %v3531_v5, %v3530_v52 }
  0xf6   : >> { %793 = vmatprep.mubr.f32.mxu0 %v4052_v61  ;;  %913 = vmatprep.mubr.f32.mxu1 %v3887_v28  ;;  %v3239_v16 = vpack.c.bf16 %v3536_v63, %v3535_v11  ;;  %v3539_v58 = vpop.permute.xlu0 %3538  ;;  %v1512_v61 = vld [vmem:[%s5027_s2 + $0x8] sm:$0xff] (%p357_p4) }
  0xf7   : >> { %794 = vmatmul.mubr.f32.gmra.mrb[12].mxu0 %v4047_v60  ;;  %914 = vmatmul.mubr.f32.gmra.mrb[2].mxu1 %v5157_v27  ;;  %v3541_v62 = vunpack.i.h.bf16 %v3539_v58  ;;  %v3540_v1 = vunpack.i.l.bf16 %v3539_v58  ;;  %v3544_v50 = vpop.permute.xlu1 %3543  ;;  %v5165_v58 = vld [vmem:[#allocation42_spill] sm:$0xff]  ;;  %v3691_v60 = vmov (%p357_p4), 0.0|0.0  }
  0xf8   : >> { %798 = vmatprep.mubr.f32.mxu0 %v5158_v13  ;;  %918 = vmatprep.mubr.f32.mxu1 %v3922_v35  ;;  %v3546_v37 = vunpack.i.h.bf16 %v3544_v50  ;;  %v3545_v21 = vunpack.i.l.bf16 %v3544_v50  ;;  %v2667_v35 = vld [vmem:[%s3827_s12 + $0x148] sm:$0x3f] (%p357_p4) }
  0xf9   : >> { %3238 = vmatprep.subr.bf16.mxu0 %v3237_v51  ;;  %3361 = vmatprep.subr.bf16.mxu1 %v3237_v51  ;;  %v3241_v12 = vpack.c.bf16 %v3541_v62, %v3540_v1 }
  0xfa   : >> { %3240 = vmatpush3.bf16.msra.mxu0 %v3239_v16  ;;  %3369 = vmatpush3.bf16.msra.mxu1 %v3239_v16  ;;  %v3243_v57 = vpack.c.bf16 %v3546_v37, %v3545_v21  ;;  %v3549_v3 = vpop.permute.xlu0 %3548  ;;  %v5164_v16 = vld [vmem:[#allocation72_spill] sm:$0xff]  ;;  %v5166_v37 = vld [vmem:[#allocation79_spill] sm:$0xff] }
  0xfb   : >> { %799 = vmatmul.mubr.f32.gmra.mrb[14].mxu0 %v5159_v14  ;;  %919 = vmatmul.mubr.f32.gmra.mrb[4].mxu1 %v3917_v34  ;;  %v3551_v10 = vunpack.i.h.bf16 %v3549_v3  ;;  %v3550_v19 = vunpack.i.l.bf16 %v3549_v3  ;;  %v3554_v18 = vpop.permute.xlu1 %3553  ;;  %v5167_v21 = vld [vmem:[#allocation47_spill] sm:$0xff] }
  0xfc   : >> { %803 = vmatprep.mubr.f32.mxu0 %v5160_v6  ;;  %923 = vmatprep.mubr.f32.mxu1 %v3957_v42  ;;  %v3556_v59 = vunpack.i.h.bf16 %v3554_v18  ;;  %v3555_v4 = vunpack.i.l.bf16 %v3554_v18  ;;  %v5168_v18 = vld [vmem:[#allocation78_spill] sm:$0xff]  ;;  %v1527_v34 = vld [vmem:[%s3827_s12 + $0x68] sm:$0x3f] (%p357_p4) }
  0xfd   : >> { %3242 = vmatprep.subr.bf16.mxu0 %v3241_v12  ;;  %3362 = vmatprep.subr.bf16.mxu1 %v3241_v12  ;;  %v3245_v23 = vpack.c.bf16 %v3551_v10, %v3550_v19 }
  0xfe   : >> { %3244 = vmatpush3.bf16.msra.mxu0 %v3243_v57  ;;  %3370 = vmatpush3.bf16.msra.mxu1 %v3243_v57  ;;  %v3247_v30 = vpack.c.bf16 %v3556_v59, %v3555_v4  ;;  %v3559_v55 = vpop.permute.xlu0 %3558  ;;  %v5169_v59 = vld [vmem:[#allocation46_spill] sm:$0xff] }
  0xff   : >> { %804 = vmatmul.mubr.f32.gmra.mrb[16].mxu0 %v5161_v7  ;;  %924 = vmatmul.mubr.f32.gmra.mrb[6].mxu1 %v3952_v41  ;;  %v3561_v31 = vunpack.i.h.bf16 %v3559_v55  ;;  %v3560_v2 = vunpack.i.l.bf16 %v3559_v55  ;;  %v3564_v43 = vpop.permute.xlu1 %3563  ;;  %v5170_v55 = vld [vmem:[#allocation86_spill] sm:$0xff]  ;;  %v1550_v41 = vrot.slane (%p357_p4), %v2667_v35, 4 }
 0x100   : >> { %808 = vmatprep.mubr.f32.mxu0 %v5162_v8  ;;  %928 = vmatprep.mubr.f32.mxu1 %v3992_v49  ;;  %v3566_v15 = vunpack.i.h.bf16 %v3564_v43  ;;  %v3565_v44 = vunpack.i.l.bf16 %v3564_v43 }
 0x101   : >> { %v3249_v29 = vpack.c.bf16 %v3561_v31, %v3560_v2  ;;  %3246 = vmatprep.subr.bf16.mxu0 %v3245_v23  ;;  %3363 = vmatprep.subr.bf16.mxu1 %v3245_v23  ;;  %v5171_v31 = vld [vmem:[#allocation54_spill] sm:$0xff] }
 0x102   : >> { %v3251_v9 = vpack.c.bf16 %v3566_v15, %v3565_v44  ;;  %3248 = vmatpush3.bf16.msra.mxu0 %v3247_v30  ;;  %3371 = vmatpush3.bf16.msra.mxu1 %v3247_v30  ;;  %v3569_v36 = vpop.permute.xlu0 %3568 }
 0x103   : >> { %809 = vmatmul.mubr.f32.gmra.mrb[18].mxu0 %v5163_v0  ;;  %929 = vmatmul.mubr.f32.gmra.mrb[8].mxu1 %v3987_v48  ;;  %v3571_v22 = vunpack.i.h.bf16 %v3569_v36  ;;  %v3570_v45 = vunpack.i.l.bf16 %v3569_v36  ;;  %v3574_v5 = vpop.permute.xlu1 %3573  ;;  %v5173_v36 = vld [vmem:[#allocation53_spill] sm:$0xff] }
 0x104   : >> { %813 = vmatprep.mubr.f32.mxu0 %v4192_v38  ;;  %933 = vmatprep.mubr.f32.mxu1 %v4027_v56  ;;  %v3576_v52 = vunpack.i.h.bf16 %v3574_v5  ;;  %v3575_v24 = vunpack.i.l.bf16 %v3574_v5  ;;  %v5174_v5 = vld [vmem:[#allocation93_spill] sm:$0xff] }
 0x105   : >> { %v3253_v63 = vpack.c.bf16 %v3571_v22, %v3570_v45  ;;  %3250 = vmatprep.subr.bf16.mxu0 %v3249_v29  ;;  %3364 = vmatprep.subr.bf16.mxu1 %v3249_v29 }
 0x106   : >> { %v3255_v11 = vpack.c.bf16 %v3576_v52, %v3575_v24  ;;  %3252 = vmatpush3.bf16.msra.mxu0 %v3251_v9  ;;  %v3579_v51 = vpop.permute.xlu0 %3578  ;;  %3372 = vmatpush3.bf16.msra.mxu1 %v3251_v9  ;;  %v5172_v9 = vld [vmem:[#allocation85_spill] sm:$0xff] }
 0x107   : >> { %814 = vmatmul.mubr.f32.gmra.mrb[20].mxu0 %v5164_v16  ;;  %934 = vmatmul.mubr.f32.gmra.mrb[10].mxu1 %v5165_v58  ;;  %v3581_v62 = vunpack.i.h.bf16 %v3579_v51  ;;  %v3580_v1 = vunpack.i.l.bf16 %v3579_v51  ;;  %v3584_v50 = vpop.permute.xlu1 %3583  ;;  %v5175_v52 = vld [vmem:[#allocation61_spill] sm:$0xff]  ;;  %v5178_v51 = vld [vmem:[#allocation100_spill] sm:$0xff]  ;;  %v5180_v58 = vld [vmem:[#allocation99_spill] sm:$0xff] }
 0x108   : >> { %818 = vmatprep.mubr.f32.mxu0 %v5166_v37  ;;  %938 = vmatprep.mubr.f32.mxu1 %v5167_v21  ;;  %v3586_v12 = vunpack.i.h.bf16 %v3584_v50  ;;  %v3585_v57 = vunpack.i.l.bf16 %v3584_v50  ;;  %v5179_v16 = vld [vmem:[#allocation68_spill] sm:$0xff]  ;;  %v5183_v50 = vld [vmem:[#allocation74_spill] sm:$0xff]  ;;  %v5185_v21 = vld [vmem:[#allocation73_spill] sm:$0xff] }
 0x109   : >> { %v3257_v3 = vpack.c.bf16 %v3581_v62, %v3580_v1  ;;  %3254 = vmatprep.subr.bf16.mxu0 %v3253_v63  ;;  %3365 = vmatprep.subr.bf16.mxu1 %v3253_v63  ;;  %v5176_v63 = vld [vmem:[#allocation92_spill] sm:$0xff]  ;;  %v5181_v62 = vld [vmem:[#allocation67_spill] sm:$0xff]  ;;  %v5184_v37 = vld [vmem:[#allocation106_spill] sm:$0xff] }
 0x10a   : >> { %v3259_v10 = vpack.c.bf16 %v3586_v12, %v3585_v57  ;;  %3256 = vmatpush3.bf16.msra.mxu0 %v3255_v11  ;;  %v3589_v19 = vpop.permute.xlu0 %3588  ;;  %3373 = vmatpush3.bf16.msra.mxu1 %v3255_v11  ;;  %v5177_v11 = vld [vmem:[#allocation60_spill] sm:$0xff]  ;;  %v5182_v1 = vld [vmem:[#allocation107_spill] sm:$0xff]  ;;  %v5186_v12 = vld [vmem:[#allocation81_spill] sm:$0xff] }
 0x10b   : >> { %819 = vmatmul.mubr.f32.gmra.mrb[22].mxu0 %v5168_v18  ;;  %939 = vmatmul.mubr.f32.gmra.mrb[12].mxu1 %v5169_v59  ;;  %v3591_v4 = vunpack.i.h.bf16 %v3589_v19  ;;  %v3590_v23 = vunpack.i.l.bf16 %v3589_v19  ;;  %v3594_v30 = vpop.permute.xlu1 %3593  ;;  %v5187_v57 = vld [vmem:[#allocation25_spill] sm:$0xff]  ;;  %v5190_v19 = vld [vmem:[#allocation88_spill] sm:$0xff]  ;;  %v5191_v18 = vld [vmem:[#allocation31_spill] sm:$0xff] }
 0x10c   : >> { %823 = vmatprep.mubr.f32.mxu0 %v5170_v55  ;;  %943 = vmatprep.mubr.f32.mxu1 %v5171_v31  ;;  %v3596_v2 = vunpack.i.h.bf16 %v3594_v30  ;;  %v3595_v43 = vunpack.i.l.bf16 %v3594_v30  ;;  %v5192_v59 = vld [vmem:[#allocation87_spill] sm:$0xff]  ;;  %v5195_v30 = vld [vmem:[#allocation34_spill] sm:$0xff]  ;;  %v5197_v31 = vld [vmem:[#allocation33_spill] sm:$0xff] }
 0x10d   : >> { %v3261_v15 = vpack.c.bf16 %v3591_v4, %v3590_v23  ;;  %3258 = vmatprep.subr.bf16.mxu0 %v3257_v3  ;;  %3366 = vmatprep.subr.bf16.mxu1 %v3257_v3  ;;  %v5188_v3 = vld [vmem:[#allocation80_spill] sm:$0xff]  ;;  %v5193_v4 = vld [vmem:[#allocation30_spill] sm:$0xff]  ;;  %v5194_v23 = vld [vmem:[#allocation95_spill] sm:$0xff] }
 0x10e   : >> { %v3263_v44 = vpack.c.bf16 %v3596_v2, %v3595_v43  ;;  %3260 = vmatpush3.bf16.msra.mxu0 %v3259_v10  ;;  %3374 = vmatpush3.bf16.msra.mxu1 %v3259_v10  ;;  %v3599_v29 = vpop.permute.xlu0 %3598  ;;  %v5189_v10 = vld [vmem:[#allocation24_spill] sm:$0xff]  ;;  %v5196_v55 = vld [vmem:[#allocation94_spill] sm:$0xff]  ;;  %v5199_v43 = vld [vmem:[#allocation37_spill] sm:$0xff] }
 0x10f   : >> { %824 = vmatmul.mubr.f32.gmra.mrb[24].mxu0 %v5172_v9  ;;  %944 = vmatmul.mubr.f32.gmra.mrb[14].mxu1 %v5173_v36  ;;  %v3601_v22 = vunpack.i.h.bf16 %v3599_v29  ;;  %v3600_v45 = vunpack.i.l.bf16 %v3599_v29  ;;  %v5198_v2 = vld [vmem:[#allocation102_spill] sm:$0xff]  ;;  %v5201_v29 = vld [vmem:[#allocation36_spill] sm:$0xff]  ;;  %v5202_v9 = vld [vmem:[#allocation109_spill] sm:$0xff] }
 0x110   : >> { %828 = vmatprep.mubr.f32.mxu0 %v5174_v5  ;;  %948 = vmatprep.mubr.f32.mxu1 %v5175_v52  ;;  %v5203_v36 = vld [vmem:[#allocation40_spill] sm:$0xff]  ;;  %v5205_v52 = vld [vmem:[#allocation39_spill] sm:$0xff] }
 0x111   : >> { %3262 = vmatprep.subr.bf16.mxu0 %v3261_v15  ;;  %3367 = vmatprep.subr.bf16.mxu1 %v3261_v15  ;;  %v3265_v24 = vpack.c.bf16 %v3601_v22, %v3600_v45  ;;  %v3604_v15 = vpop.permute.xlu1 %3603  ;;  %v5204_v5 = vld [vmem:[#allocation108_spill] sm:$0xff] }
 0x112   : >> { %3264 = vmatpush3.bf16.msra.mxu0 %v3263_v44  ;;  %3375 = vmatpush3.bf16.msra.mxu1 %v3263_v44  ;;  %v5200_v44 = vld [vmem:[#allocation101_spill] sm:$0xff]  ;;  %v3606_v22 = vunpack.i.h.bf16 %v3604_v15  ;;  %v3605_v45 = vunpack.i.l.bf16 %v3604_v15  ;;  %v5230_v15 = vld [vmem:[#allocation83_spill] sm:$0xff] }
 0x113   : >> { %829 = vmatmul.mubr.f32.gmra.mrb[26].mxu0 %v5176_v63  ;;  %949 = vmatmul.mubr.f32.gmra.mrb[16].mxu1 %v5177_v11  ;;  %v5206_v63 = vld [vmem:[#allocation44_spill] sm:$0xff] }
 0x114   : >> { %833 = vmatprep.mubr.f32.mxu0 %v5178_v51  ;;  %953 = vmatprep.mubr.f32.mxu1 %v5179_v16  ;;  %v5207_v11 = vld [vmem:[#allocation104_spill] sm:$0xff]  ;;  %v3269_v51 = vpack.c.bf16 %v3606_v22, %v3605_v45  ;;  %v5208_v16 = vld [vmem:[#allocation43_spill] sm:$0xff]  ;;  %v5235_v22 = vld [vmem:[#allocation77_spill] sm:$0xff] }
 0x115   : >> { %3266 = vmatprep.subr.bf16.mxu1 %v3265_v24  ;;  %v5236_v45 = vld [vmem:[#allocation89_spill] sm:$0xff] }
 0x117   : >> { %834 = vmatmul.mubr.f32.gmra.mrb[28].mxu0 %v5180_v58  ;;  %954 = vmatmul.mubr.f32.gmra.mrb[18].mxu1 %v5181_v62  ;;  %v5209_v58 = vld [vmem:[#allocation103_spill] sm:$0xff]  ;;  %v5210_v62 = vld [vmem:[#allocation49_spill] sm:$0xff] }
 0x118   : >> { %838 = vmatprep.mubr.f32.mxu0 %v5182_v1  ;;  %958 = vmatprep.mubr.f32.mxu1 %v5183_v50  ;;  %v5211_v1 = vld [vmem:[#allocation111_spill] sm:$0xff]  ;;  %v5212_v50 = vld [vmem:[#allocation48_spill] sm:$0xff] }
 0x11b   : >> { %839 = vmatmul.mubr.f32.gmra.mrb[30].mxu0 %v5184_v37  ;;  %959 = vmatmul.mubr.f32.gmra.mrb[20].mxu1 %v5185_v21  ;;  %v5213_v37 = vld [vmem:[#allocation110_spill] sm:$0xff]  ;;  %v5214_v21 = vld [vmem:[#allocation56_spill] sm:$0xff] }
 0x11c   : >> { %963 = vmatprep.mubr.f32.mxu1 %v5186_v12  ;;  %1053 = vmatprep.mubr.f32.mxu0 %v5187_v57  ;;  %v5215_v12 = vld [vmem:[#allocation26_spill] sm:$0xff]  ;;  %v5216_v57 = vld [vmem:[#allocation55_spill] sm:$0xff] }
 0x11f   : >> { %964 = vmatmul.mubr.f32.gmra.mrb[22].mxu1 %v5188_v3  ;;  %1054 = vmatmul.mubr.f32.vlgmr.msra.gmra.mrb[32].mxu0 %v5189_v10  ;;  %v5217_v3 = vld [vmem:[#allocation32_spill] sm:$0xff]  ;;  %v5219_v10 = vld [vmem:[#allocation35_spill] sm:$0xff] }
 0x120   : >> { %968 = vmatprep.mubr.f32.mxu1 %v5190_v19  ;;  %1058 = vmatprep.mubr.f32.mxu0 %v5191_v18  ;;  %v5220_v19 = vld [vmem:[#allocation62_spill] sm:$0xff] }
 0x121   : >> { %v5221_v18 = vld [vmem:[#allocation38_spill] sm:$0xff] }
 0x123   : >> { %969 = vmatmul.mubr.f32.gmra.mrb[24].mxu1 %v5192_v59  ;;  %1059 = vmatmul.mubr.f32.gmra.mrb[34].mxu0 %v5193_v4  ;;  %v5222_v59 = vld [vmem:[#allocation70_spill] sm:$0xff]  ;;  %v5223_v4 = vld [vmem:[#allocation41_spill] sm:$0xff] }
 0x124   : >> { %973 = vmatprep.mubr.f32.mxu1 %v5194_v23  ;;  %1063 = vmatprep.mubr.f32.mxu0 %v5195_v30  ;;  %v5224_v23 = vld [vmem:[#allocation69_spill] sm:$0xff] }
 0x125   : >> { %v5225_v30 = vld [vmem:[#allocation45_spill] sm:$0xff] }
 0x127   : >> { %974 = vmatmul.mubr.f32.gmra.mrb[26].mxu1 %v5196_v55  ;;  %1064 = vmatmul.mubr.f32.gmra.mrb[36].mxu0 %v5197_v31  ;;  %v5226_v55 = vld [vmem:[#allocation76_spill] sm:$0xff]  ;;  %v5227_v31 = vld [vmem:[#allocation50_spill] sm:$0xff] }
 0x128   : >> { %978 = vmatprep.mubr.f32.mxu1 %v5198_v2  ;;  %1068 = vmatprep.mubr.f32.mxu0 %v5199_v43  ;;  %v5228_v2 = vld [vmem:[#allocation75_spill] sm:$0xff]  ;;  %v5229_v43 = vld [vmem:[#allocation57_spill] sm:$0xff] }
 0x12b   : >> { %979 = vmatmul.mubr.f32.gmra.mrb[28].mxu1 %v5200_v44  ;;  %1069 = vmatmul.mubr.f32.gmra.mrb[38].mxu0 %v5201_v29  ;;  %v5231_v44 = vld [vmem:[#allocation64_spill] sm:$0xff]  ;;  %v5232_v29 = vld [vmem:[#allocation82_spill] sm:$0xff] }
 0x12c   : >> { %983 = vmatprep.mubr.f32.mxu1 %v5202_v9  ;;  %1073 = vmatprep.mubr.f32.mxu0 %v5203_v36  ;;  %v5233_v9 = vld [vmem:[#allocation71_spill] sm:$0xff]  ;;  %v5234_v36 = vld [vmem:[#allocation90_spill] sm:$0xff] }
 0x12f   : >> { %984 = vmatmul.mubr.f32.gmra.mrb[30].mxu1 %v5204_v5  ;;  %1074 = vmatmul.mubr.f32.gmra.mrb[40].mxu0 %v5205_v52  ;;  %v5237_v5 = vld [vmem:[#allocation84_spill] sm:$0xff]  ;;  %v5238_v52 = vld [vmem:[#allocation97_spill] sm:$0xff] }
 0x130   : >> { %1078 = vmatprep.mubr.f32.mxu0 %v5206_v63  ;;  %1123 = vmatprep.mubr.f32.mxu1 %v5207_v11  ;;  %v5239_v63 = vld [vmem:[#allocation91_spill] sm:$0xff]  ;;  %v5240_v11 = vld [vmem:[#allocation96_spill] sm:$0xff] }
 0x133   : >> { %1079 = vmatmul.mubr.f32.gmra.mrb[42].mxu0 %v5208_v16  ;;  %1124 = vmatmul.mubr.f32.vlgmr.msra.gmra.mrb[32].mxu1 %v5209_v58  ;;  %v5242_v16 = vld [vmem:[#allocation105_spill] sm:$0xff]  ;;  %v5243_v58 = vld [vmem:[#allocation112_spill] sm:$0xff] }
 0x134   : >> { %3268 = vmatpush3.bf16.msra.mxu1 %v3265_v24  ;;  %1083 = vmatprep.mubr.f32.mxu0 %v5210_v62  ;;  %v5218_v24 = vld [vmem:[#allocation63_spill] sm:$0xff] }
 0x135   : >> { %1128 = vmatprep.mubr.f32.mxu1 %v5211_v1  ;;  %3270 = vmatprep.subr.bf16.mxu1 %v3269_v51 }
 0x137   : >> { %1084 = vmatmul.mubr.f32.gmra.mrb[44].mxu0 %v5212_v50  ;;  %1129 = vmatmul.mubr.f32.gmra.mrb[34].mxu1 %v5213_v37  ;;  %v5244_v37 = vld [vmem:[#allocation2_spill] sm:$0xff] }
 0x138   : >> { %3272 = vmatpush3.bf16.msra.mxu1 %v3269_v51  ;;  %1088 = vmatprep.mubr.f32.mxu0 %v5214_v21  ;;  %v5241_v51 = vld [vmem:[#allocation98_spill] sm:$0xff]  ;;  %v5245_v21 = vld [vmem:[#allocation3_spill] sm:$0xff] }
 0x139   : >> { %3047 = vmatprep.mubr.msk.f32.mxu1 %vm650_vm0, %v5215_v12  ;;  %v4648_v12 = vpack.c.bf16 %v5245_v21, %v5244_v37 }
 0x13b   : >> { %1089 = vmatmul.mubr.f32.gmra.mrb[46].mxu0 %v5216_v57  ;;  %3048 = vmatmul.mubr.msk.f32.vlgmr.msra.gmra.mrb[36].mxu1 %vm650_vm0, %v5217_v3  ;;  %v5246_v57 = vld [vmem:[#allocation4_spill] sm:$0xff]  ;;  %v5247_v3 = vld [vmem:[#allocation5_spill] sm:$0xff] }
 0x13c   : >> { %1093 = vmatprep.mubr.f32.mxu0 %v5218_v24  ;;  %3050 = vmatprep.mubr.msk.f32.mxu1 %vm650_vm0, %v5219_v10  ;;  %v4652_v24 = vpack.c.bf16 %v5247_v3, %v5246_v57 }
 0x13d   : >> { %3274 = vmatprep.subr.bf16.mxu1 %v4648_v12 }
 0x13e   : >> { %3276 = vmatpush3.bf16.msra.mxu1 %v4648_v12 }
 0x13f   : >> { %1094 = vmatmul.mubr.f32.gmra.mrb[48].mxu0 %v5220_v19  ;;  %3051 = vmatmul.mubr.msk.f32.gmra.mrb[38].mxu1 %vm650_vm0, %v5221_v18 }
 0x140   : >> { %1098 = vmatprep.mubr.f32.mxu0 %v5222_v59  ;;  %3053 = vmatprep.mubr.msk.f32.mxu1 %vm650_vm0, %v5223_v4  ;;  %v5248_v59 = vld [vmem:[#allocation6_spill] sm:$0xff]  ;;  %v5249_v4 = vld [vmem:[#allocation7_spill] sm:$0xff] }
 0x141   : >> { %3278 = vmatprep.subr.bf16.mxu1 %v4652_v24 }
 0x142   : >> { %3280 = vmatpush3.bf16.msra.mxu1 %v4652_v24 }
 0x143   : >> { %1099 = vmatmul.mubr.f32.gmra.mrb[50].mxu0 %v5224_v23  ;;  %3054 = vmatmul.mubr.msk.f32.gmra.mrb[40].mxu1 %vm650_vm0, %v5225_v30  ;;  %v4659_v23 = vpack.c.bf16 %v5249_v4, %v5248_v59 }
 0x144   : >> { %1103 = vmatprep.mubr.f32.mxu0 %v5226_v55  ;;  %3056 = vmatprep.mubr.msk.f32.mxu1 %vm650_vm0, %v5227_v31 }
 0x145   : >> { %3282 = vmatprep.subr.bf16.mxu1 %v4659_v23 }
 0x146   : >> { %3284 = vmatpush3.bf16.msra.mxu1 %v4659_v23 }
 0x147   : >> { %1104 = vmatmul.mubr.f32.gmra.mrb[52].mxu0 %v5228_v2  ;;  %3057 = vmatmul.mubr.msk.f32.gmra.mrb[42].mxu1 %vm650_vm0, %v5229_v43  ;;  %v5250_v2 = vld [vmem:[#allocation8_spill] sm:$0xff]  ;;  %v5251_v43 = vld [vmem:[#allocation9_spill] sm:$0xff] }
 0x148   : >> { %1108 = vmatprep.mubr.f32.mxu0 %v5230_v15  ;;  %3059 = vmatprep.mubr.msk.f32.mxu1 %vm650_vm0, %v5231_v44  ;;  %v4665_v15 = vpack.c.bf16 %v5251_v43, %v5250_v2 }
 0x14a   : >> { %3286 = vmatprep.subr.bf16.mxu1 %v4665_v15 }
 0x14b   : >> { %1109 = vmatmul.mubr.f32.gmra.mrb[54].mxu0 %v5232_v29  ;;  %3060 = vmatmul.mubr.msk.f32.gmra.mrb[44].mxu1 %vm650_vm0, %v5233_v9 }
 0x14c   : >> { %1113 = vmatprep.mubr.f32.mxu0 %v5234_v36  ;;  %3062 = vmatprep.mubr.msk.f32.mxu1 %vm650_vm0, %v5235_v22  ;;  %v5252_v36 = vld [vmem:[#allocation10_spill] sm:$0xff]  ;;  %v5253_v22 = vld [vmem:[#allocation11_spill] sm:$0xff] }
 0x14d   : >> { %3288 = vmatpush3.bf16.msra.mxu1 %v4665_v15 }
 0x14f   : >> { %1114 = vmatmul.mubr.f32.gmra.mrb[56].mxu0 %v5236_v45  ;;  %3063 = vmatmul.mubr.msk.f32.gmra.mrb[46].mxu1 %vm650_vm0, %v5237_v5  ;;  %v4671_v45 = vpack.c.bf16 %v5253_v22, %v5252_v36 }
 0x150   : >> { %1118 = vmatprep.mubr.f32.mxu0 %v5238_v52  ;;  %3065 = vmatprep.mubr.msk.f32.mxu1 %vm650_vm0, %v5239_v63 }
 0x151   : >> { %3290 = vmatprep.subr.bf16.mxu1 %v4671_v45 }
 0x152   : >> { %3292 = vmatpush3.bf16.msra.mxu1 %v4671_v45 }
 0x153   : >> { %1119 = vmatmul.mubr.f32.gmra.mrb[58].mxu0 %v5240_v11  ;;  %3066 = vmatmul.mubr.msk.f32.gmra.mrb[48].mxu1 %vm650_vm0, %v5241_v51  ;;  %v5254_v11 = vld [vmem:[#allocation12_spill] sm:$0xff]  ;;  %v5255_v51 = vld [vmem:[#allocation13_spill] sm:$0xff] }
 0x154   : >> { %3068 = vmatprep.mubr.msk.f32.mxu1 %vm650_vm0, %v5242_v16  ;;  %v4677_v16 = vpack.c.bf16 %v5255_v51, %v5254_v11  ;;  %1734 = vmatprep.mubr.f32.mxu0 (%p357_p4), %v1512_v61 }
 0x156   : >> { %3294 = vmatprep.subr.bf16.mxu1 %v4677_v16 }
 0x157   : >> { %3069 = vmatmul.mubr.msk.f32.gmra.mrb[50].mxu1 %vm650_vm0, %v5243_v58 }
 0x158   : >> { %3296 = vmatpush3.bf16.msra.mxu1 %v4677_v16 }
 0x1b2   : >> { %v2717_v62 = vpop.f32.mrb[0].mxu0 }
 0x1b3   : >> { %v2718_v1 = vpop.f32.mrb[1].mxu0 }
 0x1b4   : >> { %v2719_v50 = vadd.f32 %v2718_v1, %v2717_v62 }
 0x1b6   : >> { %v2720_v10 = vpop.f32.mrb[2].mxu0 }
 0x1b7   : >> { %v2721_v19 = vpop.f32.mrb[3].mxu0 }
 0x1b8   : >> { %v2722_v18 = vadd.f32 %v2721_v19, %v2720_v10 }
 0x1ba   : >> { %v2723_v30 = vpop.f32.mrb[4].mxu0 }
 0x1bb   : >> { %v2724_v55 = vpop.f32.mrb[5].mxu0 }
 0x1bc   : >> { %v2725_v31 = vadd.f32 %v2724_v55, %v2723_v30 }
 0x1be   : >> { %v2726_v44 = vpop.f32.mrb[6].mxu0 }
 0x1bf   : >> { %v2727_v29 = vpop.f32.mrb[7].mxu0 }
 0x1c0   : >> { %v2728_v9 = vadd.f32 %v2727_v29, %v2726_v44 }
 0x1c2   : >> { %v2729_v5 = vpop.f32.mrb[8].mxu0 }
 0x1c3   : >> { %v2730_v52 = vpop.f32.mrb[9].mxu0 }
 0x1c4   : >> { %v2731_v63 = vadd.f32 %v2730_v52, %v2729_v5 }
 0x1c6   : >> { %v2797_v58 = vpop.f32.mrb[0].mxu1  ;;  %v2732_v62 = vpop.f32.mrb[10].mxu0 }
 0x1c7   : >> { %v2798_v1 = vpop.f32.mrb[1].mxu1  ;;  %v2733_v37 = vpop.f32.mrb[11].mxu0 }
 0x1c8   : >> { %v2799_v21 = vadd.f32 %v2798_v1, %v2797_v58  ;;  %v2734_v57 = vadd.f32 %v2733_v37, %v2732_v62 }
 0x1ca   : >> { %v4681_v3 = vadd.f32 %v2799_v21, %v2719_v50  ;;  %v2800_v10 = vpop.f32.mrb[2].mxu1  ;;  %v2735_v19 = vpop.f32.mrb[12].mxu0 }
 0x1cb   : >> { %v2801_v59 = vpop.f32.mrb[3].mxu1  ;;  %v2736_v4 = vpop.f32.mrb[13].mxu0 }
 0x1cc   : >> { %v2802_v30 = vadd.f32 %v2801_v59, %v2800_v10  ;;  %v2737_v55 = vadd.f32 %v2736_v4, %v2735_v19 }
 0x1ce   : >> { %v4684_v2 = vadd.f32 %v2802_v30, %v2722_v18  ;;  %v2803_v43 = vpop.f32.mrb[4].mxu1  ;;  %v2738_v44 = vpop.f32.mrb[14].mxu0 }
 0x1cf   : >> { %v2804_v29 = vpop.f32.mrb[5].mxu1  ;;  %v2739_v36 = vpop.f32.mrb[15].mxu0 }
 0x1d0   : >> { %v2805_v22 = vadd.f32 %v2804_v29, %v2803_v43  ;;  %v2740_v5 = vadd.f32 %v2739_v36, %v2738_v44 }
 0x1d2   : >> { %v4686_v52 = vadd.f32 %v2805_v22, %v2725_v31  ;;  %v2806_v50 = vpop.f32.mrb[6].mxu1  ;;  %v2741_v11 = vpop.f32.mrb[16].mxu0 }
 0x1d3   : >> { %v2807_v51 = vpop.f32.mrb[7].mxu1  ;;  %v2742_v58 = vpop.f32.mrb[17].mxu0 }
 0x1d4   : >> { %v2808_v62 = vadd.f32 %v2807_v51, %v2806_v50  ;;  %v2743_v1 = vadd.f32 %v2742_v58, %v2741_v11 }
 0x1d6   : >> { %v4688_v37 = vadd.f32 %v2808_v62, %v2728_v9  ;;  %v2809_v21 = vpop.f32.mrb[8].mxu1  ;;  %v2744_v10 = vpop.f32.mrb[18].mxu0 }
 0x1d7   : >> { %v2810_v18 = vpop.f32.mrb[9].mxu1  ;;  %v2745_v19 = vpop.f32.mrb[19].mxu0 }
 0x1d8   : >> { %v2811_v59 = vadd.f32 %v2810_v18, %v2809_v21  ;;  %v2746_v4 = vadd.f32 %v2745_v19, %v2744_v10 }
 0x1da   : >> { %v4690_v30 = vadd.f32 %v2811_v59, %v2731_v63  ;;  %v2812_v43 = vpop.f32.mrb[10].mxu1  ;;  %v2747_v44 = vpop.f32.mrb[20].mxu0 }
 0x1db   : >> { %v2813_v31 = vpop.f32.mrb[11].mxu1  ;;  %v2748_v29 = vpop.f32.mrb[21].mxu0 }
 0x1dc   : >> { %v2814_v36 = vadd.f32 %v2813_v31, %v2812_v43  ;;  %v2749_v22 = vadd.f32 %v2748_v29, %v2747_v44 }
 0x1de   : >> { %v4692_v0 = vadd.f32 %v2814_v36, %v2734_v57  ;;  %v2815_v50 = vpop.f32.mrb[12].mxu1  ;;  %v2750_v11 = vpop.f32.mrb[22].mxu0 }
 0x1df   : >> { %v2816_v9 = vpop.f32.mrb[13].mxu1  ;;  %v2751_v51 = vpop.f32.mrb[23].mxu0 }
 0x1e0   : >> { %v2817_v58 = vadd.f32 %v2816_v9, %v2815_v50  ;;  %v2752_v62 = vadd.f32 %v2751_v51, %v2750_v11 }
 0x1e2   : >> { %v4694_v6 = vadd.f32 %v2817_v58, %v2737_v55  ;;  %v2818_v21 = vpop.f32.mrb[14].mxu1  ;;  %v2753_v10 = vpop.f32.mrb[24].mxu0 }
 0x1e3   : >> { %v2819_v63 = vpop.f32.mrb[15].mxu1  ;;  %v2754_v18 = vpop.f32.mrb[25].mxu0 }
 0x1e4   : >> { %v2820_v19 = vadd.f32 %v2819_v63, %v2818_v21  ;;  %v2755_v59 = vadd.f32 %v2754_v18, %v2753_v10 }
 0x1e6   : >> { %v4696_v7 = vadd.f32 %v2820_v19, %v2740_v5  ;;  %v2821_v43 = vpop.f32.mrb[16].mxu1  ;;  %v2756_v44 = vpop.f32.mrb[26].mxu0 }
 0x1e7   : >> { %v2822_v57 = vpop.f32.mrb[17].mxu1  ;;  %v2757_v31 = vpop.f32.mrb[27].mxu0 }
 0x1e8   : >> { %v2823_v29 = vadd.f32 %v2822_v57, %v2821_v43  ;;  %v2758_v36 = vadd.f32 %v2757_v31, %v2756_v44 }
 0x1ea   : >> { %v4698_v8 = vadd.f32 %v2823_v29, %v2743_v1  ;;  %v2824_v50 = vpop.f32.mrb[18].mxu1  ;;  %v2759_v11 = vpop.f32.mrb[28].mxu0 }
 0x1eb   : >> { %v2825_v55 = vpop.f32.mrb[19].mxu1  ;;  %v2760_v9 = vpop.f32.mrb[29].mxu0 }
 0x1ec   : >> { %v2826_v51 = vadd.f32 %v2825_v55, %v2824_v50  ;;  %v2761_v58 = vadd.f32 %v2760_v9, %v2759_v11 }
 0x1ee   : >> { %v4700_v13 = vadd.f32 %v2826_v51, %v2746_v4  ;;  %v2827_v21 = vpop.f32.mrb[20].mxu1  ;;  %v2762_v10 = vpop.f32.mrb[30].mxu0 }
 0x1ef   : >> { %v2828_v5 = vpop.f32.mrb[21].mxu1  ;;  %v2763_v63 = vpop.f32.mrb[31].mxu0 }
 0x1f0   : >> { %v2829_v18 = vadd.f32 %v2828_v5, %v2827_v21  ;;  %v2764_v19 = vadd.f32 %v2763_v63, %v2762_v10 }
 0x1f2   : >> { %v4702_v14 = vadd.f32 %v2829_v18, %v2749_v22  ;;  %v2830_v43 = vpop.f32.mrb[22].mxu1  ;;  %v2877_v44 = vpop.f32.mrb[32].mxu0 }
 0x1f3   : >> { %v2831_v1 = vpop.f32.mrb[23].mxu1  ;;  %v2878_v57 = vpop.f32.mrb[33].mxu0 }
 0x1f4   : >> { %v2832_v31 = vadd.f32 %v2831_v1, %v2830_v43  ;;  %v2879_v29 = vadd.f32 %v2878_v57, %v2877_v44 }
 0x1f6   : >> { %v4704_v17 = vadd.f32 %v2832_v31, %v2752_v62  ;;  %v2833_v50 = vpop.f32.mrb[24].mxu1  ;;  %v2880_v11 = vpop.f32.mrb[34].mxu0  ;;  %v1056_v4 = vadd.f32 %v2879_v29, %v4681_v3 }
 0x1f7   : >> { %v2834_v55 = vpop.f32.mrb[25].mxu1  ;;  %v2881_v9 = vpop.f32.mrb[35].mxu0 }
 0x1f8   : >> { %v2835_v51 = vadd.f32 %v2834_v55, %v2833_v50  ;;  %v2882_v20 = vadd.f32 %v2881_v9, %v2880_v11 }
 0x1fa   : >> { %v4707_v21 = vadd.f32 %v2835_v51, %v2755_v59  ;;  %v2836_v22 = vpop.f32.mrb[26].mxu1  ;;  %v2883_v10 = vpop.f32.mrb[36].mxu0  ;;  %v1061_v5 = vadd.f32 %v2882_v20, %v4684_v2 }
 0x1fb   : >> { %v2837_v63 = vpop.f32.mrb[27].mxu1  ;;  %v2884_v18 = vpop.f32.mrb[37].mxu0 }
 0x1fc   : >> { %v2838_v43 = vadd.f32 %v2837_v63, %v2836_v22  ;;  %v2885_v44 = vadd.f32 %v2884_v18, %v2883_v10 }
 0x1fe   : >> { %v4710_v62 = vadd.f32 %v2838_v43, %v2758_v36  ;;  %v2839_v1 = vpop.f32.mrb[28].mxu1  ;;  %v2886_v57 = vpop.f32.mrb[38].mxu0  ;;  %v1066_v3 = vadd.f32 %v2885_v44, %v4686_v52 }
 0x1ff   : >> { %v2840_v31 = vpop.f32.mrb[29].mxu1  ;;  %v2887_v29 = vpop.f32.mrb[39].mxu0 }
 0x200   : >> { %v2841_v50 = vadd.f32 %v2840_v31, %v2839_v1  ;;  %v2888_v11 = vadd.f32 %v2887_v29, %v2886_v57 }
 0x202   : >> { %v981_v59 = vadd.f32 %v2841_v50, %v2761_v58  ;;  %v2842_v55 = vpop.f32.mrb[30].mxu1  ;;  %v2889_v9 = vpop.f32.mrb[40].mxu0  ;;  %v1071_v51 = vadd.f32 %v2888_v11, %v4688_v37 }
 0x203   : >> { %v2843_v20 = vpop.f32.mrb[31].mxu1  ;;  %v2890_v2 = vpop.f32.mrb[41].mxu0 }
 0x204   : >> { %v2844_v25 = vadd.f32 %v2843_v20, %v2842_v55  ;;  %v2891_v22 = vadd.f32 %v2890_v2, %v2889_v9 }
 0x206   : >> { %v986_v10 = vadd.f32 %v2844_v25, %v2764_v19  ;;  %v2892_v36 = vpop.f32.mrb[42].mxu0  ;;  %v2919_v63 = vpop.f32.mrb[32].mxu1  ;;  %v1076_v18 = vadd.f32 %v2891_v22, %v4690_v30 }
 0x207   : >> { %v2893_v43 = vpop.f32.mrb[43].mxu0  ;;  %v2920_v52 = vpop.f32.mrb[33].mxu1 }
 0x208   : >> { %v2894_v44 = vadd.f32 %v2893_v43, %v2892_v36  ;;  %v2921_v26 = vadd.f32 %v2920_v52, %v2919_v63 }
 0x20a   : >> { %v2895_v1 = vpop.f32.mrb[44].mxu0  ;;  %v2922_v57 = vpop.f32.mrb[34].mxu1  ;;  %v1081_v58 = vadd.f32 %v2894_v44, %v4692_v0  ;;  %v4716_v31 = vadd.f32 %v2921_v26, %v981_v59 }
 0x20b   : >> { %v2896_v37 = vpop.f32.mrb[45].mxu0  ;;  %v2923_v29 = vpop.f32.mrb[35].mxu1 }
 0x20c   : >> { %v2897_v50 = vadd.f32 %v2896_v37, %v2895_v1  ;;  %v2924_v11 = vadd.f32 %v2923_v29, %v2922_v57  ;;  %v5256_v57 = vld [vmem:[#allocation14_spill] sm:$0xff]  ;;  %v5257_v37 = vld [vmem:[#allocation15_spill] sm:$0xff] }
 0x20e   : >> { %v2898_v55 = vpop.f32.mrb[46].mxu0  ;;  %v3049_v25 = vpop.f32.mrb[36].mxu1  ;;  %v1086_v19 = vadd.f32 %v2897_v50, %v4694_v6  ;;  %v4719_v9 = vadd.f32 %v2924_v11, %v986_v10  ;;  %v4724_v6 = vpack.c.bf16 %v5257_v37, %v5256_v57 }
 0x20f   : >> { %v1206_v30 = vadd.f32 %v3049_v25, %v1061_v5  ;;  %v2899_v20 = vpop.f32.mrb[47].mxu0  ;;  %v1200_v2 = vpop.f32.mrb[37].mxu1 }
 0x210   : >> { %v2900_v22 = vadd.f32 %v2899_v20, %v2898_v55  ;;  %v1201_v36 = vadd.f32 %v1200_v2, %v1056_v4  ;;  %3299 = vmatprep.subr.msk.bf16.mxu1 %vm4727_vm3, %v4724_v6 }
 0x211   : >> { %3302 = vmatpush3.bf16.msk.msra.mxu1 %vm4727_vm3, %v4724_v6 }
 0x212   : >> { %v2901_v63 = vpop.f32.mrb[48].mxu0  ;;  %v3052_v43 = vpop.f32.mrb[38].mxu1  ;;  %v1091_v0 = vadd.f32 %v2900_v22, %v4696_v7  ;;  %3335 = vmatprep.subr.bf16.mxu1 (%p357_p4), %v3691_v60 }
 0x213   : >> { %v1216_v26 = vadd.f32 %v3052_v43, %v1071_v51  ;;  %v2902_v59 = vpop.f32.mrb[49].mxu0  ;;  %v1210_v52 = vpop.f32.mrb[39].mxu1 }
 0x214   : >> { %v2903_v44 = vadd.f32 %v2902_v59, %v2901_v63  ;;  %v1211_v1 = vadd.f32 %v1210_v52, %v1066_v3 }
 0x216   : >> { %v2904_v10 = vpop.f32.mrb[50].mxu0  ;;  %v3055_v5 = vpop.f32.mrb[40].mxu1  ;;  %v1096_v29 = vadd.f32 %v2903_v44, %v4698_v8 }
 0x217   : >> { %v1226_v7 = vadd.f32 %v3055_v5, %v1081_v58  ;;  %v2905_v51 = vpop.f32.mrb[51].mxu0  ;;  %v1220_v50 = vpop.f32.mrb[41].mxu1 }
 0x218   : >> { %v2906_v3 = vadd.f32 %v2905_v51, %v2904_v10  ;;  %v1221_v11 = vadd.f32 %v1220_v50, %v1076_v18 }
 0x21a   : >> { %v2907_v55 = vpop.f32.mrb[52].mxu0  ;;  %v3058_v8 = vpop.f32.mrb[42].mxu1  ;;  %v1101_v25 = vadd.f32 %v2906_v3, %v4700_v13 }
 0x21b   : >> { %v1236_v20 = vadd.f32 %v3058_v8, %v1091_v0  ;;  %v2908_v2 = vpop.f32.mrb[53].mxu0  ;;  %v1230_v22 = vpop.f32.mrb[43].mxu1 }
 0x21c   : >> { %v2909_v58 = vadd.f32 %v2908_v2, %v2907_v55  ;;  %v1231_v63 = vadd.f32 %v1230_v22, %v1086_v19 }
 0x21e   : >> { %v2910_v43 = vpop.f32.mrb[54].mxu0  ;;  %v3061_v59 = vpop.f32.mrb[44].mxu1  ;;  %v1106_v52 = vadd.f32 %v2909_v58, %v4702_v14 }
 0x21f   : >> { %v1246_v44 = vadd.f32 %v3061_v59, %v1101_v25  ;;  %v2911_v57 = vpop.f32.mrb[55].mxu0  ;;  %v1240_v18 = vpop.f32.mrb[45].mxu1 }
 0x220   : >> { %v2912_v37 = vadd.f32 %v2911_v57, %v2910_v43  ;;  %v1241_v10 = vadd.f32 %v1240_v18, %v1096_v29 }
 0x221   : >> { %v1280_v5 = vmax.f32 %v1206_v30, %v1246_v44 }
 0x222   : >> { %v1279_v51 = vmax.f32 %v1201_v36, %v1241_v10  ;;  %v2913_v50 = vpop.f32.mrb[56].mxu0  ;;  %v1111_v27 = vadd.f32 %v2912_v37, %v4704_v17  ;;  %v3064_v13 = vpop.f32.mrb[46].mxu1 }
 0x223   : >> { %v2914_v0 = vpop.f32.mrb[57].mxu0  ;;  %v1250_v3 = vpop.f32.mrb[47].mxu1  ;;  %1297 = vrot.lane.b32.xlu1 %v1280_v5, %s3683_s24 }
 0x224   : >> { %v1256_v19 = vadd.f32 %v3064_v13, %v1111_v27  ;;  %v2915_v55 = vadd.f32 %v2914_v0, %v2913_v50  ;;  %v1251_v8 = vadd.f32 %v1250_v3, %v1106_v52  ;;  %1295 = vrot.lane.b32.xlu0 %v1279_v51, %s3683_s24 }
 0x226   : >> { %v1282_v14 = vmax.f32 %v1216_v26, %v1256_v19  ;;  %v1281_v25 = vmax.f32 %v1211_v1, %v1251_v8  ;;  %v2916_v2 = vpop.f32.mrb[58].mxu0  ;;  %v3067_v22 = vpop.f32.mrb[48].mxu1  ;;  %v1116_v30 = vadd.f32 %v2915_v55, %v4707_v21  ;;  %v1465_v55 = vlaneseq }
 0x227   : >> { %v2917_v36 = vpop.f32.mrb[59].mxu0  ;;  %v1260_v29 = vpop.f32.mrb[49].mxu1 }
 0x228   : >> { %v2918_v58 = vadd.f32 %v2917_v36, %v2916_v2  ;;  %v1261_v17 = vadd.f32 %v1260_v29, %v1116_v30  ;;  %1301 = vrot.lane.b32.xlu1 %v1282_v14, %s3683_s24  ;;  %1299 = vrot.lane.b32.xlu0 %v1281_v25, %s3683_s24  ;;  %v4760_v8 = vshrl.u32 %v1465_v55, 7 }
 0x22a   : >> { %v1121_v27 = vadd.f32 %v2918_v58, %v4710_v62  ;;  %v1283_v43 = vmax.f32 %v1221_v11, %v1261_v17  ;;  %v3070_v59 = vpop.f32.mrb[50].mxu1  ;;  %v5261_v17 = vld [vmem:[#allocation17_spill] sm:$0xff] }
 0x22b   : >> { %v1276_v52 = vadd.f32 %v3070_v59, %v4719_v9  ;;  %v1270_v26 = vpop.f32.mrb[51].mxu1 }
 0x22c   : >> { %v1266_v1 = vadd.f32 %v3067_v22, %v1121_v27  ;;  %v1271_v44 = vadd.f32 %v1270_v26, %v4716_v31  ;;  %1303 = vrot.lane.b32.xlu0 %v1283_v43, %s3683_s24 }
 0x22d   : >> { %v1286_v21 = vmax.f32 %v1236_v20, %v1276_v52 }
 0x22e   : >> { %v1285_v57 = vmax.f32 %v1231_v63, %v1271_v44  ;;  %v1284_v18 = vmax.f32 %v1226_v7, %v1266_v1  ;;  %v5262_v44 = vld [vmem:[#allocation18_spill] sm:$0xff] }
 0x230   : >> { %1305 = vrot.lane.b32.xlu1 %v1284_v18, %s3683_s24  ;;  %1307 = vrot.lane.b32.xlu0 %v1285_v57, %s3683_s24 }
 0x234   : >> { %1309 = vrot.lane.b32.xlu1 %v1286_v21, %s3683_s24 }
 0x295   : >> { %v1298_v62 = vpop.permute.xlu1 %1297 }
 0x296   : >> { %v1296_v11 = vpop.permute.xlu0 %1295  ;;  %v1320_v9 = vmax.f32 %v1280_v5, %v1298_v62 }
 0x297   : >> { %v1319_v37 = vmax.f32 %v1279_v51, %v1296_v11 }
 0x299   : >> { %3099 = vmatprep.mubr.msk.f32.mxu1 %vm1327_vm4, %v1319_v37 }
 0x29a   : >> { %v1302_v10 = vpop.permute.xlu1 %1301  ;;  %3100 = vmatmul.mubr.msk.f32.vlgmr.msra.gmra.mrb[52].mxu1 %vm1327_vm4, %v1320_v9  ;;  %v1300_v31 = vpop.permute.xlu0 %1299  ;;  %v5263_v9 = vld [vmem:[#allocation20_spill] sm:$0xff] }
 0x29b   : >> { %v1322_v20 = vmax.f32 %v1282_v14, %v1302_v10  ;;  %v1321_v63 = vmax.f32 %v1281_v25, %v1300_v31  ;;  %v5260_v25 = vld [vmem:[#allocation16_spill] sm:$0xff] }
 0x29d   : >> { %3102 = vmatprep.mubr.msk.f32.mxu1 %vm1327_vm4, %v1321_v63 }
 0x29e   : >> { %3103 = vmatmul.mubr.msk.f32.gmra.mrb[54].mxu1 %vm1327_vm4, %v1322_v20  ;;  %v1304_v7 = vpop.permute.xlu0 %1303 }
 0x29f   : >> { %v1323_v50 = vmax.f32 %v1283_v43, %v1304_v7 }
 0x2a1   : >> { %3105 = vmatprep.mubr.msk.f32.mxu1 %vm1327_vm4, %v1323_v50  ;;  %v2668_v50 = vld [vmem:[%s3827_s12 + $0x1b0] sm:$0xff] (%p357_p4) }
 0x2a2   : >> { %v1306_v51 = vpop.permute.xlu1 %1305  ;;  %v1308_v5 = vpop.permute.xlu0 %1307 }
 0x2a3   : >> { %v1324_v13 = vmax.f32 %v1284_v18, %v1306_v51  ;;  %v1325_v0 = vmax.f32 %v1285_v57, %v1308_v5  ;;  %v2669_v51 = vld [vmem:[%s3827_s12 + $0x1b8] sm:$0x3f] (%p357_p4)  ;;  %v2664_v5 = vld [vmem:[%s3827_s12 + $0xd0] sm:$0xff] (%p357_p4) }
 0x2a4   : > { %v1540_v55 = vrot.slane (%p357_p4), %v2664_v5, 2 }
 0x2a5   : >> { %3106 = vmatmul.mubr.msk.f32.gmra.mrb[56].mxu1 %vm1327_vm4, %v1324_v13  ;;  %v1558_v13 = vrot.slane (%p357_p4), %v2668_v50, 6 }
 0x2a6   : >> { %v1310_v3 = vpop.permute.xlu1 %1309  ;;  %3108 = vmatprep.mubr.msk.f32.mxu1 %vm1327_vm4, %v1325_v0  ;;  %v1559_v0 = vrot.slane (%p357_p4), %v2669_v51, 6  ;;  %v1563_v40 = vsel (%p357_p4), %vm1539_vm7, %v1527_v34, %v1540_v55 }
 0x2a7   : >> { %v1326_v19 = vmax.f32 %v1286_v21, %v1310_v3  ;;  %v2665_v3 = vld [vmem:[%s3827_s12 + $0xd8] sm:$0x3f] (%p357_p4)  ;;  %v3617_v46 = vpack.i.bf16 (%p357_p4), %v1563_v40, %v1526_v32  ;;  %v1565_v48 = vsel (%p357_p4), %vm1557_vm6, %v1550_v41, %v1558_v13  ;;  %v3305_v53 = vpack.c.bf16 (%p357_p4), %v1563_v40, %v1526_v32 }
 0x2a8   : > { %v4790_v33 = vsel (%p357_p4), %vm1557_vm6, %v1558_v13, %v1559_v0 }
 0x2a9   : >> { %3109 = vmatmul.mubr.msk.f32.gmra.mrb[58].mxu1 %vm1327_vm4, %v1326_v19  ;;  %v2666_v19 = vld [vmem:[%s3827_s12 + $0x140] sm:$0xff] (%p357_p4)  ;;  %1603 = vrot.lane.b32.xlu1 (%p357_p4), %v4790_v33, %s3688_s6  ;;  %s3690_s12 = smov (%p357_p4), 127  }
 0x2aa   : > { %v1549_v28 = vrot.slane (%p357_p4), %v2666_v19, 4 }
 0x2ac   : > { %v1551_v47 = vsel (%p357_p4), %vm1548_vm8, %v1549_v28, %v1550_v41 }
 0x2ad   : > { %v3612_v49 = vpack.i.bf16 (%p357_p4), %v1565_v48, %v1551_v47  ;;  %3618 = vrot.lane.b32.xlu1 (%p357_p4), %v3617_v46, %s3689_s28  ;;  %v3313_v56 = vpack.c.bf16 (%p357_p4), %v1565_v48, %v1551_v47 }
 0x2b1   : > { %3628 = vrot.lane.b32.xlu1 (%p357_p4), %v3617_v46, %s3690_s12 }
 0x36d   : >> { %v3101_v14 = vpop.f32.mrb[52].mxu1 }
 0x36e   : >> { %v1486_v2 = vadd.f32 %v3101_v14, %v5260_v25  ;;  %v1422_v22 = vpop.f32.mrb[53].mxu1  ;;  %v1541_v14 = vrot.slane (%p357_p4), %v2665_v3, 2 }
 0x36f   : >> { %v1485_v30 = vadd.f32 %v5260_v25, %v1422_v22  ;;  %v3694_v25 = vmov (%p357_p4), 0.0  }
 0x370   : >> { %v1494_v36 = vmax.f32 %v1486_v2, 0.0  ;;  %v1542_v38 = vsel (%p357_p4), %vm1539_vm7, %v1540_v55, %v1541_v14  ;;  %v1564_v39 = vsel (%p357_p4), %vm1548_vm8, %v1541_v14, %v1549_v28  ;;  %3117 = vmatprep.mubr.msk.f32.mxu1 (%p357_p4), %vm3693_vm9, %v3694_v25  ;;  %v1604_v2 = vpop.permute.xlu1 (%p357_p4), %1603 }
 0x371   : >> { %v1493_v29 = vmax.f32 %v1485_v30, 0.0  ;;  %v3104_v58 = vpop.f32.mrb[54].mxu1  ;;  %v3607_v42 = vpack.i.bf16 (%p357_p4), %v1564_v39, %v1542_v38  ;;  %v3309_v54 = vpack.c.bf16 (%p357_p4), %v1564_v39, %v1542_v38 }
 0x372   : >> { %1504 = vst.msk [vmem:[%s1501_s30 + $0x8] sm:$0xff] %vm1502_vm5, %v1494_v36  ;;  %v1488_v27 = vadd.f32 %v3104_v58, %v5261_v17  ;;  %v1432_v43 = vpop.f32.mrb[55].mxu1 }
 0x373   : >> { %1503 = vst.msk [vmem:[%s1501_s30] sm:$0xff] %vm1502_vm5, %v1493_v29  ;;  %v1487_v59 = vadd.f32 %v5261_v17, %v1432_v43  ;;  %3608 = vrot.lane.b32.xlu0 (%p357_p4), %v3607_v42, %s3688_s6  ;;  %3638 = vrot.lane.b32.xlu1 (%p357_p4), %v3607_v42, %s3690_s12 }
 0x374   : >> { %v1496_v52 = vmax.f32 %v1488_v27, 0.0  ;;  %v3619_v29 = vpop.permute.xlu1 (%p357_p4), %3618 }
 0x375   : >> { %v1495_v26 = vmax.f32 %v1487_v59, 0.0  ;;  %v3620_v27 = vunpack.i.l.bf16 (%p357_p4), %v3619_v29 }
 0x376   : >> { %1506 = vst.msk [vmem:[%s1501_s30 + $0x40] sm:$0xff] %vm1502_vm5, %v1496_v52 }
 0x377   : >> { %1505 = vst.msk [vmem:[%s1501_s30 + $0x38] sm:$0xff] %vm1502_vm5, %v1495_v26  ;;  %3613 = vrot.lane.b32.xlu0 (%p357_p4), %v3612_v49, %s3688_s6  ;;  %3643 = vrot.lane.b32.xlu1 (%p357_p4), %v3612_v49, %s3690_s12 }
 0x378   : >> { %v3107_v1 = vpop.f32.mrb[56].mxu1  ;;  %v3629_v52 = vpop.permute.xlu1 (%p357_p4), %3628 }
 0x379   : >> { %v1490_v21 = vadd.f32 %v3107_v1, %v5262_v44  ;;  %v1442_v57 = vpop.f32.mrb[57].mxu1 }
 0x37a   : >> { %v1489_v18 = vadd.f32 %v5262_v44, %v1442_v57  ;;  %v3621_v44 = vunpack.i.h.bf16 (%p357_p4), %v3619_v29  ;;  %v1514_v29 = vld [vmem:[%s5027_s2 + $0x18] sm:$0xff] (%p357_p4) }
 0x37b   : >> { %v1498_v62 = vmax.f32 %v1490_v21, 0.0  ;;  %3623 = vrot.lane.b32.xlu0 (%p357_p4), %v3607_v42, %s3689_s28  ;;  %1582 = vrot.lane.b32.xlu1 (%p357_p4), %v4790_v33, %s3690_s12  ;;  %v3311_v21 = vpack.c.bf16 (%p357_p4), %v3620_v27, %v1604_v2  ;;  %v1517_v27 = vld [vmem:[%s5027_s2 + $0x30] sm:$0xff] (%p357_p4) }
 0x37c   : >> { %v1497_v11 = vmax.f32 %v1489_v18, 0.0  ;;  %v3110_v37 = vpop.f32.mrb[58].mxu1  ;;  %359 = sbr.rel (!%p357_p4) target bundleno = 75 (0x4b), region = 85 }
 0x37d   : >> { %1508 = vst.msk [vmem:[%s1501_s30 + $0x78] sm:$0xff] %vm1502_vm5, %v1498_v62  ;;  %v1492_v10 = vadd.f32 %v3110_v37, %v5263_v9  ;;  %v1452_v31 = vpop.f32.mrb[59].mxu1  ;;  %v3630_v62 = vunpack.i.l.bf16 (%p357_p4), %v3629_v52 }
 0x37e   : >> { %1507 = vst.msk [vmem:[%s1501_s30 + $0x70] sm:$0xff] %vm1502_vm5, %v1497_v11  ;;  %v1491_v20 = vadd.f32 %v5263_v9, %v1452_v31 }
 0x37f   : >> { %v1500_v63 = vmax.f32 %v1492_v10, 0.0  ;;  %3633 = vrot.lane.b32.xlu0 (%p357_p4), %v3612_v49, %s3689_s28  ;;  %3658 = vrot.lane.b32.xlu1 (%p357_p4), %v3617_v46, %s3688_s6  ;;  %v3317_v10 = vpack.c.bf16 (%p357_p4), %v3630_v62, %v4790_v33 }
 0x380   : >> { %v1499_v7 = vmax.f32 %v1491_v20, 0.0 }
 0x381   : >> { %1510 = vst.msk [vmem:[%s1501_s30 + $0xb0] sm:$0xff] %vm1502_vm5, %v1500_v63  ;;  %v3631_v63 = vunpack.i.h.bf16 (%p357_p4), %v3629_v52  ;;  %v1522_v52 = vld [vmem:[%s5027_s2 + $0x58] sm:$0xff] (%p357_p4) }
 0x382   : >> { %1509 = vst.msk [vmem:[%s1501_s30 + $0xa8] sm:$0xff] %vm1502_vm5, %v1499_v7 }
 0x383   : > { %1624 = vrot.lane.b32.xlu0 %v4790_v33, %s3689_s28  ;;  %1645 = vrot.lane.b32.xlu1 %v4790_v33, %s3692_s7 }
 0x387   : > { %3648 = vrot.lane.b32.xlu0 %v3617_v46, %s3692_s7 }
 0x38b   : > { %3653 = vrot.lane.b32.xlu0 %v3607_v42, %s3692_s7 }
 0x38f   : > { %3663 = vrot.lane.b32.xlu0 %v3612_v49, %s3692_s7 }
 0x3e5   : > { %v3609_v22 = vpop.permute.xlu0 %3608  ;;  %v3639_v18 = vpop.permute.xlu1 %3638 }
 0x3e6   : > { %v3611_v30 = vunpack.i.h.bf16 %v3609_v22  ;;  %v3610_v36 = vunpack.i.l.bf16 %v3609_v22  ;;  %v3640_v7 = vunpack.i.l.bf16 %v3639_v18  ;;  %v3641_v0 = vunpack.i.h.bf16 %v3639_v18  ;;  %v1511_v22 = vld [vmem:[%s5027_s2] sm:$0xff] }
 0x3e8   : > { %v3303_v58 = vpack.c.bf16 %v3611_v30, %v3610_v36  ;;  %v3321_v3 = vpack.c.bf16 %v3640_v7, %v3631_v63  ;;  %v1513_v30 = vld [vmem:[%s5027_s2 + $0x10] sm:$0xff]  ;;  %v1515_v36 = vld [vmem:[%s5027_s2 + $0x20] sm:$0xff] }
 0x3e9   : > { %v3614_v17 = vpop.permute.xlu0 %3613  ;;  %v3644_v20 = vpop.permute.xlu1 %3643 }
 0x3ea   : > { %v3616_v43 = vunpack.i.h.bf16 %v3614_v17  ;;  %v3615_v59 = vunpack.i.l.bf16 %v3614_v17  ;;  %3304 = vmatprep.subr.bf16.mxu0 %v3303_v58  ;;  %v3645_v19 = vunpack.i.l.bf16 %v3644_v20  ;;  %v3646_v35 = vunpack.i.h.bf16 %v3644_v20  ;;  %v1516_v58 = vld [vmem:[%s5027_s2 + $0x28] sm:$0xff]  ;;  %v1518_v17 = vld [vmem:[%s5027_s2 + $0x38] sm:$0xff] }
 0x3eb   : > { %3306 = vmatpush3.bf16.msra.mxu0 %v3305_v53 }
 0x3ec   : > { %v3307_v26 = vpack.c.bf16 %v3616_v43, %v3615_v59  ;;  %v3325_v38 = vpack.c.bf16 %v3645_v19, %v3641_v0  ;;  %v1519_v43 = vld [vmem:[%s5027_s2 + $0x40] sm:$0xff]  ;;  %v1520_v59 = vld [vmem:[%s5027_s2 + $0x48] sm:$0xff] }
 0x3ed   : > { %v3624_v1 = vpop.permute.xlu0 %3623  ;;  %v1583_v13 = vpop.permute.xlu1 %1582 }
 0x3ee   : > { %v3625_v57 = vunpack.i.l.bf16 %v3624_v1  ;;  %3308 = vmatprep.subr.bf16.mxu0 %v3307_v26  ;;  %v3626_v31 = vunpack.i.h.bf16 %v3624_v1  ;;  %v3329_v48 = vpack.c.bf16 %v1583_v13, %v3646_v35  ;;  %v1523_v26 = vld [vmem:[%s5027_s2 + $0x60] sm:$0xff]  ;;  %v1525_v1 = vld [vmem:[%s5027_s2 + $0x70] sm:$0xff] }
 0x3ef   : > { %3310 = vmatpush3.bf16.msra.mxu0 %v3309_v54 }
 0x3f0   : > { %3312 = vmatprep.subr.bf16.mxu0 %v3311_v21  ;;  %v3315_v37 = vpack.c.bf16 %v3625_v57, %v3621_v44 }
 0x3f1   : > { %v3634_v11 = vpop.permute.xlu0 %3633  ;;  %v3659_v34 = vpop.permute.xlu1 %3658 }
 0x3f2   : > { %v3635_v9 = vunpack.i.l.bf16 %v3634_v11  ;;  %v3636_v51 = vunpack.i.h.bf16 %v3634_v11  ;;  %v3661_v42 = vunpack.i.h.bf16 %v3659_v34  ;;  %v3660_v46 = vunpack.i.l.bf16 %v3659_v34 }
 0x3f3   : > { %3314 = vmatpush3.bf16.msra.mxu0 %v3313_v56 }
 0x3f4   : > { %3316 = vmatprep.subr.bf16.mxu0 %v3315_v37  ;;  %v3319_v5 = vpack.c.bf16 %v3635_v9, %v3626_v31  ;;  %v3333_v56 = vpack.c.bf16 %v3661_v42, %v3660_v46 }
 0x3f5   : > { %v1625_v50 = vpop.permute.xlu0 %1624  ;;  %v1646_v2 = vpop.permute.xlu1 %1645 }
 0x3f6   : > { %v3323_v14 = vpack.c.bf16 %v1625_v50, %v3636_v51 }
 0x3f7   : > { %3318 = vmatpush3.bf16.msra.mxu0 %v3317_v10 }
 0x3f8   : > { %3320 = vmatprep.subr.bf16.mxu0 %v3319_v5 }
 0x3f9   : > { %v3649_v55 = vpop.permute.xlu0 %3648 }
 0x3fa   : > { %v3651_v28 = vunpack.i.h.bf16 %v3649_v55  ;;  %v3650_v32 = vunpack.i.l.bf16 %v3649_v55 }
 0x3fb   : > { %3322 = vmatpush3.bf16.msra.mxu0 %v3321_v3 }
 0x3fc   : > { %v3327_v33 = vpack.c.bf16 %v3651_v28, %v3650_v32  ;;  %3324 = vmatprep.subr.bf16.mxu0 %v3323_v14 }
 0x3fd   : > { %v3654_v39 = vpop.permute.xlu0 %3653 }
 0x3fe   : > { %v3656_v40 = vunpack.i.h.bf16 %v3654_v39  ;;  %v3655_v41 = vunpack.i.l.bf16 %v3654_v39 }
 0x3ff   : > { %3326 = vmatpush3.bf16.msra.mxu0 %v3325_v38 }
 0x400   : > { %v3331_v47 = vpack.c.bf16 %v3656_v40, %v3655_v41  ;;  %3328 = vmatprep.subr.bf16.mxu0 %v3327_v33 }
 0x401   : > { %v3664_v49 = vpop.permute.xlu0 %3663 }
 0x402   : > { %v3666_v53 = vunpack.i.h.bf16 %v3664_v49  ;;  %v3665_v54 = vunpack.i.l.bf16 %v3664_v49 }
 0x403   : > { %3330 = vmatpush3.bf16.msra.mxu0 %v3329_v48 }
 0x404   : > { %3332 = vmatprep.subr.bf16.mxu0 %v3331_v47  ;;  %v3336_v61 = vpack.c.bf16 %v3666_v53, %v3665_v54  ;;  %v3695_v54 = vmov 1966171168  }
 0x406   : > { %3337 = vmatpush3.bf16.msra.mxu1 %v3336_v61 }
 0x407   : > { %3334 = vmatpush3.bf16.msra.mxu0 %v3333_v56  ;;  %3115 = vmatprep.subr.mxu1 %v3694_v25  ;;  %v1978_v56 = vunpack.c.l.s4 %v3695_v54 }
 0x409   : > { %v1979_v61 = vunpack.c.0.s8 %v1978_v56 }
 0x40a   : > { %1735 = vmatmul.mubr.f32.vlgmr.msra.gmra.mrb[0].mxu0 %v1511_v22  ;;  %3116 = vmatpush3.msra.mxu1 %v1646_v2  ;;  %v5264_v22 = vld [vmem:[#allocation16_spill] sm:$0xff] }
 0x40b   : > { %3118 = vmatmul.mubr.msk.f32.vlgmr.msra.gmra.mrb[0].mxu1 %vm1654_vm10, %v1513_v30  ;;  %1739 = vmatprep.mubr.f32.mxu0 %v1515_v36  ;;  %v4903_v2 = vsub.s32 %v1979_v61, %v4760_v8  ;;  %v5265_v36 = vld [vmem:[#allocation17_spill] sm:$0xff] }
 0x40c   : > { %3120 = vmatprep.mubr.msk.f32.mxu1 %vm3693_vm9, %v3694_v25  ;;  %3338 = vmatprep.subr.bf16.mxu1 %v3691_v60 }
 0x40d   : > { %3340 = vmatpush3.bf16.msra.mxu1 %v4648_v12  ;;  %v1521_v12 = vld [vmem:[%s5027_s2 + $0x50] sm:$0xff]  ;;  %v2145_v30 = vrot.slane %v5264_v22, %v4903_v2 }
 0x40e   : > { %1740 = vmatmul.mubr.f32.gmra.mrb[2].mxu0 %v1514_v29  ;;  %3341 = vmatprep.subr.bf16.mxu1 %v3691_v60  ;;  %v2184_v29 = vrot.slane %v5265_v36, %v4903_v2 }
 0x40f   : > { %3121 = vmatmul.mubr.msk.f32.gmra.mrb[2].mxu1 %vm1654_vm10, %v1516_v58  ;;  %1744 = vmatprep.mubr.f32.mxu0 %v1518_v17  ;;  %v2138_v58 = vcombine.high %v5264_v22, %v5264_v22 }
 0x410   : > { %3123 = vmatprep.mubr.msk.f32.mxu1 %vm3693_vm9, %v3694_v25 }
 0x411   : > { %3343 = vmatpush3.bf16.msra.mxu1 %v4652_v24  ;;  %v1524_v24 = vld [vmem:[%s5027_s2 + $0x68] sm:$0xff]  ;;  %v2152_v8 = vrot.slane %v2138_v58, %v4903_v2 }
 0x412   : > { %1745 = vmatmul.mubr.f32.gmra.mrb[4].mxu0 %v1517_v27  ;;  %3344 = vmatprep.subr.bf16.mxu1 %v3691_v60  ;;  %v2153_v27 = vcombine.high %v2145_v30, %v2145_v30 }
 0x413   : > { %3124 = vmatmul.mubr.msk.f32.gmra.mrb[4].mxu1 %vm1654_vm10, %v1519_v43  ;;  %1749 = vmatprep.mubr.f32.mxu0 %v1521_v12  ;;  %v2192_v43 = vcombine.high %v2184_v29, %v2184_v29  ;;  %v2177_v12 = vcombine.high %v5265_v36, %v5265_v36 }
 0x414   : > { %3126 = vmatprep.mubr.msk.f32.mxu1 %vm3693_vm9, %v3694_v25 }
 0x415   : > { %3346 = vmatpush3.bf16.msra.mxu1 %v4659_v23 }
 0x416   : > { %1750 = vmatmul.mubr.f32.gmra.mrb[6].mxu0 %v1520_v59  ;;  %3347 = vmatprep.subr.bf16.mxu1 %v3691_v60 }
 0x417   : > { %3127 = vmatmul.mubr.msk.f32.gmra.mrb[6].mxu1 %vm1654_vm10, %v1522_v52  ;;  %1754 = vmatprep.mubr.f32.mxu0 %v1524_v24  ;;  %v5267_v24 = vld [vmem:[#allocation20_spill] sm:$0xff] }
 0x418   : > { %3129 = vmatprep.mubr.msk.f32.mxu1 %vm3693_vm9, %v3694_v25 }
 0x419   : > { %3349 = vmatpush3.bf16.msra.mxu1 %v4665_v15 }
 0x41a   : > { %1755 = vmatmul.mubr.f32.gmra.mrb[8].mxu0 %v1523_v26  ;;  %3350 = vmatprep.subr.bf16.mxu1 %v3691_v60  ;;  %v2262_v26 = vrot.slane %v5267_v24, %v4903_v2 }
 0x41b   : > { %3130 = vmatmul.mubr.msk.f32.gmra.mrb[8].mxu1 %vm1654_vm10, %v1525_v1  ;;  %v2160_v1 = vrot.slane %v2145_v30, %v4903_v2 }
 0x41c   : > { %3160 = vmatprep.mubr.msk.f32.mxu1 %vm3693_vm9, %v3694_v25 }
 0x41d   : > { %3352 = vmatpush3.bf16.msra.mxu1 %v4671_v45 }
 0x41e   : > { %3353 = vmatprep.subr.bf16.mxu1 %v3691_v60 }
 0x421   : > { %3355 = vmatpush3.bf16.msra.mxu1 %v4677_v16 }
 0x422   : > { %3356 = vmatprep.subr.bf16.mxu1 %v3691_v60 }
 0x425   : > { %3359 = vmatpush3.bf16.msk.msra.mxu1 %vm4727_vm3, %v4724_v6 }
 0x4dd   : > { %v2999_v23 = vpop.f32.mrb[0].mxu0 }
 0x4de   : > { %v3000_v15 = vpop.f32.mrb[1].mxu0  ;;  %v1826_v44 = vpop.f32.mrb[0].mxu1 }
 0x4df   : > { %v3001_v21 = vadd.f32 %v3000_v15, %v2999_v23  ;;  %v3119_v57 = vpop.f32.mrb[1].mxu1  ;;  %v2174_v23 = vrot.slane %v2153_v27, %v4903_v2  ;;  %v4923_v15 = vrot.slane %v2184_v29, %v4903_v2 }
 0x4e0   : > { %v2167_v57 = vrot.slane %v2152_v8, %v4903_v2 }
 0x4e1   : > { %v1827_v18 = vadd.f32 %v3001_v21, %v1826_v44  ;;  %v3002_v62 = vpop.f32.mrb[2].mxu0  ;;  %v4926_v44 = vrot.slane %v2192_v43, %v4903_v2  ;;  %v4929_v21 = vrot.slane %v2177_v12, %v4903_v2 }
 0x4e2   : > { %v3003_v11 = vpop.f32.mrb[3].mxu0  ;;  %v1831_v37 = vpop.f32.mrb[2].mxu1 }
 0x4e3   : > { %v3004_v45 = vadd.f32 %v3003_v11, %v3002_v62  ;;  %v3122_v9 = vpop.f32.mrb[3].mxu1 }
 0x4e4   : > { %v2270_v9 = vcombine.high %v2262_v26, %v2262_v26 }
 0x4e5   : > { %v1832_v10 = vadd.f32 %v3004_v45, %v1831_v37  ;;  %v3005_v31 = vpop.f32.mrb[4].mxu0  ;;  %v2255_v45 = vcombine.high %v5267_v24, %v5267_v24 }
 0x4e6   : > { %v3006_v16 = vpop.f32.mrb[5].mxu0  ;;  %v1836_v20 = vpop.f32.mrb[4].mxu1 }
 0x4e7   : > { %v3007_v60 = vadd.f32 %v3006_v16, %v3005_v31  ;;  %v3125_v63 = vpop.f32.mrb[5].mxu1  ;;  %v2175_v16 = vcombine.high %v2160_v1, %v2160_v1 }
 0x4e8   : > { %v2206_v63 = vrot.slane %v4929_v21, %v4903_v2 }
 0x4e9   : > { %v1837_v7 = vadd.f32 %v3007_v60, %v1836_v20  ;;  %v3008_v4 = vpop.f32.mrb[6].mxu0  ;;  %v2176_v20 = vcombine.high %v2174_v23, %v2174_v23 }
 0x4ea   : > { %v3009_v6 = vpop.f32.mrb[7].mxu0  ;;  %v1841_v50 = vpop.f32.mrb[6].mxu1 }
 0x4eb   : > { %v3010_v51 = vadd.f32 %v3009_v6, %v3008_v4  ;;  %v3128_v5 = vpop.f32.mrb[7].mxu1  ;;  %v1853_v55 = vrot.slane %v1837_v7, 4  ;;  %v2215_v4 = vcombine.high %v4926_v44, %v4926_v44  ;;  %v4951_v6 = vrot.slane %v2262_v26, %v4903_v2 }
 0x4ed   : > { %v1842_v13 = vadd.f32 %v3010_v51, %v1841_v50  ;;  %v3011_v0 = vpop.f32.mrb[8].mxu0 }
 0x4ee   : > { %v3012_v3 = vpop.f32.mrb[9].mxu0  ;;  %v1846_v19 = vpop.f32.mrb[8].mxu1 }
 0x4ef   : > { %v1854_v14 = vrot.slane %v1842_v13, 4  ;;  %v3013_v28 = vadd.f32 %v3012_v3, %v3011_v0  ;;  %v3131_v32 = vpop.f32.mrb[9].mxu1 }
 0x4f1   : > { %v1847_v33 = vadd.f32 %v3013_v28, %v1846_v19  ;;  %v1855_v34 = vsel %vm1548_vm8, %v1853_v55, %v1854_v14  ;;  %v4962_v55 = vrot.slane %v2255_v45, %v4903_v2 }
 0x4f2   : > { %v1861_v35 = vmax.f32 %v1827_v18, %v1855_v34 }
 0x4f3   : > { %v1856_v38 = vrot.slane %v1847_v33, 4 }
 0x4f4   : > { %1867 = vrot.lane.b32.xlu0 %v1861_v35, %s3690_s12 }
 0x4f5   : > { %v1863_v39 = vmax.f32 %v1837_v7, %v1856_v38  ;;  %v1857_v40 = vsel %vm1548_vm8, %v1854_v14, %v1856_v38  ;;  %v2214_v7 = vcombine.high %v4923_v15, %v4923_v15  ;;  %v4965_v14 = vrot.slane %v2270_v9, %v4903_v2 }
 0x4f6   : > { %v1862_v41 = vmax.f32 %v1832_v10, %v1857_v40 }
 0x4f8   : > { %1869 = vrot.lane.b32.xlu1 %v1862_v41, %s3690_s12  ;;  %1871 = vrot.lane.b32.xlu0 %v1863_v39, %s3690_s12 }
 0x566   : > { %v1868_v42 = vpop.permute.xlu0 %1867 }
 0x567   : > { %v1876_v46 = vmax.f32 %v1861_v35, %v1868_v42 }
 0x569   : > { %3161 = vmatmul.mubr.msk.f32.vlgmr.msra.gmra.mrb[10].mxu1 %vm1327_vm4, %v1876_v46 }
 0x56a   : > { %v1870_v47 = vpop.permute.xlu1 %1869  ;;  %3163 = vmatprep.mubr.msk.f32.mxu1 %vm3693_vm9, %v3694_v25  ;;  %v1872_v49 = vpop.permute.xlu0 %1871 }
 0x56b   : > { %v1877_v48 = vmax.f32 %v1862_v41, %v1870_v47  ;;  %v1878_v53 = vmax.f32 %v1863_v39, %v1872_v49  ;;  %v2292_v41 = vcombine.high %v4951_v6, %v4951_v6 }
 0x56d   : > { %3164 = vmatmul.mubr.msk.f32.gmra.mrb[12].mxu1 %vm1327_vm4, %v1877_v48 }
 0x56e   : > { %3166 = vmatprep.mubr.msk.f32.mxu1 %vm3693_vm9, %v3694_v25  ;;  %v5266_v25 = vld [vmem:[#allocation18_spill] sm:$0xff] }
 0x56f   : > { %v2223_v17 = vrot.slane %v5266_v25, %v4903_v2  ;;  %v2216_v59 = vcombine.high %v5266_v25, %v5266_v25 }
 0x571   : > { %3167 = vmatmul.mubr.msk.f32.gmra.mrb[14].mxu1 %vm1327_vm4, %v1878_v53  ;;  %v2231_v52 = vcombine.high %v2223_v17, %v2223_v17  ;;  %v4933_v18 = vrot.slane %v2223_v17, %v4903_v2  ;;  %v4936_v11 = vrot.slane %v2216_v59, %v4903_v2 }
 0x573   : > { %v4939_v37 = vrot.slane %v2231_v52, %v4903_v2  ;;  %v2253_v13 = vcombine.high %v4933_v18, %v4933_v18  ;;  %v2245_v3 = vrot.slane %v4936_v11, %v4903_v2 }
 0x575   : > { %v2254_v19 = vcombine.high %v4939_v37, %v4939_v37 }
 0x63c   : > { %v1959_v62 = vpop.f32.mrb[10].mxu1 }
 0x63d   : > { %v1976_v10 = vcombine.high %v1959_v62, %v1959_v62  ;;  %v1983_v31 = vrot.slane %v1959_v62, %v4903_v2  ;;  %v3162_v60 = vpop.f32.mrb[11].mxu1 }
 0x63f   : > { %v1990_v50 = vrot.slane %v1976_v10, %v4903_v2  ;;  %v1991_v51 = vcombine.high %v1983_v31, %v1983_v31  ;;  %v1999_v5 = vrot.slane %v1983_v31, %v4903_v2 }
 0x640   : > { %v1964_v0 = vpop.f32.mrb[12].mxu1 }
 0x641   : > { %v1992_v28 = vcombine.high %v1990_v50, %v1990_v50  ;;  %v2006_v32 = vrot.slane %v1990_v50, %v4903_v2  ;;  %v2013_v33 = vrot.slane %v1991_v51, %v4903_v2  ;;  %v2021_v34 = vcombine.high %v1999_v5, %v1999_v5  ;;  %v3165_v35 = vpop.f32.mrb[13].mxu1 }
 0x642   : > { %v2314_v38 = vadd.f32 %v2160_v1, %v1999_v5  ;;  %v2025_v39 = vcombine.high %v1964_v0, %v1964_v0  ;;  %v2032_v40 = vrot.slane %v1964_v0, %v4903_v2 }
 0x643   : > { %v2020_v42 = vrot.slane %v1992_v28, %v4903_v2  ;;  %v2022_v46 = vcombine.high %v2006_v32, %v2006_v32  ;;  %v2023_v47 = vcombine.high %v2013_v33, %v2013_v33  ;;  %v2315_v48 = vadd.f32 %v2174_v23, %v2013_v33 }
 0x644   : > { %v2316_v49 = vadd.f32 %v2175_v16, %v2021_v34  ;;  %v2318_v53 = vadd.f32 %v2167_v57, %v2006_v32  ;;  %v2334_v54 = vmax.f32 %v2314_v38, 0.0  ;;  %v2039_v56 = vrot.slane %v2025_v39, %v4903_v2  ;;  %v1969_v61 = vpop.f32.mrb[14].mxu1 }
 0x645   : > { %v2024_v22 = vcombine.high %v2020_v42, %v2020_v42  ;;  %v2317_v30 = vadd.f32 %v2176_v20, %v2023_v47  ;;  %v2319_v36 = vadd.f32 %v4923_v15, %v2020_v42  ;;  %v2320_v29 = vadd.f32 %v4926_v44, %v2022_v46  ;;  %v3168_v58 = vpop.f32.mrb[15].mxu1 }
 0x646   : > { %v2335_v25 = vmax.f32 %v2315_v48, 0.0  ;;  %v2336_v17 = vmax.f32 %v2316_v49, 0.0  ;;  %v2338_v27 = vmax.f32 %v2318_v53, 0.0  ;;  %v2040_v43 = vcombine.high %v2032_v40, %v2032_v40 }
 0x647   : > { %v2337_v12 = vmax.f32 %v2317_v30, 0.0  ;;  %v2339_v8 = vmax.f32 %v2319_v36, 0.0  ;;  %v2340_v59 = vmax.f32 %v2320_v29, 0.0  ;;  %v2041_v52 = vcombine.high %v2039_v56, %v2039_v56 }
 0x648   : > { %v2374_v24 = vcombine.low %v2334_v54, %v2335_v25  ;;  %v2396_v26 = vrot.slane %v2338_v27, %v4903_v2  ;;  %v2048_v1 = vrot.slane %v2032_v40, %v4903_v2  ;;  %v2055_v23 = vrot.slane %v2039_v56, %v4903_v2 }
 0x649   : > { %v2375_v15 = vcombine.low %v2336_v17, %v2337_v12  ;;  %v2413_v21 = vcombine.low %v2339_v8, %v2340_v59  ;;  %v2062_v44 = vrot.slane %v2040_v43, %v4903_v2  ;;  %v2069_v57 = vrot.slane %v2041_v52, %v4903_v2 }
 0x64a   : > { %v2382_v62 = vrot.slane %v2374_v24, %v4903_v2  ;;  %v2411_v11 = vrot.slane %v2396_v26, %v4903_v2  ;;  %v2070_v45 = vcombine.high %v2048_v1, %v2048_v1  ;;  %v2071_v9 = vcombine.high %v2055_v23, %v2055_v23 }
 0x64b   : > { %v2389_v10 = vrot.slane %v2375_v15, %v4903_v2  ;;  %v2072_v31 = vcombine.high %v2062_v44, %v2062_v44  ;;  %v2073_v16 = vcombine.high %v2069_v57, %v2069_v57  ;;  %v2321_v20 = vadd.f32 %v2214_v7, %v2024_v22 }
 0x64c   : > { %v2322_v60 = vadd.f32 %v2215_v4, %v2048_v1  ;;  %v2323_v50 = vadd.f32 %v2206_v63, %v2062_v44  ;;  %v2324_v51 = vadd.f32 %v4933_v18, %v2070_v45  ;;  %v2326_v5 = vadd.f32 %v2253_v13, %v2055_v23 }
 0x64d   : > { %v2397_v0 = vcombine.low %v2382_v62, %v2389_v10  ;;  %v2325_v28 = vadd.f32 %v4939_v37, %v2072_v31  ;;  %v2327_v32 = vadd.f32 %v2254_v19, %v2069_v57  ;;  %v2328_v33 = vadd.f32 %v2245_v3, %v2071_v9 }
 0x64e   : > { %v2341_v34 = vmax.f32 %v2321_v20, 0.0  ;;  %v2342_v35 = vmax.f32 %v2322_v60, 0.0  ;;  %v2343_v38 = vmax.f32 %v2323_v50, 0.0  ;;  %v2344_v39 = vmax.f32 %v2324_v51, 0.0 }
 0x64f   : > { %v2404_v40 = vrot.slane %v2397_v0, %v4903_v2  ;;  %v2345_v42 = vmax.f32 %v2325_v28, 0.0  ;;  %v2346_v46 = vmax.f32 %v2326_v5, 0.0  ;;  %v2347_v7 = vmax.f32 %v2327_v32, 0.0 }
 0x650   : > { %v2348_v4 = vmax.f32 %v2328_v33, 0.0  ;;  %v2414_v63 = vcombine.low %v2341_v34, %v2342_v35  ;;  %v2421_v18 = vrot.slane %v2413_v21, %v4903_v2  ;;  %v2293_v13 = vcombine.high %v4965_v14, %v4965_v14 }
 0x651   : > { %v2412_v37 = vcombine.low %v2404_v40, %v2411_v11  ;;  %v2452_v19 = vcombine.low %v2344_v39, %v2345_v42  ;;  %v2453_v3 = vcombine.low %v2346_v46, %v2347_v7  ;;  %v2080_v47 = vrot.slane %v1969_v61, %v4903_v2 }
 0x652   : > { %v2428_v48 = vrot.slane %v2414_v63, %v4903_v2  ;;  %v2435_v49 = vrot.slane %v2343_v38, %v4903_v2  ;;  %v2474_v53 = vrot.slane %v2348_v4, %v4903_v2  ;;  %v2329_v54 = vadd.f32 %v4951_v6, %v2073_v16 }
 0x653   : > { %2535 = vst.msk [vmem:[%s3847_s21 + $0x30] sm:$0x1f] %vm2534_vm11, %v2412_v37  ;;  %v2460_v56 = vrot.slane %v2452_v19, %v4903_v2  ;;  %v2467_v22 = vrot.slane %v2453_v3, %v4903_v2  ;;  %v2081_v30 = vcombine.high %v2080_v47, %v2080_v47  ;;  %v2088_v36 = vrot.slane %v2080_v47, %v4903_v2 }
 0x654   : > { %v2436_v29 = vcombine.low %v2421_v18, %v2428_v48  ;;  %v2284_v61 = vrot.slane %v4962_v55, %v4903_v2  ;;  %v2450_v12 = vrot.slane %v2435_v49, %v4903_v2  ;;  %v2489_v8 = vrot.slane %v2474_v53, %v4903_v2 }
 0x655   : > { %v2475_v58 = vcombine.low %v2460_v56, %v2467_v22  ;;  %v2095_v25 = vrot.slane %v2081_v30, %v4903_v2  ;;  %v2096_v17 = vcombine.high %v2088_v36, %v2088_v36  ;;  %v2330_v27 = vadd.f32 %v4965_v14, %v2088_v36 }
 0x656   : > { %v2443_v43 = vrot.slane %v2436_v29, %v4903_v2  ;;  %v2349_v59 = vmax.f32 %v2329_v54, 0.0 }
 0x657   : > { %v2482_v52 = vrot.slane %v2475_v58, %v4903_v2  ;;  %v2097_v24 = vcombine.high %v2095_v25, %v2095_v25  ;;  %v2331_v55 = vadd.f32 %v2292_v41, %v2095_v25  ;;  %v2332_v26 = vadd.f32 %v2293_v13, %v2096_v17 }
 0x658   : > { %v2451_v1 = vcombine.low %v2443_v43, %v2450_v12  ;;  %v2350_v23 = vmax.f32 %v2330_v27, 0.0 }
 0x659   : > { %v2490_v15 = vcombine.low %v2482_v52, %v2489_v8  ;;  %v2333_v14 = vadd.f32 %v2284_v61, %v2097_v24  ;;  %v2351_v21 = vmax.f32 %v2331_v55, 0.0  ;;  %v2352_v44 = vmax.f32 %v2332_v26, 0.0 }
 0x65a   : > { %2536 = vst.msk [vmem:[%s3847_s21 + $0x68] sm:$0x1f] %vm2534_vm11, %v2451_v1  ;;  %v2491_v57 = vcombine.low %v2349_v59, %v2350_v23 }
 0x65b   : > { %2537 = vst.msk [vmem:[%s3847_s21 + $0xa0] sm:$0x1f] %vm2534_vm11, %v2490_v15  ;;  %v2353_v62 = vmax.f32 %v2333_v14, 0.0  ;;  %v2492_v11 = vcombine.low %v2351_v21, %v2352_v44 }
 0x65c   : > { %v2499_v45 = vrot.slane %v2491_v57, %v4903_v2 }
 0x65d   : > { %v2506_v6 = vrot.slane %v2492_v11, %v4903_v2  ;;  %v2513_v41 = vrot.slane %v2353_v62, %v4903_v2 }
 0x65f   : > { %v2514_v9 = vcombine.low %v2499_v45, %v2506_v6  ;;  %v2528_v31 = vrot.slane %v2513_v41, %v4903_v2 }
 0x661   : > { %v2521_v10 = vrot.slane %v2514_v9, %v4903_v2 }
 0x663   : > { %v2529_v16 = vcombine.low %v2521_v10, %v2528_v31 }
 0x665   : > { %2538 = vst.msk [vmem:[%s3847_s21 + $0xd8] sm:$0x1f] %vm2534_vm11, %v2529_v16 }
 0x666 PF: > { %s15_s18 = sadd.s32 1, %s3677_s18  }
 0x667   : > { %p12_p5 = scmp.ge.s32.totalorder %s15_s18, 4  }
 0x669   :  { %14 = sbr.rel (!%p12_p5) target bundleno = 1 (0x1), region = 96 }

// kernel: cnn_forward.5
= control target key start
LH: loop header
LB: loop body
LE: loop exit
PB: predicated region body
PF: predicated region fallthrough
CT: control target
= control target key end

     0   :  { %v8011_v47 = vmov 1983009808   ;;  %v1475_v49 = vlaneseq  ;;  %s12643_s0 = inlined_call_operand.vmem [shape: f32[2,11236], index: 0, kind: input, shape index: {}]   ;;  %s12644_s1 = inlined_call_operand.vmem [shape: f32[11236,75], index: 1, kind: input, shape index: {}]   ;;  %s12645_s2 = inlined_call_operand.vmem [shape: f32[1,75], index: 2, kind: input, shape index: {}]   ;;  %s12646_s3 = inlined_call_operand.hbm [shape: f32[2,75], index: 3, kind: output, shape index: {}]  }
   0x1   :  { %v53_v0 = vld [vmem:[%s12644_s1 + $0x80] sm:$0xff]  ;;  %v54_v1 = vld [vmem:[%s12644_s1 + $0x88] sm:$0xff]  ;;  %v55_v11 = vld [vmem:[%s12644_s1 + $0x90] sm:$0xff]  ;;  %v1473_v48 = vunpack.c.l.s4 %v8011_v47 }
   0x2   :  { %v85_v2 = vld [vmem:[%s12644_s1 + $0x180] sm:$0xff]  ;;  %v6543_v3 = vpack.c.bf16 %v54_v1, %v53_v0  ;;  %v86_v4 = vld [vmem:[%s12644_s1 + $0x188] sm:$0xff]  ;;  %v56_v13 = vld [vmem:[%s12644_s1 + $0x98] sm:$0xff]  ;;  %v1476_v0 = vshrl.u32 %v1475_v49, 7 }
   0x3   :  { %v37_v5 = vld [vmem:[%s12644_s1] sm:$0xff]  ;;  %v38_v6 = vld [vmem:[%s12644_s1 + $0x8] sm:$0xff]  ;;  %v6575_v7 = vpack.c.bf16 %v86_v4, %v85_v2  ;;  %v87_v14 = vld [vmem:[%s12644_s1 + $0x190] sm:$0xff]  ;;  %v6547_v16 = vpack.c.bf16 %v56_v13, %v55_v11  ;;  %v1474_v63 = vunpack.c.0.s8 %v1473_v48 }
   0x4   :  { %v6545_v8 = vpack.c.bf16 %v38_v6, %v37_v5  ;;  %v69_v9 = vld [vmem:[%s12644_s1 + $0x100] sm:$0xff]  ;;  %v70_v10 = vld [vmem:[%s12644_s1 + $0x108] sm:$0xff]  ;;  %6544 = vmatprep.subr.bf16.mxu0 %v6543_v3  ;;  %v88_v15 = vld [vmem:[%s12644_s1 + $0x198] sm:$0xff] }
   0x5   :  { %v6577_v12 = vpack.c.bf16 %v70_v10, %v69_v9  ;;  %6576 = vmatprep.subr.bf16.mxu1 %v6575_v7  ;;  %v6579_v17 = vpack.c.bf16 %v88_v15, %v87_v14  ;;  %v39_v18 = vld [vmem:[%s12644_s1 + $0x10] sm:$0xff]  ;;  %v40_v19 = vld [vmem:[%s12644_s1 + $0x18] sm:$0xff]  ;;  %v57_v23 = vld [vmem:[%s12644_s1 + $0xa0] sm:$0xff]  ;;  %v8185_v13 = vsub.s32 %v1474_v63, %v1476_v0 }
   0x6   :  { %6546 = vmatpush3.bf16.msra.mxu0 %v6545_v8  ;;  %v71_v20 = vld [vmem:[%s12644_s1 + $0x110] sm:$0xff]  ;;  %v6549_v21 = vpack.c.bf16 %v40_v19, %v39_v18  ;;  %v72_v22 = vld [vmem:[%s12644_s1 + $0x118] sm:$0xff]  ;;  %v58_v24 = vld [vmem:[%s12644_s1 + $0xa8] sm:$0xff] }
   0x7   :  { %6578 = vmatpush3.bf16.msra.mxu1 %v6577_v12  ;;  %6548 = vmatprep.subr.bf16.mxu0 %v6547_v16  ;;  %v6581_v25 = vpack.c.bf16 %v72_v22, %v71_v20  ;;  %v6551_v26 = vpack.c.bf16 %v58_v24, %v57_v23  ;;  %v89_v27 = vld [vmem:[%s12644_s1 + $0x1a0] sm:$0xff]  ;;  %v90_v28 = vld [vmem:[%s12644_s1 + $0x1a8] sm:$0xff]  ;;  %v59_v35 = vld [vmem:[%s12644_s1 + $0xb0] sm:$0xff] }
   0x8   :  { %6580 = vmatprep.subr.bf16.mxu1 %v6579_v17  ;;  %v41_v29 = vld [vmem:[%s12644_s1 + $0x20] sm:$0xff]  ;;  %v6583_v30 = vpack.c.bf16 %v90_v28, %v89_v27  ;;  %v42_v31 = vld [vmem:[%s12644_s1 + $0x28] sm:$0xff]  ;;  %v60_v36 = vld [vmem:[%s12644_s1 + $0xb8] sm:$0xff] }
   0x9   :  { %v73_v32 = vld [vmem:[%s12644_s1 + $0x120] sm:$0xff]  ;;  %v74_v33 = vld [vmem:[%s12644_s1 + $0x128] sm:$0xff]  ;;  %v6553_v34 = vpack.c.bf16 %v42_v31, %v41_v29  ;;  %v91_v37 = vld [vmem:[%s12644_s1 + $0x1b0] sm:$0xff]  ;;  %v6555_v39 = vpack.c.bf16 %v60_v36, %v59_v35 }
   0xa   :  { %6550 = vmatpush3.bf16.msra.mxu0 %v6549_v21  ;;  %v6585_v38 = vpack.c.bf16 %v74_v33, %v73_v32  ;;  %v92_v40 = vld [vmem:[%s12644_s1 + $0x1b8] sm:$0xff]  ;;  %v43_v41 = vld [vmem:[%s12644_s1 + $0x30] sm:$0xff]  ;;  %v61_v46 = vld [vmem:[%s12644_s1 + $0xc0] sm:$0xff] }
   0xb   :  { %6582 = vmatpush3.bf16.msra.mxu1 %v6581_v25  ;;  %6552 = vmatprep.subr.bf16.mxu0 %v6551_v26  ;;  %v44_v42 = vld [vmem:[%s12644_s1 + $0x38] sm:$0xff]  ;;  %v6587_v43 = vpack.c.bf16 %v92_v40, %v91_v37  ;;  %v75_v44 = vld [vmem:[%s12644_s1 + $0x130] sm:$0xff]  ;;  %v62_v50 = vld [vmem:[%s12644_s1 + $0xc8] sm:$0xff] }
   0xc   :  { %6584 = vmatprep.subr.bf16.mxu1 %v6583_v30  ;;  %v76_v45 = vld [vmem:[%s12644_s1 + $0x138] sm:$0xff]  ;;  %v93_v51 = vld [vmem:[%s12644_s1 + $0x1c0] sm:$0xff]  ;;  %v94_v52 = vld [vmem:[%s12644_s1 + $0x1c8] sm:$0xff]  ;;  %v6557_v53 = vpack.c.bf16 %v44_v42, %v43_v41  ;;  %v6559_v55 = vpack.c.bf16 %v62_v50, %v61_v46 }
   0xd   :  { %v6589_v54 = vpack.c.bf16 %v76_v45, %v75_v44  ;;  %v45_v56 = vld [vmem:[%s12644_s1 + $0x40] sm:$0xff]  ;;  %v46_v57 = vld [vmem:[%s12644_s1 + $0x48] sm:$0xff]  ;;  %v6591_v59 = vpack.c.bf16 %v94_v52, %v93_v51  ;;  %v63_v61 = vld [vmem:[%s12644_s1 + $0xd0] sm:$0xff] }
   0xe   :  { %6554 = vmatpush3.bf16.msra.mxu0 %v6553_v34  ;;  %v77_v58 = vld [vmem:[%s12644_s1 + $0x140] sm:$0xff]  ;;  %v78_v60 = vld [vmem:[%s12644_s1 + $0x148] sm:$0xff]  ;;  %v64_v62 = vld [vmem:[%s12644_s1 + $0xd8] sm:$0xff]  ;;  %v6561_v3 = vpack.c.bf16 %v46_v57, %v45_v56 }
   0xf   :  { %6586 = vmatpush3.bf16.msra.mxu1 %v6585_v38  ;;  %6556 = vmatprep.subr.bf16.mxu0 %v6555_v39  ;;  %v95_v1 = vld [vmem:[%s12644_s1 + $0x1d0] sm:$0xff]  ;;  %v96_v2 = vld [vmem:[%s12644_s1 + $0x1d8] sm:$0xff]  ;;  %v6593_v4 = vpack.c.bf16 %v78_v60, %v77_v58  ;;  %v6563_v5 = vpack.c.bf16 %v64_v62, %v63_v61  ;;  %v65_v11 = vld [vmem:[%s12644_s1 + $0xe0] sm:$0xff] }
  0x10   :  { %6588 = vmatprep.subr.bf16.mxu1 %v6587_v43  ;;  %v47_v6 = vld [vmem:[%s12644_s1 + $0x50] sm:$0xff]  ;;  %v48_v7 = vld [vmem:[%s12644_s1 + $0x58] sm:$0xff]  ;;  %v6595_v9 = vpack.c.bf16 %v96_v2, %v95_v1  ;;  %v66_v12 = vld [vmem:[%s12644_s1 + $0xe8] sm:$0xff] }
  0x11   :  { %v79_v8 = vld [vmem:[%s12644_s1 + $0x150] sm:$0xff]  ;;  %v80_v10 = vld [vmem:[%s12644_s1 + $0x158] sm:$0xff]  ;;  %v97_v14 = vld [vmem:[%s12644_s1 + $0x1e0] sm:$0xff]  ;;  %v6565_v16 = vpack.c.bf16 %v48_v7, %v47_v6  ;;  %v6567_v19 = vpack.c.bf16 %v66_v12, %v65_v11 }
  0x12   :  { %6558 = vmatpush3.bf16.msra.mxu0 %v6557_v53  ;;  %v98_v15 = vld [vmem:[%s12644_s1 + $0x1e8] sm:$0xff]  ;;  %v49_v17 = vld [vmem:[%s12644_s1 + $0x60] sm:$0xff]  ;;  %v6597_v18 = vpack.c.bf16 %v80_v10, %v79_v8  ;;  %v67_v25 = vld [vmem:[%s12644_s1 + $0xf0] sm:$0xff] }
  0x13   :  { %6590 = vmatpush3.bf16.msra.mxu1 %v6589_v54  ;;  %6560 = vmatprep.subr.bf16.mxu0 %v6559_v55  ;;  %v50_v20 = vld [vmem:[%s12644_s1 + $0x68] sm:$0xff]  ;;  %v81_v21 = vld [vmem:[%s12644_s1 + $0x160] sm:$0xff]  ;;  %v6599_v23 = vpack.c.bf16 %v98_v15, %v97_v14  ;;  %v68_v26 = vld [vmem:[%s12644_s1 + $0xf8] sm:$0xff] }
  0x14   :  { %6592 = vmatprep.subr.bf16.mxu1 %v6591_v59  ;;  %v15_v22 = vld [vmem:[%s12643_s0] sm:$0xff]  ;;  %v82_v24 = vld [vmem:[%s12644_s1 + $0x168] sm:$0xff]  ;;  %v99_v29 = vld [vmem:[%s12644_s1 + $0x1f0] sm:$0xff]  ;;  %v6569_v31 = vpack.c.bf16 %v50_v20, %v49_v17  ;;  %v6571_v35 = vpack.c.bf16 %v68_v26, %v67_v25 }
  0x15   :  { %v1478_v27 = vrot.slane %v15_v22, %v8185_v13  ;;  %v1471_v28 = vcombine.high %v15_v22, %v15_v22  ;;  %v100_v30 = vld [vmem:[%s12644_s1 + $0x1f8] sm:$0xff]  ;;  %v6601_v34 = vpack.c.bf16 %v82_v24, %v81_v21  ;;  %v51_v36 = vld [vmem:[%s12644_s1 + $0x70] sm:$0xff]  ;;  %v117_v42 = vld [vmem:[%s12644_s1 + $0x280] sm:$0xff] }
  0x16   :  { %6562 = vmatpush3.bf16.msra.mxu0 %v6561_v3  ;;  %v52_v37 = vld [vmem:[%s12644_s1 + $0x78] sm:$0xff]  ;;  %v83_v38 = vld [vmem:[%s12644_s1 + $0x170] sm:$0xff]  ;;  %v6603_v39 = vpack.c.bf16 %v100_v30, %v99_v29  ;;  %v118_v43 = vld [vmem:[%s12644_s1 + $0x288] sm:$0xff] }
  0x17   :  { %6594 = vmatpush3.bf16.msra.mxu1 %v6593_v4  ;;  %6564 = vmatprep.subr.bf16.mxu0 %v6563_v5  ;;  %v1486_v32 = vcombine.high %v1478_v27, %v1478_v27  ;;  %v1485_v33 = vrot.slane %v1471_v28, %v8185_v13  ;;  %v84_v40 = vld [vmem:[%s12644_s1 + $0x178] sm:$0xff]  ;;  %v149_v44 = vld [vmem:[%s12644_s1 + $0x380] sm:$0xff]  ;;  %v150_v45 = vld [vmem:[%s12644_s1 + $0x388] sm:$0xff]  ;;  %v6573_v46 = vpack.c.bf16 %v52_v37, %v51_v36 }
  0x18   :  { %6596 = vmatprep.subr.bf16.mxu1 %v6595_v9  ;;  %v6605_v47 = vpack.c.bf16 %v84_v40, %v83_v38  ;;  %v6607_v48 = vpack.c.bf16 %v118_v43, %v117_v42  ;;  %v101_v49 = vld [vmem:[%s12644_s1 + $0x200] sm:$0xff]  ;;  %v102_v50 = vld [vmem:[%s12644_s1 + $0x208] sm:$0xff]  ;;  %v6639_v52 = vpack.c.bf16 %v150_v45, %v149_v44  ;;  %v119_v54 = vld [vmem:[%s12644_s1 + $0x290] sm:$0xff] }
  0x19   :  { %2003 = vmatprep.mubr.f32.mxu0 %v1486_v32  ;;  %v1487_v41 = vcombine.high %v1485_v33, %v1485_v33  ;;  %v133_v51 = vld [vmem:[%s12644_s1 + $0x300] sm:$0xff]  ;;  %v134_v53 = vld [vmem:[%s12644_s1 + $0x308] sm:$0xff]  ;;  %v120_v55 = vld [vmem:[%s12644_s1 + $0x298] sm:$0xff]  ;;  %v6609_v58 = vpack.c.bf16 %v102_v50, %v101_v49 }
  0x1a   :  { %6566 = vmatpush3.bf16.msra.mxu0 %v6565_v16  ;;  %v151_v56 = vld [vmem:[%s12644_s1 + $0x390] sm:$0xff]  ;;  %v152_v57 = vld [vmem:[%s12644_s1 + $0x398] sm:$0xff]  ;;  %v6641_v59 = vpack.c.bf16 %v134_v53, %v133_v51  ;;  %v6611_v60 = vpack.c.bf16 %v120_v55, %v119_v54  ;;  %v121_v2 = vld [vmem:[%s12644_s1 + $0x2a0] sm:$0xff] }
  0x1b   :  { %6598 = vmatpush3.bf16.msra.mxu1 %v6597_v18  ;;  %6568 = vmatprep.subr.bf16.mxu0 %v6567_v19  ;;  %v103_v61 = vld [vmem:[%s12644_s1 + $0x210] sm:$0xff]  ;;  %v104_v62 = vld [vmem:[%s12644_s1 + $0x218] sm:$0xff]  ;;  %v6643_v0 = vpack.c.bf16 %v152_v57, %v151_v56  ;;  %v122_v3 = vld [vmem:[%s12644_s1 + $0x2a8] sm:$0xff] }
  0x1c   :  { %6600 = vmatprep.subr.bf16.mxu1 %v6599_v23  ;;  %2073 = vmatprep.mubr.f32.mxu1 %v1487_v41  ;;  %v135_v63 = vld [vmem:[%s12644_s1 + $0x310] sm:$0xff]  ;;  %v136_v1 = vld [vmem:[%s12644_s1 + $0x318] sm:$0xff]  ;;  %v153_v4 = vld [vmem:[%s12644_s1 + $0x3a0] sm:$0xff]  ;;  %v6613_v6 = vpack.c.bf16 %v104_v62, %v103_v61  ;;  %v6615_v8 = vpack.c.bf16 %v122_v3, %v121_v2 }
  0x1d   :  { %v154_v5 = vld [vmem:[%s12644_s1 + $0x3a8] sm:$0xff]  ;;  %v6645_v7 = vpack.c.bf16 %v136_v1, %v135_v63  ;;  %v105_v9 = vld [vmem:[%s12644_s1 + $0x220] sm:$0xff]  ;;  %v123_v15 = vld [vmem:[%s12644_s1 + $0x2b0] sm:$0xff] }
  0x1e   :  { %6570 = vmatpush3.bf16.msra.mxu0 %v6569_v31  ;;  %v106_v10 = vld [vmem:[%s12644_s1 + $0x228] sm:$0xff]  ;;  %v137_v11 = vld [vmem:[%s12644_s1 + $0x320] sm:$0xff]  ;;  %v6647_v12 = vpack.c.bf16 %v154_v5, %v153_v4  ;;  %v124_v16 = vld [vmem:[%s12644_s1 + $0x2b8] sm:$0xff] }
  0x1f   :  { %6602 = vmatpush3.bf16.msra.mxu1 %v6601_v34  ;;  %6572 = vmatprep.subr.bf16.mxu0 %v6571_v35  ;;  %v138_v14 = vld [vmem:[%s12644_s1 + $0x328] sm:$0xff]  ;;  %v155_v17 = vld [vmem:[%s12644_s1 + $0x3b0] sm:$0xff]  ;;  %v156_v18 = vld [vmem:[%s12644_s1 + $0x3b8] sm:$0xff]  ;;  %v6617_v19 = vpack.c.bf16 %v106_v10, %v105_v9  ;;  %v6619_v21 = vpack.c.bf16 %v124_v16, %v123_v15 }
  0x20   :  { %6604 = vmatprep.subr.bf16.mxu1 %v6603_v39  ;;  %v6649_v20 = vpack.c.bf16 %v138_v14, %v137_v11  ;;  %v107_v22 = vld [vmem:[%s12644_s1 + $0x230] sm:$0xff]  ;;  %v108_v23 = vld [vmem:[%s12644_s1 + $0x238] sm:$0xff]  ;;  %v6651_v25 = vpack.c.bf16 %v156_v18, %v155_v17  ;;  %v126_v28 = vld [vmem:[%s12644_s1 + $0x2c8] sm:$0xff] }
  0x21   :  { %v139_v24 = vld [vmem:[%s12644_s1 + $0x330] sm:$0xff]  ;;  %v140_v26 = vld [vmem:[%s12644_s1 + $0x338] sm:$0xff]  ;;  %v157_v29 = vld [vmem:[%s12644_s1 + $0x3c0] sm:$0xff]  ;;  %v6621_v32 = vpack.c.bf16 %v108_v23, %v107_v22 }
  0x22   :  { %6574 = vmatpush3.bf16.msra.mxu0 %v6573_v46  ;;  %v158_v30 = vld [vmem:[%s12644_s1 + $0x3c8] sm:$0xff]  ;;  %v6653_v35 = vpack.c.bf16 %v140_v26, %v139_v24  ;;  %v109_v37 = vld [vmem:[%s12644_s1 + $0x240] sm:$0xff]  ;;  %v127_v42 = vld [vmem:[%s12644_s1 + $0x2d0] sm:$0xff] }
  0x23   :  { %6606 = vmatpush3.bf16.msra.mxu1 %v6605_v47  ;;  %6608 = vmatprep.subr.bf16.mxu0 %v6607_v48  ;;  %v16_v31 = vld [vmem:[%s12643_s0 + $0x8] sm:$0xff]  ;;  %v141_v39 = vld [vmem:[%s12644_s1 + $0x340] sm:$0xff]  ;;  %v6655_v40 = vpack.c.bf16 %v158_v30, %v157_v29  ;;  %v128_v43 = vld [vmem:[%s12644_s1 + $0x2d8] sm:$0xff] }
  0x24   :  { %6640 = vmatprep.subr.bf16.mxu1 %v6639_v52  ;;  %v1488_v34 = vcombine.high %v16_v31, %v16_v31  ;;  %v110_v38 = vld [vmem:[%s12644_s1 + $0x248] sm:$0xff]  ;;  %v159_v46 = vld [vmem:[%s12644_s1 + $0x3d0] sm:$0xff]  ;;  %v160_v47 = vld [vmem:[%s12644_s1 + $0x3d8] sm:$0xff]  ;;  %v6627_v51 = vpack.c.bf16 %v128_v43, %v127_v42 }
  0x25   :  { %2004 = vmatmul.mubr.f32.vlgmr.msra.gmra.mrb[0].mxu0 %v1478_v27  ;;  %v125_v27 = vld [vmem:[%s12644_s1 + $0x2c0] sm:$0xff]  ;;  %v142_v41 = vld [vmem:[%s12644_s1 + $0x348] sm:$0xff]  ;;  %v6625_v48 = vpack.c.bf16 %v110_v38, %v109_v37  ;;  %v111_v52 = vld [vmem:[%s12644_s1 + $0x250] sm:$0xff]  ;;  %v6659_v55 = vpack.c.bf16 %v160_v47, %v159_v46 }
  0x26   :  { %2074 = vmatmul.mubr.f32.vlgmr.msra.gmra.mrb[0].mxu1 %v1485_v33  ;;  %6610 = vmatpush3.bf16.msra.mxu0 %v6609_v58  ;;  %v8346_v33 = vrot.slane %v16_v31, %v8185_v13  ;;  %v6623_v36 = vpack.c.bf16 %v126_v28, %v125_v27  ;;  %v8369_v45 = vrot.slane %v1488_v34, %v8185_v13  ;;  %v112_v53 = vld [vmem:[%s12644_s1 + $0x258] sm:$0xff]  ;;  %v143_v54 = vld [vmem:[%s12644_s1 + $0x350] sm:$0xff]  ;;  %v129_v57 = vld [vmem:[%s12644_s1 + $0x2e0] sm:$0xff] }
  0x27   :  { %6642 = vmatpush3.bf16.msra.mxu1 %v6641_v59  ;;  %6612 = vmatprep.subr.bf16.mxu0 %v6611_v60  ;;  %v6657_v50 = vpack.c.bf16 %v142_v41, %v141_v39  ;;  %v144_v56 = vld [vmem:[%s12644_s1 + $0x358] sm:$0xff]  ;;  %v130_v58 = vld [vmem:[%s12644_s1 + $0x2e8] sm:$0xff]  ;;  %v161_v59 = vld [vmem:[%s12644_s1 + $0x3e0] sm:$0xff]  ;;  %v6629_v61 = vpack.c.bf16 %v112_v53, %v111_v52 }
  0x28   :  { %6644 = vmatprep.subr.bf16.mxu1 %v6643_v0  ;;  %v1503_v44 = vcombine.high %v8346_v33, %v8346_v33  ;;  %v1504_v49 = vcombine.high %v8369_v45, %v8369_v45  ;;  %v162_v60 = vld [vmem:[%s12644_s1 + $0x3e8] sm:$0xff]  ;;  %v6661_v62 = vpack.c.bf16 %v144_v56, %v143_v54  ;;  %v6631_v63 = vpack.c.bf16 %v130_v58, %v129_v57  ;;  %v113_v0 = vld [vmem:[%s12644_s1 + $0x260] sm:$0xff]  ;;  %v131_v5 = vld [vmem:[%s12644_s1 + $0x2f0] sm:$0xff] }
  0x29   :  { %v114_v1 = vld [vmem:[%s12644_s1 + $0x268] sm:$0xff]  ;;  %v145_v2 = vld [vmem:[%s12644_s1 + $0x360] sm:$0xff]  ;;  %v6663_v3 = vpack.c.bf16 %v162_v60, %v161_v59  ;;  %v116_v14 = vld [vmem:[%s12644_s1 + $0x278] sm:$0xff] }
  0x2a   :  { %6614 = vmatpush3.bf16.msra.mxu0 %v6613_v6  ;;  %2143 = vmatprep.mubr.f32.mxu0 %v1503_v44  ;;  %v146_v4 = vld [vmem:[%s12644_s1 + $0x368] sm:$0xff]  ;;  %v132_v6 = vld [vmem:[%s12644_s1 + $0x2f8] sm:$0xff]  ;;  %v6633_v9 = vpack.c.bf16 %v114_v1, %v113_v0  ;;  %v147_v15 = vld [vmem:[%s12644_s1 + $0x370] sm:$0xff] }
  0x2b   :  { %6646 = vmatpush3.bf16.msra.mxu1 %v6645_v7  ;;  %6616 = vmatprep.subr.bf16.mxu0 %v6615_v8  ;;  %v163_v7 = vld [vmem:[%s12644_s1 + $0x3f0] sm:$0xff]  ;;  %v164_v8 = vld [vmem:[%s12644_s1 + $0x3f8] sm:$0xff]  ;;  %v6665_v10 = vpack.c.bf16 %v146_v4, %v145_v2  ;;  %v6635_v11 = vpack.c.bf16 %v132_v6, %v131_v5  ;;  %v181_v18 = vld [vmem:[%s12644_s1 + $0x480] sm:$0xff] }
  0x2c   :  { %6648 = vmatprep.subr.bf16.mxu1 %v6647_v12  ;;  %2213 = vmatprep.mubr.f32.mxu1 %v1504_v49  ;;  %v115_v12 = vld [vmem:[%s12644_s1 + $0x270] sm:$0xff]  ;;  %v6667_v16 = vpack.c.bf16 %v164_v8, %v163_v7  ;;  %v148_v17 = vld [vmem:[%s12644_s1 + $0x378] sm:$0xff]  ;;  %v165_v23 = vld [vmem:[%s12644_s1 + $0x400] sm:$0xff] }
  0x2d   :  { %v6637_v22 = vpack.c.bf16 %v116_v14, %v115_v12  ;;  %v6669_v24 = vpack.c.bf16 %v148_v17, %v147_v15  ;;  %v166_v26 = vld [vmem:[%s12644_s1 + $0x408] sm:$0xff]  ;;  %v197_v27 = vld [vmem:[%s12644_s1 + $0x500] sm:$0xff]  ;;  %v183_v30 = vld [vmem:[%s12644_s1 + $0x490] sm:$0xff] }
  0x2e   :  { %6618 = vmatpush3.bf16.msra.mxu0 %v6617_v19  ;;  %v182_v19 = vld [vmem:[%s12644_s1 + $0x488] sm:$0xff]  ;;  %v184_v31 = vld [vmem:[%s12644_s1 + $0x498] sm:$0xff]  ;;  %v17_v37 = vld [vmem:[%s12643_s0 + $0x10] sm:$0xff] }
  0x2f   :  { %6650 = vmatpush3.bf16.msra.mxu1 %v6649_v20  ;;  %6620 = vmatprep.subr.bf16.mxu0 %v6619_v21  ;;  %v213_v20 = vld [vmem:[%s12644_s1 + $0x580] sm:$0xff]  ;;  %v214_v21 = vld [vmem:[%s12644_s1 + $0x588] sm:$0xff]  ;;  %v216_v34 = vld [vmem:[%s12644_s1 + $0x598] sm:$0xff]  ;;  %v6675_v38 = vpack.c.bf16 %v184_v31, %v183_v30  ;;  %v8488_v42 = vrot.slane %v17_v37, %v8185_v13  ;;  %v1505_v43 = vcombine.high %v17_v37, %v17_v37 }
  0x30   :  { %6652 = vmatprep.subr.bf16.mxu1 %v6651_v25  ;;  %v6671_v25 = vpack.c.bf16 %v182_v19, %v181_v18  ;;  %v198_v28 = vld [vmem:[%s12644_s1 + $0x508] sm:$0xff]  ;;  %v6703_v29 = vpack.c.bf16 %v214_v21, %v213_v20  ;;  %v167_v39 = vld [vmem:[%s12644_s1 + $0x410] sm:$0xff]  ;;  %v200_v46 = vld [vmem:[%s12644_s1 + $0x518] sm:$0xff] }
  0x31   :  { %v199_v41 = vld [vmem:[%s12644_s1 + $0x510] sm:$0xff]  ;;  %v185_v47 = vld [vmem:[%s12644_s1 + $0x4a0] sm:$0xff]  ;;  %v8509_v52 = vrot.slane %v1505_v43, %v8185_v13  ;;  %v170_v56 = vld [vmem:[%s12644_s1 + $0x428] sm:$0xff] }
  0x32   :  { %6622 = vmatpush3.bf16.msra.mxu0 %v6621_v32  ;;  %v215_v32 = vld [vmem:[%s12644_s1 + $0x590] sm:$0xff]  ;;  %v217_v49 = vld [vmem:[%s12644_s1 + $0x5a0] sm:$0xff]  ;;  %v202_v59 = vld [vmem:[%s12644_s1 + $0x528] sm:$0xff] }
  0x33   :  { %6654 = vmatpush3.bf16.msra.mxu1 %v6653_v35  ;;  %6624 = vmatprep.subr.bf16.mxu0 %v6623_v36  ;;  %v6673_v35 = vpack.c.bf16 %v166_v26, %v165_v23  ;;  %v6705_v36 = vpack.c.bf16 %v198_v28, %v197_v27  ;;  %v6707_v44 = vpack.c.bf16 %v216_v34, %v215_v32  ;;  %v201_v57 = vld [vmem:[%s12644_s1 + $0x520] sm:$0xff]  ;;  %v187_v60 = vld [vmem:[%s12644_s1 + $0x4b0] sm:$0xff]  ;;  %v172_v4 = vld [vmem:[%s12644_s1 + $0x438] sm:$0xff] }
  0x34   :  { %6656 = vmatprep.subr.bf16.mxu1 %v6655_v40  ;;  %v168_v40 = vld [vmem:[%s12644_s1 + $0x418] sm:$0xff]  ;;  %v6713_v1 = vpack.c.bf16 %v202_v59, %v201_v57  ;;  %v203_v5 = vld [vmem:[%s12644_s1 + $0x530] sm:$0xff]  ;;  %v189_v8 = vld [vmem:[%s12644_s1 + $0x4c0] sm:$0xff] }
  0x35   :  { %v6677_v53 = vpack.c.bf16 %v168_v40, %v167_v39  ;;  %v204_v7 = vld [vmem:[%s12644_s1 + $0x538] sm:$0xff]  ;;  %v174_v17 = vld [vmem:[%s12644_s1 + $0x448] sm:$0xff]  ;;  %v205_v18 = vld [vmem:[%s12644_s1 + $0x540] sm:$0xff] }
  0x36   :  { %6626 = vmatpush3.bf16.msra.mxu0 %v6625_v48  ;;  %v186_v48 = vld [vmem:[%s12644_s1 + $0x4a8] sm:$0xff]  ;;  %v6717_v14 = vpack.c.bf16 %v204_v7, %v203_v5  ;;  %v191_v21 = vld [vmem:[%s12644_s1 + $0x4d0] sm:$0xff]  ;;  %v208_v32 = vld [vmem:[%s12644_s1 + $0x558] sm:$0xff] }
  0x37   :  { %6658 = vmatpush3.bf16.msra.mxu1 %v6657_v50  ;;  %6628 = vmatprep.subr.bf16.mxu0 %v6627_v51  ;;  %v218_v50 = vld [vmem:[%s12644_s1 + $0x5a8] sm:$0xff]  ;;  %v1520_v51 = vcombine.high %v8488_v42, %v8488_v42  ;;  %v6679_v54 = vpack.c.bf16 %v186_v48, %v185_v47  ;;  %v223_v23 = vld [vmem:[%s12644_s1 + $0x5d0] sm:$0xff]  ;;  %v193_v34 = vld [vmem:[%s12644_s1 + $0x4e0] sm:$0xff] }
  0x38   :  { %6660 = vmatprep.subr.bf16.mxu1 %v6659_v55  ;;  %v169_v55 = vld [vmem:[%s12644_s1 + $0x420] sm:$0xff]  ;;  %v6711_v58 = vpack.c.bf16 %v218_v50, %v217_v49  ;;  %v206_v20 = vld [vmem:[%s12644_s1 + $0x548] sm:$0xff]  ;;  %v175_v28 = vld [vmem:[%s12644_s1 + $0x450] sm:$0xff] }
  0x39   :  { %v6681_v0 = vpack.c.bf16 %v170_v56, %v169_v55  ;;  %v6721_v26 = vpack.c.bf16 %v206_v20, %v205_v18  ;;  %v207_v30 = vld [vmem:[%s12644_s1 + $0x550] sm:$0xff]  ;;  %v226_v37 = vld [vmem:[%s12644_s1 + $0x5e8] sm:$0xff]  ;;  %v196_v49 = vld [vmem:[%s12644_s1 + $0x4f8] sm:$0xff] }
  0x3a   :  { %6630 = vmatpush3.bf16.msra.mxu0 %v6629_v61  ;;  %v188_v61 = vld [vmem:[%s12644_s1 + $0x4b8] sm:$0xff]  ;;  %v6725_v39 = vpack.c.bf16 %v208_v32, %v207_v30  ;;  %v178_v43 = vld [vmem:[%s12644_s1 + $0x468] sm:$0xff]  ;;  %v195_v48 = vld [vmem:[%s12644_s1 + $0x4f0] sm:$0xff] }
  0x3b   :  { %6662 = vmatpush3.bf16.msra.mxu1 %v6661_v62  ;;  %6632 = vmatprep.subr.bf16.mxu0 %v6631_v63  ;;  %v219_v62 = vld [vmem:[%s12644_s1 + $0x5b0] sm:$0xff]  ;;  %v220_v63 = vld [vmem:[%s12644_s1 + $0x5b8] sm:$0xff]  ;;  %v6683_v2 = vpack.c.bf16 %v188_v61, %v187_v60  ;;  %v210_v47 = vld [vmem:[%s12644_s1 + $0x568] sm:$0xff]  ;;  %v6699_v55 = vpack.c.bf16 %v196_v49, %v195_v48 }
  0x3c   :  { %6664 = vmatprep.subr.bf16.mxu1 %v6663_v3  ;;  %v171_v3 = vld [vmem:[%s12644_s1 + $0x430] sm:$0xff]  ;;  %v6715_v6 = vpack.c.bf16 %v220_v63, %v219_v62  ;;  %v180_v57 = vld [vmem:[%s12644_s1 + $0x478] sm:$0xff]  ;;  %v245_v60 = vld [vmem:[%s12644_s1 + $0x680] sm:$0xff] }
  0x3d   :  { %v6685_v12 = vpack.c.bf16 %v172_v4, %v171_v3  ;;  %v227_v50 = vld [vmem:[%s12644_s1 + $0x5f0] sm:$0xff]  ;;  %v212_v59 = vld [vmem:[%s12644_s1 + $0x578] sm:$0xff]  ;;  %v246_v61 = vld [vmem:[%s12644_s1 + $0x688] sm:$0xff] }
  0x3e   :  { %6634 = vmatpush3.bf16.msra.mxu0 %v6633_v9  ;;  %v190_v9 = vld [vmem:[%s12644_s1 + $0x4c8] sm:$0xff]  ;;  %v179_v56 = vld [vmem:[%s12644_s1 + $0x470] sm:$0xff]  ;;  %v277_v62 = vld [vmem:[%s12644_s1 + $0x780] sm:$0xff]  ;;  %v6735_v3 = vpack.c.bf16 %v246_v61, %v245_v60 }
  0x3f   :  { %6666 = vmatpush3.bf16.msra.mxu1 %v6665_v10  ;;  %6636 = vmatprep.subr.bf16.mxu0 %v6635_v11  ;;  %v221_v10 = vld [vmem:[%s12644_s1 + $0x5c0] sm:$0xff]  ;;  %v222_v11 = vld [vmem:[%s12644_s1 + $0x5c8] sm:$0xff]  ;;  %v6687_v15 = vpack.c.bf16 %v190_v9, %v189_v8  ;;  %v247_v9 = vld [vmem:[%s12644_s1 + $0x690] sm:$0xff] }
  0x40   :  { %6668 = vmatprep.subr.bf16.mxu1 %v6667_v16  ;;  %v173_v16 = vld [vmem:[%s12644_s1 + $0x440] sm:$0xff]  ;;  %v6719_v19 = vpack.c.bf16 %v222_v11, %v221_v10  ;;  %v278_v63 = vld [vmem:[%s12644_s1 + $0x788] sm:$0xff]  ;;  %v248_v10 = vld [vmem:[%s12644_s1 + $0x698] sm:$0xff] }
  0x41   :  { %v229_v4 = vld [vmem:[%s12644_s1 + $0x600] sm:$0xff]  ;;  %v230_v5 = vld [vmem:[%s12644_s1 + $0x608] sm:$0xff]  ;;  %v6767_v7 = vpack.c.bf16 %v278_v63, %v277_v62  ;;  %v6739_v18 = vpack.c.bf16 %v248_v10, %v247_v9  ;;  %v232_v20 = vld [vmem:[%s12644_s1 + $0x618] sm:$0xff] }
  0x42   :  { %6638 = vmatpush3.bf16.msra.mxu0 %v6637_v22  ;;  %v192_v22 = vld [vmem:[%s12644_s1 + $0x4d8] sm:$0xff]  ;;  %v262_v8 = vld [vmem:[%s12644_s1 + $0x708] sm:$0xff]  ;;  %v267_v48 = vld [vmem:[%s12644_s1 + $0x730] sm:$0xff] }
  0x43   :  { %6670 = vmatpush3.bf16.msra.mxu1 %v6669_v24  ;;  %6672 = vmatprep.subr.bf16.mxu0 %v6671_v25  ;;  %v224_v24 = vld [vmem:[%s12644_s1 + $0x5d8] sm:$0xff]  ;;  %v6689_v25 = vpack.c.bf16 %v174_v17, %v173_v16  ;;  %v6691_v27 = vpack.c.bf16 %v192_v22, %v191_v21  ;;  %v6737_v16 = vpack.c.bf16 %v230_v5, %v229_v4  ;;  %v263_v21 = vld [vmem:[%s12644_s1 + $0x710] sm:$0xff]  ;;  %v270_v61 = vld [vmem:[%s12644_s1 + $0x748] sm:$0xff] }
  0x44   :  { %6704 = vmatprep.subr.bf16.mxu1 %v6703_v29  ;;  %v176_v29 = vld [vmem:[%s12644_s1 + $0x458] sm:$0xff]  ;;  %v6723_v31 = vpack.c.bf16 %v224_v24, %v223_v23  ;;  %v249_v24 = vld [vmem:[%s12644_s1 + $0x6a0] sm:$0xff]  ;;  %v255_v62 = vld [vmem:[%s12644_s1 + $0x6d0] sm:$0xff] }
  0x45   :  { %2144 = vmatmul.mubr.f32.vlgmr.msra.gmra.mrb[2].mxu0 %v8346_v33  ;;  %v6709_v33 = vpack.c.bf16 %v200_v46, %v199_v41  ;;  %v177_v41 = vld [vmem:[%s12644_s1 + $0x460] sm:$0xff]  ;;  %v264_v23 = vld [vmem:[%s12644_s1 + $0x718] sm:$0xff]  ;;  %v239_v5 = vld [vmem:[%s12644_s1 + $0x650] sm:$0xff] }
  0x46   :  { %2214 = vmatmul.mubr.f32.vlgmr.msra.gmra.mrb[2].mxu1 %v8369_v45  ;;  %6674 = vmatpush3.bf16.msra.mxu0 %v6673_v35  ;;  %v1521_v45 = vcombine.high %v8509_v52, %v8509_v52  ;;  %v194_v35 = vld [vmem:[%s12644_s1 + $0x4e8] sm:$0xff]  ;;  %v256_v63 = vld [vmem:[%s12644_s1 + $0x6d8] sm:$0xff]  ;;  %v257_v10 = vld [vmem:[%s12644_s1 + $0x6e0] sm:$0xff] }
  0x47   :  { %6706 = vmatpush3.bf16.msra.mxu1 %v6705_v36  ;;  %6676 = vmatprep.subr.bf16.mxu0 %v6675_v38  ;;  %v225_v36 = vld [vmem:[%s12644_s1 + $0x5e0] sm:$0xff]  ;;  %v6693_v38 = vpack.c.bf16 %v176_v29, %v175_v28  ;;  %v6695_v40 = vpack.c.bf16 %v194_v35, %v193_v34  ;;  %v282_v28 = vld [vmem:[%s12644_s1 + $0x7a8] sm:$0xff]  ;;  %v6755_v4 = vpack.c.bf16 %v256_v63, %v255_v62  ;;  %v272_v9 = vld [vmem:[%s12644_s1 + $0x758] sm:$0xff] }
  0x48   :  { %6708 = vmatprep.subr.bf16.mxu1 %v6707_v44  ;;  %2283 = vmatprep.mubr.f32.mxu0 %v1520_v51  ;;  %v209_v44 = vld [vmem:[%s12644_s1 + $0x560] sm:$0xff]  ;;  %v6727_v46 = vpack.c.bf16 %v226_v37, %v225_v36  ;;  %v228_v51 = vld [vmem:[%s12644_s1 + $0x5f8] sm:$0xff]  ;;  %v234_v34 = vld [vmem:[%s12644_s1 + $0x628] sm:$0xff] }
  0x49   :  { %2353 = vmatprep.mubr.f32.mxu1 %v1521_v45  ;;  %v211_v45 = vld [vmem:[%s12644_s1 + $0x570] sm:$0xff]  ;;  %v265_v35 = vld [vmem:[%s12644_s1 + $0x720] sm:$0xff]  ;;  %v266_v36 = vld [vmem:[%s12644_s1 + $0x728] sm:$0xff] }
  0x4a   :  { %6678 = vmatpush3.bf16.msra.mxu0 %v6677_v53  ;;  %v6697_v53 = vpack.c.bf16 %v178_v43, %v177_v41  ;;  %v251_v37 = vld [vmem:[%s12644_s1 + $0x6b0] sm:$0xff]  ;;  %v6777_v43 = vpack.c.bf16 %v266_v36, %v265_v35  ;;  %v276_v36 = vld [vmem:[%s12644_s1 + $0x778] sm:$0xff] }
  0x4b   :  { %6710 = vmatpush3.bf16.msra.mxu1 %v6709_v33  ;;  %6680 = vmatprep.subr.bf16.mxu0 %v6679_v54  ;;  %v18_v33 = vld [vmem:[%s12643_s0 + $0x18] sm:$0xff]  ;;  %v6729_v54 = vpack.c.bf16 %v210_v47, %v209_v44  ;;  %v275_v35 = vld [vmem:[%s12644_s1 + $0x770] sm:$0xff] }
  0x4c   :  { %6712 = vmatprep.subr.bf16.mxu1 %v6711_v58  ;;  %v6731_v58 = vpack.c.bf16 %v228_v51, %v227_v50  ;;  %v8680_v11 = vrot.slane %v18_v33, %v8185_v13  ;;  %v236_v47 = vld [vmem:[%s12644_s1 + $0x638] sm:$0xff]  ;;  %v253_v51 = vld [vmem:[%s12644_s1 + $0x6c0] sm:$0xff]  ;;  %v327_v62 = vld [vmem:[%s12644_s1 + $0x910] sm:$0xff] }
  0x4d   :  { %v268_v50 = vld [vmem:[%s12644_s1 + $0x738] sm:$0xff] }
  0x4e   :  { %6682 = vmatpush3.bf16.msra.mxu0 %v6681_v0  ;;  %v1522_v0 = vcombine.high %v18_v33, %v18_v33  ;;  %v285_v33 = vld [vmem:[%s12644_s1 + $0x7c0] sm:$0xff] }
  0x4f   :  { %6714 = vmatpush3.bf16.msra.mxu1 %v6713_v1  ;;  %6684 = vmatprep.subr.bf16.mxu0 %v6683_v2  ;;  %v6701_v1 = vpack.c.bf16 %v180_v57, %v179_v56  ;;  %v6733_v2 = vpack.c.bf16 %v212_v59, %v211_v45  ;;  %v6781_v56 = vpack.c.bf16 %v268_v50, %v267_v48  ;;  %v237_v45 = vld [vmem:[%s12644_s1 + $0x640] sm:$0xff]  ;;  %v294_v48 = vld [vmem:[%s12644_s1 + $0x808] sm:$0xff] }
  0x50   :  { %6716 = vmatprep.subr.bf16.mxu1 %v6715_v6  ;;  %v261_v6 = vld [vmem:[%s12644_s1 + $0x700] sm:$0xff] }
  0x51   :  { %v6769_v17 = vpack.c.bf16 %v262_v8, %v261_v6  ;;  %v269_v59 = vld [vmem:[%s12644_s1 + $0x740] sm:$0xff]  ;;  %v240_v6 = vld [vmem:[%s12644_s1 + $0x658] sm:$0xff] }
  0x52   :  { %6686 = vmatpush3.bf16.msra.mxu0 %v6685_v12  ;;  %v279_v12 = vld [vmem:[%s12644_s1 + $0x790] sm:$0xff] }
  0x53   :  { %6718 = vmatpush3.bf16.msra.mxu1 %v6717_v14  ;;  %6688 = vmatprep.subr.bf16.mxu0 %v6687_v15  ;;  %v280_v14 = vld [vmem:[%s12644_s1 + $0x798] sm:$0xff]  ;;  %v8689_v15 = vrot.slane %v1522_v0, %v8185_v13  ;;  %v287_v0 = vld [vmem:[%s12644_s1 + $0x7d0] sm:$0xff] }
  0x54   :  { %6720 = vmatprep.subr.bf16.mxu1 %v6719_v19  ;;  %v231_v19 = vld [vmem:[%s12644_s1 + $0x610] sm:$0xff]  ;;  %v6771_v22 = vpack.c.bf16 %v280_v14, %v279_v12  ;;  %v258_v12 = vld [vmem:[%s12644_s1 + $0x6e8] sm:$0xff]  ;;  %v289_v14 = vld [vmem:[%s12644_s1 + $0x7e0] sm:$0xff] }
  0x55   :  { %v1538_v29 = vcombine.high %v8689_v15, %v8689_v15  ;;  %v6741_v30 = vpack.c.bf16 %v232_v20, %v231_v19  ;;  %v6759_v19 = vpack.c.bf16 %v258_v12, %v257_v10  ;;  %v241_v20 = vld [vmem:[%s12644_s1 + $0x660] sm:$0xff]  ;;  %v298_v10 = vld [vmem:[%s12644_s1 + $0x828] sm:$0xff] }
  0x56   :  { %6690 = vmatpush3.bf16.msra.mxu0 %v6689_v25  ;;  %v250_v25 = vld [vmem:[%s12644_s1 + $0x6a8] sm:$0xff]  ;;  %v329_v12 = vld [vmem:[%s12644_s1 + $0x920] sm:$0xff] }
  0x57   :  { %6722 = vmatpush3.bf16.msra.mxu1 %v6721_v26  ;;  %6692 = vmatprep.subr.bf16.mxu0 %v6691_v27  ;;  %v1537_v26 = vcombine.high %v8680_v11, %v8680_v11  ;;  %v281_v27 = vld [vmem:[%s12644_s1 + $0x7a0] sm:$0xff]  ;;  %v6743_v32 = vpack.c.bf16 %v250_v25, %v249_v24  ;;  %v274_v24 = vld [vmem:[%s12644_s1 + $0x768] sm:$0xff]  ;;  %v259_v25 = vld [vmem:[%s12644_s1 + $0x6f0] sm:$0xff] }
  0x58   :  { %6724 = vmatprep.subr.bf16.mxu1 %v6723_v31  ;;  %v6773_v31 = vpack.c.bf16 %v264_v23, %v263_v21  ;;  %v242_v21 = vld [vmem:[%s12644_s1 + $0x668] sm:$0xff] }
  0x5a   :  { %6694 = vmatpush3.bf16.msra.mxu0 %v6693_v38  ;;  %v252_v38 = vld [vmem:[%s12644_s1 + $0x6b8] sm:$0xff] }
  0x5b   :  { %6726 = vmatpush3.bf16.msra.mxu1 %v6725_v39  ;;  %6696 = vmatprep.subr.bf16.mxu0 %v6695_v40  ;;  %v283_v39 = vld [vmem:[%s12644_s1 + $0x7b0] sm:$0xff]  ;;  %v284_v40 = vld [vmem:[%s12644_s1 + $0x7b8] sm:$0xff]  ;;  %v6747_v44 = vpack.c.bf16 %v252_v38, %v251_v37  ;;  %v309_v37 = vld [vmem:[%s12644_s1 + $0x880] sm:$0xff] }
  0x5c   :  { %6728 = vmatprep.subr.bf16.mxu1 %v6727_v46  ;;  %v235_v46 = vld [vmem:[%s12644_s1 + $0x630] sm:$0xff]  ;;  %v6779_v49 = vpack.c.bf16 %v284_v40, %v283_v39  ;;  %v310_v38 = vld [vmem:[%s12644_s1 + $0x888] sm:$0xff]  ;;  %v341_v39 = vld [vmem:[%s12644_s1 + $0x980] sm:$0xff] }
  0x5d   :  { %v342_v40 = vld [vmem:[%s12644_s1 + $0x988] sm:$0xff] }
  0x5e   :  { %6698 = vmatpush3.bf16.msra.mxu0 %v6697_v53  ;;  %v254_v53 = vld [vmem:[%s12644_s1 + $0x6c8] sm:$0xff]  ;;  %v6831_v50 = vpack.c.bf16 %v342_v40, %v341_v39  ;;  %v319_v39 = vld [vmem:[%s12644_s1 + $0x8d0] sm:$0xff]  ;;  %v320_v40 = vld [vmem:[%s12644_s1 + $0x8d8] sm:$0xff] }
  0x5f   :  { %6730 = vmatpush3.bf16.msra.mxu1 %v6729_v54  ;;  %6700 = vmatprep.subr.bf16.mxu0 %v6699_v55  ;;  %v286_v54 = vld [vmem:[%s12644_s1 + $0x7c8] sm:$0xff]  ;;  %v6749_v55 = vpack.c.bf16 %v236_v47, %v235_v46  ;;  %v6751_v57 = vpack.c.bf16 %v254_v53, %v253_v51  ;;  %v6799_v46 = vpack.c.bf16 %v310_v38, %v309_v37  ;;  %v293_v47 = vld [vmem:[%s12644_s1 + $0x800] sm:$0xff]  ;;  %v311_v53 = vld [vmem:[%s12644_s1 + $0x890] sm:$0xff] }
  0x60   :  { %6732 = vmatprep.subr.bf16.mxu1 %v6731_v58  ;;  %v238_v58 = vld [vmem:[%s12644_s1 + $0x648] sm:$0xff]  ;;  %v6783_v60 = vpack.c.bf16 %v286_v54, %v285_v33  ;;  %v312_v33 = vld [vmem:[%s12644_s1 + $0x898] sm:$0xff] }
  0x61   :  { %v326_v51 = vld [vmem:[%s12644_s1 + $0x908] sm:$0xff] }
  0x62   :  { %6702 = vmatpush3.bf16.msra.mxu0 %v6701_v1  ;;  %v288_v1 = vld [vmem:[%s12644_s1 + $0x7d8] sm:$0xff]  ;;  %v334_v38 = vld [vmem:[%s12644_s1 + $0x948] sm:$0xff] }
  0x63   :  { %6734 = vmatpush3.bf16.msra.mxu1 %v6733_v2  ;;  %6736 = vmatprep.subr.bf16.mxu0 %v6735_v3  ;;  %v6753_v2 = vpack.c.bf16 %v238_v58, %v237_v45  ;;  %v6785_v3 = vpack.c.bf16 %v270_v61, %v269_v59  ;;  %v6787_v8 = vpack.c.bf16 %v288_v1, %v287_v0  ;;  %v296_v61 = vld [vmem:[%s12644_s1 + $0x818] sm:$0xff]  ;;  %v313_v1 = vld [vmem:[%s12644_s1 + $0x8a0] sm:$0xff] }
  0x64   :  { %6768 = vmatprep.subr.bf16.mxu1 %v6767_v7  ;;  %v271_v7 = vld [vmem:[%s12644_s1 + $0x750] sm:$0xff]  ;;  %v6801_v45 = vpack.c.bf16 %v294_v48, %v293_v47  ;;  %v6803_v59 = vpack.c.bf16 %v312_v33, %v311_v53  ;;  %v328_v0 = vld [vmem:[%s12644_s1 + $0x918] sm:$0xff]  ;;  %v6819_v47 = vpack.c.bf16 %v320_v40, %v319_v39  ;;  %v321_v33 = vld [vmem:[%s12644_s1 + $0x8e0] sm:$0xff] }
  0x65   :  { %2284 = vmatmul.mubr.f32.vlgmr.msra.gmra.mrb[4].mxu0 %v8488_v42  ;;  %v233_v42 = vld [vmem:[%s12644_s1 + $0x620] sm:$0xff]  ;;  %v303_v48 = vld [vmem:[%s12644_s1 + $0x850] sm:$0xff]  ;;  %v336_v53 = vld [vmem:[%s12644_s1 + $0x958] sm:$0xff] }
  0x66   :  { %2354 = vmatmul.mubr.f32.vlgmr.msra.gmra.mrb[4].mxu1 %v8509_v52  ;;  %6738 = vmatpush3.bf16.msra.mxu0 %v6737_v16  ;;  %v6775_v52 = vpack.c.bf16 %v282_v28, %v281_v27  ;;  %v6745_v41 = vpack.c.bf16 %v234_v34, %v233_v42  ;;  %v290_v16 = vld [vmem:[%s12644_s1 + $0x7e8] sm:$0xff]  ;;  %v291_v27 = vld [vmem:[%s12644_s1 + $0x7f0] sm:$0xff]  ;;  %v292_v28 = vld [vmem:[%s12644_s1 + $0x7f8] sm:$0xff] }
  0x67   :  { %6770 = vmatpush3.bf16.msra.mxu1 %v6769_v17  ;;  %6740 = vmatprep.subr.bf16.mxu0 %v6739_v18  ;;  %v6757_v17 = vpack.c.bf16 %v240_v6, %v239_v5  ;;  %v6789_v18 = vpack.c.bf16 %v272_v9, %v271_v7  ;;  %v6791_v23 = vpack.c.bf16 %v290_v16, %v289_v14  ;;  %v243_v42 = vld [vmem:[%s12644_s1 + $0x670] sm:$0xff]  ;;  %v244_v34 = vld [vmem:[%s12644_s1 + $0x678] sm:$0xff]  ;;  %v346_v5 = vld [vmem:[%s12644_s1 + $0x9a8] sm:$0xff] }
  0x68   :  { %6772 = vmatprep.subr.bf16.mxu1 %v6771_v22  ;;  %2423 = vmatprep.mubr.f32.mxu0 %v1537_v26  ;;  %v273_v22 = vld [vmem:[%s12644_s1 + $0x760] sm:$0xff]  ;;  %v260_v26 = vld [vmem:[%s12644_s1 + $0x6f8] sm:$0xff]  ;;  %v330_v14 = vld [vmem:[%s12644_s1 + $0x928] sm:$0xff] }
  0x69   :  { %2493 = vmatprep.mubr.f32.mxu1 %v1538_v29  ;;  %v6761_v29 = vpack.c.bf16 %v242_v21, %v241_v20  ;;  %v315_v16 = vld [vmem:[%s12644_s1 + $0x8b0] sm:$0xff]  ;;  %v6841_v21 = vpack.c.bf16 %v330_v14, %v329_v12  ;;  %v340_v14 = vld [vmem:[%s12644_s1 + $0x978] sm:$0xff] }
  0x6a   :  { %6742 = vmatpush3.bf16.msra.mxu0 %v6741_v30  ;;  %v19_v30 = vld [vmem:[%s12643_s0 + $0x20] sm:$0xff]  ;;  %v339_v12 = vld [vmem:[%s12644_s1 + $0x970] sm:$0xff] }
  0x6b   :  { %6774 = vmatpush3.bf16.msra.mxu1 %v6773_v31  ;;  %6744 = vmatprep.subr.bf16.mxu0 %v6743_v32  ;;  %v6793_v31 = vpack.c.bf16 %v274_v24, %v273_v22  ;;  %v6763_v32 = vpack.c.bf16 %v260_v26, %v259_v25  ;;  %v8887_v54 = vrot.slane %v19_v30, %v8185_v13  ;;  %v300_v24 = vld [vmem:[%s12644_s1 + $0x838] sm:$0xff]  ;;  %v331_v25 = vld [vmem:[%s12644_s1 + $0x930] sm:$0xff] }
  0x6c   :  { %6776 = vmatprep.subr.bf16.mxu1 %v6775_v52  ;;  %v6795_v52 = vpack.c.bf16 %v292_v28, %v291_v27  ;;  %v332_v27 = vld [vmem:[%s12644_s1 + $0x938] sm:$0xff]  ;;  %v317_v28 = vld [vmem:[%s12644_s1 + $0x8c0] sm:$0xff]  ;;  %v391_v39 = vld [vmem:[%s12644_s1 + $0xb10] sm:$0xff] }
  0x6e   :  { %6746 = vmatpush3.bf16.msra.mxu0 %v6745_v41  ;;  %v1539_v41 = vcombine.high %v19_v30, %v19_v30  ;;  %v349_v30 = vld [vmem:[%s12644_s1 + $0x9c0] sm:$0xff] }
  0x6f   :  { %6778 = vmatpush3.bf16.msra.mxu1 %v6777_v43  ;;  %6748 = vmatprep.subr.bf16.mxu0 %v6747_v44  ;;  %v6765_v43 = vpack.c.bf16 %v244_v34, %v243_v42  ;;  %v6797_v44 = vpack.c.bf16 %v276_v36, %v275_v35  ;;  %v6845_v42 = vpack.c.bf16 %v332_v27, %v331_v25  ;;  %v301_v35 = vld [vmem:[%s12644_s1 + $0x840] sm:$0xff]  ;;  %v358_v25 = vld [vmem:[%s12644_s1 + $0xa08] sm:$0xff] }
  0x70   :  { %6780 = vmatprep.subr.bf16.mxu1 %v6779_v49  ;;  %v325_v49 = vld [vmem:[%s12644_s1 + $0x900] sm:$0xff] }
  0x71   :  { %v6833_v58 = vpack.c.bf16 %v326_v51, %v325_v49  ;;  %v333_v36 = vld [vmem:[%s12644_s1 + $0x940] sm:$0xff]  ;;  %v304_v49 = vld [vmem:[%s12644_s1 + $0x858] sm:$0xff] }
  0x72   :  { %6750 = vmatpush3.bf16.msra.mxu0 %v6749_v55  ;;  %v343_v55 = vld [vmem:[%s12644_s1 + $0x990] sm:$0xff] }
  0x73   :  { %6782 = vmatpush3.bf16.msra.mxu1 %v6781_v56  ;;  %6752 = vmatprep.subr.bf16.mxu0 %v6751_v57  ;;  %v344_v56 = vld [vmem:[%s12644_s1 + $0x998] sm:$0xff]  ;;  %v8896_v57 = vrot.slane %v1539_v41, %v8185_v13  ;;  %v351_v41 = vld [vmem:[%s12644_s1 + $0x9d0] sm:$0xff] }
  0x74   :  { %6784 = vmatprep.subr.bf16.mxu1 %v6783_v60  ;;  %v295_v60 = vld [vmem:[%s12644_s1 + $0x810] sm:$0xff]  ;;  %v6835_v63 = vpack.c.bf16 %v344_v56, %v343_v55  ;;  %v322_v55 = vld [vmem:[%s12644_s1 + $0x8e8] sm:$0xff]  ;;  %v353_v56 = vld [vmem:[%s12644_s1 + $0x9e0] sm:$0xff] }
  0x75   :  { %v1555_v6 = vcombine.high %v8896_v57, %v8896_v57  ;;  %v6805_v7 = vpack.c.bf16 %v296_v61, %v295_v60  ;;  %v6823_v60 = vpack.c.bf16 %v322_v55, %v321_v33  ;;  %v305_v61 = vld [vmem:[%s12644_s1 + $0x860] sm:$0xff]  ;;  %v362_v33 = vld [vmem:[%s12644_s1 + $0xa28] sm:$0xff] }
  0x76   :  { %6754 = vmatpush3.bf16.msra.mxu0 %v6753_v2  ;;  %v314_v2 = vld [vmem:[%s12644_s1 + $0x8a8] sm:$0xff]  ;;  %v393_v55 = vld [vmem:[%s12644_s1 + $0xb20] sm:$0xff] }
  0x77   :  { %6786 = vmatpush3.bf16.msra.mxu1 %v6785_v3  ;;  %6756 = vmatprep.subr.bf16.mxu0 %v6755_v4  ;;  %v1554_v3 = vcombine.high %v8887_v54, %v8887_v54  ;;  %v345_v4 = vld [vmem:[%s12644_s1 + $0x9a0] sm:$0xff]  ;;  %v6807_v9 = vpack.c.bf16 %v314_v2, %v313_v1  ;;  %v338_v1 = vld [vmem:[%s12644_s1 + $0x968] sm:$0xff]  ;;  %v323_v2 = vld [vmem:[%s12644_s1 + $0x8f0] sm:$0xff] }
  0x78   :  { %6788 = vmatprep.subr.bf16.mxu1 %v6787_v8  ;;  %v6837_v8 = vpack.c.bf16 %v328_v0, %v327_v62  ;;  %v306_v62 = vld [vmem:[%s12644_s1 + $0x868] sm:$0xff] }
  0x7a   :  { %6758 = vmatpush3.bf16.msra.mxu0 %v6757_v17  ;;  %v316_v17 = vld [vmem:[%s12644_s1 + $0x8b8] sm:$0xff] }
  0x7b   :  { %6790 = vmatpush3.bf16.msra.mxu1 %v6789_v18  ;;  %6760 = vmatprep.subr.bf16.mxu0 %v6759_v19  ;;  %v347_v18 = vld [vmem:[%s12644_s1 + $0x9b0] sm:$0xff]  ;;  %v348_v19 = vld [vmem:[%s12644_s1 + $0x9b8] sm:$0xff]  ;;  %v6811_v22 = vpack.c.bf16 %v316_v17, %v315_v16  ;;  %v373_v16 = vld [vmem:[%s12644_s1 + $0xa80] sm:$0xff] }
  0x7c   :  { %6792 = vmatprep.subr.bf16.mxu1 %v6791_v23  ;;  %v299_v23 = vld [vmem:[%s12644_s1 + $0x830] sm:$0xff]  ;;  %v6843_v26 = vpack.c.bf16 %v348_v19, %v347_v18  ;;  %v374_v17 = vld [vmem:[%s12644_s1 + $0xa88] sm:$0xff]  ;;  %v405_v18 = vld [vmem:[%s12644_s1 + $0xb80] sm:$0xff] }
  0x7d   :  { %v406_v19 = vld [vmem:[%s12644_s1 + $0xb88] sm:$0xff] }
  0x7e   :  { %6762 = vmatpush3.bf16.msra.mxu0 %v6761_v29  ;;  %v318_v29 = vld [vmem:[%s12644_s1 + $0x8c8] sm:$0xff]  ;;  %v6895_v27 = vpack.c.bf16 %v406_v19, %v405_v18  ;;  %v383_v18 = vld [vmem:[%s12644_s1 + $0xad0] sm:$0xff]  ;;  %v384_v19 = vld [vmem:[%s12644_s1 + $0xad8] sm:$0xff] }
  0x7f   :  { %6794 = vmatpush3.bf16.msra.mxu1 %v6793_v31  ;;  %6764 = vmatprep.subr.bf16.mxu0 %v6763_v32  ;;  %v350_v31 = vld [vmem:[%s12644_s1 + $0x9c8] sm:$0xff]  ;;  %v6813_v32 = vpack.c.bf16 %v300_v24, %v299_v23  ;;  %v6815_v34 = vpack.c.bf16 %v318_v29, %v317_v28  ;;  %v6863_v23 = vpack.c.bf16 %v374_v17, %v373_v16  ;;  %v357_v24 = vld [vmem:[%s12644_s1 + $0xa00] sm:$0xff]  ;;  %v375_v29 = vld [vmem:[%s12644_s1 + $0xa90] sm:$0xff] }
  0x80   :  { %6796 = vmatprep.subr.bf16.mxu1 %v6795_v52  ;;  %v302_v52 = vld [vmem:[%s12644_s1 + $0x848] sm:$0xff]  ;;  %v6847_v37 = vpack.c.bf16 %v350_v31, %v349_v30  ;;  %v376_v30 = vld [vmem:[%s12644_s1 + $0xa98] sm:$0xff] }
  0x81   :  { %v390_v28 = vld [vmem:[%s12644_s1 + $0xb08] sm:$0xff] }
  0x82   :  { %6766 = vmatpush3.bf16.msra.mxu0 %v6765_v43  ;;  %v352_v43 = vld [vmem:[%s12644_s1 + $0x9d8] sm:$0xff]  ;;  %v398_v17 = vld [vmem:[%s12644_s1 + $0xb48] sm:$0xff] }
  0x83   :  { %6798 = vmatpush3.bf16.msra.mxu1 %v6797_v44  ;;  %6800 = vmatprep.subr.bf16.mxu0 %v6799_v46  ;;  %v6817_v44 = vpack.c.bf16 %v302_v52, %v301_v35  ;;  %v6849_v46 = vpack.c.bf16 %v334_v38, %v333_v36  ;;  %v6851_v51 = vpack.c.bf16 %v352_v43, %v351_v41  ;;  %v360_v38 = vld [vmem:[%s12644_s1 + $0xa18] sm:$0xff]  ;;  %v377_v43 = vld [vmem:[%s12644_s1 + $0xaa0] sm:$0xff] }
  0x84   :  { %6832 = vmatprep.subr.bf16.mxu1 %v6831_v50  ;;  %v335_v50 = vld [vmem:[%s12644_s1 + $0x950] sm:$0xff]  ;;  %v6865_v35 = vpack.c.bf16 %v358_v25, %v357_v24  ;;  %v6867_v36 = vpack.c.bf16 %v376_v30, %v375_v29  ;;  %v392_v41 = vld [vmem:[%s12644_s1 + $0xb18] sm:$0xff]  ;;  %v6883_v24 = vpack.c.bf16 %v384_v19, %v383_v18  ;;  %v385_v30 = vld [vmem:[%s12644_s1 + $0xae0] sm:$0xff] }
  0x85   :  { %2424 = vmatmul.mubr.f32.vlgmr.msra.gmra.mrb[6].mxu0 %v8680_v11  ;;  %v297_v11 = vld [vmem:[%s12644_s1 + $0x820] sm:$0xff]  ;;  %v367_v25 = vld [vmem:[%s12644_s1 + $0xa50] sm:$0xff]  ;;  %v400_v29 = vld [vmem:[%s12644_s1 + $0xb58] sm:$0xff] }
  0x86   :  { %2494 = vmatmul.mubr.f32.vlgmr.msra.gmra.mrb[6].mxu1 %v8689_v15  ;;  %6802 = vmatpush3.bf16.msra.mxu0 %v6801_v45  ;;  %v6839_v15 = vpack.c.bf16 %v346_v5, %v345_v4  ;;  %v6809_v20 = vpack.c.bf16 %v298_v10, %v297_v11  ;;  %v354_v45 = vld [vmem:[%s12644_s1 + $0x9e8] sm:$0xff]  ;;  %v355_v4 = vld [vmem:[%s12644_s1 + $0x9f0] sm:$0xff]  ;;  %v356_v5 = vld [vmem:[%s12644_s1 + $0x9f8] sm:$0xff] }
  0x87   :  { %6834 = vmatpush3.bf16.msra.mxu1 %v6833_v58  ;;  %6804 = vmatprep.subr.bf16.mxu0 %v6803_v59  ;;  %v6821_v58 = vpack.c.bf16 %v304_v49, %v303_v48  ;;  %v6853_v59 = vpack.c.bf16 %v336_v53, %v335_v50  ;;  %v6855_v0 = vpack.c.bf16 %v354_v45, %v353_v56  ;;  %v307_v11 = vld [vmem:[%s12644_s1 + $0x870] sm:$0xff]  ;;  %v308_v10 = vld [vmem:[%s12644_s1 + $0x878] sm:$0xff]  ;;  %v410_v48 = vld [vmem:[%s12644_s1 + $0xba8] sm:$0xff] }
  0x88   :  { %6836 = vmatprep.subr.bf16.mxu1 %v6835_v63  ;;  %2563 = vmatprep.mubr.f32.mxu0 %v1554_v3  ;;  %v337_v63 = vld [vmem:[%s12644_s1 + $0x960] sm:$0xff]  ;;  %v324_v3 = vld [vmem:[%s12644_s1 + $0x8f8] sm:$0xff]  ;;  %v394_v56 = vld [vmem:[%s12644_s1 + $0xb28] sm:$0xff] }
  0x89   :  { %2633 = vmatprep.mubr.f32.mxu1 %v1555_v6  ;;  %v6825_v6 = vpack.c.bf16 %v306_v62, %v305_v61  ;;  %v379_v45 = vld [vmem:[%s12644_s1 + $0xab0] sm:$0xff]  ;;  %v6905_v62 = vpack.c.bf16 %v394_v56, %v393_v55  ;;  %v404_v56 = vld [vmem:[%s12644_s1 + $0xb78] sm:$0xff] }
  0x8a   :  { %6806 = vmatpush3.bf16.msra.mxu0 %v6805_v7  ;;  %v20_v7 = vld [vmem:[%s12643_s0 + $0x28] sm:$0xff]  ;;  %v403_v55 = vld [vmem:[%s12644_s1 + $0xb70] sm:$0xff] }
  0x8b   :  { %6838 = vmatpush3.bf16.msra.mxu1 %v6837_v8  ;;  %6808 = vmatprep.subr.bf16.mxu0 %v6807_v9  ;;  %v6857_v8 = vpack.c.bf16 %v338_v1, %v337_v63  ;;  %v6827_v9 = vpack.c.bf16 %v324_v3, %v323_v2  ;;  %v9094_v31 = vrot.slane %v20_v7, %v8185_v13  ;;  %v364_v1 = vld [vmem:[%s12644_s1 + $0xa38] sm:$0xff]  ;;  %v395_v2 = vld [vmem:[%s12644_s1 + $0xb30] sm:$0xff] }
  0x8c   :  { %6840 = vmatprep.subr.bf16.mxu1 %v6839_v15  ;;  %v6859_v15 = vpack.c.bf16 %v356_v5, %v355_v4  ;;  %v396_v4 = vld [vmem:[%s12644_s1 + $0xb38] sm:$0xff]  ;;  %v381_v5 = vld [vmem:[%s12644_s1 + $0xac0] sm:$0xff]  ;;  %v455_v18 = vld [vmem:[%s12644_s1 + $0xd10] sm:$0xff] }
  0x8e   :  { %6810 = vmatpush3.bf16.msra.mxu0 %v6809_v20  ;;  %v1556_v20 = vcombine.high %v20_v7, %v20_v7  ;;  %v413_v7 = vld [vmem:[%s12644_s1 + $0xbc0] sm:$0xff] }
  0x8f   :  { %6842 = vmatpush3.bf16.msra.mxu1 %v6841_v21  ;;  %6812 = vmatprep.subr.bf16.mxu0 %v6811_v22  ;;  %v6829_v21 = vpack.c.bf16 %v308_v10, %v307_v11  ;;  %v6861_v22 = vpack.c.bf16 %v340_v14, %v339_v12  ;;  %v6909_v11 = vpack.c.bf16 %v396_v4, %v395_v2  ;;  %v365_v12 = vld [vmem:[%s12644_s1 + $0xa40] sm:$0xff]  ;;  %v422_v2 = vld [vmem:[%s12644_s1 + $0xc08] sm:$0xff] }
  0x90   :  { %6844 = vmatprep.subr.bf16.mxu1 %v6843_v26  ;;  %v389_v26 = vld [vmem:[%s12644_s1 + $0xb00] sm:$0xff] }
  0x91   :  { %v6897_v52 = vpack.c.bf16 %v390_v28, %v389_v26  ;;  %v397_v14 = vld [vmem:[%s12644_s1 + $0xb40] sm:$0xff]  ;;  %v368_v26 = vld [vmem:[%s12644_s1 + $0xa58] sm:$0xff] }
  0x92   :  { %6814 = vmatpush3.bf16.msra.mxu0 %v6813_v32  ;;  %v407_v32 = vld [vmem:[%s12644_s1 + $0xb90] sm:$0xff] }
  0x93   :  { %6846 = vmatpush3.bf16.msra.mxu1 %v6845_v42  ;;  %6816 = vmatprep.subr.bf16.mxu0 %v6815_v34  ;;  %v408_v42 = vld [vmem:[%s12644_s1 + $0xb98] sm:$0xff]  ;;  %v9103_v34 = vrot.slane %v1556_v20, %v8185_v13  ;;  %v415_v20 = vld [vmem:[%s12644_s1 + $0xbd0] sm:$0xff] }
  0x94   :  { %6848 = vmatprep.subr.bf16.mxu1 %v6847_v37  ;;  %v359_v37 = vld [vmem:[%s12644_s1 + $0xa10] sm:$0xff]  ;;  %v6899_v40 = vpack.c.bf16 %v408_v42, %v407_v32  ;;  %v386_v32 = vld [vmem:[%s12644_s1 + $0xae8] sm:$0xff]  ;;  %v417_v42 = vld [vmem:[%s12644_s1 + $0xbe0] sm:$0xff] }
  0x95   :  { %v1572_v49 = vcombine.high %v9103_v34, %v9103_v34  ;;  %v6869_v50 = vpack.c.bf16 %v360_v38, %v359_v37  ;;  %v6887_v37 = vpack.c.bf16 %v386_v32, %v385_v30  ;;  %v369_v38 = vld [vmem:[%s12644_s1 + $0xa60] sm:$0xff]  ;;  %v426_v30 = vld [vmem:[%s12644_s1 + $0xc28] sm:$0xff] }
  0x96   :  { %6818 = vmatpush3.bf16.msra.mxu0 %v6817_v44  ;;  %v378_v44 = vld [vmem:[%s12644_s1 + $0xaa8] sm:$0xff]  ;;  %v457_v32 = vld [vmem:[%s12644_s1 + $0xd20] sm:$0xff] }
  0x97   :  { %6850 = vmatpush3.bf16.msra.mxu1 %v6849_v46  ;;  %6820 = vmatprep.subr.bf16.mxu0 %v6819_v47  ;;  %v1571_v46 = vcombine.high %v9094_v31, %v9094_v31  ;;  %v409_v47 = vld [vmem:[%s12644_s1 + $0xba0] sm:$0xff]  ;;  %v6871_v53 = vpack.c.bf16 %v378_v44, %v377_v43  ;;  %v402_v43 = vld [vmem:[%s12644_s1 + $0xb68] sm:$0xff]  ;;  %v387_v44 = vld [vmem:[%s12644_s1 + $0xaf0] sm:$0xff] }
  0x98   :  { %6852 = vmatprep.subr.bf16.mxu1 %v6851_v51  ;;  %v6901_v51 = vpack.c.bf16 %v392_v41, %v391_v39  ;;  %v370_v39 = vld [vmem:[%s12644_s1 + $0xa68] sm:$0xff] }
  0x9a   :  { %6822 = vmatpush3.bf16.msra.mxu0 %v6821_v58  ;;  %v380_v58 = vld [vmem:[%s12644_s1 + $0xab8] sm:$0xff] }
  0x9b   :  { %6854 = vmatpush3.bf16.msra.mxu1 %v6853_v59  ;;  %6824 = vmatprep.subr.bf16.mxu0 %v6823_v60  ;;  %v411_v59 = vld [vmem:[%s12644_s1 + $0xbb0] sm:$0xff]  ;;  %v412_v60 = vld [vmem:[%s12644_s1 + $0xbb8] sm:$0xff]  ;;  %v6875_v63 = vpack.c.bf16 %v380_v58, %v379_v45  ;;  %v437_v45 = vld [vmem:[%s12644_s1 + $0xc80] sm:$0xff] }
  0x9c   :  { %6856 = vmatprep.subr.bf16.mxu1 %v6855_v0  ;;  %v363_v0 = vld [vmem:[%s12644_s1 + $0xa30] sm:$0xff]  ;;  %v6907_v3 = vpack.c.bf16 %v412_v60, %v411_v59  ;;  %v438_v58 = vld [vmem:[%s12644_s1 + $0xc88] sm:$0xff]  ;;  %v469_v59 = vld [vmem:[%s12644_s1 + $0xd80] sm:$0xff] }
  0x9d   :  { %v470_v60 = vld [vmem:[%s12644_s1 + $0xd88] sm:$0xff] }
  0x9e   :  { %6826 = vmatpush3.bf16.msra.mxu0 %v6825_v6  ;;  %v382_v6 = vld [vmem:[%s12644_s1 + $0xac8] sm:$0xff]  ;;  %v6959_v4 = vpack.c.bf16 %v470_v60, %v469_v59  ;;  %v447_v59 = vld [vmem:[%s12644_s1 + $0xcd0] sm:$0xff]  ;;  %v448_v60 = vld [vmem:[%s12644_s1 + $0xcd8] sm:$0xff] }
  0x9f   :  { %6858 = vmatpush3.bf16.msra.mxu1 %v6857_v8  ;;  %6828 = vmatprep.subr.bf16.mxu0 %v6827_v9  ;;  %v414_v8 = vld [vmem:[%s12644_s1 + $0xbc8] sm:$0xff]  ;;  %v6877_v9 = vpack.c.bf16 %v364_v1, %v363_v0  ;;  %v6879_v10 = vpack.c.bf16 %v382_v6, %v381_v5  ;;  %v6927_v0 = vpack.c.bf16 %v438_v58, %v437_v45  ;;  %v421_v1 = vld [vmem:[%s12644_s1 + $0xc00] sm:$0xff]  ;;  %v439_v6 = vld [vmem:[%s12644_s1 + $0xc90] sm:$0xff] }
  0xa0   :  { %6860 = vmatprep.subr.bf16.mxu1 %v6859_v15  ;;  %v366_v15 = vld [vmem:[%s12644_s1 + $0xa48] sm:$0xff]  ;;  %v6911_v16 = vpack.c.bf16 %v414_v8, %v413_v7  ;;  %v440_v7 = vld [vmem:[%s12644_s1 + $0xc98] sm:$0xff] }
  0xa1   :  { %v454_v5 = vld [vmem:[%s12644_s1 + $0xd08] sm:$0xff] }
  0xa2   :  { %6830 = vmatpush3.bf16.msra.mxu0 %v6829_v21  ;;  %v416_v21 = vld [vmem:[%s12644_s1 + $0xbd8] sm:$0xff]  ;;  %v462_v58 = vld [vmem:[%s12644_s1 + $0xd48] sm:$0xff] }
  0xa3   :  { %6862 = vmatpush3.bf16.msra.mxu1 %v6861_v22  ;;  %6864 = vmatprep.subr.bf16.mxu0 %v6863_v23  ;;  %v6881_v22 = vpack.c.bf16 %v366_v15, %v365_v12  ;;  %v6913_v23 = vpack.c.bf16 %v398_v17, %v397_v14  ;;  %v6915_v28 = vpack.c.bf16 %v416_v21, %v415_v20  ;;  %v424_v17 = vld [vmem:[%s12644_s1 + $0xc18] sm:$0xff]  ;;  %v441_v21 = vld [vmem:[%s12644_s1 + $0xca0] sm:$0xff] }
  0xa4   :  { %6896 = vmatprep.subr.bf16.mxu1 %v6895_v27  ;;  %v399_v27 = vld [vmem:[%s12644_s1 + $0xb50] sm:$0xff]  ;;  %v6929_v12 = vpack.c.bf16 %v422_v2, %v421_v1  ;;  %v6931_v14 = vpack.c.bf16 %v440_v7, %v439_v6  ;;  %v456_v20 = vld [vmem:[%s12644_s1 + $0xd18] sm:$0xff]  ;;  %v6947_v1 = vpack.c.bf16 %v448_v60, %v447_v59  ;;  %v449_v7 = vld [vmem:[%s12644_s1 + $0xce0] sm:$0xff] }
  0xa5   :  { %2564 = vmatmul.mubr.f32.vlgmr.msra.gmra.mrb[8].mxu0 %v8887_v54  ;;  %v361_v54 = vld [vmem:[%s12644_s1 + $0xa20] sm:$0xff]  ;;  %v431_v2 = vld [vmem:[%s12644_s1 + $0xc50] sm:$0xff]  ;;  %v464_v6 = vld [vmem:[%s12644_s1 + $0xd58] sm:$0xff] }
  0xa6   :  { %2634 = vmatmul.mubr.f32.vlgmr.msra.gmra.mrb[8].mxu1 %v8896_v57  ;;  %6866 = vmatpush3.bf16.msra.mxu0 %v6865_v35  ;;  %v6903_v57 = vpack.c.bf16 %v410_v48, %v409_v47  ;;  %v6873_v61 = vpack.c.bf16 %v362_v33, %v361_v54  ;;  %v418_v35 = vld [vmem:[%s12644_s1 + $0xbe8] sm:$0xff]  ;;  %v419_v47 = vld [vmem:[%s12644_s1 + $0xbf0] sm:$0xff]  ;;  %v420_v48 = vld [vmem:[%s12644_s1 + $0xbf8] sm:$0xff] }
  0xa7   :  { %6898 = vmatpush3.bf16.msra.mxu1 %v6897_v52  ;;  %6868 = vmatprep.subr.bf16.mxu0 %v6867_v36  ;;  %v6885_v52 = vpack.c.bf16 %v368_v26, %v367_v25  ;;  %v6917_v36 = vpack.c.bf16 %v400_v29, %v399_v27  ;;  %v6919_v41 = vpack.c.bf16 %v418_v35, %v417_v42  ;;  %v371_v54 = vld [vmem:[%s12644_s1 + $0xa70] sm:$0xff]  ;;  %v372_v33 = vld [vmem:[%s12644_s1 + $0xa78] sm:$0xff]  ;;  %v474_v25 = vld [vmem:[%s12644_s1 + $0xda8] sm:$0xff] }
  0xa8   :  { %6900 = vmatprep.subr.bf16.mxu1 %v6899_v40  ;;  %2703 = vmatprep.mubr.f32.mxu0 %v1571_v46  ;;  %v401_v40 = vld [vmem:[%s12644_s1 + $0xb60] sm:$0xff]  ;;  %v388_v46 = vld [vmem:[%s12644_s1 + $0xaf8] sm:$0xff]  ;;  %v458_v42 = vld [vmem:[%s12644_s1 + $0xd28] sm:$0xff] }
  0xa9   :  { %2773 = vmatprep.mubr.f32.mxu1 %v1572_v49  ;;  %v6889_v49 = vpack.c.bf16 %v370_v39, %v369_v38  ;;  %v443_v35 = vld [vmem:[%s12644_s1 + $0xcb0] sm:$0xff]  ;;  %v6969_v39 = vpack.c.bf16 %v458_v42, %v457_v32  ;;  %v468_v42 = vld [vmem:[%s12644_s1 + $0xd78] sm:$0xff] }
  0xaa   :  { %6870 = vmatpush3.bf16.msra.mxu0 %v6869_v50  ;;  %v21_v50 = vld [vmem:[%s12643_s0 + $0x30] sm:$0xff] }
  0xab   :  { %6902 = vmatpush3.bf16.msra.mxu1 %v6901_v51  ;;  %6872 = vmatprep.subr.bf16.mxu0 %v6871_v53  ;;  %v6921_v51 = vpack.c.bf16 %v402_v43, %v401_v40  ;;  %v6891_v53 = vpack.c.bf16 %v388_v46, %v387_v44  ;;  %v9301_v8 = vrot.slane %v21_v50, %v8185_v13  ;;  %v428_v43 = vld [vmem:[%s12644_s1 + $0xc38] sm:$0xff]  ;;  %v459_v44 = vld [vmem:[%s12644_s1 + $0xd30] sm:$0xff] }
  0xac   :  { %6904 = vmatprep.subr.bf16.mxu1 %v6903_v57  ;;  %v6923_v57 = vpack.c.bf16 %v420_v48, %v419_v47  ;;  %v460_v47 = vld [vmem:[%s12644_s1 + $0xd38] sm:$0xff]  ;;  %v445_v48 = vld [vmem:[%s12644_s1 + $0xcc0] sm:$0xff]  ;;  %v467_v32 = vld [vmem:[%s12644_s1 + $0xd70] sm:$0xff] }
  0xad   :  { %v519_v59 = vld [vmem:[%s12644_s1 + $0xf10] sm:$0xff] }
  0xae   :  { %6874 = vmatpush3.bf16.msra.mxu0 %v6873_v61  ;;  %v1573_v61 = vcombine.high %v21_v50, %v21_v50  ;;  %v477_v50 = vld [vmem:[%s12644_s1 + $0xdc0] sm:$0xff] }
  0xaf   :  { %6906 = vmatpush3.bf16.msra.mxu1 %v6905_v62  ;;  %6876 = vmatprep.subr.bf16.mxu0 %v6875_v63  ;;  %v6893_v62 = vpack.c.bf16 %v372_v33, %v371_v54  ;;  %v6925_v63 = vpack.c.bf16 %v404_v56, %v403_v55  ;;  %v6973_v54 = vpack.c.bf16 %v460_v47, %v459_v44  ;;  %v429_v55 = vld [vmem:[%s12644_s1 + $0xc40] sm:$0xff]  ;;  %v486_v44 = vld [vmem:[%s12644_s1 + $0xe08] sm:$0xff] }
  0xb0   :  { %6908 = vmatprep.subr.bf16.mxu1 %v6907_v3  ;;  %v453_v3 = vld [vmem:[%s12644_s1 + $0xd00] sm:$0xff] }
  0xb1   :  { %v6961_v15 = vpack.c.bf16 %v454_v5, %v453_v3  ;;  %v461_v56 = vld [vmem:[%s12644_s1 + $0xd40] sm:$0xff]  ;;  %v432_v3 = vld [vmem:[%s12644_s1 + $0xc58] sm:$0xff] }
  0xb2   :  { %6878 = vmatpush3.bf16.msra.mxu0 %v6877_v9  ;;  %v471_v9 = vld [vmem:[%s12644_s1 + $0xd90] sm:$0xff] }
  0xb3   :  { %6910 = vmatpush3.bf16.msra.mxu1 %v6909_v11  ;;  %6880 = vmatprep.subr.bf16.mxu0 %v6879_v10  ;;  %v472_v11 = vld [vmem:[%s12644_s1 + $0xd98] sm:$0xff]  ;;  %v9310_v10 = vrot.slane %v1573_v61, %v8185_v13  ;;  %v479_v61 = vld [vmem:[%s12644_s1 + $0xdd0] sm:$0xff] }
  0xb4   :  { %6912 = vmatprep.subr.bf16.mxu1 %v6911_v16  ;;  %v423_v16 = vld [vmem:[%s12644_s1 + $0xc10] sm:$0xff]  ;;  %v6963_v19 = vpack.c.bf16 %v472_v11, %v471_v9  ;;  %v450_v9 = vld [vmem:[%s12644_s1 + $0xce8] sm:$0xff]  ;;  %v481_v11 = vld [vmem:[%s12644_s1 + $0xde0] sm:$0xff] }
  0xb5   :  { %v1589_v26 = vcombine.high %v9310_v10, %v9310_v10  ;;  %v6933_v27 = vpack.c.bf16 %v424_v17, %v423_v16  ;;  %v6951_v16 = vpack.c.bf16 %v450_v9, %v449_v7  ;;  %v433_v17 = vld [vmem:[%s12644_s1 + $0xc60] sm:$0xff]  ;;  %v490_v7 = vld [vmem:[%s12644_s1 + $0xe28] sm:$0xff] }
  0xb6   :  { %6882 = vmatpush3.bf16.msra.mxu0 %v6881_v22  ;;  %v442_v22 = vld [vmem:[%s12644_s1 + $0xca8] sm:$0xff]  ;;  %v521_v9 = vld [vmem:[%s12644_s1 + $0xf20] sm:$0xff] }
  0xb7   :  { %6914 = vmatpush3.bf16.msra.mxu1 %v6913_v23  ;;  %6884 = vmatprep.subr.bf16.mxu0 %v6883_v24  ;;  %v1588_v23 = vcombine.high %v9301_v8, %v9301_v8  ;;  %v473_v24 = vld [vmem:[%s12644_s1 + $0xda0] sm:$0xff]  ;;  %v6935_v29 = vpack.c.bf16 %v442_v22, %v441_v21  ;;  %v466_v21 = vld [vmem:[%s12644_s1 + $0xd68] sm:$0xff]  ;;  %v451_v22 = vld [vmem:[%s12644_s1 + $0xcf0] sm:$0xff] }
  0xb8   :  { %6916 = vmatprep.subr.bf16.mxu1 %v6915_v28  ;;  %v6965_v28 = vpack.c.bf16 %v456_v20, %v455_v18  ;;  %v434_v18 = vld [vmem:[%s12644_s1 + $0xc68] sm:$0xff] }
  0xba   :  { %6886 = vmatpush3.bf16.msra.mxu0 %v6885_v52  ;;  %v444_v52 = vld [vmem:[%s12644_s1 + $0xcb8] sm:$0xff] }
  0xbb   :  { %6918 = vmatpush3.bf16.msra.mxu1 %v6917_v36  ;;  %6888 = vmatprep.subr.bf16.mxu0 %v6887_v37  ;;  %v475_v36 = vld [vmem:[%s12644_s1 + $0xdb0] sm:$0xff]  ;;  %v476_v37 = vld [vmem:[%s12644_s1 + $0xdb8] sm:$0xff]  ;;  %v6939_v40 = vpack.c.bf16 %v444_v52, %v443_v35  ;;  %v501_v35 = vld [vmem:[%s12644_s1 + $0xe80] sm:$0xff] }
  0xbc   :  { %6920 = vmatprep.subr.bf16.mxu1 %v6919_v41  ;;  %v427_v41 = vld [vmem:[%s12644_s1 + $0xc30] sm:$0xff]  ;;  %v6971_v46 = vpack.c.bf16 %v476_v37, %v475_v36  ;;  %v502_v52 = vld [vmem:[%s12644_s1 + $0xe88] sm:$0xff]  ;;  %v533_v36 = vld [vmem:[%s12644_s1 + $0xf80] sm:$0xff] }
  0xbd   :  { %v534_v37 = vld [vmem:[%s12644_s1 + $0xf88] sm:$0xff] }
  0xbe   :  { %6890 = vmatpush3.bf16.msra.mxu0 %v6889_v49  ;;  %v446_v49 = vld [vmem:[%s12644_s1 + $0xcc8] sm:$0xff]  ;;  %v7023_v47 = vpack.c.bf16 %v534_v37, %v533_v36  ;;  %v511_v36 = vld [vmem:[%s12644_s1 + $0xed0] sm:$0xff]  ;;  %v512_v37 = vld [vmem:[%s12644_s1 + $0xed8] sm:$0xff] }
  0xbf   :  { %6922 = vmatpush3.bf16.msra.mxu1 %v6921_v51  ;;  %6892 = vmatprep.subr.bf16.mxu0 %v6891_v53  ;;  %v478_v51 = vld [vmem:[%s12644_s1 + $0xdc8] sm:$0xff]  ;;  %v6941_v53 = vpack.c.bf16 %v428_v43, %v427_v41  ;;  %v6943_v33 = vpack.c.bf16 %v446_v49, %v445_v48  ;;  %v6991_v41 = vpack.c.bf16 %v502_v52, %v501_v35  ;;  %v485_v43 = vld [vmem:[%s12644_s1 + $0xe00] sm:$0xff]  ;;  %v503_v49 = vld [vmem:[%s12644_s1 + $0xe90] sm:$0xff] }
  0xc0   :  { %6924 = vmatprep.subr.bf16.mxu1 %v6923_v57  ;;  %v430_v57 = vld [vmem:[%s12644_s1 + $0xc48] sm:$0xff]  ;;  %v6975_v45 = vpack.c.bf16 %v478_v51, %v477_v50  ;;  %v504_v50 = vld [vmem:[%s12644_s1 + $0xe98] sm:$0xff] }
  0xc1   :  { %v518_v48 = vld [vmem:[%s12644_s1 + $0xf08] sm:$0xff] }
  0xc2   :  { %6894 = vmatpush3.bf16.msra.mxu0 %v6893_v62  ;;  %v480_v62 = vld [vmem:[%s12644_s1 + $0xdd8] sm:$0xff]  ;;  %v526_v52 = vld [vmem:[%s12644_s1 + $0xf48] sm:$0xff] }
  0xc3   :  { %6926 = vmatpush3.bf16.msra.mxu1 %v6925_v63  ;;  %6928 = vmatprep.subr.bf16.mxu0 %v6927_v0  ;;  %v6945_v63 = vpack.c.bf16 %v430_v57, %v429_v55  ;;  %v6977_v0 = vpack.c.bf16 %v462_v58, %v461_v56  ;;  %v6979_v5 = vpack.c.bf16 %v480_v62, %v479_v61  ;;  %v488_v58 = vld [vmem:[%s12644_s1 + $0xe18] sm:$0xff]  ;;  %v505_v62 = vld [vmem:[%s12644_s1 + $0xea0] sm:$0xff] }
  0xc4   :  { %6960 = vmatprep.subr.bf16.mxu1 %v6959_v4  ;;  %v463_v4 = vld [vmem:[%s12644_s1 + $0xd50] sm:$0xff]  ;;  %v6993_v55 = vpack.c.bf16 %v486_v44, %v485_v43  ;;  %v6995_v56 = vpack.c.bf16 %v504_v50, %v503_v49  ;;  %v520_v61 = vld [vmem:[%s12644_s1 + $0xf18] sm:$0xff]  ;;  %v7011_v43 = vpack.c.bf16 %v512_v37, %v511_v36  ;;  %v513_v50 = vld [vmem:[%s12644_s1 + $0xee0] sm:$0xff] }
  0xc5   :  { %2704 = vmatmul.mubr.f32.vlgmr.msra.gmra.mrb[10].mxu0 %v9094_v31  ;;  %v425_v31 = vld [vmem:[%s12644_s1 + $0xc20] sm:$0xff]  ;;  %v495_v44 = vld [vmem:[%s12644_s1 + $0xe50] sm:$0xff]  ;;  %v528_v49 = vld [vmem:[%s12644_s1 + $0xf58] sm:$0xff] }
  0xc6   :  { %2774 = vmatmul.mubr.f32.vlgmr.msra.gmra.mrb[10].mxu1 %v9103_v34  ;;  %6930 = vmatpush3.bf16.msra.mxu0 %v6929_v12  ;;  %v6967_v34 = vpack.c.bf16 %v474_v25, %v473_v24  ;;  %v6937_v38 = vpack.c.bf16 %v426_v30, %v425_v31  ;;  %v482_v12 = vld [vmem:[%s12644_s1 + $0xde8] sm:$0xff]  ;;  %v483_v24 = vld [vmem:[%s12644_s1 + $0xdf0] sm:$0xff]  ;;  %v484_v25 = vld [vmem:[%s12644_s1 + $0xdf8] sm:$0xff] }
  0xc7   :  { %6962 = vmatpush3.bf16.msra.mxu1 %v6961_v15  ;;  %6932 = vmatprep.subr.bf16.mxu0 %v6931_v14  ;;  %v6949_v15 = vpack.c.bf16 %v432_v3, %v431_v2  ;;  %v6981_v14 = vpack.c.bf16 %v464_v6, %v463_v4  ;;  %v6983_v20 = vpack.c.bf16 %v482_v12, %v481_v11  ;;  %v435_v31 = vld [vmem:[%s12644_s1 + $0xc70] sm:$0xff]  ;;  %v436_v30 = vld [vmem:[%s12644_s1 + $0xc78] sm:$0xff]  ;;  %v538_v2 = vld [vmem:[%s12644_s1 + $0xfa8] sm:$0xff] }
  0xc8   :  { %6964 = vmatprep.subr.bf16.mxu1 %v6963_v19  ;;  %2843 = vmatprep.mubr.f32.mxu0 %v1588_v23  ;;  %v465_v19 = vld [vmem:[%s12644_s1 + $0xd60] sm:$0xff]  ;;  %v452_v23 = vld [vmem:[%s12644_s1 + $0xcf8] sm:$0xff]  ;;  %v522_v11 = vld [vmem:[%s12644_s1 + $0xf28] sm:$0xff] }
  0xc9   :  { %2913 = vmatprep.mubr.f32.mxu1 %v1589_v26  ;;  %v6953_v26 = vpack.c.bf16 %v434_v18, %v433_v17  ;;  %v507_v12 = vld [vmem:[%s12644_s1 + $0xeb0] sm:$0xff]  ;;  %v7033_v18 = vpack.c.bf16 %v522_v11, %v521_v9 }
  0xca   :  { %6934 = vmatpush3.bf16.msra.mxu0 %v6933_v27  ;;  %v22_v27 = vld [vmem:[%s12643_s0 + $0x38] sm:$0xff]  ;;  %v599_v37 = vld [vmem:[%s12644_s1 + $0x1190] sm:$0xff] }
  0xcb   :  { %6966 = vmatpush3.bf16.msra.mxu1 %v6965_v28  ;;  %6936 = vmatprep.subr.bf16.mxu0 %v6935_v29  ;;  %v6985_v28 = vpack.c.bf16 %v466_v21, %v465_v19  ;;  %v6955_v29 = vpack.c.bf16 %v452_v23, %v451_v22  ;;  %v9508_v51 = vrot.slane %v22_v27, %v8185_v13  ;;  %v492_v21 = vld [vmem:[%s12644_s1 + $0xe38] sm:$0xff]  ;;  %v523_v22 = vld [vmem:[%s12644_s1 + $0xf30] sm:$0xff] }
  0xcc   :  { %6968 = vmatprep.subr.bf16.mxu1 %v6967_v34  ;;  %v6987_v34 = vpack.c.bf16 %v484_v25, %v483_v24  ;;  %v524_v24 = vld [vmem:[%s12644_s1 + $0xf38] sm:$0xff]  ;;  %v509_v25 = vld [vmem:[%s12644_s1 + $0xec0] sm:$0xff] }
  0xce   :  { %6938 = vmatpush3.bf16.msra.mxu0 %v6937_v38  ;;  %v1590_v38 = vcombine.high %v22_v27, %v22_v27  ;;  %v541_v27 = vld [vmem:[%s12644_s1 + $0xfc0] sm:$0xff] }
  0xcf   :  { %6970 = vmatpush3.bf16.msra.mxu1 %v6969_v39  ;;  %6940 = vmatprep.subr.bf16.mxu0 %v6939_v40  ;;  %v6957_v39 = vpack.c.bf16 %v436_v30, %v435_v31  ;;  %v6989_v40 = vpack.c.bf16 %v468_v42, %v467_v32  ;;  %v7037_v31 = vpack.c.bf16 %v524_v24, %v523_v22  ;;  %v493_v32 = vld [vmem:[%s12644_s1 + $0xe40] sm:$0xff]  ;;  %v566_v22 = vld [vmem:[%s12644_s1 + $0x1088] sm:$0xff] }
  0xd0   :  { %6972 = vmatprep.subr.bf16.mxu1 %v6971_v46  ;;  %v517_v46 = vld [vmem:[%s12644_s1 + $0xf00] sm:$0xff]  ;;  %v598_v24 = vld [vmem:[%s12644_s1 + $0x1188] sm:$0xff] }
  0xd1   :  { %v7025_v57 = vpack.c.bf16 %v518_v48, %v517_v46  ;;  %v525_v42 = vld [vmem:[%s12644_s1 + $0xf40] sm:$0xff]  ;;  %v496_v46 = vld [vmem:[%s12644_s1 + $0xe58] sm:$0xff] }
  0xd2   :  { %6942 = vmatpush3.bf16.msra.mxu0 %v6941_v53  ;;  %v535_v53 = vld [vmem:[%s12644_s1 + $0xf90] sm:$0xff] }
  0xd3   :  { %6974 = vmatpush3.bf16.msra.mxu1 %v6973_v54  ;;  %6944 = vmatprep.subr.bf16.mxu0 %v6943_v33  ;;  %v536_v54 = vld [vmem:[%s12644_s1 + $0xf98] sm:$0xff]  ;;  %v9517_v33 = vrot.slane %v1590_v38, %v8185_v13  ;;  %v543_v38 = vld [vmem:[%s12644_s1 + $0xfd0] sm:$0xff] }
  0xd4   :  { %6976 = vmatprep.subr.bf16.mxu1 %v6975_v45  ;;  %v487_v45 = vld [vmem:[%s12644_s1 + $0xe10] sm:$0xff]  ;;  %v7027_v60 = vpack.c.bf16 %v536_v54, %v535_v53  ;;  %v514_v53 = vld [vmem:[%s12644_s1 + $0xee8] sm:$0xff]  ;;  %v545_v54 = vld [vmem:[%s12644_s1 + $0xfe0] sm:$0xff] }
  0xd5   :  { %v1606_v3 = vcombine.high %v9517_v33, %v9517_v33  ;;  %v6997_v4 = vpack.c.bf16 %v488_v58, %v487_v45  ;;  %v7015_v45 = vpack.c.bf16 %v514_v53, %v513_v50  ;;  %v497_v58 = vld [vmem:[%s12644_s1 + $0xe60] sm:$0xff]  ;;  %v570_v53 = vld [vmem:[%s12644_s1 + $0x10a8] sm:$0xff] }
  0xd6   :  { %6946 = vmatpush3.bf16.msra.mxu0 %v6945_v63  ;;  %v506_v63 = vld [vmem:[%s12644_s1 + $0xea8] sm:$0xff]  ;;  %v569_v50 = vld [vmem:[%s12644_s1 + $0x10a0] sm:$0xff] }
  0xd7   :  { %6978 = vmatpush3.bf16.msra.mxu1 %v6977_v0  ;;  %6948 = vmatprep.subr.bf16.mxu0 %v6947_v1  ;;  %v1605_v0 = vcombine.high %v9508_v51, %v9508_v51  ;;  %v537_v1 = vld [vmem:[%s12644_s1 + $0xfa0] sm:$0xff]  ;;  %v6999_v6 = vpack.c.bf16 %v506_v63, %v505_v62  ;;  %v530_v63 = vld [vmem:[%s12644_s1 + $0xf68] sm:$0xff] }
  0xd8   :  { %6980 = vmatprep.subr.bf16.mxu1 %v6979_v5  ;;  %v7029_v5 = vpack.c.bf16 %v520_v61, %v519_v59  ;;  %v498_v59 = vld [vmem:[%s12644_s1 + $0xe68] sm:$0xff] }
  0xd9   :  { %v7017_v9 = vpack.c.bf16 %v498_v59, %v497_v58  ;;  %v7063_v59 = vpack.c.bf16 %v570_v53, %v569_v50 }
  0xda   :  { %6950 = vmatpush3.bf16.msra.mxu0 %v6949_v15  ;;  %v508_v15 = vld [vmem:[%s12644_s1 + $0xeb8] sm:$0xff] }
  0xdb   :  { %6982 = vmatpush3.bf16.msra.mxu1 %v6981_v14  ;;  %6952 = vmatprep.subr.bf16.mxu0 %v6951_v16  ;;  %v539_v14 = vld [vmem:[%s12644_s1 + $0xfb0] sm:$0xff]  ;;  %v540_v16 = vld [vmem:[%s12644_s1 + $0xfb8] sm:$0xff]  ;;  %v7003_v19 = vpack.c.bf16 %v508_v15, %v507_v12 }
  0xdc   :  { %6984 = vmatprep.subr.bf16.mxu1 %v6983_v20  ;;  %v491_v20 = vld [vmem:[%s12644_s1 + $0xe30] sm:$0xff]  ;;  %v7035_v23 = vpack.c.bf16 %v540_v16, %v539_v14  ;;  %v500_v16 = vld [vmem:[%s12644_s1 + $0xe78] sm:$0xff] }
  0xdd   :  { %v499_v14 = vld [vmem:[%s12644_s1 + $0xe70] sm:$0xff] }
  0xde   :  { %6954 = vmatpush3.bf16.msra.mxu0 %v6953_v26  ;;  %v510_v26 = vld [vmem:[%s12644_s1 + $0xec8] sm:$0xff] }
  0xdf   :  { %6986 = vmatpush3.bf16.msra.mxu1 %v6985_v28  ;;  %6956 = vmatprep.subr.bf16.mxu0 %v6955_v29  ;;  %v542_v28 = vld [vmem:[%s12644_s1 + $0xfc8] sm:$0xff]  ;;  %v7005_v29 = vpack.c.bf16 %v492_v21, %v491_v20  ;;  %v7007_v30 = vpack.c.bf16 %v510_v26, %v509_v25  ;;  %v532_v20 = vld [vmem:[%s12644_s1 + $0xf78] sm:$0xff]  ;;  %v565_v21 = vld [vmem:[%s12644_s1 + $0x1080] sm:$0xff] }
  0xe0   :  { %6988 = vmatprep.subr.bf16.mxu1 %v6987_v34  ;;  %v494_v34 = vld [vmem:[%s12644_s1 + $0xe48] sm:$0xff]  ;;  %v7039_v35 = vpack.c.bf16 %v542_v28, %v541_v27  ;;  %v7021_v27 = vpack.c.bf16 %v500_v16, %v499_v14 }
  0xe1   :  { %v606_v14 = vld [vmem:[%s12644_s1 + $0x11c8] sm:$0xff] }
  0xe2   :  { %6958 = vmatpush3.bf16.msra.mxu0 %v6957_v39  ;;  %v544_v39 = vld [vmem:[%s12644_s1 + $0xfd8] sm:$0xff] }
  0xe3   :  { %6990 = vmatpush3.bf16.msra.mxu1 %v6989_v40  ;;  %6992 = vmatprep.subr.bf16.mxu0 %v6991_v41  ;;  %v7009_v40 = vpack.c.bf16 %v494_v34, %v493_v32  ;;  %v7041_v41 = vpack.c.bf16 %v526_v52, %v525_v42  ;;  %v7043_v48 = vpack.c.bf16 %v544_v39, %v543_v38  ;;  %v581_v32 = vld [vmem:[%s12644_s1 + $0x1100] sm:$0xff]  ;;  %v582_v42 = vld [vmem:[%s12644_s1 + $0x1108] sm:$0xff]  ;;  %v568_v52 = vld [vmem:[%s12644_s1 + $0x1098] sm:$0xff] }
  0xe4   :  { %7024 = vmatprep.subr.bf16.mxu1 %v7023_v47  ;;  %v527_v47 = vld [vmem:[%s12644_s1 + $0xf50] sm:$0xff]  ;;  %v600_v38 = vld [vmem:[%s12644_s1 + $0x1198] sm:$0xff] }
  0xe5   :  { %2844 = vmatmul.mubr.f32.vlgmr.msra.gmra.mrb[12].mxu0 %v9301_v8  ;;  %v489_v8 = vld [vmem:[%s12644_s1 + $0xe20] sm:$0xff] }
  0xe6   :  { %2914 = vmatmul.mubr.f32.vlgmr.msra.gmra.mrb[12].mxu1 %v9310_v10  ;;  %6994 = vmatpush3.bf16.msra.mxu0 %v6993_v55  ;;  %v7031_v10 = vpack.c.bf16 %v538_v2, %v537_v1  ;;  %v7001_v17 = vpack.c.bf16 %v490_v7, %v489_v8  ;;  %v546_v55 = vld [vmem:[%s12644_s1 + $0xfe8] sm:$0xff]  ;;  %v516_v1 = vld [vmem:[%s12644_s1 + $0xef8] sm:$0xff] }
  0xe7   :  { %7026 = vmatpush3.bf16.msra.mxu1 %v7025_v57  ;;  %6996 = vmatprep.subr.bf16.mxu0 %v6995_v56  ;;  %v7013_v57 = vpack.c.bf16 %v496_v46, %v495_v44  ;;  %v7045_v56 = vpack.c.bf16 %v528_v49, %v527_v47  ;;  %v7047_v62 = vpack.c.bf16 %v546_v55, %v545_v54  ;;  %v551_v44 = vld [vmem:[%s12644_s1 + $0x1010] sm:$0xff]  ;;  %v552_v46 = vld [vmem:[%s12644_s1 + $0x1018] sm:$0xff]  ;;  %v601_v55 = vld [vmem:[%s12644_s1 + $0x11a0] sm:$0xff] }
  0xe8   :  { %7028 = vmatprep.subr.bf16.mxu1 %v7027_v60  ;;  %2983 = vmatprep.mubr.f32.mxu0 %v1605_v0  ;;  %v529_v60 = vld [vmem:[%s12644_s1 + $0xf60] sm:$0xff]  ;;  %v515_v0 = vld [vmem:[%s12644_s1 + $0xef0] sm:$0xff]  ;;  %v584_v49 = vld [vmem:[%s12644_s1 + $0x1118] sm:$0xff] }
  0xe9   :  { %3053 = vmatprep.mubr.f32.mxu1 %v1606_v3  ;;  %v5035_v3 = vld [vmem:[%s12645_s2] ss:$0 sm:$0xff]  ;;  %v7049_v12 = vpack.c.bf16 %v530_v63, %v529_v60  ;;  %v7019_v15 = vpack.c.bf16 %v516_v1, %v515_v0  ;;  %v583_v47 = vld [vmem:[%s12644_s1 + $0x1110] sm:$0xff]  ;;  %v554_v60 = vld [vmem:[%s12644_s1 + $0x1028] sm:$0xff] }
  0xea   :  { %6998 = vmatpush3.bf16.msra.mxu0 %v6997_v4  ;;  %v7093_v58 = vpack.c.bf16 %v584_v49, %v583_v47  ;;  %v571_v63 = vld [vmem:[%s12644_s1 + $0x10b0] sm:$0xff]  ;;  %v572_v0 = vld [vmem:[%s12644_s1 + $0x10b8] sm:$0xff] }
  0xeb   :  { %7030 = vmatpush3.bf16.msra.mxu1 %v7029_v5  ;;  %7000 = vmatprep.subr.bf16.mxu0 %v6999_v6  ;;  %v547_v5 = vld [vmem:[%s12644_s1 + $0xff0] sm:$0xff]  ;;  %v548_v6 = vld [vmem:[%s12644_s1 + $0xff8] sm:$0xff] }
  0xec   :  { %7032 = vmatprep.subr.bf16.mxu1 %v7031_v10  ;;  %v23_v10 = vld [vmem:[%s12643_s0 + $0x40] sm:$0xff]  ;;  %v603_v1 = vld [vmem:[%s12644_s1 + $0x11b0] sm:$0xff] }
  0xed   :  { %v1607_v25 = vcombine.high %v23_v10, %v23_v10  ;;  %v9720_v36 = vrot.slane %v23_v10, %v8185_v13  ;;  %v588_v10 = vld [vmem:[%s12644_s1 + $0x1138] sm:$0xff] }
  0xee   :  { %7002 = vmatpush3.bf16.msra.mxu0 %v7001_v17  ;;  %v531_v17 = vld [vmem:[%s12644_s1 + $0xf70] sm:$0xff] }
  0xef   :  { %7034 = vmatpush3.bf16.msra.mxu1 %v7033_v18  ;;  %7004 = vmatprep.subr.bf16.mxu0 %v7003_v19  ;;  %v7051_v19 = vpack.c.bf16 %v548_v6, %v547_v5  ;;  %v7053_v28 = vpack.c.bf16 %v532_v20, %v531_v17  ;;  %v9729_v39 = vrot.slane %v1607_v25, %v8185_v13  ;;  %v555_v6 = vld [vmem:[%s12644_s1 + $0x1030] sm:$0xff] }
  0xf0   :  { %7036 = vmatprep.subr.bf16.mxu1 %v7035_v23  ;;  %v597_v23 = vld [vmem:[%s12644_s1 + $0x1180] sm:$0xff]  ;;  %v1622_v54 = vcombine.high %v9720_v36, %v9720_v36  ;;  %v7067_v5 = vpack.c.bf16 %v572_v0, %v571_v63 }
  0xf1   :  { %v7087_v34 = vpack.c.bf16 %v598_v24, %v597_v23 }
  0xf2   :  { %7006 = vmatpush3.bf16.msra.mxu0 %v7005_v29  ;;  %v7055_v29 = vpack.c.bf16 %v566_v22, %v565_v21 }
  0xf3   :  { %7038 = vmatpush3.bf16.msra.mxu1 %v7037_v31  ;;  %7008 = vmatprep.subr.bf16.mxu0 %v7007_v30  ;;  %v549_v31 = vld [vmem:[%s12644_s1 + $0x1000] sm:$0xff]  ;;  %v550_v30 = vld [vmem:[%s12644_s1 + $0x1008] sm:$0xff] }
  0xf4   :  { %7040 = vmatprep.subr.bf16.mxu1 %v7039_v35  ;;  %v567_v35 = vld [vmem:[%s12644_s1 + $0x1090] sm:$0xff] }
  0xf6   :  { %7010 = vmatpush3.bf16.msra.mxu0 %v7009_v40  ;;  %v7057_v40 = vpack.c.bf16 %v550_v30, %v549_v31 }
  0xf7   :  { %7042 = vmatpush3.bf16.msra.mxu1 %v7041_v41  ;;  %7012 = vmatprep.subr.bf16.mxu0 %v7011_v43  ;;  %v7089_v41 = vpack.c.bf16 %v582_v42, %v581_v32  ;;  %v7059_v43 = vpack.c.bf16 %v568_v52, %v567_v35 }
  0xf8   :  { %v5070_v61 = vpop.f32.mrb[0].mxu0  ;;  %7044 = vmatprep.subr.bf16.mxu1 %v7043_v48  ;;  %v7091_v48 = vpack.c.bf16 %v600_v38, %v599_v37 }
  0xf9   :  { %v5105_v2 = vpop.f32.mrb[0].mxu1  ;;  %v5071_v4 = vpop.f32.mrb[1].mxu0 }
  0xfa   :  { %v5072_v8 = vadd.f32 %v5071_v4, %v5070_v61  ;;  %v5106_v7 = vpop.f32.mrb[1].mxu1  ;;  %7014 = vmatpush3.bf16.msra.mxu0 %v7013_v57  ;;  %v602_v57 = vld [vmem:[%s12644_s1 + $0x11a8] sm:$0xff]  ;;  %v585_v61 = vld [vmem:[%s12644_s1 + $0x1120] sm:$0xff] }
  0xfb   :  { %v5107_v11 = vadd.f32 %v5106_v7, %v5105_v2  ;;  %7046 = vmatpush3.bf16.msra.mxu1 %v7045_v56  ;;  %7016 = vmatprep.subr.bf16.mxu0 %v7015_v45  ;;  %v1623_v56 = vcombine.high %v9729_v39, %v9729_v39  ;;  %v7061_v45 = vpack.c.bf16 %v552_v46, %v551_v44  ;;  %v604_v2 = vld [vmem:[%s12644_s1 + $0x11b8] sm:$0xff]  ;;  %v587_v7 = vld [vmem:[%s12644_s1 + $0x1130] sm:$0xff] }
  0xfc   :  { %v2006_v18 = vadd.f32 %v5072_v8, %v5035_v3  ;;  %7048 = vmatprep.subr.bf16.mxu1 %v7047_v62  ;;  %v586_v62 = vld [vmem:[%s12644_s1 + $0x1128] sm:$0xff]  ;;  %v556_v8 = vld [vmem:[%s12644_s1 + $0x1038] sm:$0xff] }
  0xfd   :  { %v7097_v4 = vpack.c.bf16 %v586_v62, %v585_v61  ;;  %v7069_v16 = vpack.c.bf16 %v556_v8, %v555_v6 }
  0xfe   :  { %v9699_v26 = vadd.f32 %v5107_v11, %v2006_v18  ;;  %7018 = vmatpush3.bf16.msra.mxu0 %v7017_v9  ;;  %v7099_v9 = vpack.c.bf16 %v604_v2, %v603_v1  ;;  %v573_v11 = vld [vmem:[%s12644_s1 + $0x10c0] sm:$0xff] }
  0xff   :  { %7050 = vmatpush3.bf16.msra.mxu1 %v7049_v12  ;;  %7020 = vmatprep.subr.bf16.mxu0 %v7019_v15  ;;  %v574_v12 = vld [vmem:[%s12644_s1 + $0x10c8] sm:$0xff]  ;;  %v605_v15 = vld [vmem:[%s12644_s1 + $0x11c0] sm:$0xff] }
 0x100   :  { %7052 = vmatprep.subr.bf16.mxu1 %v7051_v19 }
 0x102   :  { %7022 = vmatpush3.bf16.msra.mxu0 %v7021_v27 }
 0x103   :  { %7054 = vmatpush3.bf16.msra.mxu1 %v7053_v28  ;;  %7056 = vmatprep.subr.bf16.mxu0 %v7055_v29 }
 0x104   :  { %7088 = vmatprep.subr.bf16.mxu1 %v7087_v34 }
 0x105   :  { %2984 = vmatmul.mubr.f32.vlgmr.msra.gmra.mrb[14].mxu0 %v9508_v51  ;;  %v553_v51 = vld [vmem:[%s12644_s1 + $0x1020] sm:$0xff] }
 0x106   :  { %3054 = vmatmul.mubr.f32.vlgmr.msra.gmra.mrb[14].mxu1 %v9517_v33  ;;  %7058 = vmatpush3.bf16.msra.mxu0 %v7057_v40  ;;  %v7095_v33 = vpack.c.bf16 %v602_v57, %v601_v55  ;;  %v7065_v3 = vpack.c.bf16 %v554_v60, %v553_v51 }
 0x107   :  { %7090 = vmatpush3.bf16.msra.mxu1 %v7089_v41  ;;  %7060 = vmatprep.subr.bf16.mxu0 %v7059_v43 }
 0x108   :  { %7092 = vmatprep.subr.bf16.mxu1 %v7091_v48  ;;  %3123 = vmatprep.mubr.f32.mxu0 %v1622_v54 }
 0x109   :  { %3193 = vmatprep.mubr.f32.mxu1 %v1623_v56 }
 0x10a   :  { %7062 = vmatpush3.bf16.msra.mxu0 %v7061_v45 }
 0x10b   :  { %7094 = vmatpush3.bf16.msra.mxu1 %v7093_v58  ;;  %7064 = vmatprep.subr.bf16.mxu0 %v7063_v59 }
 0x10c   :  { %7096 = vmatprep.subr.bf16.mxu1 %v7095_v33 }
 0x10e   :  { %7066 = vmatpush3.bf16.msra.mxu0 %v7065_v3 }
 0x10f   :  { %8 = vsyncpa [#allocation3], 0  ;;  %7098 = vmatpush3.bf16.msra.mxu1 %v7097_v4  ;;  %7068 = vmatprep.subr.bf16.mxu0 %v7067_v5  ;;  %v7101_v17 = vpack.c.bf16 %v588_v10, %v587_v7  ;;  %v7071_v18 = vpack.c.bf16 %v574_v12, %v573_v11  ;;  %v557_v19 = vld [vmem:[%s12644_s1 + $0x1040] sm:$0xff]  ;;  %v558_v20 = vld [vmem:[%s12644_s1 + $0x1048] sm:$0xff]  ;;  %v7103_v22 = vpack.c.bf16 %v606_v14, %v605_v15  ;;  %vm1932_vm0 = vcmask 818176  }
 0x110   :  { %v589_v21 = vld [vmem:[%s12644_s1 + $0x1140] sm:$0xff]  ;;  %7100 = vmatprep.subr.bf16.mxu1 %v7099_v9  ;;  %v590_v23 = vld [vmem:[%s12644_s1 + $0x1148] sm:$0xff]  ;;  %v575_v24 = vld [vmem:[%s12644_s1 + $0x10d0] sm:$0xff]  ;;  %v7073_v29 = vpack.c.bf16 %v558_v20, %v557_v19  ;;  %vm1935_vm1 = vcmask 1043456   ;;  %vm5019_vm2 = vcmask 607232  }
 0x111   :  { %v576_v25 = vld [vmem:[%s12644_s1 + $0x10d8] sm:$0xff]  ;;  %v607_v27 = vld [vmem:[%s12644_s1 + $0x11d0] sm:$0xff]  ;;  %v7105_v31 = vpack.c.bf16 %v590_v23, %v589_v21  ;;  %v577_v37 = vld [vmem:[%s12644_s1 + $0x10e0] sm:$0xff] }
 0x112   :  { %v608_v28 = vld [vmem:[%s12644_s1 + $0x11d8] sm:$0xff]  ;;  %7070 = vmatpush3.bf16.msra.mxu0 %v7069_v16  ;;  %v7075_v30 = vpack.c.bf16 %v576_v25, %v575_v24  ;;  %v559_v32 = vld [vmem:[%s12644_s1 + $0x1050] sm:$0xff]  ;;  %v578_v38 = vld [vmem:[%s12644_s1 + $0x10e8] sm:$0xff] }
 0x113   :  { %7102 = vmatpush3.bf16.msra.mxu1 %v7101_v17  ;;  %7072 = vmatprep.subr.bf16.mxu0 %v7071_v18  ;;  %v560_v34 = vld [vmem:[%s12644_s1 + $0x1058] sm:$0xff]  ;;  %v591_v42 = vld [vmem:[%s12644_s1 + $0x1150] sm:$0xff]  ;;  %v7107_v35 = vpack.c.bf16 %v608_v28, %v607_v27  ;;  %v609_v40 = vld [vmem:[%s12644_s1 + $0x11e0] sm:$0xff]  ;;  %v7079_v46 = vpack.c.bf16 %v578_v38, %v577_v37 }
 0x114   :  { %7104 = vmatprep.subr.bf16.mxu1 %v7103_v22  ;;  %v592_v52 = vld [vmem:[%s12644_s1 + $0x1158] sm:$0xff]  ;;  %v610_v41 = vld [vmem:[%s12644_s1 + $0x11e8] sm:$0xff]  ;;  %v7077_v43 = vpack.c.bf16 %v560_v34, %v559_v32  ;;  %v561_v47 = vld [vmem:[%s12644_s1 + $0x1060] sm:$0xff] }
 0x115   :  { %v7109_v44 = vpack.c.bf16 %v592_v52, %v591_v42  ;;  %v562_v48 = vld [vmem:[%s12644_s1 + $0x1068] sm:$0xff]  ;;  %v593_v49 = vld [vmem:[%s12644_s1 + $0x1160] sm:$0xff]  ;;  %v7111_v53 = vpack.c.bf16 %v610_v41, %v609_v40  ;;  %v579_v55 = vld [vmem:[%s12644_s1 + $0x10f0] sm:$0xff] }
 0x116   :  { %7074 = vmatpush3.bf16.msra.mxu0 %v7073_v29  ;;  %v594_v54 = vld [vmem:[%s12644_s1 + $0x1168] sm:$0xff]  ;;  %v580_v57 = vld [vmem:[%s12644_s1 + $0x10f8] sm:$0xff]  ;;  %v611_v58 = vld [vmem:[%s12644_s1 + $0x11f0] sm:$0xff]  ;;  %v7081_v61 = vpack.c.bf16 %v562_v48, %v561_v47 }
 0x117   :  { %7106 = vmatpush3.bf16.msra.mxu1 %v7105_v31  ;;  %7076 = vmatprep.subr.bf16.mxu0 %v7075_v30  ;;  %v612_v59 = vld [vmem:[%s12644_s1 + $0x11f8] sm:$0xff]  ;;  %v24_v33 = vld [vmem:[%s12643_s0 + $0x48] sm:$0xff]  ;;  %v7113_v63 = vpack.c.bf16 %v594_v54, %v593_v49  ;;  %v7083_v0 = vpack.c.bf16 %v580_v57, %v579_v55  ;;  %v563_v1 = vld [vmem:[%s12644_s1 + $0x1070] sm:$0xff] }
 0x118   :  { %v5140_v50 = vpop.f32.mrb[2].mxu0  ;;  %7108 = vmatprep.subr.bf16.mxu1 %v7107_v35  ;;  %v564_v2 = vld [vmem:[%s12644_s1 + $0x1078] sm:$0xff]  ;;  %v595_v3 = vld [vmem:[%s12644_s1 + $0x1170] sm:$0xff]  ;;  %v7115_v5 = vpack.c.bf16 %v612_v59, %v611_v58  ;;  %v629_v8 = vld [vmem:[%s12644_s1 + $0x1280] sm:$0xff]  ;;  %v1624_v10 = vcombine.high %v24_v33, %v24_v33  ;;  %v9930_v23 = vrot.slane %v24_v33, %v8185_v13 }
 0x119   :  { %v5175_v56 = vpop.f32.mrb[2].mxu1  ;;  %v5141_v45 = vpop.f32.mrb[3].mxu0  ;;  %v596_v6 = vld [vmem:[%s12644_s1 + $0x1178] sm:$0xff]  ;;  %v630_v7 = vld [vmem:[%s12644_s1 + $0x1288] sm:$0xff]  ;;  %v661_v9 = vld [vmem:[%s12644_s1 + $0x1380] sm:$0xff]  ;;  %v7085_v12 = vpack.c.bf16 %v564_v2, %v563_v1 }
 0x11a   :  { %v5142_v51 = vadd.f32 %v5141_v45, %v5140_v50  ;;  %v5176_v60 = vpop.f32.mrb[3].mxu1  ;;  %7078 = vmatpush3.bf16.msra.mxu0 %v7077_v43  ;;  %v7117_v15 = vpack.c.bf16 %v596_v6, %v595_v3  ;;  %v7119_v14 = vpack.c.bf16 %v630_v7, %v629_v8  ;;  %v613_v16 = vld [vmem:[%s12644_s1 + $0x1200] sm:$0xff]  ;;  %v614_v17 = vld [vmem:[%s12644_s1 + $0x1208] sm:$0xff]  ;;  %v631_v21 = vld [vmem:[%s12644_s1 + $0x1290] sm:$0xff]  ;;  %v9939_v27 = vrot.slane %v1624_v10, %v8185_v13 }
 0x11b   :  { %v5177_v62 = vadd.f32 %v5176_v60, %v5175_v56  ;;  %7110 = vmatpush3.bf16.msra.mxu1 %v7109_v44  ;;  %7080 = vmatprep.subr.bf16.mxu0 %v7079_v46  ;;  %v645_v18 = vld [vmem:[%s12644_s1 + $0x1300] sm:$0xff]  ;;  %v646_v20 = vld [vmem:[%s12644_s1 + $0x1308] sm:$0xff]  ;;  %v632_v22 = vld [vmem:[%s12644_s1 + $0x1298] sm:$0xff]  ;;  %v7121_v28 = vpack.c.bf16 %v614_v17, %v613_v16  ;;  %v1639_v38 = vcombine.high %v9930_v23, %v9930_v23 }
 0x11c   :  { %v2146_v4 = vadd.f32 %v5142_v51, %v9699_v26  ;;  %7112 = vmatprep.subr.bf16.mxu1 %v7111_v53  ;;  %v662_v26 = vld [vmem:[%s12644_s1 + $0x1388] sm:$0xff]  ;;  %v663_v24 = vld [vmem:[%s12644_s1 + $0x1390] sm:$0xff]  ;;  %v664_v25 = vld [vmem:[%s12644_s1 + $0x1398] sm:$0xff]  ;;  %v7153_v29 = vpack.c.bf16 %v646_v20, %v645_v18  ;;  %v7123_v31 = vpack.c.bf16 %v632_v22, %v631_v21  ;;  %v1640_v43 = vcombine.high %v9939_v27, %v9939_v27 }
 0x11d   :  { %v7151_v19 = vpack.c.bf16 %v662_v26, %v661_v9  ;;  %v615_v30 = vld [vmem:[%s12644_s1 + $0x1210] sm:$0xff]  ;;  %v616_v32 = vld [vmem:[%s12644_s1 + $0x1218] sm:$0xff]  ;;  %v7155_v42 = vpack.c.bf16 %v664_v25, %v663_v24  ;;  %v633_v52 = vld [vmem:[%s12644_s1 + $0x12a0] sm:$0xff] }
 0x11e   :  { %v9909_v11 = vadd.f32 %v5177_v62, %v2146_v4  ;;  %7082 = vmatpush3.bf16.msra.mxu0 %v7081_v61  ;;  %v647_v34 = vld [vmem:[%s12644_s1 + $0x1310] sm:$0xff]  ;;  %v648_v35 = vld [vmem:[%s12644_s1 + $0x1318] sm:$0xff]  ;;  %v634_v37 = vld [vmem:[%s12644_s1 + $0x12a8] sm:$0xff]  ;;  %v7125_v44 = vpack.c.bf16 %v616_v32, %v615_v30 }
 0x11f   :  { %7114 = vmatpush3.bf16.msra.mxu1 %v7113_v63  ;;  %7084 = vmatprep.subr.bf16.mxu0 %v7083_v0  ;;  %v665_v40 = vld [vmem:[%s12644_s1 + $0x13a0] sm:$0xff]  ;;  %v666_v41 = vld [vmem:[%s12644_s1 + $0x13a8] sm:$0xff]  ;;  %v7157_v46 = vpack.c.bf16 %v648_v35, %v647_v34  ;;  %v7127_v47 = vpack.c.bf16 %v634_v37, %v633_v52  ;;  %v635_v53 = vld [vmem:[%s12644_s1 + $0x12b0] sm:$0xff] }
 0x120   :  { %7116 = vmatprep.subr.bf16.mxu1 %v7115_v5  ;;  %v618_v48 = vld [vmem:[%s12644_s1 + $0x1228] sm:$0xff]  ;;  %v649_v49 = vld [vmem:[%s12644_s1 + $0x1320] sm:$0xff]  ;;  %v636_v54 = vld [vmem:[%s12644_s1 + $0x12b8] sm:$0xff] }
 0x121   :  { %v650_v50 = vld [vmem:[%s12644_s1 + $0x1328] sm:$0xff]  ;;  %v667_v55 = vld [vmem:[%s12644_s1 + $0x13b0] sm:$0xff]  ;;  %v668_v57 = vld [vmem:[%s12644_s1 + $0x13b8] sm:$0xff]  ;;  %v7131_v58 = vpack.c.bf16 %v636_v54, %v635_v53 }
 0x122   :  { %7086 = vmatpush3.bf16.msra.mxu0 %v7085_v12  ;;  %v7161_v45 = vpack.c.bf16 %v650_v50, %v649_v49  ;;  %v619_v59 = vld [vmem:[%s12644_s1 + $0x1230] sm:$0xff]  ;;  %v620_v51 = vld [vmem:[%s12644_s1 + $0x1238] sm:$0xff]  ;;  %v7163_v61 = vpack.c.bf16 %v668_v57, %v667_v55  ;;  %v637_v62 = vld [vmem:[%s12644_s1 + $0x12c0] sm:$0xff] }
 0x123   :  { %7118 = vmatpush3.bf16.msra.mxu1 %v7117_v15  ;;  %7120 = vmatprep.subr.bf16.mxu0 %v7119_v14  ;;  %v651_v60 = vld [vmem:[%s12644_s1 + $0x1330] sm:$0xff]  ;;  %v652_v33 = vld [vmem:[%s12644_s1 + $0x1338] sm:$0xff]  ;;  %v638_v63 = vld [vmem:[%s12644_s1 + $0x12c8] sm:$0xff]  ;;  %v7133_v2 = vpack.c.bf16 %v620_v51, %v619_v59 }
 0x124   :  { %7152 = vmatprep.subr.bf16.mxu1 %v7151_v19  ;;  %v669_v0 = vld [vmem:[%s12644_s1 + $0x13c0] sm:$0xff]  ;;  %v670_v1 = vld [vmem:[%s12644_s1 + $0x13c8] sm:$0xff]  ;;  %v7165_v3 = vpack.c.bf16 %v652_v33, %v651_v60  ;;  %v7135_v4 = vpack.c.bf16 %v638_v63, %v637_v62  ;;  %v639_v26 = vld [vmem:[%s12644_s1 + $0x12d0] sm:$0xff] }
 0x125   :  { %3124 = vmatmul.mubr.f32.vlgmr.msra.gmra.mrb[16].mxu0 %v9720_v36  ;;  %v617_v36 = vld [vmem:[%s12644_s1 + $0x1220] sm:$0xff]  ;;  %v622_v6 = vld [vmem:[%s12644_s1 + $0x1248] sm:$0xff]  ;;  %v7167_v7 = vpack.c.bf16 %v670_v1, %v669_v0  ;;  %v640_v10 = vld [vmem:[%s12644_s1 + $0x12d8] sm:$0xff] }
 0x126   :  { %3194 = vmatmul.mubr.f32.vlgmr.msra.gmra.mrb[16].mxu1 %v9729_v39  ;;  %7122 = vmatpush3.bf16.msra.mxu0 %v7121_v28  ;;  %v7159_v39 = vpack.c.bf16 %v666_v41, %v665_v40  ;;  %v7129_v56 = vpack.c.bf16 %v618_v48, %v617_v36  ;;  %v621_v5 = vld [vmem:[%s12644_s1 + $0x1240] sm:$0xff]  ;;  %v654_v9 = vld [vmem:[%s12644_s1 + $0x1348] sm:$0xff]  ;;  %v671_v12 = vld [vmem:[%s12644_s1 + $0x13d0] sm:$0xff]  ;;  %v7139_v17 = vpack.c.bf16 %v640_v10, %v639_v26 }
 0x127   :  { %7154 = vmatpush3.bf16.msra.mxu1 %v7153_v29  ;;  %7124 = vmatprep.subr.bf16.mxu0 %v7123_v31  ;;  %v653_v8 = vld [vmem:[%s12644_s1 + $0x1340] sm:$0xff]  ;;  %v672_v15 = vld [vmem:[%s12644_s1 + $0x13d8] sm:$0xff]  ;;  %v7137_v14 = vpack.c.bf16 %v622_v6, %v621_v5  ;;  %v623_v18 = vld [vmem:[%s12644_s1 + $0x1250] sm:$0xff] }
 0x128   :  { %7156 = vmatprep.subr.bf16.mxu1 %v7155_v42  ;;  %3263 = vmatprep.mubr.f32.mxu0 %v1639_v38  ;;  %v7169_v16 = vpack.c.bf16 %v654_v9, %v653_v8  ;;  %v624_v19 = vld [vmem:[%s12644_s1 + $0x1258] sm:$0xff]  ;;  %v655_v20 = vld [vmem:[%s12644_s1 + $0x1350] sm:$0xff]  ;;  %v7171_v21 = vpack.c.bf16 %v672_v15, %v671_v12  ;;  %v641_v24 = vld [vmem:[%s12644_s1 + $0x12e0] sm:$0xff] }
 0x129   :  { %3333 = vmatprep.mubr.f32.mxu1 %v1640_v43  ;;  %v656_v22 = vld [vmem:[%s12644_s1 + $0x1358] sm:$0xff]  ;;  %v642_v25 = vld [vmem:[%s12644_s1 + $0x12e8] sm:$0xff]  ;;  %v673_v28 = vld [vmem:[%s12644_s1 + $0x13e0] sm:$0xff]  ;;  %v7141_v31 = vpack.c.bf16 %v624_v19, %v623_v18 }
 0x12a   :  { %7126 = vmatpush3.bf16.msra.mxu0 %v7125_v44  ;;  %v674_v29 = vld [vmem:[%s12644_s1 + $0x13e8] sm:$0xff]  ;;  %v7173_v30 = vpack.c.bf16 %v656_v22, %v655_v20  ;;  %v7143_v32 = vpack.c.bf16 %v642_v25, %v641_v24  ;;  %v625_v34 = vld [vmem:[%s12644_s1 + $0x1260] sm:$0xff]  ;;  %v643_v40 = vld [vmem:[%s12644_s1 + $0x12f0] sm:$0xff] }
 0x12b   :  { %7158 = vmatpush3.bf16.msra.mxu1 %v7157_v46  ;;  %7128 = vmatprep.subr.bf16.mxu0 %v7127_v47  ;;  %v626_v42 = vld [vmem:[%s12644_s1 + $0x1268] sm:$0xff]  ;;  %v657_v35 = vld [vmem:[%s12644_s1 + $0x1360] sm:$0xff]  ;;  %v7175_v37 = vpack.c.bf16 %v674_v29, %v673_v28  ;;  %v644_v41 = vld [vmem:[%s12644_s1 + $0x12f8] sm:$0xff] }
 0x12c   :  { %7160 = vmatprep.subr.bf16.mxu1 %v7159_v39  ;;  %v658_v38 = vld [vmem:[%s12644_s1 + $0x1368] sm:$0xff]  ;;  %v675_v46 = vld [vmem:[%s12644_s1 + $0x13f0] sm:$0xff]  ;;  %v676_v47 = vld [vmem:[%s12644_s1 + $0x13f8] sm:$0xff]  ;;  %v7145_v49 = vpack.c.bf16 %v626_v42, %v625_v34  ;;  %v7147_v54 = vpack.c.bf16 %v644_v41, %v643_v40 }
 0x12d   :  { %v25_v39 = vld [vmem:[%s12643_s0 + $0x50] sm:$0xff]  ;;  %v7177_v53 = vpack.c.bf16 %v658_v38, %v657_v35  ;;  %v628_v57 = vld [vmem:[%s12644_s1 + $0x1278] sm:$0xff]  ;;  %v693_v51 = vld [vmem:[%s12644_s1 + $0x1480] sm:$0xff] }
 0x12e   :  { %7130 = vmatpush3.bf16.msra.mxu0 %v7129_v56  ;;  %v627_v55 = vld [vmem:[%s12644_s1 + $0x1270] sm:$0xff]  ;;  %v660_v59 = vld [vmem:[%s12644_s1 + $0x1378] sm:$0xff]  ;;  %v694_v60 = vld [vmem:[%s12644_s1 + $0x1488] sm:$0xff]  ;;  %v1641_v33 = vcombine.high %v25_v39, %v25_v39  ;;  %v10140_v9 = vrot.slane %v25_v39, %v8185_v13 }
 0x12f   :  { %7162 = vmatpush3.bf16.msra.mxu1 %v7161_v45  ;;  %7132 = vmatprep.subr.bf16.mxu0 %v7131_v58  ;;  %v659_v56 = vld [vmem:[%s12644_s1 + $0x1370] sm:$0xff]  ;;  %v7179_v58 = vpack.c.bf16 %v676_v47, %v675_v46  ;;  %v7149_v63 = vpack.c.bf16 %v628_v57, %v627_v55  ;;  %v7183_v1 = vpack.c.bf16 %v694_v60, %v693_v51  ;;  %v710_v6 = vld [vmem:[%s12644_s1 + $0x1508] sm:$0xff]  ;;  %v728_v10 = vld [vmem:[%s12644_s1 + $0x1598] sm:$0xff] }
 0x130   :  { %7164 = vmatprep.subr.bf16.mxu1 %v7163_v61  ;;  %v725_v61 = vld [vmem:[%s12644_s1 + $0x1580] sm:$0xff]  ;;  %v7181_v0 = vpack.c.bf16 %v660_v59, %v659_v56  ;;  %v695_v8 = vld [vmem:[%s12644_s1 + $0x1490] sm:$0xff]  ;;  %v10149_v12 = vrot.slane %v1641_v33, %v8185_v13  ;;  %v680_v18 = vld [vmem:[%s12644_s1 + $0x1418] sm:$0xff]  ;;  %v1656_v25 = vcombine.high %v10140_v9, %v10140_v9 }
 0x131   :  { %v727_v26 = vld [vmem:[%s12644_s1 + $0x1590] sm:$0xff]  ;;  %v697_v22 = vld [vmem:[%s12644_s1 + $0x14a0] sm:$0xff]  ;;  %v698_v24 = vld [vmem:[%s12644_s1 + $0x14a8] sm:$0xff] }
 0x132   :  { %7134 = vmatpush3.bf16.msra.mxu0 %v7133_v2  ;;  %v677_v2 = vld [vmem:[%s12644_s1 + $0x1400] sm:$0xff]  ;;  %v711_v19 = vld [vmem:[%s12644_s1 + $0x1510] sm:$0xff]  ;;  %v7219_v20 = vpack.c.bf16 %v728_v10, %v727_v26  ;;  %v730_v29 = vld [vmem:[%s12644_s1 + $0x15a8] sm:$0xff]  ;;  %v7191_v34 = vpack.c.bf16 %v698_v24, %v697_v22 }
 0x133   :  { %7166 = vmatpush3.bf16.msra.mxu1 %v7165_v3  ;;  %7136 = vmatprep.subr.bf16.mxu0 %v7135_v4  ;;  %v678_v3 = vld [vmem:[%s12644_s1 + $0x1408] sm:$0xff]  ;;  %v709_v4 = vld [vmem:[%s12644_s1 + $0x1500] sm:$0xff]  ;;  %v700_v38 = vld [vmem:[%s12644_s1 + $0x14b8] sm:$0xff] }
 0x134   :  { %7168 = vmatprep.subr.bf16.mxu1 %v7167_v7  ;;  %v696_v7 = vld [vmem:[%s12644_s1 + $0x1498] sm:$0xff]  ;;  %v7185_v15 = vpack.c.bf16 %v678_v3, %v677_v2  ;;  %v729_v28 = vld [vmem:[%s12644_s1 + $0x15a0] sm:$0xff]  ;;  %v682_v42 = vld [vmem:[%s12644_s1 + $0x1428] sm:$0xff] }
 0x135   :  { %v713_v35 = vld [vmem:[%s12644_s1 + $0x1520] sm:$0xff]  ;;  %v731_v40 = vld [vmem:[%s12644_s1 + $0x15b0] sm:$0xff]  ;;  %v732_v41 = vld [vmem:[%s12644_s1 + $0x15b8] sm:$0xff] }
 0x136   :  { %7138 = vmatpush3.bf16.msra.mxu0 %v7137_v14  ;;  %v7217_v14 = vpack.c.bf16 %v710_v6, %v709_v4  ;;  %v683_v47 = vld [vmem:[%s12644_s1 + $0x1430] sm:$0xff]  ;;  %v716_v39 = vld [vmem:[%s12644_s1 + $0x1538] sm:$0xff]  ;;  %v734_v55 = vld [vmem:[%s12644_s1 + $0x15c8] sm:$0xff] }
 0x137   :  { %7170 = vmatpush3.bf16.msra.mxu1 %v7169_v16  ;;  %7140 = vmatprep.subr.bf16.mxu0 %v7139_v17  ;;  %v7187_v16 = vpack.c.bf16 %v696_v7, %v695_v8  ;;  %v679_v17 = vld [vmem:[%s12644_s1 + $0x1410] sm:$0xff]  ;;  %v686_v59 = vld [vmem:[%s12644_s1 + $0x1448] sm:$0xff]  ;;  %v717_v51 = vld [vmem:[%s12644_s1 + $0x1540] sm:$0xff] }
 0x138   :  { %v5210_v52 = vpop.f32.mrb[4].mxu0  ;;  %7172 = vmatprep.subr.bf16.mxu1 %v7171_v21  ;;  %v712_v21 = vld [vmem:[%s12644_s1 + $0x1518] sm:$0xff]  ;;  %v687_v4 = vld [vmem:[%s12644_s1 + $0x1450] sm:$0xff]  ;;  %v705_v26 = vld [vmem:[%s12644_s1 + $0x14e0] sm:$0xff] }
 0x139   :  { %v5245_v43 = vpop.f32.mrb[4].mxu1  ;;  %v5211_v44 = vpop.f32.mrb[5].mxu0  ;;  %v704_v33 = vld [vmem:[%s12644_s1 + $0x14d8] sm:$0xff]  ;;  %v719_v6 = vld [vmem:[%s12644_s1 + $0x1550] sm:$0xff]  ;;  %v706_v10 = vld [vmem:[%s12644_s1 + $0x14e8] sm:$0xff] }
 0x13a   :  { %v5212_v36 = vadd.f32 %v5211_v44, %v5210_v52  ;;  %v5246_v48 = vpop.f32.mrb[5].mxu1  ;;  %7142 = vmatpush3.bf16.msra.mxu0 %v7141_v31  ;;  %v1657_v31 = vcombine.high %v10149_v12, %v10149_v12  ;;  %v714_v52 = vld [vmem:[%s12644_s1 + $0x1528] sm:$0xff]  ;;  %v720_v7 = vld [vmem:[%s12644_s1 + $0x1558] sm:$0xff] }
 0x13b   :  { %v5247_v50 = vadd.f32 %v5246_v48, %v5245_v43  ;;  %7174 = vmatpush3.bf16.msra.mxu1 %v7173_v30  ;;  %7144 = vmatprep.subr.bf16.mxu0 %v7143_v32  ;;  %v7189_v30 = vpack.c.bf16 %v680_v18, %v679_v17  ;;  %v7221_v32 = vpack.c.bf16 %v712_v21, %v711_v19  ;;  %v715_v48 = vld [vmem:[%s12644_s1 + $0x1530] sm:$0xff]  ;;  %v689_v19 = vld [vmem:[%s12644_s1 + $0x1460] sm:$0xff] }
 0x13c   :  { %v2286_v45 = vadd.f32 %v5212_v36, %v9909_v11  ;;  %7176 = vmatprep.subr.bf16.mxu1 %v7175_v37  ;;  %v726_v11 = vld [vmem:[%s12644_s1 + $0x1588] sm:$0xff]  ;;  %v699_v37 = vld [vmem:[%s12644_s1 + $0x14b0] sm:$0xff]  ;;  %v7225_v44 = vpack.c.bf16 %v714_v52, %v713_v35  ;;  %v684_v36 = vld [vmem:[%s12644_s1 + $0x1438] sm:$0xff]  ;;  %v7229_v56 = vpack.c.bf16 %v716_v39, %v715_v48  ;;  %v7237_v17 = vpack.c.bf16 %v720_v7, %v719_v6 }
 0x13d   :  { %v7215_v5 = vpack.c.bf16 %v726_v11, %v725_v61  ;;  %v7195_v46 = vpack.c.bf16 %v700_v38, %v699_v37  ;;  %v7197_v57 = vpack.c.bf16 %v684_v36, %v683_v47  ;;  %v718_v61 = vld [vmem:[%s12644_s1 + $0x1548] sm:$0xff]  ;;  %v703_v11 = vld [vmem:[%s12644_s1 + $0x14d0] sm:$0xff]  ;;  %v7207_v18 = vpack.c.bf16 %v706_v10, %v705_v26  ;;  %v721_v21 = vld [vmem:[%s12644_s1 + $0x1560] sm:$0xff] }
 0x13e   :  { %v10119_v62 = vadd.f32 %v5247_v50, %v2286_v45  ;;  %7146 = vmatpush3.bf16.msra.mxu0 %v7145_v49  ;;  %v7227_v49 = vpack.c.bf16 %v732_v41, %v731_v40  ;;  %v701_v50 = vld [vmem:[%s12644_s1 + $0x14c0] sm:$0xff]  ;;  %v7233_v2 = vpack.c.bf16 %v718_v61, %v717_v51  ;;  %v7203_v3 = vpack.c.bf16 %v704_v33, %v703_v11  ;;  %v691_v40 = vld [vmem:[%s12644_s1 + $0x1470] sm:$0xff]  ;;  %v692_v41 = vld [vmem:[%s12644_s1 + $0x1478] sm:$0xff] }
 0x13f   :  { %7178 = vmatpush3.bf16.msra.mxu1 %v7177_v53  ;;  %7148 = vmatprep.subr.bf16.mxu0 %v7147_v54  ;;  %v702_v53 = vld [vmem:[%s12644_s1 + $0x14c8] sm:$0xff]  ;;  %v733_v54 = vld [vmem:[%s12644_s1 + $0x15c0] sm:$0xff]  ;;  %v724_v47 = vld [vmem:[%s12644_s1 + $0x1578] sm:$0xff] }
 0x140   :  { %7180 = vmatprep.subr.bf16.mxu1 %v7179_v58  ;;  %v7199_v45 = vpack.c.bf16 %v702_v53, %v701_v50  ;;  %v685_v58 = vld [vmem:[%s12644_s1 + $0x1440] sm:$0xff]  ;;  %v7231_v60 = vpack.c.bf16 %v734_v55, %v733_v54  ;;  %v758_v48 = vld [vmem:[%s12644_s1 + $0x1688] sm:$0xff]  ;;  %v7213_v53 = vpack.c.bf16 %v692_v41, %v691_v40  ;;  %v759_v51 = vld [vmem:[%s12644_s1 + $0x1690] sm:$0xff] }
 0x141   :  { %v757_v36 = vld [vmem:[%s12644_s1 + $0x1680] sm:$0xff]  ;;  %v791_v11 = vld [vmem:[%s12644_s1 + $0x1790] sm:$0xff]  ;;  %v792_v33 = vld [vmem:[%s12644_s1 + $0x1798] sm:$0xff] }
 0x142   :  { %7150 = vmatpush3.bf16.msra.mxu0 %v7149_v63  ;;  %v735_v63 = vld [vmem:[%s12644_s1 + $0x15d0] sm:$0xff]  ;;  %v7247_v55 = vpack.c.bf16 %v758_v48, %v757_v36  ;;  %v7283_v6 = vpack.c.bf16 %v792_v33, %v791_v11  ;;  %v761_v7 = vld [vmem:[%s12644_s1 + $0x16a0] sm:$0xff]  ;;  %v762_v26 = vld [vmem:[%s12644_s1 + $0x16a8] sm:$0xff] }
 0x143   :  { %7182 = vmatpush3.bf16.msra.mxu1 %v7181_v0  ;;  %7184 = vmatprep.subr.bf16.mxu0 %v7183_v1  ;;  %v736_v0 = vld [vmem:[%s12644_s1 + $0x15d8] sm:$0xff]  ;;  %v7201_v1 = vpack.c.bf16 %v686_v59, %v685_v58  ;;  %v774_v59 = vld [vmem:[%s12644_s1 + $0x1708] sm:$0xff]  ;;  %v781_v36 = vld [vmem:[%s12644_s1 + $0x1740] sm:$0xff] }
 0x144   :  { %7216 = vmatprep.subr.bf16.mxu1 %v7215_v5  ;;  %v688_v5 = vld [vmem:[%s12644_s1 + $0x1458] sm:$0xff]  ;;  %v7235_v8 = vpack.c.bf16 %v736_v0, %v735_v63  ;;  %v798_v40 = vld [vmem:[%s12644_s1 + $0x17c8] sm:$0xff]  ;;  %v769_v11 = vld [vmem:[%s12644_s1 + $0x16e0] sm:$0xff] }
 0x145   :  { %3264 = vmatmul.mubr.f32.vlgmr.msra.gmra.mrb[18].mxu0 %v9930_v23  ;;  %v681_v23 = vld [vmem:[%s12644_s1 + $0x1420] sm:$0xff]  ;;  %v770_v33 = vld [vmem:[%s12644_s1 + $0x16e8] sm:$0xff] }
 0x146   :  { %3334 = vmatmul.mubr.f32.vlgmr.msra.gmra.mrb[18].mxu1 %v9939_v27  ;;  %7186 = vmatpush3.bf16.msra.mxu0 %v7185_v15  ;;  %v7223_v27 = vpack.c.bf16 %v730_v29, %v729_v28  ;;  %v7193_v43 = vpack.c.bf16 %v682_v42, %v681_v23  ;;  %v737_v15 = vld [vmem:[%s12644_s1 + $0x15e0] sm:$0xff]  ;;  %v707_v28 = vld [vmem:[%s12644_s1 + $0x14f0] sm:$0xff]  ;;  %v708_v29 = vld [vmem:[%s12644_s1 + $0x14f8] sm:$0xff] }
 0x147   :  { %7218 = vmatpush3.bf16.msra.mxu1 %v7217_v14  ;;  %7188 = vmatprep.subr.bf16.mxu0 %v7187_v16  ;;  %v738_v14 = vld [vmem:[%s12644_s1 + $0x15e8] sm:$0xff]  ;;  %v7205_v16 = vpack.c.bf16 %v688_v5, %v687_v4  ;;  %v7211_v38 = vpack.c.bf16 %v708_v29, %v707_v28  ;;  %v744_v4 = vld [vmem:[%s12644_s1 + $0x1618] sm:$0xff]  ;;  %v775_v5 = vld [vmem:[%s12644_s1 + $0x1710] sm:$0xff] }
 0x148   :  { %7220 = vmatprep.subr.bf16.mxu1 %v7219_v20  ;;  %3403 = vmatprep.mubr.f32.mxu0 %v1656_v25  ;;  %v690_v20 = vld [vmem:[%s12644_s1 + $0x1468] sm:$0xff]  ;;  %v7239_v24 = vpack.c.bf16 %v738_v14, %v737_v15  ;;  %v793_v15 = vld [vmem:[%s12644_s1 + $0x17a0] sm:$0xff]  ;;  %v795_v28 = vld [vmem:[%s12644_s1 + $0x17b0] sm:$0xff] }
 0x149   :  { %3473 = vmatprep.mubr.f32.mxu1 %v1657_v31  ;;  %v722_v25 = vld [vmem:[%s12644_s1 + $0x1568] sm:$0xff]  ;;  %v7209_v35 = vpack.c.bf16 %v690_v20, %v689_v19  ;;  %v7255_v19 = vpack.c.bf16 %v762_v26, %v761_v7  ;;  %v796_v29 = vld [vmem:[%s12644_s1 + $0x17b8] sm:$0xff] }
 0x14a   :  { %7190 = vmatpush3.bf16.msra.mxu0 %v7189_v30  ;;  %v7241_v37 = vpack.c.bf16 %v722_v25, %v721_v21  ;;  %v794_v14 = vld [vmem:[%s12644_s1 + $0x17a8] sm:$0xff]  ;;  %v777_v21 = vld [vmem:[%s12644_s1 + $0x1720] sm:$0xff]  ;;  %v764_v25 = vld [vmem:[%s12644_s1 + $0x16b8] sm:$0xff] }
 0x14b   :  { %7222 = vmatpush3.bf16.msra.mxu1 %v7221_v32  ;;  %7192 = vmatprep.subr.bf16.mxu0 %v7191_v34  ;;  %v739_v32 = vld [vmem:[%s12644_s1 + $0x15f0] sm:$0xff]  ;;  %v740_v34 = vld [vmem:[%s12644_s1 + $0x15f8] sm:$0xff]  ;;  %v746_v20 = vld [vmem:[%s12644_s1 + $0x1628] sm:$0xff] }
 0x14c   :  { %7224 = vmatprep.subr.bf16.mxu1 %v7223_v27  ;;  %v26_v27 = vld [vmem:[%s12643_s0 + $0x58] sm:$0xff] }
 0x14d   :  { %v1658_v39 = vcombine.high %v26_v27, %v26_v27  ;;  %v10350_v61 = vrot.slane %v26_v27, %v8185_v13  ;;  %v780_v27 = vld [vmem:[%s12644_s1 + $0x1738] sm:$0xff] }
 0x14e   :  { %7194 = vmatpush3.bf16.msra.mxu0 %v7193_v43  ;;  %v723_v43 = vld [vmem:[%s12644_s1 + $0x1570] sm:$0xff] }
 0x14f   :  { %7226 = vmatpush3.bf16.msra.mxu1 %v7225_v44  ;;  %7196 = vmatprep.subr.bf16.mxu0 %v7195_v46  ;;  %v7243_v46 = vpack.c.bf16 %v740_v34, %v739_v32  ;;  %v7245_v54 = vpack.c.bf16 %v724_v47, %v723_v43  ;;  %v10359_v63 = vrot.slane %v1658_v39, %v8185_v13  ;;  %v747_v34 = vld [vmem:[%s12644_s1 + $0x1630] sm:$0xff]  ;;  %v750_v47 = vld [vmem:[%s12644_s1 + $0x1648] sm:$0xff]  ;;  %v768_v39 = vld [vmem:[%s12644_s1 + $0x16d8] sm:$0xff] }
 0x150   :  { %7228 = vmatprep.subr.bf16.mxu1 %v7227_v49  ;;  %v789_v49 = vld [vmem:[%s12644_s1 + $0x1780] sm:$0xff]  ;;  %v1673_v10 = vcombine.high %v10350_v61, %v10350_v61 }
 0x152   :  { %7198 = vmatpush3.bf16.msra.mxu0 %v7197_v57  ;;  %v741_v57 = vld [vmem:[%s12644_s1 + $0x1600] sm:$0xff] }
 0x153   :  { %7230 = vmatpush3.bf16.msra.mxu1 %v7229_v56  ;;  %7200 = vmatprep.subr.bf16.mxu0 %v7199_v45  ;;  %v742_v56 = vld [vmem:[%s12644_s1 + $0x1608] sm:$0xff]  ;;  %v773_v45 = vld [vmem:[%s12644_s1 + $0x1700] sm:$0xff] }
 0x154   :  { %7232 = vmatprep.subr.bf16.mxu1 %v7231_v60  ;;  %v760_v60 = vld [vmem:[%s12644_s1 + $0x1698] sm:$0xff]  ;;  %v7249_v0 = vpack.c.bf16 %v742_v56, %v741_v57 }
 0x156   :  { %7202 = vmatpush3.bf16.msra.mxu0 %v7201_v1  ;;  %v7281_v1 = vpack.c.bf16 %v774_v59, %v773_v45  ;;  %v751_v45 = vld [vmem:[%s12644_s1 + $0x1650] sm:$0xff] }
 0x157   :  { %7234 = vmatpush3.bf16.msra.mxu1 %v7233_v2  ;;  %7204 = vmatprep.subr.bf16.mxu0 %v7203_v3  ;;  %v7251_v2 = vpack.c.bf16 %v760_v60, %v759_v51  ;;  %v743_v3 = vld [vmem:[%s12644_s1 + $0x1610] sm:$0xff]  ;;  %v784_v60 = vld [vmem:[%s12644_s1 + $0x1758] sm:$0xff] }
 0x158   :  { %v5280_v22 = vpop.f32.mrb[6].mxu0  ;;  %7236 = vmatprep.subr.bf16.mxu1 %v7235_v8  ;;  %v776_v8 = vld [vmem:[%s12644_s1 + $0x1718] sm:$0xff]  ;;  %v783_v59 = vld [vmem:[%s12644_s1 + $0x1750] sm:$0xff] }
 0x159   :  { %v5315_v31 = vpop.f32.mrb[6].mxu1  ;;  %v5281_v30 = vpop.f32.mrb[7].mxu0 }
 0x15a   :  { %v5282_v23 = vadd.f32 %v5281_v30, %v5280_v22  ;;  %v5316_v42 = vpop.f32.mrb[7].mxu1  ;;  %7206 = vmatpush3.bf16.msra.mxu0 %v7205_v16  ;;  %v1674_v16 = vcombine.high %v10359_v63, %v10359_v63  ;;  %v778_v22 = vld [vmem:[%s12644_s1 + $0x1728] sm:$0xff] }
 0x15b   :  { %v5317_v52 = vadd.f32 %v5316_v42, %v5315_v31  ;;  %7238 = vmatpush3.bf16.msra.mxu1 %v7237_v17  ;;  %7208 = vmatprep.subr.bf16.mxu0 %v7207_v18  ;;  %v7253_v17 = vpack.c.bf16 %v744_v4, %v743_v3  ;;  %v7285_v18 = vpack.c.bf16 %v776_v8, %v775_v5  ;;  %v779_v42 = vld [vmem:[%s12644_s1 + $0x1730] sm:$0xff]  ;;  %v753_v5 = vld [vmem:[%s12644_s1 + $0x1660] sm:$0xff] }
 0x15c   :  { %v2426_v44 = vadd.f32 %v5282_v23, %v10119_v62  ;;  %7240 = vmatprep.subr.bf16.mxu1 %v7239_v24  ;;  %v790_v62 = vld [vmem:[%s12644_s1 + $0x1788] sm:$0xff]  ;;  %v763_v24 = vld [vmem:[%s12644_s1 + $0x16b0] sm:$0xff]  ;;  %v7289_v30 = vpack.c.bf16 %v778_v22, %v777_v21  ;;  %v748_v23 = vld [vmem:[%s12644_s1 + $0x1638] sm:$0xff]  ;;  %v7293_v43 = vpack.c.bf16 %v780_v27, %v779_v42  ;;  %v7301_v3 = vpack.c.bf16 %v784_v60, %v783_v59 }
 0x15d   :  { %v7279_v58 = vpack.c.bf16 %v790_v62, %v789_v49  ;;  %v7259_v32 = vpack.c.bf16 %v764_v25, %v763_v24  ;;  %v7261_v41 = vpack.c.bf16 %v748_v23, %v747_v34  ;;  %v782_v49 = vld [vmem:[%s12644_s1 + $0x1748] sm:$0xff]  ;;  %v767_v62 = vld [vmem:[%s12644_s1 + $0x16d0] sm:$0xff]  ;;  %v7271_v4 = vpack.c.bf16 %v770_v33, %v769_v11  ;;  %v785_v8 = vld [vmem:[%s12644_s1 + $0x1760] sm:$0xff] }
 0x15e   :  { %v10329_v50 = vadd.f32 %v5317_v52, %v2426_v44  ;;  %7210 = vmatpush3.bf16.msra.mxu0 %v7209_v35  ;;  %v7291_v35 = vpack.c.bf16 %v796_v29, %v795_v28  ;;  %v765_v52 = vld [vmem:[%s12644_s1 + $0x16c0] sm:$0xff]  ;;  %v7297_v57 = vpack.c.bf16 %v782_v49, %v781_v36  ;;  %v7267_v56 = vpack.c.bf16 %v768_v39, %v767_v62  ;;  %v755_v28 = vld [vmem:[%s12644_s1 + $0x1670] sm:$0xff]  ;;  %v756_v29 = vld [vmem:[%s12644_s1 + $0x1678] sm:$0xff] }
 0x15f   :  { %7242 = vmatpush3.bf16.msra.mxu1 %v7241_v37  ;;  %7212 = vmatprep.subr.bf16.mxu0 %v7211_v38  ;;  %v766_v37 = vld [vmem:[%s12644_s1 + $0x16c8] sm:$0xff]  ;;  %v797_v38 = vld [vmem:[%s12644_s1 + $0x17c0] sm:$0xff]  ;;  %v788_v34 = vld [vmem:[%s12644_s1 + $0x1778] sm:$0xff] }
 0x160   :  { %7244 = vmatprep.subr.bf16.mxu1 %v7243_v46  ;;  %v7263_v44 = vpack.c.bf16 %v766_v37, %v765_v52  ;;  %v749_v46 = vld [vmem:[%s12644_s1 + $0x1640] sm:$0xff]  ;;  %v7295_v48 = vpack.c.bf16 %v798_v40, %v797_v38  ;;  %v822_v42 = vld [vmem:[%s12644_s1 + $0x1888] sm:$0xff]  ;;  %v7277_v37 = vpack.c.bf16 %v756_v29, %v755_v28  ;;  %v823_v36 = vld [vmem:[%s12644_s1 + $0x1890] sm:$0xff] }
 0x161   :  { %v821_v23 = vld [vmem:[%s12644_s1 + $0x1880] sm:$0xff]  ;;  %v855_v62 = vld [vmem:[%s12644_s1 + $0x1990] sm:$0xff]  ;;  %v856_v39 = vld [vmem:[%s12644_s1 + $0x1998] sm:$0xff] }
 0x162   :  { %7214 = vmatpush3.bf16.msra.mxu0 %v7213_v53  ;;  %v799_v53 = vld [vmem:[%s12644_s1 + $0x17d0] sm:$0xff]  ;;  %v7311_v40 = vpack.c.bf16 %v822_v42, %v821_v23  ;;  %v7347_v59 = vpack.c.bf16 %v856_v39, %v855_v62  ;;  %v825_v60 = vld [vmem:[%s12644_s1 + $0x18a0] sm:$0xff]  ;;  %v826_v11 = vld [vmem:[%s12644_s1 + $0x18a8] sm:$0xff] }
 0x163   :  { %7246 = vmatpush3.bf16.msra.mxu1 %v7245_v54  ;;  %7248 = vmatprep.subr.bf16.mxu0 %v7247_v55  ;;  %v800_v54 = vld [vmem:[%s12644_s1 + $0x17d8] sm:$0xff]  ;;  %v7265_v55 = vpack.c.bf16 %v750_v47, %v749_v46  ;;  %v838_v47 = vld [vmem:[%s12644_s1 + $0x1908] sm:$0xff]  ;;  %v845_v23 = vld [vmem:[%s12644_s1 + $0x1940] sm:$0xff] }
 0x164   :  { %7280 = vmatprep.subr.bf16.mxu1 %v7279_v58  ;;  %v752_v58 = vld [vmem:[%s12644_s1 + $0x1658] sm:$0xff]  ;;  %v7299_v51 = vpack.c.bf16 %v800_v54, %v799_v53  ;;  %v862_v28 = vld [vmem:[%s12644_s1 + $0x19c8] sm:$0xff]  ;;  %v833_v62 = vld [vmem:[%s12644_s1 + $0x18e0] sm:$0xff] }
 0x165   :  { %3404 = vmatmul.mubr.f32.vlgmr.msra.gmra.mrb[20].mxu0 %v10140_v9  ;;  %v745_v9 = vld [vmem:[%s12644_s1 + $0x1620] sm:$0xff]  ;;  %v834_v39 = vld [vmem:[%s12644_s1 + $0x18e8] sm:$0xff] }
 0x166   :  { %3474 = vmatmul.mubr.f32.vlgmr.msra.gmra.mrb[20].mxu1 %v10149_v12  ;;  %7250 = vmatpush3.bf16.msra.mxu0 %v7249_v0  ;;  %v7287_v12 = vpack.c.bf16 %v794_v14, %v793_v15  ;;  %v7257_v31 = vpack.c.bf16 %v746_v20, %v745_v9  ;;  %v801_v0 = vld [vmem:[%s12644_s1 + $0x17e0] sm:$0xff]  ;;  %v771_v15 = vld [vmem:[%s12644_s1 + $0x16f0] sm:$0xff]  ;;  %v772_v14 = vld [vmem:[%s12644_s1 + $0x16f8] sm:$0xff] }
 0x167   :  { %7282 = vmatpush3.bf16.msra.mxu1 %v7281_v1  ;;  %7252 = vmatprep.subr.bf16.mxu0 %v7251_v2  ;;  %v802_v1 = vld [vmem:[%s12644_s1 + $0x17e8] sm:$0xff]  ;;  %v7269_v2 = vpack.c.bf16 %v752_v58, %v751_v45  ;;  %v7275_v25 = vpack.c.bf16 %v772_v14, %v771_v15  ;;  %v808_v45 = vld [vmem:[%s12644_s1 + $0x1818] sm:$0xff]  ;;  %v839_v58 = vld [vmem:[%s12644_s1 + $0x1910] sm:$0xff] }
 0x168   :  { %7284 = vmatprep.subr.bf16.mxu1 %v7283_v6  ;;  %3543 = vmatprep.mubr.f32.mxu0 %v1673_v10  ;;  %v754_v6 = vld [vmem:[%s12644_s1 + $0x1668] sm:$0xff]  ;;  %v7303_v26 = vpack.c.bf16 %v802_v1, %v801_v0  ;;  %v857_v0 = vld [vmem:[%s12644_s1 + $0x19a0] sm:$0xff]  ;;  %v859_v15 = vld [vmem:[%s12644_s1 + $0x19b0] sm:$0xff] }
 0x169   :  { %3613 = vmatprep.mubr.f32.mxu1 %v1674_v16  ;;  %v786_v10 = vld [vmem:[%s12644_s1 + $0x1768] sm:$0xff]  ;;  %v7273_v21 = vpack.c.bf16 %v754_v6, %v753_v5  ;;  %v7319_v5 = vpack.c.bf16 %v826_v11, %v825_v60  ;;  %v860_v14 = vld [vmem:[%s12644_s1 + $0x19b8] sm:$0xff] }
 0x16a   :  { %7254 = vmatpush3.bf16.msra.mxu0 %v7253_v17  ;;  %v7305_v24 = vpack.c.bf16 %v786_v10, %v785_v8  ;;  %v858_v1 = vld [vmem:[%s12644_s1 + $0x19a8] sm:$0xff]  ;;  %v841_v8 = vld [vmem:[%s12644_s1 + $0x1920] sm:$0xff]  ;;  %v828_v10 = vld [vmem:[%s12644_s1 + $0x18b8] sm:$0xff] }
 0x16b   :  { %7286 = vmatpush3.bf16.msra.mxu1 %v7285_v18  ;;  %7256 = vmatprep.subr.bf16.mxu0 %v7255_v19  ;;  %v803_v18 = vld [vmem:[%s12644_s1 + $0x17f0] sm:$0xff]  ;;  %v804_v19 = vld [vmem:[%s12644_s1 + $0x17f8] sm:$0xff]  ;;  %v810_v6 = vld [vmem:[%s12644_s1 + $0x1828] sm:$0xff] }
 0x16c   :  { %7288 = vmatprep.subr.bf16.mxu1 %v7287_v12  ;;  %v27_v12 = vld [vmem:[%s12643_s0 + $0x60] sm:$0xff] }
 0x16d   :  { %v1675_v27 = vcombine.high %v27_v12, %v27_v12  ;;  %v10560_v49 = vrot.slane %v27_v12, %v8185_v13  ;;  %v844_v12 = vld [vmem:[%s12644_s1 + $0x1938] sm:$0xff] }
 0x16e   :  { %7258 = vmatpush3.bf16.msra.mxu0 %v7257_v31  ;;  %v787_v31 = vld [vmem:[%s12644_s1 + $0x1770] sm:$0xff] }
 0x16f   :  { %7290 = vmatpush3.bf16.msra.mxu1 %v7289_v30  ;;  %7260 = vmatprep.subr.bf16.mxu0 %v7259_v32  ;;  %v7307_v32 = vpack.c.bf16 %v804_v19, %v803_v18  ;;  %v7309_v38 = vpack.c.bf16 %v788_v34, %v787_v31  ;;  %v10569_v53 = vrot.slane %v1675_v27, %v8185_v13  ;;  %v811_v19 = vld [vmem:[%s12644_s1 + $0x1830] sm:$0xff]  ;;  %v814_v34 = vld [vmem:[%s12644_s1 + $0x1848] sm:$0xff]  ;;  %v832_v27 = vld [vmem:[%s12644_s1 + $0x18d8] sm:$0xff] }
 0x170   :  { %7292 = vmatprep.subr.bf16.mxu1 %v7291_v35  ;;  %v853_v35 = vld [vmem:[%s12644_s1 + $0x1980] sm:$0xff]  ;;  %v1690_v33 = vcombine.high %v10560_v49, %v10560_v49 }
 0x172   :  { %7262 = vmatpush3.bf16.msra.mxu0 %v7261_v41  ;;  %v805_v41 = vld [vmem:[%s12644_s1 + $0x1800] sm:$0xff] }
 0x173   :  { %7294 = vmatpush3.bf16.msra.mxu1 %v7293_v43  ;;  %7264 = vmatprep.subr.bf16.mxu0 %v7263_v44  ;;  %v806_v43 = vld [vmem:[%s12644_s1 + $0x1808] sm:$0xff]  ;;  %v837_v44 = vld [vmem:[%s12644_s1 + $0x1900] sm:$0xff] }
 0x174   :  { %7296 = vmatprep.subr.bf16.mxu1 %v7295_v48  ;;  %v824_v48 = vld [vmem:[%s12644_s1 + $0x1898] sm:$0xff]  ;;  %v7313_v54 = vpack.c.bf16 %v806_v43, %v805_v41 }
 0x176   :  { %7266 = vmatpush3.bf16.msra.mxu0 %v7265_v55  ;;  %v7345_v55 = vpack.c.bf16 %v838_v47, %v837_v44  ;;  %v815_v44 = vld [vmem:[%s12644_s1 + $0x1850] sm:$0xff] }
 0x177   :  { %7298 = vmatpush3.bf16.msra.mxu1 %v7297_v57  ;;  %7268 = vmatprep.subr.bf16.mxu0 %v7267_v56  ;;  %v7315_v57 = vpack.c.bf16 %v824_v48, %v823_v36  ;;  %v807_v56 = vld [vmem:[%s12644_s1 + $0x1810] sm:$0xff]  ;;  %v848_v48 = vld [vmem:[%s12644_s1 + $0x1958] sm:$0xff] }
 0x178   :  { %v5350_v7 = vpop.f32.mrb[8].mxu0  ;;  %7300 = vmatprep.subr.bf16.mxu1 %v7299_v51  ;;  %v840_v51 = vld [vmem:[%s12644_s1 + $0x1918] sm:$0xff]  ;;  %v847_v47 = vld [vmem:[%s12644_s1 + $0x1950] sm:$0xff] }
 0x179   :  { %v5385_v16 = vpop.f32.mrb[8].mxu1  ;;  %v5351_v17 = vpop.f32.mrb[9].mxu0 }
 0x17a   :  { %v5352_v9 = vadd.f32 %v5351_v17, %v5350_v7  ;;  %v5386_v20 = vpop.f32.mrb[9].mxu1  ;;  %7270 = vmatpush3.bf16.msra.mxu0 %v7269_v2  ;;  %v1691_v2 = vcombine.high %v10569_v53, %v10569_v53  ;;  %v842_v7 = vld [vmem:[%s12644_s1 + $0x1928] sm:$0xff] }
 0x17b   :  { %v5387_v22 = vadd.f32 %v5386_v20, %v5385_v16  ;;  %7302 = vmatpush3.bf16.msra.mxu1 %v7301_v3  ;;  %7272 = vmatprep.subr.bf16.mxu0 %v7271_v4  ;;  %v7317_v3 = vpack.c.bf16 %v808_v45, %v807_v56  ;;  %v7349_v4 = vpack.c.bf16 %v840_v51, %v839_v58  ;;  %v843_v20 = vld [vmem:[%s12644_s1 + $0x1930] sm:$0xff]  ;;  %v817_v58 = vld [vmem:[%s12644_s1 + $0x1860] sm:$0xff] }
 0x17c   :  { %v2566_v30 = vadd.f32 %v5352_v9, %v10329_v50  ;;  %7304 = vmatprep.subr.bf16.mxu1 %v7303_v26  ;;  %v854_v50 = vld [vmem:[%s12644_s1 + $0x1988] sm:$0xff]  ;;  %v827_v26 = vld [vmem:[%s12644_s1 + $0x18b0] sm:$0xff]  ;;  %v7353_v17 = vpack.c.bf16 %v842_v7, %v841_v8  ;;  %v812_v9 = vld [vmem:[%s12644_s1 + $0x1838] sm:$0xff]  ;;  %v7357_v31 = vpack.c.bf16 %v844_v12, %v843_v20  ;;  %v7365_v56 = vpack.c.bf16 %v848_v48, %v847_v47 }
 0x17d   :  { %v7343_v46 = vpack.c.bf16 %v854_v50, %v853_v35  ;;  %v7323_v18 = vpack.c.bf16 %v828_v10, %v827_v26  ;;  %v7325_v29 = vpack.c.bf16 %v812_v9, %v811_v19  ;;  %v846_v35 = vld [vmem:[%s12644_s1 + $0x1948] sm:$0xff]  ;;  %v831_v50 = vld [vmem:[%s12644_s1 + $0x18d0] sm:$0xff]  ;;  %v7335_v45 = vpack.c.bf16 %v834_v39, %v833_v62  ;;  %v849_v51 = vld [vmem:[%s12644_s1 + $0x1960] sm:$0xff] }
 0x17e   :  { %v10539_v52 = vadd.f32 %v5387_v22, %v2566_v30  ;;  %7274 = vmatpush3.bf16.msra.mxu0 %v7273_v21  ;;  %v7355_v21 = vpack.c.bf16 %v860_v14, %v859_v15  ;;  %v829_v22 = vld [vmem:[%s12644_s1 + $0x18c0] sm:$0xff]  ;;  %v7361_v41 = vpack.c.bf16 %v846_v35, %v845_v23  ;;  %v7331_v43 = vpack.c.bf16 %v832_v27, %v831_v50  ;;  %v819_v15 = vld [vmem:[%s12644_s1 + $0x1870] sm:$0xff]  ;;  %v820_v14 = vld [vmem:[%s12644_s1 + $0x1878] sm:$0xff] }
 0x17f   :  { %7306 = vmatpush3.bf16.msra.mxu1 %v7305_v24  ;;  %7276 = vmatprep.subr.bf16.mxu0 %v7275_v25  ;;  %v830_v24 = vld [vmem:[%s12644_s1 + $0x18c8] sm:$0xff]  ;;  %v861_v25 = vld [vmem:[%s12644_s1 + $0x19c0] sm:$0xff]  ;;  %v852_v19 = vld [vmem:[%s12644_s1 + $0x1978] sm:$0xff] }
 0x180   :  { %7308 = vmatprep.subr.bf16.mxu1 %v7307_v32  ;;  %v7327_v30 = vpack.c.bf16 %v830_v24, %v829_v22  ;;  %v813_v32 = vld [vmem:[%s12644_s1 + $0x1840] sm:$0xff]  ;;  %v7359_v42 = vpack.c.bf16 %v862_v28, %v861_v25  ;;  %v886_v20 = vld [vmem:[%s12644_s1 + $0x1a88] sm:$0xff]  ;;  %v7341_v24 = vpack.c.bf16 %v820_v14, %v819_v15  ;;  %v887_v23 = vld [vmem:[%s12644_s1 + $0x1a90] sm:$0xff] }
 0x181   :  { %v885_v9 = vld [vmem:[%s12644_s1 + $0x1a80] sm:$0xff]  ;;  %v919_v50 = vld [vmem:[%s12644_s1 + $0x1b90] sm:$0xff]  ;;  %v920_v27 = vld [vmem:[%s12644_s1 + $0x1b98] sm:$0xff] }
 0x182   :  { %7278 = vmatpush3.bf16.msra.mxu0 %v7277_v37  ;;  %v863_v37 = vld [vmem:[%s12644_s1 + $0x19d0] sm:$0xff]  ;;  %v7375_v28 = vpack.c.bf16 %v886_v20, %v885_v9  ;;  %v7411_v47 = vpack.c.bf16 %v920_v27, %v919_v50  ;;  %v889_v48 = vld [vmem:[%s12644_s1 + $0x1aa0] sm:$0xff]  ;;  %v890_v62 = vld [vmem:[%s12644_s1 + $0x1aa8] sm:$0xff] }
 0x183   :  { %7310 = vmatpush3.bf16.msra.mxu1 %v7309_v38  ;;  %7312 = vmatprep.subr.bf16.mxu0 %v7311_v40  ;;  %v864_v38 = vld [vmem:[%s12644_s1 + $0x19d8] sm:$0xff]  ;;  %v7329_v40 = vpack.c.bf16 %v814_v34, %v813_v32  ;;  %v902_v34 = vld [vmem:[%s12644_s1 + $0x1b08] sm:$0xff]  ;;  %v909_v9 = vld [vmem:[%s12644_s1 + $0x1b40] sm:$0xff] }
 0x184   :  { %7344 = vmatprep.subr.bf16.mxu1 %v7343_v46  ;;  %v816_v46 = vld [vmem:[%s12644_s1 + $0x1858] sm:$0xff]  ;;  %v7363_v36 = vpack.c.bf16 %v864_v38, %v863_v37  ;;  %v926_v15 = vld [vmem:[%s12644_s1 + $0x1bc8] sm:$0xff]  ;;  %v897_v50 = vld [vmem:[%s12644_s1 + $0x1ae0] sm:$0xff] }
 0x185   :  { %3544 = vmatmul.mubr.f32.vlgmr.msra.gmra.mrb[22].mxu0 %v10350_v61  ;;  %v809_v61 = vld [vmem:[%s12644_s1 + $0x1820] sm:$0xff]  ;;  %v898_v27 = vld [vmem:[%s12644_s1 + $0x1ae8] sm:$0xff] }
 0x186   :  { %3614 = vmatmul.mubr.f32.vlgmr.msra.gmra.mrb[22].mxu1 %v10359_v63  ;;  %7314 = vmatpush3.bf16.msra.mxu0 %v7313_v54  ;;  %v7351_v63 = vpack.c.bf16 %v858_v1, %v857_v0  ;;  %v7321_v16 = vpack.c.bf16 %v810_v6, %v809_v61  ;;  %v865_v54 = vld [vmem:[%s12644_s1 + $0x19e0] sm:$0xff]  ;;  %v835_v0 = vld [vmem:[%s12644_s1 + $0x18f0] sm:$0xff]  ;;  %v836_v1 = vld [vmem:[%s12644_s1 + $0x18f8] sm:$0xff] }
 0x187   :  { %7346 = vmatpush3.bf16.msra.mxu1 %v7345_v55  ;;  %7316 = vmatprep.subr.bf16.mxu0 %v7315_v57  ;;  %v866_v55 = vld [vmem:[%s12644_s1 + $0x19e8] sm:$0xff]  ;;  %v7333_v57 = vpack.c.bf16 %v816_v46, %v815_v44  ;;  %v7339_v10 = vpack.c.bf16 %v836_v1, %v835_v0  ;;  %v872_v44 = vld [vmem:[%s12644_s1 + $0x1a18] sm:$0xff]  ;;  %v903_v46 = vld [vmem:[%s12644_s1 + $0x1b10] sm:$0xff] }
 0x188   :  { %7348 = vmatprep.subr.bf16.mxu1 %v7347_v59  ;;  %3683 = vmatprep.mubr.f32.mxu0 %v1690_v33  ;;  %v818_v59 = vld [vmem:[%s12644_s1 + $0x1868] sm:$0xff]  ;;  %v7367_v11 = vpack.c.bf16 %v866_v55, %v865_v54  ;;  %v921_v54 = vld [vmem:[%s12644_s1 + $0x1ba0] sm:$0xff]  ;;  %v923_v0 = vld [vmem:[%s12644_s1 + $0x1bb0] sm:$0xff] }
 0x189   :  { %3753 = vmatprep.mubr.f32.mxu1 %v1691_v2  ;;  %v850_v33 = vld [vmem:[%s12644_s1 + $0x1968] sm:$0xff]  ;;  %v7337_v8 = vpack.c.bf16 %v818_v59, %v817_v58  ;;  %v7383_v58 = vpack.c.bf16 %v890_v62, %v889_v48  ;;  %v924_v1 = vld [vmem:[%s12644_s1 + $0x1bb8] sm:$0xff] }
 0x18a   :  { %7318 = vmatpush3.bf16.msra.mxu0 %v7317_v3  ;;  %v7369_v26 = vpack.c.bf16 %v850_v33, %v849_v51  ;;  %v922_v55 = vld [vmem:[%s12644_s1 + $0x1ba8] sm:$0xff]  ;;  %v905_v51 = vld [vmem:[%s12644_s1 + $0x1b20] sm:$0xff]  ;;  %v892_v33 = vld [vmem:[%s12644_s1 + $0x1ab8] sm:$0xff] }
 0x18b   :  { %7350 = vmatpush3.bf16.msra.mxu1 %v7349_v4  ;;  %7320 = vmatprep.subr.bf16.mxu0 %v7319_v5  ;;  %v867_v4 = vld [vmem:[%s12644_s1 + $0x19f0] sm:$0xff]  ;;  %v868_v5 = vld [vmem:[%s12644_s1 + $0x19f8] sm:$0xff]  ;;  %v874_v59 = vld [vmem:[%s12644_s1 + $0x1a28] sm:$0xff] }
 0x18c   :  { %7352 = vmatprep.subr.bf16.mxu1 %v7351_v63  ;;  %v28_v63 = vld [vmem:[%s12643_s0 + $0x68] sm:$0xff] }
 0x18d   :  { %v1692_v12 = vcombine.high %v28_v63, %v28_v63  ;;  %v10770_v35 = vrot.slane %v28_v63, %v8185_v13  ;;  %v908_v63 = vld [vmem:[%s12644_s1 + $0x1b38] sm:$0xff] }
 0x18e   :  { %7322 = vmatpush3.bf16.msra.mxu0 %v7321_v16  ;;  %v851_v16 = vld [vmem:[%s12644_s1 + $0x1970] sm:$0xff] }
 0x18f   :  { %7354 = vmatpush3.bf16.msra.mxu1 %v7353_v17  ;;  %7324 = vmatprep.subr.bf16.mxu0 %v7323_v18  ;;  %v7371_v18 = vpack.c.bf16 %v868_v5, %v867_v4  ;;  %v7373_v25 = vpack.c.bf16 %v852_v19, %v851_v16  ;;  %v10779_v37 = vrot.slane %v1692_v12, %v8185_v13  ;;  %v875_v5 = vld [vmem:[%s12644_s1 + $0x1a30] sm:$0xff]  ;;  %v878_v19 = vld [vmem:[%s12644_s1 + $0x1a48] sm:$0xff]  ;;  %v896_v12 = vld [vmem:[%s12644_s1 + $0x1ad8] sm:$0xff] }
 0x190   :  { %7356 = vmatprep.subr.bf16.mxu1 %v7355_v21  ;;  %v917_v21 = vld [vmem:[%s12644_s1 + $0x1b80] sm:$0xff]  ;;  %v1707_v39 = vcombine.high %v10770_v35, %v10770_v35 }
 0x192   :  { %7326 = vmatpush3.bf16.msra.mxu0 %v7325_v29  ;;  %v869_v29 = vld [vmem:[%s12644_s1 + $0x1a00] sm:$0xff] }
 0x193   :  { %7358 = vmatpush3.bf16.msra.mxu1 %v7357_v31  ;;  %7328 = vmatprep.subr.bf16.mxu0 %v7327_v30  ;;  %v870_v31 = vld [vmem:[%s12644_s1 + $0x1a08] sm:$0xff]  ;;  %v901_v30 = vld [vmem:[%s12644_s1 + $0x1b00] sm:$0xff] }
 0x194   :  { %7360 = vmatprep.subr.bf16.mxu1 %v7359_v42  ;;  %v888_v42 = vld [vmem:[%s12644_s1 + $0x1a98] sm:$0xff]  ;;  %v7377_v38 = vpack.c.bf16 %v870_v31, %v869_v29 }
 0x196   :  { %7330 = vmatpush3.bf16.msra.mxu0 %v7329_v40  ;;  %v7409_v40 = vpack.c.bf16 %v902_v34, %v901_v30  ;;  %v879_v30 = vld [vmem:[%s12644_s1 + $0x1a50] sm:$0xff] }
 0x197   :  { %7362 = vmatpush3.bf16.msra.mxu1 %v7361_v41  ;;  %7332 = vmatprep.subr.bf16.mxu0 %v7331_v43  ;;  %v7379_v41 = vpack.c.bf16 %v888_v42, %v887_v23  ;;  %v871_v43 = vld [vmem:[%s12644_s1 + $0x1a10] sm:$0xff]  ;;  %v912_v42 = vld [vmem:[%s12644_s1 + $0x1b58] sm:$0xff] }
 0x198   :  { %v5420_v60 = vpop.f32.mrb[10].mxu0  ;;  %7364 = vmatprep.subr.bf16.mxu1 %v7363_v36  ;;  %v904_v36 = vld [vmem:[%s12644_s1 + $0x1b18] sm:$0xff]  ;;  %v911_v34 = vld [vmem:[%s12644_s1 + $0x1b50] sm:$0xff] }
 0x199   :  { %v5455_v2 = vpop.f32.mrb[10].mxu1  ;;  %v5421_v3 = vpop.f32.mrb[11].mxu0 }
 0x19a   :  { %v5422_v61 = vadd.f32 %v5421_v3, %v5420_v60  ;;  %v5456_v6 = vpop.f32.mrb[11].mxu1  ;;  %7334 = vmatpush3.bf16.msra.mxu0 %v7333_v57  ;;  %v1708_v57 = vcombine.high %v10779_v37, %v10779_v37  ;;  %v906_v60 = vld [vmem:[%s12644_s1 + $0x1b28] sm:$0xff] }
 0x19b   :  { %v5457_v7 = vadd.f32 %v5456_v6, %v5455_v2  ;;  %7366 = vmatpush3.bf16.msra.mxu1 %v7365_v56  ;;  %7336 = vmatprep.subr.bf16.mxu0 %v7335_v45  ;;  %v7381_v56 = vpack.c.bf16 %v872_v44, %v871_v43  ;;  %v7413_v45 = vpack.c.bf16 %v904_v36, %v903_v46  ;;  %v907_v6 = vld [vmem:[%s12644_s1 + $0x1b30] sm:$0xff]  ;;  %v881_v46 = vld [vmem:[%s12644_s1 + $0x1a60] sm:$0xff] }
 0x19c   :  { %v2706_v17 = vadd.f32 %v5422_v61, %v10539_v52  ;;  %7368 = vmatprep.subr.bf16.mxu1 %v7367_v11  ;;  %v918_v52 = vld [vmem:[%s12644_s1 + $0x1b88] sm:$0xff]  ;;  %v891_v11 = vld [vmem:[%s12644_s1 + $0x1ab0] sm:$0xff]  ;;  %v7417_v3 = vpack.c.bf16 %v906_v60, %v905_v51  ;;  %v876_v61 = vld [vmem:[%s12644_s1 + $0x1a38] sm:$0xff]  ;;  %v7421_v16 = vpack.c.bf16 %v908_v63, %v907_v6  ;;  %v7429_v43 = vpack.c.bf16 %v912_v42, %v911_v34 }
 0x19d   :  { %v7407_v32 = vpack.c.bf16 %v918_v52, %v917_v21  ;;  %v7387_v4 = vpack.c.bf16 %v892_v33, %v891_v11  ;;  %v7389_v14 = vpack.c.bf16 %v876_v61, %v875_v5  ;;  %v910_v21 = vld [vmem:[%s12644_s1 + $0x1b48] sm:$0xff]  ;;  %v895_v52 = vld [vmem:[%s12644_s1 + $0x1ad0] sm:$0xff]  ;;  %v7399_v44 = vpack.c.bf16 %v898_v27, %v897_v50  ;;  %v913_v36 = vld [vmem:[%s12644_s1 + $0x1b60] sm:$0xff] }
 0x19e   :  { %v10749_v22 = vadd.f32 %v5457_v7, %v2706_v17  ;;  %7338 = vmatpush3.bf16.msra.mxu0 %v7337_v8  ;;  %v7419_v8 = vpack.c.bf16 %v924_v1, %v923_v0  ;;  %v893_v7 = vld [vmem:[%s12644_s1 + $0x1ac0] sm:$0xff]  ;;  %v7425_v29 = vpack.c.bf16 %v910_v21, %v909_v9  ;;  %v7395_v31 = vpack.c.bf16 %v896_v12, %v895_v52  ;;  %v883_v0 = vld [vmem:[%s12644_s1 + $0x1a70] sm:$0xff]  ;;  %v884_v1 = vld [vmem:[%s12644_s1 + $0x1a78] sm:$0xff] }
 0x19f   :  { %7370 = vmatpush3.bf16.msra.mxu1 %v7369_v26  ;;  %7340 = vmatprep.subr.bf16.mxu0 %v7339_v10  ;;  %v894_v26 = vld [vmem:[%s12644_s1 + $0x1ac8] sm:$0xff]  ;;  %v925_v10 = vld [vmem:[%s12644_s1 + $0x1bc0] sm:$0xff]  ;;  %v916_v5 = vld [vmem:[%s12644_s1 + $0x1b78] sm:$0xff] }
 0x1a0   :  { %7372 = vmatprep.subr.bf16.mxu1 %v7371_v18  ;;  %v7391_v17 = vpack.c.bf16 %v894_v26, %v893_v7  ;;  %v877_v18 = vld [vmem:[%s12644_s1 + $0x1a40] sm:$0xff]  ;;  %v7423_v20 = vpack.c.bf16 %v926_v15, %v925_v10  ;;  %v950_v6 = vld [vmem:[%s12644_s1 + $0x1c88] sm:$0xff]  ;;  %v7405_v26 = vpack.c.bf16 %v884_v1, %v883_v0  ;;  %v951_v9 = vld [vmem:[%s12644_s1 + $0x1c90] sm:$0xff] }
 0x1a1   :  { %v949_v61 = vld [vmem:[%s12644_s1 + $0x1c80] sm:$0xff]  ;;  %v983_v52 = vld [vmem:[%s12644_s1 + $0x1d90] sm:$0xff]  ;;  %v984_v12 = vld [vmem:[%s12644_s1 + $0x1d98] sm:$0xff] }
 0x1a2   :  { %7342 = vmatpush3.bf16.msra.mxu0 %v7341_v24  ;;  %v927_v24 = vld [vmem:[%s12644_s1 + $0x1bd0] sm:$0xff]  ;;  %v7439_v15 = vpack.c.bf16 %v950_v6, %v949_v61  ;;  %v7475_v34 = vpack.c.bf16 %v984_v12, %v983_v52  ;;  %v953_v42 = vld [vmem:[%s12644_s1 + $0x1ca0] sm:$0xff]  ;;  %v954_v50 = vld [vmem:[%s12644_s1 + $0x1ca8] sm:$0xff] }
 0x1a3   :  { %7374 = vmatpush3.bf16.msra.mxu1 %v7373_v25  ;;  %7376 = vmatprep.subr.bf16.mxu0 %v7375_v28  ;;  %v928_v25 = vld [vmem:[%s12644_s1 + $0x1bd8] sm:$0xff]  ;;  %v7393_v28 = vpack.c.bf16 %v878_v19, %v877_v18  ;;  %v966_v19 = vld [vmem:[%s12644_s1 + $0x1d08] sm:$0xff]  ;;  %v973_v61 = vld [vmem:[%s12644_s1 + $0x1d40] sm:$0xff] }
 0x1a4   :  { %7408 = vmatprep.subr.bf16.mxu1 %v7407_v32  ;;  %v880_v32 = vld [vmem:[%s12644_s1 + $0x1a58] sm:$0xff]  ;;  %v7427_v23 = vpack.c.bf16 %v928_v25, %v927_v24  ;;  %v990_v0 = vld [vmem:[%s12644_s1 + $0x1dc8] sm:$0xff]  ;;  %v961_v52 = vld [vmem:[%s12644_s1 + $0x1ce0] sm:$0xff] }
 0x1a5   :  { %3684 = vmatmul.mubr.f32.vlgmr.msra.gmra.mrb[24].mxu0 %v10560_v49  ;;  %v873_v49 = vld [vmem:[%s12644_s1 + $0x1a20] sm:$0xff]  ;;  %v962_v12 = vld [vmem:[%s12644_s1 + $0x1ce8] sm:$0xff] }
 0x1a6   :  { %3754 = vmatmul.mubr.f32.vlgmr.msra.gmra.mrb[24].mxu1 %v10569_v53  ;;  %7378 = vmatpush3.bf16.msra.mxu0 %v7377_v38  ;;  %v7415_v53 = vpack.c.bf16 %v922_v55, %v921_v54  ;;  %v7385_v2 = vpack.c.bf16 %v874_v59, %v873_v49  ;;  %v929_v38 = vld [vmem:[%s12644_s1 + $0x1be0] sm:$0xff]  ;;  %v899_v54 = vld [vmem:[%s12644_s1 + $0x1af0] sm:$0xff]  ;;  %v900_v55 = vld [vmem:[%s12644_s1 + $0x1af8] sm:$0xff] }
 0x1a7   :  { %7410 = vmatpush3.bf16.msra.mxu1 %v7409_v40  ;;  %7380 = vmatprep.subr.bf16.mxu0 %v7379_v41  ;;  %v930_v40 = vld [vmem:[%s12644_s1 + $0x1be8] sm:$0xff]  ;;  %v7397_v41 = vpack.c.bf16 %v880_v32, %v879_v30  ;;  %v7403_v33 = vpack.c.bf16 %v900_v55, %v899_v54  ;;  %v936_v30 = vld [vmem:[%s12644_s1 + $0x1c18] sm:$0xff]  ;;  %v967_v32 = vld [vmem:[%s12644_s1 + $0x1d10] sm:$0xff] }
 0x1a8   :  { %7412 = vmatprep.subr.bf16.mxu1 %v7411_v47  ;;  %3823 = vmatprep.mubr.f32.mxu0 %v1707_v39  ;;  %v882_v47 = vld [vmem:[%s12644_s1 + $0x1a68] sm:$0xff]  ;;  %v7431_v62 = vpack.c.bf16 %v930_v40, %v929_v38  ;;  %v985_v38 = vld [vmem:[%s12644_s1 + $0x1da0] sm:$0xff]  ;;  %v987_v54 = vld [vmem:[%s12644_s1 + $0x1db0] sm:$0xff] }
 0x1a9   :  { %3893 = vmatprep.mubr.f32.mxu1 %v1708_v57  ;;  %v914_v39 = vld [vmem:[%s12644_s1 + $0x1b68] sm:$0xff]  ;;  %v7401_v51 = vpack.c.bf16 %v882_v47, %v881_v46  ;;  %v7447_v46 = vpack.c.bf16 %v954_v50, %v953_v42  ;;  %v988_v55 = vld [vmem:[%s12644_s1 + $0x1db8] sm:$0xff] }
 0x1aa   :  { %7382 = vmatpush3.bf16.msra.mxu0 %v7381_v56  ;;  %v7433_v11 = vpack.c.bf16 %v914_v39, %v913_v36  ;;  %v986_v40 = vld [vmem:[%s12644_s1 + $0x1da8] sm:$0xff]  ;;  %v969_v36 = vld [vmem:[%s12644_s1 + $0x1d20] sm:$0xff]  ;;  %v956_v39 = vld [vmem:[%s12644_s1 + $0x1cb8] sm:$0xff] }
 0x1ab   :  { %7414 = vmatpush3.bf16.msra.mxu1 %v7413_v45  ;;  %7384 = vmatprep.subr.bf16.mxu0 %v7383_v58  ;;  %v931_v45 = vld [vmem:[%s12644_s1 + $0x1bf0] sm:$0xff]  ;;  %v932_v58 = vld [vmem:[%s12644_s1 + $0x1bf8] sm:$0xff]  ;;  %v938_v47 = vld [vmem:[%s12644_s1 + $0x1c28] sm:$0xff] }
 0x1ac   :  { %7416 = vmatprep.subr.bf16.mxu1 %v7415_v53  ;;  %v29_v53 = vld [vmem:[%s12643_s0 + $0x70] sm:$0xff] }
 0x1ad   :  { %v1709_v63 = vcombine.high %v29_v53, %v29_v53  ;;  %v10980_v21 = vrot.slane %v29_v53, %v8185_v13  ;;  %v972_v53 = vld [vmem:[%s12644_s1 + $0x1d38] sm:$0xff] }
 0x1ae   :  { %7386 = vmatpush3.bf16.msra.mxu0 %v7385_v2  ;;  %v915_v2 = vld [vmem:[%s12644_s1 + $0x1b70] sm:$0xff] }
 0x1af   :  { %7418 = vmatpush3.bf16.msra.mxu1 %v7417_v3  ;;  %7388 = vmatprep.subr.bf16.mxu0 %v7387_v4  ;;  %v7435_v4 = vpack.c.bf16 %v932_v58, %v931_v45  ;;  %v7437_v10 = vpack.c.bf16 %v916_v5, %v915_v2  ;;  %v10989_v24 = vrot.slane %v1709_v63, %v8185_v13  ;;  %v939_v58 = vld [vmem:[%s12644_s1 + $0x1c30] sm:$0xff]  ;;  %v942_v5 = vld [vmem:[%s12644_s1 + $0x1c48] sm:$0xff]  ;;  %v960_v63 = vld [vmem:[%s12644_s1 + $0x1cd8] sm:$0xff] }
 0x1b0   :  { %7420 = vmatprep.subr.bf16.mxu1 %v7419_v8  ;;  %v981_v8 = vld [vmem:[%s12644_s1 + $0x1d80] sm:$0xff]  ;;  %v1724_v27 = vcombine.high %v10980_v21, %v10980_v21 }
 0x1b2   :  { %7390 = vmatpush3.bf16.msra.mxu0 %v7389_v14  ;;  %v933_v14 = vld [vmem:[%s12644_s1 + $0x1c00] sm:$0xff] }
 0x1b3   :  { %7422 = vmatpush3.bf16.msra.mxu1 %v7421_v16  ;;  %7392 = vmatprep.subr.bf16.mxu0 %v7391_v17  ;;  %v934_v16 = vld [vmem:[%s12644_s1 + $0x1c08] sm:$0xff]  ;;  %v965_v17 = vld [vmem:[%s12644_s1 + $0x1d00] sm:$0xff] }
 0x1b4   :  { %7424 = vmatprep.subr.bf16.mxu1 %v7423_v20  ;;  %v952_v20 = vld [vmem:[%s12644_s1 + $0x1c98] sm:$0xff]  ;;  %v7441_v25 = vpack.c.bf16 %v934_v16, %v933_v14 }
 0x1b6   :  { %7394 = vmatpush3.bf16.msra.mxu0 %v7393_v28  ;;  %v7473_v28 = vpack.c.bf16 %v966_v19, %v965_v17  ;;  %v943_v17 = vld [vmem:[%s12644_s1 + $0x1c50] sm:$0xff] }
 0x1b7   :  { %7426 = vmatpush3.bf16.msra.mxu1 %v7425_v29  ;;  %7396 = vmatprep.subr.bf16.mxu0 %v7395_v31  ;;  %v7443_v29 = vpack.c.bf16 %v952_v20, %v951_v9  ;;  %v935_v31 = vld [vmem:[%s12644_s1 + $0x1c10] sm:$0xff]  ;;  %v976_v20 = vld [vmem:[%s12644_s1 + $0x1d58] sm:$0xff] }
 0x1b8   :  { %v5490_v48 = vpop.f32.mrb[12].mxu0  ;;  %7428 = vmatprep.subr.bf16.mxu1 %v7427_v23  ;;  %v968_v23 = vld [vmem:[%s12644_s1 + $0x1d18] sm:$0xff]  ;;  %v975_v19 = vld [vmem:[%s12644_s1 + $0x1d50] sm:$0xff] }
 0x1b9   :  { %v5525_v57 = vpop.f32.mrb[12].mxu1  ;;  %v5491_v56 = vpop.f32.mrb[13].mxu0 }
 0x1ba   :  { %v5492_v49 = vadd.f32 %v5491_v56, %v5490_v48  ;;  %v5526_v59 = vpop.f32.mrb[13].mxu1  ;;  %7398 = vmatpush3.bf16.msra.mxu0 %v7397_v41  ;;  %v1725_v41 = vcombine.high %v10989_v24, %v10989_v24  ;;  %v970_v48 = vld [vmem:[%s12644_s1 + $0x1d28] sm:$0xff] }
 0x1bb   :  { %v5527_v60 = vadd.f32 %v5526_v59, %v5525_v57  ;;  %7430 = vmatpush3.bf16.msra.mxu1 %v7429_v43  ;;  %7400 = vmatprep.subr.bf16.mxu0 %v7399_v44  ;;  %v7445_v43 = vpack.c.bf16 %v936_v30, %v935_v31  ;;  %v7477_v44 = vpack.c.bf16 %v968_v23, %v967_v32  ;;  %v971_v59 = vld [vmem:[%s12644_s1 + $0x1d30] sm:$0xff]  ;;  %v945_v32 = vld [vmem:[%s12644_s1 + $0x1c60] sm:$0xff] }
 0x1bc   :  { %v2846_v3 = vadd.f32 %v5492_v49, %v10749_v22  ;;  %7432 = vmatprep.subr.bf16.mxu1 %v7431_v62  ;;  %v982_v22 = vld [vmem:[%s12644_s1 + $0x1d88] sm:$0xff]  ;;  %v955_v62 = vld [vmem:[%s12644_s1 + $0x1cb0] sm:$0xff]  ;;  %v7481_v56 = vpack.c.bf16 %v970_v48, %v969_v36  ;;  %v940_v49 = vld [vmem:[%s12644_s1 + $0x1c38] sm:$0xff]  ;;  %v7485_v2 = vpack.c.bf16 %v972_v53, %v971_v59  ;;  %v7493_v31 = vpack.c.bf16 %v976_v20, %v975_v19 }
 0x1bd   :  { %v7471_v18 = vpack.c.bf16 %v982_v22, %v981_v8  ;;  %v7451_v45 = vpack.c.bf16 %v956_v39, %v955_v62  ;;  %v7453_v1 = vpack.c.bf16 %v940_v49, %v939_v58  ;;  %v974_v8 = vld [vmem:[%s12644_s1 + $0x1d48] sm:$0xff]  ;;  %v959_v22 = vld [vmem:[%s12644_s1 + $0x1cd0] sm:$0xff]  ;;  %v7463_v30 = vpack.c.bf16 %v962_v12, %v961_v52  ;;  %v977_v23 = vld [vmem:[%s12644_s1 + $0x1d60] sm:$0xff] }
 0x1be   :  { %v10959_v7 = vadd.f32 %v5527_v60, %v2846_v3  ;;  %7402 = vmatpush3.bf16.msra.mxu0 %v7401_v51  ;;  %v7483_v51 = vpack.c.bf16 %v988_v55, %v987_v54  ;;  %v957_v60 = vld [vmem:[%s12644_s1 + $0x1cc0] sm:$0xff]  ;;  %v7489_v14 = vpack.c.bf16 %v974_v8, %v973_v61  ;;  %v7459_v16 = vpack.c.bf16 %v960_v63, %v959_v22  ;;  %v947_v54 = vld [vmem:[%s12644_s1 + $0x1c70] sm:$0xff]  ;;  %v948_v55 = vld [vmem:[%s12644_s1 + $0x1c78] sm:$0xff] }
 0x1bf   :  { %7434 = vmatpush3.bf16.msra.mxu1 %v7433_v11  ;;  %7404 = vmatprep.subr.bf16.mxu0 %v7403_v33  ;;  %v958_v11 = vld [vmem:[%s12644_s1 + $0x1cc8] sm:$0xff]  ;;  %v989_v33 = vld [vmem:[%s12644_s1 + $0x1dc0] sm:$0xff]  ;;  %v980_v58 = vld [vmem:[%s12644_s1 + $0x1d78] sm:$0xff] }
 0x1c0   :  { %7436 = vmatprep.subr.bf16.mxu1 %v7435_v4  ;;  %v7455_v3 = vpack.c.bf16 %v958_v11, %v957_v60  ;;  %v941_v4 = vld [vmem:[%s12644_s1 + $0x1c40] sm:$0xff]  ;;  %v7487_v6 = vpack.c.bf16 %v990_v0, %v989_v33  ;;  %v1014_v59 = vld [vmem:[%s12644_s1 + $0x1e88] sm:$0xff]  ;;  %v7469_v11 = vpack.c.bf16 %v948_v55, %v947_v54  ;;  %v1015_v61 = vld [vmem:[%s12644_s1 + $0x1e90] sm:$0xff] }
 0x1c1   :  { %v1013_v49 = vld [vmem:[%s12644_s1 + $0x1e80] sm:$0xff]  ;;  %v1047_v22 = vld [vmem:[%s12644_s1 + $0x1f90] sm:$0xff]  ;;  %v1048_v63 = vld [vmem:[%s12644_s1 + $0x1f98] sm:$0xff] }
 0x1c2   :  { %7406 = vmatpush3.bf16.msra.mxu0 %v7405_v26  ;;  %v991_v26 = vld [vmem:[%s12644_s1 + $0x1dd0] sm:$0xff]  ;;  %v7503_v0 = vpack.c.bf16 %v1014_v59, %v1013_v49  ;;  %v7539_v19 = vpack.c.bf16 %v1048_v63, %v1047_v22  ;;  %v1017_v20 = vld [vmem:[%s12644_s1 + $0x1ea0] sm:$0xff]  ;;  %v1018_v52 = vld [vmem:[%s12644_s1 + $0x1ea8] sm:$0xff] }
 0x1c3   :  { %7438 = vmatpush3.bf16.msra.mxu1 %v7437_v10  ;;  %7440 = vmatprep.subr.bf16.mxu0 %v7439_v15  ;;  %v992_v10 = vld [vmem:[%s12644_s1 + $0x1dd8] sm:$0xff]  ;;  %v7457_v15 = vpack.c.bf16 %v942_v5, %v941_v4  ;;  %v1030_v5 = vld [vmem:[%s12644_s1 + $0x1f08] sm:$0xff]  ;;  %v1037_v49 = vld [vmem:[%s12644_s1 + $0x1f40] sm:$0xff] }
 0x1c4   :  { %7472 = vmatprep.subr.bf16.mxu1 %v7471_v18  ;;  %v944_v18 = vld [vmem:[%s12644_s1 + $0x1c58] sm:$0xff]  ;;  %v7491_v9 = vpack.c.bf16 %v992_v10, %v991_v26  ;;  %v1054_v54 = vld [vmem:[%s12644_s1 + $0x1fc8] sm:$0xff]  ;;  %v1025_v22 = vld [vmem:[%s12644_s1 + $0x1ee0] sm:$0xff] }
 0x1c5   :  { %3824 = vmatmul.mubr.f32.vlgmr.msra.gmra.mrb[26].mxu0 %v10770_v35  ;;  %v937_v35 = vld [vmem:[%s12644_s1 + $0x1c20] sm:$0xff]  ;;  %v1026_v63 = vld [vmem:[%s12644_s1 + $0x1ee8] sm:$0xff] }
 0x1c6   :  { %3894 = vmatmul.mubr.f32.vlgmr.msra.gmra.mrb[26].mxu1 %v10779_v37  ;;  %7442 = vmatpush3.bf16.msra.mxu0 %v7441_v25  ;;  %v7479_v37 = vpack.c.bf16 %v986_v40, %v985_v38  ;;  %v7449_v57 = vpack.c.bf16 %v938_v47, %v937_v35  ;;  %v993_v25 = vld [vmem:[%s12644_s1 + $0x1de0] sm:$0xff]  ;;  %v963_v38 = vld [vmem:[%s12644_s1 + $0x1cf0] sm:$0xff]  ;;  %v964_v40 = vld [vmem:[%s12644_s1 + $0x1cf8] sm:$0xff] }
 0x1c7   :  { %7474 = vmatpush3.bf16.msra.mxu1 %v7473_v28  ;;  %7444 = vmatprep.subr.bf16.mxu0 %v7443_v29  ;;  %v994_v28 = vld [vmem:[%s12644_s1 + $0x1de8] sm:$0xff]  ;;  %v7461_v29 = vpack.c.bf16 %v944_v18, %v943_v17  ;;  %v7467_v39 = vpack.c.bf16 %v964_v40, %v963_v38  ;;  %v1000_v17 = vld [vmem:[%s12644_s1 + $0x1e18] sm:$0xff]  ;;  %v1031_v18 = vld [vmem:[%s12644_s1 + $0x1f10] sm:$0xff] }
 0x1c8   :  { %7476 = vmatprep.subr.bf16.mxu1 %v7475_v34  ;;  %3963 = vmatprep.mubr.f32.mxu0 %v1724_v27  ;;  %v946_v34 = vld [vmem:[%s12644_s1 + $0x1c68] sm:$0xff]  ;;  %v7495_v50 = vpack.c.bf16 %v994_v28, %v993_v25  ;;  %v1049_v25 = vld [vmem:[%s12644_s1 + $0x1fa0] sm:$0xff]  ;;  %v1051_v38 = vld [vmem:[%s12644_s1 + $0x1fb0] sm:$0xff] }
 0x1c9   :  { %4033 = vmatprep.mubr.f32.mxu1 %v1725_v41  ;;  %v978_v27 = vld [vmem:[%s12644_s1 + $0x1d68] sm:$0xff]  ;;  %v7465_v36 = vpack.c.bf16 %v946_v34, %v945_v32  ;;  %v7511_v32 = vpack.c.bf16 %v1018_v52, %v1017_v20  ;;  %v1052_v40 = vld [vmem:[%s12644_s1 + $0x1fb8] sm:$0xff] }
 0x1ca   :  { %7446 = vmatpush3.bf16.msra.mxu0 %v7445_v43  ;;  %v7497_v62 = vpack.c.bf16 %v978_v27, %v977_v23  ;;  %v1050_v28 = vld [vmem:[%s12644_s1 + $0x1fa8] sm:$0xff]  ;;  %v1033_v23 = vld [vmem:[%s12644_s1 + $0x1f20] sm:$0xff]  ;;  %v1020_v27 = vld [vmem:[%s12644_s1 + $0x1eb8] sm:$0xff] }
 0x1cb   :  { %7478 = vmatpush3.bf16.msra.mxu1 %v7477_v44  ;;  %7448 = vmatprep.subr.bf16.mxu0 %v7447_v46  ;;  %v995_v44 = vld [vmem:[%s12644_s1 + $0x1df0] sm:$0xff]  ;;  %v996_v46 = vld [vmem:[%s12644_s1 + $0x1df8] sm:$0xff]  ;;  %v1002_v34 = vld [vmem:[%s12644_s1 + $0x1e28] sm:$0xff] }
 0x1cc   :  { %7480 = vmatprep.subr.bf16.mxu1 %v7479_v37  ;;  %v30_v37 = vld [vmem:[%s12643_s0 + $0x78] sm:$0xff] }
 0x1cd   :  { %v1726_v53 = vcombine.high %v30_v37, %v30_v37  ;;  %v11190_v8 = vrot.slane %v30_v37, %v8185_v13  ;;  %v1036_v37 = vld [vmem:[%s12644_s1 + $0x1f38] sm:$0xff] }
 0x1ce   :  { %7450 = vmatpush3.bf16.msra.mxu0 %v7449_v57  ;;  %v979_v57 = vld [vmem:[%s12644_s1 + $0x1d70] sm:$0xff] }
 0x1cf   :  { %7482 = vmatpush3.bf16.msra.mxu1 %v7481_v56  ;;  %7452 = vmatprep.subr.bf16.mxu0 %v7451_v45  ;;  %v7499_v45 = vpack.c.bf16 %v996_v46, %v995_v44  ;;  %v7501_v33 = vpack.c.bf16 %v980_v58, %v979_v57  ;;  %v11199_v26 = vrot.slane %v1726_v53, %v8185_v13  ;;  %v1003_v46 = vld [vmem:[%s12644_s1 + $0x1e30] sm:$0xff]  ;;  %v1006_v58 = vld [vmem:[%s12644_s1 + $0x1e48] sm:$0xff]  ;;  %v1024_v53 = vld [vmem:[%s12644_s1 + $0x1ed8] sm:$0xff] }
 0x1d0   :  { %7484 = vmatprep.subr.bf16.mxu1 %v7483_v51  ;;  %v1045_v51 = vld [vmem:[%s12644_s1 + $0x1f80] sm:$0xff]  ;;  %v1741_v12 = vcombine.high %v11190_v8, %v11190_v8 }
 0x1d2   :  { %7454 = vmatpush3.bf16.msra.mxu0 %v7453_v1  ;;  %v997_v1 = vld [vmem:[%s12644_s1 + $0x1e00] sm:$0xff] }
 0x1d3   :  { %7486 = vmatpush3.bf16.msra.mxu1 %v7485_v2  ;;  %7456 = vmatprep.subr.bf16.mxu0 %v7455_v3  ;;  %v998_v2 = vld [vmem:[%s12644_s1 + $0x1e08] sm:$0xff]  ;;  %v1029_v3 = vld [vmem:[%s12644_s1 + $0x1f00] sm:$0xff] }
 0x1d4   :  { %7488 = vmatprep.subr.bf16.mxu1 %v7487_v6  ;;  %v1016_v6 = vld [vmem:[%s12644_s1 + $0x1e98] sm:$0xff]  ;;  %v7505_v10 = vpack.c.bf16 %v998_v2, %v997_v1 }
 0x1d6   :  { %7458 = vmatpush3.bf16.msra.mxu0 %v7457_v15  ;;  %v7537_v15 = vpack.c.bf16 %v1030_v5, %v1029_v3  ;;  %v1007_v3 = vld [vmem:[%s12644_s1 + $0x1e50] sm:$0xff] }
 0x1d7   :  { %7490 = vmatpush3.bf16.msra.mxu1 %v7489_v14  ;;  %7460 = vmatprep.subr.bf16.mxu0 %v7459_v16  ;;  %v7507_v14 = vpack.c.bf16 %v1016_v6, %v1015_v61  ;;  %v999_v16 = vld [vmem:[%s12644_s1 + $0x1e10] sm:$0xff]  ;;  %v1040_v6 = vld [vmem:[%s12644_s1 + $0x1f58] sm:$0xff] }
 0x1d8   :  { %v5560_v42 = vpop.f32.mrb[14].mxu0  ;;  %7492 = vmatprep.subr.bf16.mxu1 %v7491_v9  ;;  %v1032_v9 = vld [vmem:[%s12644_s1 + $0x1f18] sm:$0xff]  ;;  %v1039_v5 = vld [vmem:[%s12644_s1 + $0x1f50] sm:$0xff] }
 0x1d9   :  { %v5595_v41 = vpop.f32.mrb[14].mxu1  ;;  %v5561_v43 = vpop.f32.mrb[15].mxu0 }
 0x1da   :  { %v5562_v35 = vadd.f32 %v5561_v43, %v5560_v42  ;;  %v5596_v47 = vpop.f32.mrb[15].mxu1  ;;  %7462 = vmatpush3.bf16.msra.mxu0 %v7461_v29  ;;  %v1742_v29 = vcombine.high %v11199_v26, %v11199_v26  ;;  %v1034_v42 = vld [vmem:[%s12644_s1 + $0x1f28] sm:$0xff] }
 0x1db   :  { %v5597_v48 = vadd.f32 %v5596_v47, %v5595_v41  ;;  %7494 = vmatpush3.bf16.msra.mxu1 %v7493_v31  ;;  %7464 = vmatprep.subr.bf16.mxu0 %v7463_v30  ;;  %v7509_v31 = vpack.c.bf16 %v1000_v17, %v999_v16  ;;  %v7541_v30 = vpack.c.bf16 %v1032_v9, %v1031_v18  ;;  %v1035_v47 = vld [vmem:[%s12644_s1 + $0x1f30] sm:$0xff]  ;;  %v1009_v18 = vld [vmem:[%s12644_s1 + $0x1e60] sm:$0xff] }
 0x1dc   :  { %v2986_v56 = vadd.f32 %v5562_v35, %v10959_v7  ;;  %7496 = vmatprep.subr.bf16.mxu1 %v7495_v50  ;;  %v1046_v7 = vld [vmem:[%s12644_s1 + $0x1f88] sm:$0xff]  ;;  %v1019_v50 = vld [vmem:[%s12644_s1 + $0x1eb0] sm:$0xff]  ;;  %v7545_v43 = vpack.c.bf16 %v1034_v42, %v1033_v23  ;;  %v1004_v35 = vld [vmem:[%s12644_s1 + $0x1e38] sm:$0xff]  ;;  %v7549_v57 = vpack.c.bf16 %v1036_v37, %v1035_v47  ;;  %v7557_v16 = vpack.c.bf16 %v1040_v6, %v1039_v5 }
 0x1dd   :  { %v7535_v4 = vpack.c.bf16 %v1046_v7, %v1045_v51  ;;  %v7515_v44 = vpack.c.bf16 %v1020_v27, %v1019_v50  ;;  %v7517_v55 = vpack.c.bf16 %v1004_v35, %v1003_v46  ;;  %v1038_v51 = vld [vmem:[%s12644_s1 + $0x1f48] sm:$0xff]  ;;  %v1023_v7 = vld [vmem:[%s12644_s1 + $0x1ed0] sm:$0xff]  ;;  %v7527_v17 = vpack.c.bf16 %v1026_v63, %v1025_v22  ;;  %v1041_v9 = vld [vmem:[%s12644_s1 + $0x1f60] sm:$0xff] }
 0x1de   :  { %v11169_v60 = vadd.f32 %v5597_v48, %v2986_v56  ;;  %7466 = vmatpush3.bf16.msra.mxu0 %v7465_v36  ;;  %v7547_v36 = vpack.c.bf16 %v1052_v40, %v1051_v38  ;;  %v1021_v48 = vld [vmem:[%s12644_s1 + $0x1ec0] sm:$0xff]  ;;  %v7553_v1 = vpack.c.bf16 %v1038_v51, %v1037_v49  ;;  %v7523_v2 = vpack.c.bf16 %v1024_v53, %v1023_v7  ;;  %v1011_v38 = vld [vmem:[%s12644_s1 + $0x1e70] sm:$0xff]  ;;  %v1012_v40 = vld [vmem:[%s12644_s1 + $0x1e78] sm:$0xff] }
 0x1df   :  { %7498 = vmatpush3.bf16.msra.mxu1 %v7497_v62  ;;  %7468 = vmatprep.subr.bf16.mxu0 %v7467_v39  ;;  %v1022_v62 = vld [vmem:[%s12644_s1 + $0x1ec8] sm:$0xff]  ;;  %v1053_v39 = vld [vmem:[%s12644_s1 + $0x1fc0] sm:$0xff]  ;;  %v1044_v46 = vld [vmem:[%s12644_s1 + $0x1f78] sm:$0xff] }
 0x1e0   :  { %7500 = vmatprep.subr.bf16.mxu1 %v7499_v45  ;;  %v7519_v56 = vpack.c.bf16 %v1022_v62, %v1021_v48  ;;  %v1005_v45 = vld [vmem:[%s12644_s1 + $0x1e40] sm:$0xff]  ;;  %v7551_v59 = vpack.c.bf16 %v1054_v54, %v1053_v39  ;;  %v1078_v47 = vld [vmem:[%s12644_s1 + $0x2088] sm:$0xff]  ;;  %v7533_v62 = vpack.c.bf16 %v1012_v40, %v1011_v38  ;;  %v1079_v49 = vld [vmem:[%s12644_s1 + $0x2090] sm:$0xff] }
 0x1e1   :  { %v1077_v35 = vld [vmem:[%s12644_s1 + $0x2080] sm:$0xff]  ;;  %v1111_v7 = vld [vmem:[%s12644_s1 + $0x2190] sm:$0xff]  ;;  %v1112_v53 = vld [vmem:[%s12644_s1 + $0x2198] sm:$0xff] }
 0x1e2   :  { %7470 = vmatpush3.bf16.msra.mxu0 %v7469_v11  ;;  %v1055_v11 = vld [vmem:[%s12644_s1 + $0x1fd0] sm:$0xff]  ;;  %v7567_v54 = vpack.c.bf16 %v1078_v47, %v1077_v35  ;;  %v7603_v5 = vpack.c.bf16 %v1112_v53, %v1111_v7  ;;  %v1081_v6 = vld [vmem:[%s12644_s1 + $0x20a0] sm:$0xff]  ;;  %v1082_v22 = vld [vmem:[%s12644_s1 + $0x20a8] sm:$0xff] }
 0x1e3   :  { %7502 = vmatpush3.bf16.msra.mxu1 %v7501_v33  ;;  %7504 = vmatprep.subr.bf16.mxu0 %v7503_v0  ;;  %v1056_v33 = vld [vmem:[%s12644_s1 + $0x1fd8] sm:$0xff]  ;;  %v7521_v0 = vpack.c.bf16 %v1006_v58, %v1005_v45  ;;  %v1094_v58 = vld [vmem:[%s12644_s1 + $0x2108] sm:$0xff]  ;;  %v1101_v35 = vld [vmem:[%s12644_s1 + $0x2140] sm:$0xff] }
 0x1e4   :  { %7536 = vmatprep.subr.bf16.mxu1 %v7535_v4  ;;  %v1008_v4 = vld [vmem:[%s12644_s1 + $0x1e58] sm:$0xff]  ;;  %v7555_v61 = vpack.c.bf16 %v1056_v33, %v1055_v11  ;;  %v1118_v38 = vld [vmem:[%s12644_s1 + $0x21c8] sm:$0xff]  ;;  %v1089_v7 = vld [vmem:[%s12644_s1 + $0x20e0] sm:$0xff] }
 0x1e5   :  { %3964 = vmatmul.mubr.f32.vlgmr.msra.gmra.mrb[28].mxu0 %v10980_v21  ;;  %v1001_v21 = vld [vmem:[%s12644_s1 + $0x1e20] sm:$0xff]  ;;  %v1090_v53 = vld [vmem:[%s12644_s1 + $0x20e8] sm:$0xff] }
 0x1e6   :  { %4034 = vmatmul.mubr.f32.vlgmr.msra.gmra.mrb[28].mxu1 %v10989_v24  ;;  %7506 = vmatpush3.bf16.msra.mxu0 %v7505_v10  ;;  %v7543_v24 = vpack.c.bf16 %v1050_v28, %v1049_v25  ;;  %v7513_v41 = vpack.c.bf16 %v1002_v34, %v1001_v21  ;;  %v1057_v10 = vld [vmem:[%s12644_s1 + $0x1fe0] sm:$0xff]  ;;  %v1027_v25 = vld [vmem:[%s12644_s1 + $0x1ef0] sm:$0xff]  ;;  %v1028_v28 = vld [vmem:[%s12644_s1 + $0x1ef8] sm:$0xff] }
 0x1e7   :  { %7538 = vmatpush3.bf16.msra.mxu1 %v7537_v15  ;;  %7508 = vmatprep.subr.bf16.mxu0 %v7507_v14  ;;  %v1058_v15 = vld [vmem:[%s12644_s1 + $0x1fe8] sm:$0xff]  ;;  %v7525_v14 = vpack.c.bf16 %v1008_v4, %v1007_v3  ;;  %v7531_v27 = vpack.c.bf16 %v1028_v28, %v1027_v25  ;;  %v1064_v3 = vld [vmem:[%s12644_s1 + $0x2018] sm:$0xff]  ;;  %v1095_v4 = vld [vmem:[%s12644_s1 + $0x2110] sm:$0xff] }
 0x1e8   :  { %7540 = vmatprep.subr.bf16.mxu1 %v7539_v19  ;;  %4103 = vmatprep.mubr.f32.mxu0 %v1741_v12  ;;  %v1010_v19 = vld [vmem:[%s12644_s1 + $0x1e68] sm:$0xff]  ;;  %v7559_v52 = vpack.c.bf16 %v1058_v15, %v1057_v10  ;;  %v1113_v10 = vld [vmem:[%s12644_s1 + $0x21a0] sm:$0xff]  ;;  %v1115_v25 = vld [vmem:[%s12644_s1 + $0x21b0] sm:$0xff] }
 0x1e9   :  { %4173 = vmatprep.mubr.f32.mxu1 %v1742_v29  ;;  %v1042_v12 = vld [vmem:[%s12644_s1 + $0x1f68] sm:$0xff]  ;;  %v7529_v23 = vpack.c.bf16 %v1010_v19, %v1009_v18  ;;  %v7575_v18 = vpack.c.bf16 %v1082_v22, %v1081_v6  ;;  %v1116_v28 = vld [vmem:[%s12644_s1 + $0x21b8] sm:$0xff] }
 0x1ea   :  { %7510 = vmatpush3.bf16.msra.mxu0 %v7509_v31  ;;  %v7561_v50 = vpack.c.bf16 %v1042_v12, %v1041_v9  ;;  %v1114_v15 = vld [vmem:[%s12644_s1 + $0x21a8] sm:$0xff]  ;;  %v1097_v9 = vld [vmem:[%s12644_s1 + $0x2120] sm:$0xff]  ;;  %v1084_v12 = vld [vmem:[%s12644_s1 + $0x20b8] sm:$0xff] }
 0x1eb   :  { %7542 = vmatpush3.bf16.msra.mxu1 %v7541_v30  ;;  %7512 = vmatprep.subr.bf16.mxu0 %v7511_v32  ;;  %v1059_v30 = vld [vmem:[%s12644_s1 + $0x1ff0] sm:$0xff]  ;;  %v1060_v32 = vld [vmem:[%s12644_s1 + $0x1ff8] sm:$0xff]  ;;  %v1066_v19 = vld [vmem:[%s12644_s1 + $0x2028] sm:$0xff] }
 0x1ec   :  { %7544 = vmatprep.subr.bf16.mxu1 %v7543_v24  ;;  %v31_v24 = vld [vmem:[%s12643_s0 + $0x80] sm:$0xff] }
 0x1ed   :  { %v1743_v37 = vcombine.high %v31_v24, %v31_v24  ;;  %v11400_v51 = vrot.slane %v31_v24, %v8185_v13  ;;  %v1100_v24 = vld [vmem:[%s12644_s1 + $0x2138] sm:$0xff] }
 0x1ee   :  { %7514 = vmatpush3.bf16.msra.mxu0 %v7513_v41  ;;  %v1043_v41 = vld [vmem:[%s12644_s1 + $0x1f70] sm:$0xff] }
 0x1ef   :  { %7546 = vmatpush3.bf16.msra.mxu1 %v7545_v43  ;;  %7516 = vmatprep.subr.bf16.mxu0 %v7515_v44  ;;  %v7563_v44 = vpack.c.bf16 %v1060_v32, %v1059_v30  ;;  %v7565_v39 = vpack.c.bf16 %v1044_v46, %v1043_v41  ;;  %v11409_v11 = vrot.slane %v1743_v37, %v8185_v13  ;;  %v1067_v32 = vld [vmem:[%s12644_s1 + $0x2030] sm:$0xff]  ;;  %v1070_v46 = vld [vmem:[%s12644_s1 + $0x2048] sm:$0xff]  ;;  %v1088_v37 = vld [vmem:[%s12644_s1 + $0x20d8] sm:$0xff] }
 0x1f0   :  { %7548 = vmatprep.subr.bf16.mxu1 %v7547_v36  ;;  %v1109_v36 = vld [vmem:[%s12644_s1 + $0x2180] sm:$0xff]  ;;  %v1758_v63 = vcombine.high %v11400_v51, %v11400_v51 }
 0x1f2   :  { %7518 = vmatpush3.bf16.msra.mxu0 %v7517_v55  ;;  %v1061_v55 = vld [vmem:[%s12644_s1 + $0x2000] sm:$0xff] }
 0x1f3   :  { %7550 = vmatpush3.bf16.msra.mxu1 %v7549_v57  ;;  %7520 = vmatprep.subr.bf16.mxu0 %v7519_v56  ;;  %v1062_v57 = vld [vmem:[%s12644_s1 + $0x2008] sm:$0xff]  ;;  %v1093_v56 = vld [vmem:[%s12644_s1 + $0x2100] sm:$0xff] }
 0x1f4   :  { %7552 = vmatprep.subr.bf16.mxu1 %v7551_v59  ;;  %v1080_v59 = vld [vmem:[%s12644_s1 + $0x2098] sm:$0xff]  ;;  %v7569_v33 = vpack.c.bf16 %v1062_v57, %v1061_v55 }
 0x1f6   :  { %7522 = vmatpush3.bf16.msra.mxu0 %v7521_v0  ;;  %v7601_v0 = vpack.c.bf16 %v1094_v58, %v1093_v56  ;;  %v1071_v56 = vld [vmem:[%s12644_s1 + $0x2050] sm:$0xff] }
 0x1f7   :  { %7554 = vmatpush3.bf16.msra.mxu1 %v7553_v1  ;;  %7524 = vmatprep.subr.bf16.mxu0 %v7523_v2  ;;  %v7571_v1 = vpack.c.bf16 %v1080_v59, %v1079_v49  ;;  %v1063_v2 = vld [vmem:[%s12644_s1 + $0x2010] sm:$0xff]  ;;  %v1104_v59 = vld [vmem:[%s12644_s1 + $0x2158] sm:$0xff] }
 0x1f8   :  { %v5630_v20 = vpop.f32.mrb[16].mxu0  ;;  %7556 = vmatprep.subr.bf16.mxu1 %v7555_v61  ;;  %v1096_v61 = vld [vmem:[%s12644_s1 + $0x2118] sm:$0xff]  ;;  %v1103_v58 = vld [vmem:[%s12644_s1 + $0x2150] sm:$0xff] }
 0x1f9   :  { %v5665_v29 = vpop.f32.mrb[16].mxu1  ;;  %v5631_v31 = vpop.f32.mrb[17].mxu0 }
 0x1fa   :  { %v5632_v21 = vadd.f32 %v5631_v31, %v5630_v20  ;;  %v5666_v34 = vpop.f32.mrb[17].mxu1  ;;  %7526 = vmatpush3.bf16.msra.mxu0 %v7525_v14  ;;  %v1759_v14 = vcombine.high %v11409_v11, %v11409_v11  ;;  %v1098_v20 = vld [vmem:[%s12644_s1 + $0x2128] sm:$0xff] }
 0x1fb   :  { %v5667_v42 = vadd.f32 %v5666_v34, %v5665_v29  ;;  %7558 = vmatpush3.bf16.msra.mxu1 %v7557_v16  ;;  %7528 = vmatprep.subr.bf16.mxu0 %v7527_v17  ;;  %v7573_v16 = vpack.c.bf16 %v1064_v3, %v1063_v2  ;;  %v7605_v17 = vpack.c.bf16 %v1096_v61, %v1095_v4  ;;  %v1099_v34 = vld [vmem:[%s12644_s1 + $0x2130] sm:$0xff]  ;;  %v1073_v4 = vld [vmem:[%s12644_s1 + $0x2060] sm:$0xff] }
 0x1fc   :  { %v3126_v43 = vadd.f32 %v5632_v21, %v11169_v60  ;;  %7560 = vmatprep.subr.bf16.mxu1 %v7559_v52  ;;  %v1110_v60 = vld [vmem:[%s12644_s1 + $0x2188] sm:$0xff]  ;;  %v1083_v52 = vld [vmem:[%s12644_s1 + $0x20b0] sm:$0xff]  ;;  %v7609_v31 = vpack.c.bf16 %v1098_v20, %v1097_v9  ;;  %v1068_v21 = vld [vmem:[%s12644_s1 + $0x2038] sm:$0xff]  ;;  %v7613_v41 = vpack.c.bf16 %v1100_v24, %v1099_v34  ;;  %v7621_v2 = vpack.c.bf16 %v1104_v59, %v1103_v58 }
 0x1fd   :  { %v7599_v45 = vpack.c.bf16 %v1110_v60, %v1109_v36  ;;  %v7579_v30 = vpack.c.bf16 %v1084_v12, %v1083_v52  ;;  %v7581_v40 = vpack.c.bf16 %v1068_v21, %v1067_v32  ;;  %v1102_v36 = vld [vmem:[%s12644_s1 + $0x2148] sm:$0xff]  ;;  %v1087_v60 = vld [vmem:[%s12644_s1 + $0x20d0] sm:$0xff]  ;;  %v7591_v3 = vpack.c.bf16 %v1090_v53, %v1089_v7  ;;  %v1105_v61 = vld [vmem:[%s12644_s1 + $0x2160] sm:$0xff] }
 0x1fe   :  { %v11379_v48 = vadd.f32 %v5667_v42, %v3126_v43  ;;  %7530 = vmatpush3.bf16.msra.mxu0 %v7529_v23  ;;  %v7611_v23 = vpack.c.bf16 %v1116_v28, %v1115_v25  ;;  %v1085_v42 = vld [vmem:[%s12644_s1 + $0x20c0] sm:$0xff]  ;;  %v7617_v55 = vpack.c.bf16 %v1102_v36, %v1101_v35  ;;  %v7587_v57 = vpack.c.bf16 %v1088_v37, %v1087_v60  ;;  %v1075_v25 = vld [vmem:[%s12644_s1 + $0x2070] sm:$0xff]  ;;  %v1076_v28 = vld [vmem:[%s12644_s1 + $0x2078] sm:$0xff] }
 0x1ff   :  { %7562 = vmatpush3.bf16.msra.mxu1 %v7561_v50  ;;  %7532 = vmatprep.subr.bf16.mxu0 %v7531_v27  ;;  %v1086_v50 = vld [vmem:[%s12644_s1 + $0x20c8] sm:$0xff]  ;;  %v1117_v27 = vld [vmem:[%s12644_s1 + $0x21c0] sm:$0xff]  ;;  %v1108_v32 = vld [vmem:[%s12644_s1 + $0x2178] sm:$0xff] }
 0x200   :  { %7564 = vmatprep.subr.bf16.mxu1 %v7563_v44  ;;  %v7583_v43 = vpack.c.bf16 %v1086_v50, %v1085_v42  ;;  %v1069_v44 = vld [vmem:[%s12644_s1 + $0x2040] sm:$0xff]  ;;  %v7615_v47 = vpack.c.bf16 %v1118_v38, %v1117_v27  ;;  %v1142_v34 = vld [vmem:[%s12644_s1 + $0x2288] sm:$0xff]  ;;  %v7597_v50 = vpack.c.bf16 %v1076_v28, %v1075_v25  ;;  %v1143_v35 = vld [vmem:[%s12644_s1 + $0x2290] sm:$0xff] }
 0x201   :  { %v1141_v21 = vld [vmem:[%s12644_s1 + $0x2280] sm:$0xff]  ;;  %v1175_v60 = vld [vmem:[%s12644_s1 + $0x2390] sm:$0xff]  ;;  %v1176_v37 = vld [vmem:[%s12644_s1 + $0x2398] sm:$0xff] }
 0x202   :  { %7534 = vmatpush3.bf16.msra.mxu0 %v7533_v62  ;;  %v1119_v62 = vld [vmem:[%s12644_s1 + $0x21d0] sm:$0xff]  ;;  %v7631_v38 = vpack.c.bf16 %v1142_v34, %v1141_v21  ;;  %v7667_v58 = vpack.c.bf16 %v1176_v37, %v1175_v60  ;;  %v1145_v59 = vld [vmem:[%s12644_s1 + $0x22a0] sm:$0xff]  ;;  %v1146_v7 = vld [vmem:[%s12644_s1 + $0x22a8] sm:$0xff] }
 0x203   :  { %7566 = vmatpush3.bf16.msra.mxu1 %v7565_v39  ;;  %7568 = vmatprep.subr.bf16.mxu0 %v7567_v54  ;;  %v1120_v39 = vld [vmem:[%s12644_s1 + $0x21d8] sm:$0xff]  ;;  %v7585_v54 = vpack.c.bf16 %v1070_v46, %v1069_v44  ;;  %v1158_v46 = vld [vmem:[%s12644_s1 + $0x2308] sm:$0xff]  ;;  %v1165_v21 = vld [vmem:[%s12644_s1 + $0x2340] sm:$0xff] }
 0x204   :  { %7600 = vmatprep.subr.bf16.mxu1 %v7599_v45  ;;  %v1072_v45 = vld [vmem:[%s12644_s1 + $0x2058] sm:$0xff]  ;;  %v7619_v49 = vpack.c.bf16 %v1120_v39, %v1119_v62  ;;  %v1182_v25 = vld [vmem:[%s12644_s1 + $0x23c8] sm:$0xff]  ;;  %v1153_v60 = vld [vmem:[%s12644_s1 + $0x22e0] sm:$0xff] }
 0x205   :  { %4104 = vmatmul.mubr.f32.vlgmr.msra.gmra.mrb[30].mxu0 %v11190_v8  ;;  %v1065_v8 = vld [vmem:[%s12644_s1 + $0x2020] sm:$0xff]  ;;  %v1154_v37 = vld [vmem:[%s12644_s1 + $0x22e8] sm:$0xff] }
 0x206   :  { %4174 = vmatmul.mubr.f32.vlgmr.msra.gmra.mrb[30].mxu1 %v11199_v26  ;;  %7570 = vmatpush3.bf16.msra.mxu0 %v7569_v33  ;;  %v7607_v26 = vpack.c.bf16 %v1114_v15, %v1113_v10  ;;  %v7577_v29 = vpack.c.bf16 %v1066_v19, %v1065_v8  ;;  %v1121_v33 = vld [vmem:[%s12644_s1 + $0x21e0] sm:$0xff]  ;;  %v1091_v10 = vld [vmem:[%s12644_s1 + $0x20f0] sm:$0xff]  ;;  %v1092_v15 = vld [vmem:[%s12644_s1 + $0x20f8] sm:$0xff] }
 0x207   :  { %7602 = vmatpush3.bf16.msra.mxu1 %v7601_v0  ;;  %7572 = vmatprep.subr.bf16.mxu0 %v7571_v1  ;;  %v1122_v0 = vld [vmem:[%s12644_s1 + $0x21e8] sm:$0xff]  ;;  %v7589_v1 = vpack.c.bf16 %v1072_v45, %v1071_v56  ;;  %v7595_v12 = vpack.c.bf16 %v1092_v15, %v1091_v10  ;;  %v1128_v56 = vld [vmem:[%s12644_s1 + $0x2218] sm:$0xff]  ;;  %v1159_v45 = vld [vmem:[%s12644_s1 + $0x2310] sm:$0xff] }
 0x208   :  { %7604 = vmatprep.subr.bf16.mxu1 %v7603_v5  ;;  %4243 = vmatprep.mubr.f32.mxu0 %v1758_v63  ;;  %v1074_v5 = vld [vmem:[%s12644_s1 + $0x2068] sm:$0xff]  ;;  %v7623_v22 = vpack.c.bf16 %v1122_v0, %v1121_v33  ;;  %v1177_v33 = vld [vmem:[%s12644_s1 + $0x23a0] sm:$0xff]  ;;  %v1179_v10 = vld [vmem:[%s12644_s1 + $0x23b0] sm:$0xff] }
 0x209   :  { %4313 = vmatprep.mubr.f32.mxu1 %v1759_v14  ;;  %v1106_v63 = vld [vmem:[%s12644_s1 + $0x2168] sm:$0xff]  ;;  %v7593_v9 = vpack.c.bf16 %v1074_v5, %v1073_v4  ;;  %v7639_v4 = vpack.c.bf16 %v1146_v7, %v1145_v59  ;;  %v1180_v15 = vld [vmem:[%s12644_s1 + $0x23b8] sm:$0xff] }
 0x20a   :  { %7574 = vmatpush3.bf16.msra.mxu0 %v7573_v16  ;;  %v7625_v52 = vpack.c.bf16 %v1106_v63, %v1105_v61  ;;  %v1178_v0 = vld [vmem:[%s12644_s1 + $0x23a8] sm:$0xff]  ;;  %v1161_v61 = vld [vmem:[%s12644_s1 + $0x2320] sm:$0xff]  ;;  %v1148_v63 = vld [vmem:[%s12644_s1 + $0x22b8] sm:$0xff] }
 0x20b   :  { %7606 = vmatpush3.bf16.msra.mxu1 %v7605_v17  ;;  %7576 = vmatprep.subr.bf16.mxu0 %v7575_v18  ;;  %v1123_v17 = vld [vmem:[%s12644_s1 + $0x21f0] sm:$0xff]  ;;  %v1124_v18 = vld [vmem:[%s12644_s1 + $0x21f8] sm:$0xff]  ;;  %v1130_v5 = vld [vmem:[%s12644_s1 + $0x2228] sm:$0xff] }
 0x20c   :  { %7608 = vmatprep.subr.bf16.mxu1 %v7607_v26  ;;  %v32_v26 = vld [vmem:[%s12643_s0 + $0x88] sm:$0xff] }
 0x20d   :  { %v1760_v24 = vcombine.high %v32_v26, %v32_v26  ;;  %v11610_v36 = vrot.slane %v32_v26, %v8185_v13  ;;  %v1164_v26 = vld [vmem:[%s12644_s1 + $0x2338] sm:$0xff] }
 0x20e   :  { %7578 = vmatpush3.bf16.msra.mxu0 %v7577_v29  ;;  %v1107_v29 = vld [vmem:[%s12644_s1 + $0x2170] sm:$0xff] }
 0x20f   :  { %7610 = vmatpush3.bf16.msra.mxu1 %v7609_v31  ;;  %7580 = vmatprep.subr.bf16.mxu0 %v7579_v30  ;;  %v7627_v30 = vpack.c.bf16 %v1124_v18, %v1123_v17  ;;  %v7629_v27 = vpack.c.bf16 %v1108_v32, %v1107_v29  ;;  %v11619_v62 = vrot.slane %v1760_v24, %v8185_v13  ;;  %v1131_v18 = vld [vmem:[%s12644_s1 + $0x2230] sm:$0xff]  ;;  %v1134_v32 = vld [vmem:[%s12644_s1 + $0x2248] sm:$0xff]  ;;  %v1152_v24 = vld [vmem:[%s12644_s1 + $0x22d8] sm:$0xff] }
 0x210   :  { %7612 = vmatprep.subr.bf16.mxu1 %v7611_v23  ;;  %v1173_v23 = vld [vmem:[%s12644_s1 + $0x2380] sm:$0xff]  ;;  %v1775_v53 = vcombine.high %v11610_v36, %v11610_v36 }
 0x212   :  { %7582 = vmatpush3.bf16.msra.mxu0 %v7581_v40  ;;  %v1125_v40 = vld [vmem:[%s12644_s1 + $0x2200] sm:$0xff] }
 0x213   :  { %7614 = vmatpush3.bf16.msra.mxu1 %v7613_v41  ;;  %7584 = vmatprep.subr.bf16.mxu0 %v7583_v43  ;;  %v1126_v41 = vld [vmem:[%s12644_s1 + $0x2208] sm:$0xff]  ;;  %v1157_v43 = vld [vmem:[%s12644_s1 + $0x2300] sm:$0xff] }
 0x214   :  { %7616 = vmatprep.subr.bf16.mxu1 %v7615_v47  ;;  %v1144_v47 = vld [vmem:[%s12644_s1 + $0x2298] sm:$0xff]  ;;  %v7633_v39 = vpack.c.bf16 %v1126_v41, %v1125_v40 }
 0x216   :  { %7586 = vmatpush3.bf16.msra.mxu0 %v7585_v54  ;;  %v7665_v54 = vpack.c.bf16 %v1158_v46, %v1157_v43  ;;  %v1135_v43 = vld [vmem:[%s12644_s1 + $0x2250] sm:$0xff] }
 0x217   :  { %7618 = vmatpush3.bf16.msra.mxu1 %v7617_v55  ;;  %7588 = vmatprep.subr.bf16.mxu0 %v7587_v57  ;;  %v7635_v55 = vpack.c.bf16 %v1144_v47, %v1143_v35  ;;  %v1127_v57 = vld [vmem:[%s12644_s1 + $0x2210] sm:$0xff]  ;;  %v1168_v47 = vld [vmem:[%s12644_s1 + $0x2358] sm:$0xff] }
 0x218   :  { %v5700_v6 = vpop.f32.mrb[18].mxu0  ;;  %7620 = vmatprep.subr.bf16.mxu1 %v7619_v49  ;;  %v1160_v49 = vld [vmem:[%s12644_s1 + $0x2318] sm:$0xff]  ;;  %v1167_v46 = vld [vmem:[%s12644_s1 + $0x2350] sm:$0xff] }
 0x219   :  { %v5735_v14 = vpop.f32.mrb[18].mxu1  ;;  %v5701_v16 = vpop.f32.mrb[19].mxu0 }
 0x21a   :  { %v5702_v8 = vadd.f32 %v5701_v16, %v5700_v6  ;;  %v5736_v19 = vpop.f32.mrb[19].mxu1  ;;  %7590 = vmatpush3.bf16.msra.mxu0 %v7589_v1  ;;  %v1776_v1 = vcombine.high %v11619_v62, %v11619_v62  ;;  %v1162_v6 = vld [vmem:[%s12644_s1 + $0x2328] sm:$0xff] }
 0x21b   :  { %v5737_v20 = vadd.f32 %v5736_v19, %v5735_v14  ;;  %7622 = vmatpush3.bf16.msra.mxu1 %v7621_v2  ;;  %7592 = vmatprep.subr.bf16.mxu0 %v7591_v3  ;;  %v7637_v2 = vpack.c.bf16 %v1128_v56, %v1127_v57  ;;  %v7669_v3 = vpack.c.bf16 %v1160_v49, %v1159_v45  ;;  %v1163_v19 = vld [vmem:[%s12644_s1 + $0x2330] sm:$0xff]  ;;  %v1137_v45 = vld [vmem:[%s12644_s1 + $0x2260] sm:$0xff] }
 0x21c   :  { %v3266_v31 = vadd.f32 %v5702_v8, %v11379_v48  ;;  %7624 = vmatprep.subr.bf16.mxu1 %v7623_v22  ;;  %v1174_v48 = vld [vmem:[%s12644_s1 + $0x2388] sm:$0xff]  ;;  %v1147_v22 = vld [vmem:[%s12644_s1 + $0x22b0] sm:$0xff]  ;;  %v7673_v16 = vpack.c.bf16 %v1162_v6, %v1161_v61  ;;  %v1132_v8 = vld [vmem:[%s12644_s1 + $0x2238] sm:$0xff]  ;;  %v7677_v29 = vpack.c.bf16 %v1164_v26, %v1163_v19  ;;  %v7685_v57 = vpack.c.bf16 %v1168_v47, %v1167_v46 }
 0x21d   :  { %v7663_v44 = vpack.c.bf16 %v1174_v48, %v1173_v23  ;;  %v7643_v17 = vpack.c.bf16 %v1148_v63, %v1147_v22  ;;  %v7645_v28 = vpack.c.bf16 %v1132_v8, %v1131_v18  ;;  %v1166_v23 = vld [vmem:[%s12644_s1 + $0x2348] sm:$0xff]  ;;  %v1151_v48 = vld [vmem:[%s12644_s1 + $0x22d0] sm:$0xff]  ;;  %v7655_v56 = vpack.c.bf16 %v1154_v37, %v1153_v60  ;;  %v1169_v49 = vld [vmem:[%s12644_s1 + $0x2360] sm:$0xff] }
 0x21e   :  { %v11589_v42 = vadd.f32 %v5737_v20, %v3266_v31  ;;  %7594 = vmatpush3.bf16.msra.mxu0 %v7593_v9  ;;  %v7675_v9 = vpack.c.bf16 %v1180_v15, %v1179_v10  ;;  %v1149_v20 = vld [vmem:[%s12644_s1 + $0x22c0] sm:$0xff]  ;;  %v7681_v40 = vpack.c.bf16 %v1166_v23, %v1165_v21  ;;  %v7651_v41 = vpack.c.bf16 %v1152_v24, %v1151_v48  ;;  %v1139_v10 = vld [vmem:[%s12644_s1 + $0x2270] sm:$0xff]  ;;  %v1140_v15 = vld [vmem:[%s12644_s1 + $0x2278] sm:$0xff] }
 0x21f   :  { %7626 = vmatpush3.bf16.msra.mxu1 %v7625_v52  ;;  %7596 = vmatprep.subr.bf16.mxu0 %v7595_v12  ;;  %v1150_v52 = vld [vmem:[%s12644_s1 + $0x22c8] sm:$0xff]  ;;  %v1181_v12 = vld [vmem:[%s12644_s1 + $0x23c0] sm:$0xff]  ;;  %v1172_v18 = vld [vmem:[%s12644_s1 + $0x2378] sm:$0xff] }
 0x220   :  { %7628 = vmatprep.subr.bf16.mxu1 %v7627_v30  ;;  %v7647_v31 = vpack.c.bf16 %v1150_v52, %v1149_v20  ;;  %v1133_v30 = vld [vmem:[%s12644_s1 + $0x2240] sm:$0xff]  ;;  %v7679_v34 = vpack.c.bf16 %v1182_v25, %v1181_v12  ;;  %v1206_v19 = vld [vmem:[%s12644_s1 + $0x2488] sm:$0xff]  ;;  %v7661_v52 = vpack.c.bf16 %v1140_v15, %v1139_v10  ;;  %v1207_v21 = vld [vmem:[%s12644_s1 + $0x2490] sm:$0xff] }
 0x221   :  { %v1205_v8 = vld [vmem:[%s12644_s1 + $0x2480] sm:$0xff]  ;;  %v1239_v48 = vld [vmem:[%s12644_s1 + $0x2590] sm:$0xff]  ;;  %v1240_v24 = vld [vmem:[%s12644_s1 + $0x2598] sm:$0xff] }
 0x222   :  { %7598 = vmatpush3.bf16.msra.mxu0 %v7597_v50  ;;  %v1183_v50 = vld [vmem:[%s12644_s1 + $0x23d0] sm:$0xff]  ;;  %v7695_v25 = vpack.c.bf16 %v1206_v19, %v1205_v8  ;;  %v7731_v46 = vpack.c.bf16 %v1240_v24, %v1239_v48  ;;  %v1209_v47 = vld [vmem:[%s12644_s1 + $0x24a0] sm:$0xff]  ;;  %v1210_v60 = vld [vmem:[%s12644_s1 + $0x24a8] sm:$0xff] }
 0x223   :  { %7630 = vmatpush3.bf16.msra.mxu1 %v7629_v27  ;;  %7632 = vmatprep.subr.bf16.mxu0 %v7631_v38  ;;  %v1184_v27 = vld [vmem:[%s12644_s1 + $0x23d8] sm:$0xff]  ;;  %v7649_v38 = vpack.c.bf16 %v1134_v32, %v1133_v30  ;;  %v1222_v32 = vld [vmem:[%s12644_s1 + $0x2508] sm:$0xff]  ;;  %v1229_v8 = vld [vmem:[%s12644_s1 + $0x2540] sm:$0xff] }
 0x224   :  { %7664 = vmatprep.subr.bf16.mxu1 %v7663_v44  ;;  %v1136_v44 = vld [vmem:[%s12644_s1 + $0x2258] sm:$0xff]  ;;  %v7683_v35 = vpack.c.bf16 %v1184_v27, %v1183_v50  ;;  %v1246_v10 = vld [vmem:[%s12644_s1 + $0x25c8] sm:$0xff]  ;;  %v1217_v48 = vld [vmem:[%s12644_s1 + $0x24e0] sm:$0xff] }
 0x225   :  { %4244 = vmatmul.mubr.f32.vlgmr.msra.gmra.mrb[32].mxu0 %v11400_v51  ;;  %v1129_v51 = vld [vmem:[%s12644_s1 + $0x2220] sm:$0xff]  ;;  %v1218_v24 = vld [vmem:[%s12644_s1 + $0x24e8] sm:$0xff] }
 0x226   :  { %4314 = vmatmul.mubr.f32.vlgmr.msra.gmra.mrb[32].mxu1 %v11409_v11  ;;  %7634 = vmatpush3.bf16.msra.mxu0 %v7633_v39  ;;  %v7671_v11 = vpack.c.bf16 %v1178_v0, %v1177_v33  ;;  %v7641_v14 = vpack.c.bf16 %v1130_v5, %v1129_v51  ;;  %v1185_v39 = vld [vmem:[%s12644_s1 + $0x23e0] sm:$0xff]  ;;  %v1155_v33 = vld [vmem:[%s12644_s1 + $0x22f0] sm:$0xff]  ;;  %v1156_v0 = vld [vmem:[%s12644_s1 + $0x22f8] sm:$0xff] }
 0x227   :  { %7666 = vmatpush3.bf16.msra.mxu1 %v7665_v54  ;;  %7636 = vmatprep.subr.bf16.mxu0 %v7635_v55  ;;  %v1186_v54 = vld [vmem:[%s12644_s1 + $0x23e8] sm:$0xff]  ;;  %v7653_v55 = vpack.c.bf16 %v1136_v44, %v1135_v43  ;;  %v7659_v63 = vpack.c.bf16 %v1156_v0, %v1155_v33  ;;  %v1192_v43 = vld [vmem:[%s12644_s1 + $0x2418] sm:$0xff]  ;;  %v1223_v44 = vld [vmem:[%s12644_s1 + $0x2510] sm:$0xff] }
 0x228   :  { %7668 = vmatprep.subr.bf16.mxu1 %v7667_v58  ;;  %4383 = vmatprep.mubr.f32.mxu0 %v1775_v53  ;;  %v1138_v58 = vld [vmem:[%s12644_s1 + $0x2268] sm:$0xff]  ;;  %v7687_v7 = vpack.c.bf16 %v1186_v54, %v1185_v39  ;;  %v1241_v39 = vld [vmem:[%s12644_s1 + $0x25a0] sm:$0xff]  ;;  %v1243_v33 = vld [vmem:[%s12644_s1 + $0x25b0] sm:$0xff] }
 0x229   :  { %4453 = vmatprep.mubr.f32.mxu1 %v1776_v1  ;;  %v1170_v53 = vld [vmem:[%s12644_s1 + $0x2368] sm:$0xff]  ;;  %v7657_v61 = vpack.c.bf16 %v1138_v58, %v1137_v45  ;;  %v7703_v45 = vpack.c.bf16 %v1210_v60, %v1209_v47  ;;  %v1244_v0 = vld [vmem:[%s12644_s1 + $0x25b8] sm:$0xff] }
 0x22a   :  { %7638 = vmatpush3.bf16.msra.mxu0 %v7637_v2  ;;  %v7689_v22 = vpack.c.bf16 %v1170_v53, %v1169_v49  ;;  %v1242_v54 = vld [vmem:[%s12644_s1 + $0x25a8] sm:$0xff]  ;;  %v1225_v49 = vld [vmem:[%s12644_s1 + $0x2520] sm:$0xff]  ;;  %v1212_v53 = vld [vmem:[%s12644_s1 + $0x24b8] sm:$0xff] }
 0x22b   :  { %7670 = vmatpush3.bf16.msra.mxu1 %v7669_v3  ;;  %7640 = vmatprep.subr.bf16.mxu0 %v7639_v4  ;;  %v1187_v3 = vld [vmem:[%s12644_s1 + $0x23f0] sm:$0xff]  ;;  %v1188_v4 = vld [vmem:[%s12644_s1 + $0x23f8] sm:$0xff]  ;;  %v1194_v58 = vld [vmem:[%s12644_s1 + $0x2428] sm:$0xff] }
 0x22c   :  { %7672 = vmatprep.subr.bf16.mxu1 %v7671_v11  ;;  %v33_v11 = vld [vmem:[%s12643_s0 + $0x90] sm:$0xff] }
 0x22d   :  { %v1777_v26 = vcombine.high %v33_v11, %v33_v11  ;;  %v11820_v23 = vrot.slane %v33_v11, %v8185_v13  ;;  %v1228_v11 = vld [vmem:[%s12644_s1 + $0x2538] sm:$0xff] }
 0x22e   :  { %7642 = vmatpush3.bf16.msra.mxu0 %v7641_v14  ;;  %v1171_v14 = vld [vmem:[%s12644_s1 + $0x2370] sm:$0xff] }
 0x22f   :  { %7674 = vmatpush3.bf16.msra.mxu1 %v7673_v16  ;;  %7644 = vmatprep.subr.bf16.mxu0 %v7643_v17  ;;  %v7691_v17 = vpack.c.bf16 %v1188_v4, %v1187_v3  ;;  %v7693_v12 = vpack.c.bf16 %v1172_v18, %v1171_v14  ;;  %v11829_v50 = vrot.slane %v1777_v26, %v8185_v13  ;;  %v1195_v4 = vld [vmem:[%s12644_s1 + $0x2430] sm:$0xff]  ;;  %v1198_v18 = vld [vmem:[%s12644_s1 + $0x2448] sm:$0xff]  ;;  %v1216_v26 = vld [vmem:[%s12644_s1 + $0x24d8] sm:$0xff] }
 0x230   :  { %7676 = vmatprep.subr.bf16.mxu1 %v7675_v9  ;;  %v1237_v9 = vld [vmem:[%s12644_s1 + $0x2580] sm:$0xff]  ;;  %v1792_v37 = vcombine.high %v11820_v23, %v11820_v23 }
 0x232   :  { %7646 = vmatpush3.bf16.msra.mxu0 %v7645_v28  ;;  %v1189_v28 = vld [vmem:[%s12644_s1 + $0x2400] sm:$0xff] }
 0x233   :  { %7678 = vmatpush3.bf16.msra.mxu1 %v7677_v29  ;;  %7648 = vmatprep.subr.bf16.mxu0 %v7647_v31  ;;  %v1190_v29 = vld [vmem:[%s12644_s1 + $0x2408] sm:$0xff]  ;;  %v1221_v31 = vld [vmem:[%s12644_s1 + $0x2500] sm:$0xff] }
 0x234   :  { %7680 = vmatprep.subr.bf16.mxu1 %v7679_v34  ;;  %v1208_v34 = vld [vmem:[%s12644_s1 + $0x2498] sm:$0xff]  ;;  %v7697_v27 = vpack.c.bf16 %v1190_v29, %v1189_v28 }
 0x236   :  { %7650 = vmatpush3.bf16.msra.mxu0 %v7649_v38  ;;  %v7729_v38 = vpack.c.bf16 %v1222_v32, %v1221_v31  ;;  %v1199_v31 = vld [vmem:[%s12644_s1 + $0x2450] sm:$0xff] }
 0x237   :  { %7682 = vmatpush3.bf16.msra.mxu1 %v7681_v40  ;;  %7652 = vmatprep.subr.bf16.mxu0 %v7651_v41  ;;  %v7699_v40 = vpack.c.bf16 %v1208_v34, %v1207_v21  ;;  %v1191_v41 = vld [vmem:[%s12644_s1 + $0x2410] sm:$0xff]  ;;  %v1232_v34 = vld [vmem:[%s12644_s1 + $0x2558] sm:$0xff] }
 0x238   :  { %v5770_v59 = vpop.f32.mrb[20].mxu0  ;;  %7684 = vmatprep.subr.bf16.mxu1 %v7683_v35  ;;  %v1224_v35 = vld [vmem:[%s12644_s1 + $0x2518] sm:$0xff]  ;;  %v1231_v32 = vld [vmem:[%s12644_s1 + $0x2550] sm:$0xff] }
 0x239   :  { %v5805_v1 = vpop.f32.mrb[20].mxu1  ;;  %v5771_v2 = vpop.f32.mrb[21].mxu0 }
 0x23a   :  { %v5772_v51 = vadd.f32 %v5771_v2, %v5770_v59  ;;  %v5806_v5 = vpop.f32.mrb[21].mxu1  ;;  %7654 = vmatpush3.bf16.msra.mxu0 %v7653_v55  ;;  %v1793_v55 = vcombine.high %v11829_v50, %v11829_v50  ;;  %v1226_v59 = vld [vmem:[%s12644_s1 + $0x2528] sm:$0xff] }
 0x23b   :  { %v5807_v6 = vadd.f32 %v5806_v5, %v5805_v1  ;;  %7686 = vmatpush3.bf16.msra.mxu1 %v7685_v57  ;;  %7656 = vmatprep.subr.bf16.mxu0 %v7655_v56  ;;  %v7701_v57 = vpack.c.bf16 %v1192_v43, %v1191_v41  ;;  %v7733_v56 = vpack.c.bf16 %v1224_v35, %v1223_v44  ;;  %v1227_v5 = vld [vmem:[%s12644_s1 + $0x2530] sm:$0xff]  ;;  %v1201_v44 = vld [vmem:[%s12644_s1 + $0x2460] sm:$0xff] }
 0x23c   :  { %v3406_v16 = vadd.f32 %v5772_v51, %v11589_v42  ;;  %7688 = vmatprep.subr.bf16.mxu1 %v7687_v7  ;;  %v1238_v42 = vld [vmem:[%s12644_s1 + $0x2588] sm:$0xff]  ;;  %v1211_v7 = vld [vmem:[%s12644_s1 + $0x24b0] sm:$0xff]  ;;  %v7737_v2 = vpack.c.bf16 %v1226_v59, %v1225_v49  ;;  %v1196_v51 = vld [vmem:[%s12644_s1 + $0x2438] sm:$0xff]  ;;  %v7741_v14 = vpack.c.bf16 %v1228_v11, %v1227_v5  ;;  %v7749_v41 = vpack.c.bf16 %v1232_v34, %v1231_v32 }
 0x23d   :  { %v7727_v30 = vpack.c.bf16 %v1238_v42, %v1237_v9  ;;  %v7707_v3 = vpack.c.bf16 %v1212_v53, %v1211_v7  ;;  %v7709_v15 = vpack.c.bf16 %v1196_v51, %v1195_v4  ;;  %v1230_v9 = vld [vmem:[%s12644_s1 + $0x2548] sm:$0xff]  ;;  %v1215_v42 = vld [vmem:[%s12644_s1 + $0x24d0] sm:$0xff]  ;;  %v7719_v43 = vpack.c.bf16 %v1218_v24, %v1217_v48  ;;  %v1233_v35 = vld [vmem:[%s12644_s1 + $0x2560] sm:$0xff] }
 0x23e   :  { %v11799_v20 = vadd.f32 %v5807_v6, %v3406_v16  ;;  %7658 = vmatpush3.bf16.msra.mxu0 %v7657_v61  ;;  %v7739_v61 = vpack.c.bf16 %v1244_v0, %v1243_v33  ;;  %v1213_v6 = vld [vmem:[%s12644_s1 + $0x24c0] sm:$0xff]  ;;  %v7745_v28 = vpack.c.bf16 %v1230_v9, %v1229_v8  ;;  %v7715_v29 = vpack.c.bf16 %v1216_v26, %v1215_v42  ;;  %v1203_v33 = vld [vmem:[%s12644_s1 + $0x2470] sm:$0xff]  ;;  %v1204_v0 = vld [vmem:[%s12644_s1 + $0x2478] sm:$0xff] }
 0x23f   :  { %7690 = vmatpush3.bf16.msra.mxu1 %v7689_v22  ;;  %7660 = vmatprep.subr.bf16.mxu0 %v7659_v63  ;;  %v1214_v22 = vld [vmem:[%s12644_s1 + $0x24c8] sm:$0xff]  ;;  %v1245_v63 = vld [vmem:[%s12644_s1 + $0x25c0] sm:$0xff]  ;;  %v1236_v4 = vld [vmem:[%s12644_s1 + $0x2578] sm:$0xff] }
 0x240   :  { %7692 = vmatprep.subr.bf16.mxu1 %v7691_v17  ;;  %v7711_v16 = vpack.c.bf16 %v1214_v22, %v1213_v6  ;;  %v1197_v17 = vld [vmem:[%s12644_s1 + $0x2440] sm:$0xff]  ;;  %v7743_v19 = vpack.c.bf16 %v1246_v10, %v1245_v63  ;;  %v1270_v5 = vld [vmem:[%s12644_s1 + $0x2688] sm:$0xff]  ;;  %v7725_v22 = vpack.c.bf16 %v1204_v0, %v1203_v33  ;;  %v1271_v8 = vld [vmem:[%s12644_s1 + $0x2690] sm:$0xff] }
 0x241   :  { %v1269_v51 = vld [vmem:[%s12644_s1 + $0x2680] sm:$0xff]  ;;  %v1303_v42 = vld [vmem:[%s12644_s1 + $0x2790] sm:$0xff]  ;;  %v1304_v26 = vld [vmem:[%s12644_s1 + $0x2798] sm:$0xff] }
 0x242   :  { %7662 = vmatpush3.bf16.msra.mxu0 %v7661_v52  ;;  %v1247_v52 = vld [vmem:[%s12644_s1 + $0x25d0] sm:$0xff]  ;;  %v7759_v10 = vpack.c.bf16 %v1270_v5, %v1269_v51  ;;  %v7795_v32 = vpack.c.bf16 %v1304_v26, %v1303_v42  ;;  %v1273_v34 = vld [vmem:[%s12644_s1 + $0x26a0] sm:$0xff]  ;;  %v1274_v48 = vld [vmem:[%s12644_s1 + $0x26a8] sm:$0xff] }
 0x243   :  { %7694 = vmatpush3.bf16.msra.mxu1 %v7693_v12  ;;  %7696 = vmatprep.subr.bf16.mxu0 %v7695_v25  ;;  %v1248_v12 = vld [vmem:[%s12644_s1 + $0x25d8] sm:$0xff]  ;;  %v7713_v25 = vpack.c.bf16 %v1198_v18, %v1197_v17  ;;  %v1286_v18 = vld [vmem:[%s12644_s1 + $0x2708] sm:$0xff]  ;;  %v1293_v51 = vld [vmem:[%s12644_s1 + $0x2740] sm:$0xff] }
 0x244   :  { %7728 = vmatprep.subr.bf16.mxu1 %v7727_v30  ;;  %v1200_v30 = vld [vmem:[%s12644_s1 + $0x2458] sm:$0xff]  ;;  %v7747_v21 = vpack.c.bf16 %v1248_v12, %v1247_v52  ;;  %v1310_v33 = vld [vmem:[%s12644_s1 + $0x27c8] sm:$0xff]  ;;  %v1281_v42 = vld [vmem:[%s12644_s1 + $0x26e0] sm:$0xff] }
 0x245   :  { %4384 = vmatmul.mubr.f32.vlgmr.msra.gmra.mrb[34].mxu0 %v11610_v36  ;;  %v1193_v36 = vld [vmem:[%s12644_s1 + $0x2420] sm:$0xff]  ;;  %v1282_v26 = vld [vmem:[%s12644_s1 + $0x26e8] sm:$0xff] }
 0x246   :  { %4454 = vmatmul.mubr.f32.vlgmr.msra.gmra.mrb[34].mxu1 %v11619_v62  ;;  %7698 = vmatpush3.bf16.msra.mxu0 %v7697_v27  ;;  %v7735_v62 = vpack.c.bf16 %v1242_v54, %v1241_v39  ;;  %v7705_v1 = vpack.c.bf16 %v1194_v58, %v1193_v36  ;;  %v1249_v27 = vld [vmem:[%s12644_s1 + $0x25e0] sm:$0xff]  ;;  %v1219_v39 = vld [vmem:[%s12644_s1 + $0x24f0] sm:$0xff]  ;;  %v1220_v54 = vld [vmem:[%s12644_s1 + $0x24f8] sm:$0xff] }
 0x247   :  { %7730 = vmatpush3.bf16.msra.mxu1 %v7729_v38  ;;  %7700 = vmatprep.subr.bf16.mxu0 %v7699_v40  ;;  %v1250_v38 = vld [vmem:[%s12644_s1 + $0x25e8] sm:$0xff]  ;;  %v7717_v40 = vpack.c.bf16 %v1200_v30, %v1199_v31  ;;  %v7723_v53 = vpack.c.bf16 %v1220_v54, %v1219_v39  ;;  %v1256_v31 = vld [vmem:[%s12644_s1 + $0x2618] sm:$0xff]  ;;  %v1287_v30 = vld [vmem:[%s12644_s1 + $0x2710] sm:$0xff] }
 0x248   :  { %7732 = vmatprep.subr.bf16.mxu1 %v7731_v46  ;;  %4523 = vmatprep.mubr.f32.mxu0 %v1792_v37  ;;  %v1202_v46 = vld [vmem:[%s12644_s1 + $0x2468] sm:$0xff]  ;;  %v7751_v60 = vpack.c.bf16 %v1250_v38, %v1249_v27  ;;  %v1305_v27 = vld [vmem:[%s12644_s1 + $0x27a0] sm:$0xff]  ;;  %v1307_v39 = vld [vmem:[%s12644_s1 + $0x27b0] sm:$0xff] }
 0x249   :  { %4593 = vmatprep.mubr.f32.mxu1 %v1793_v55  ;;  %v1234_v37 = vld [vmem:[%s12644_s1 + $0x2568] sm:$0xff]  ;;  %v7721_v49 = vpack.c.bf16 %v1202_v46, %v1201_v44  ;;  %v7767_v44 = vpack.c.bf16 %v1274_v48, %v1273_v34  ;;  %v1308_v54 = vld [vmem:[%s12644_s1 + $0x27b8] sm:$0xff] }
 0x24a   :  { %7702 = vmatpush3.bf16.msra.mxu0 %v7701_v57  ;;  %v7753_v7 = vpack.c.bf16 %v1234_v37, %v1233_v35  ;;  %v1306_v38 = vld [vmem:[%s12644_s1 + $0x27a8] sm:$0xff]  ;;  %v1289_v35 = vld [vmem:[%s12644_s1 + $0x2720] sm:$0xff]  ;;  %v1276_v37 = vld [vmem:[%s12644_s1 + $0x26b8] sm:$0xff] }
 0x24b   :  { %7734 = vmatpush3.bf16.msra.mxu1 %v7733_v56  ;;  %7704 = vmatprep.subr.bf16.mxu0 %v7703_v45  ;;  %v1251_v56 = vld [vmem:[%s12644_s1 + $0x25f0] sm:$0xff]  ;;  %v1252_v45 = vld [vmem:[%s12644_s1 + $0x25f8] sm:$0xff]  ;;  %v1258_v46 = vld [vmem:[%s12644_s1 + $0x2628] sm:$0xff] }
 0x24c   :  { %7736 = vmatprep.subr.bf16.mxu1 %v7735_v62  ;;  %v34_v62 = vld [vmem:[%s12643_s0 + $0x98] sm:$0xff] }
 0x24d   :  { %v1794_v11 = vcombine.high %v34_v62, %v34_v62  ;;  %v12030_v9 = vrot.slane %v34_v62, %v8185_v13  ;;  %v1292_v62 = vld [vmem:[%s12644_s1 + $0x2738] sm:$0xff] }
 0x24e   :  { %7706 = vmatpush3.bf16.msra.mxu0 %v7705_v1  ;;  %v1235_v1 = vld [vmem:[%s12644_s1 + $0x2570] sm:$0xff] }
 0x24f   :  { %7738 = vmatpush3.bf16.msra.mxu1 %v7737_v2  ;;  %7708 = vmatprep.subr.bf16.mxu0 %v7707_v3  ;;  %v7755_v3 = vpack.c.bf16 %v1252_v45, %v1251_v56  ;;  %v7757_v63 = vpack.c.bf16 %v1236_v4, %v1235_v1  ;;  %v12039_v52 = vrot.slane %v1794_v11, %v8185_v13  ;;  %v1259_v45 = vld [vmem:[%s12644_s1 + $0x2630] sm:$0xff]  ;;  %v1262_v4 = vld [vmem:[%s12644_s1 + $0x2648] sm:$0xff]  ;;  %v1280_v11 = vld [vmem:[%s12644_s1 + $0x26d8] sm:$0xff] }
 0x250   :  { %7740 = vmatprep.subr.bf16.mxu1 %v7739_v61  ;;  %v1301_v61 = vld [vmem:[%s12644_s1 + $0x2780] sm:$0xff]  ;;  %v1809_v24 = vcombine.high %v12030_v9, %v12030_v9 }
 0x252   :  { %7710 = vmatpush3.bf16.msra.mxu0 %v7709_v15  ;;  %v1253_v15 = vld [vmem:[%s12644_s1 + $0x2600] sm:$0xff] }
 0x253   :  { %7742 = vmatpush3.bf16.msra.mxu1 %v7741_v14  ;;  %7712 = vmatprep.subr.bf16.mxu0 %v7711_v16  ;;  %v1254_v14 = vld [vmem:[%s12644_s1 + $0x2608] sm:$0xff]  ;;  %v1285_v16 = vld [vmem:[%s12644_s1 + $0x2700] sm:$0xff] }
 0x254   :  { %7744 = vmatprep.subr.bf16.mxu1 %v7743_v19  ;;  %v1272_v19 = vld [vmem:[%s12644_s1 + $0x2698] sm:$0xff]  ;;  %v7761_v12 = vpack.c.bf16 %v1254_v14, %v1253_v15 }
 0x256   :  { %7714 = vmatpush3.bf16.msra.mxu0 %v7713_v25  ;;  %v7793_v25 = vpack.c.bf16 %v1286_v18, %v1285_v16  ;;  %v1263_v16 = vld [vmem:[%s12644_s1 + $0x2650] sm:$0xff] }
 0x257   :  { %7746 = vmatpush3.bf16.msra.mxu1 %v7745_v28  ;;  %7716 = vmatprep.subr.bf16.mxu0 %v7715_v29  ;;  %v7763_v28 = vpack.c.bf16 %v1272_v19, %v1271_v8  ;;  %v1255_v29 = vld [vmem:[%s12644_s1 + $0x2610] sm:$0xff]  ;;  %v1296_v19 = vld [vmem:[%s12644_s1 + $0x2758] sm:$0xff] }
 0x258   :  { %v5840_v47 = vpop.f32.mrb[22].mxu0  ;;  %7748 = vmatprep.subr.bf16.mxu1 %v7747_v21  ;;  %v1288_v21 = vld [vmem:[%s12644_s1 + $0x2718] sm:$0xff]  ;;  %v1295_v18 = vld [vmem:[%s12644_s1 + $0x2750] sm:$0xff] }
 0x259   :  { %v5875_v55 = vpop.f32.mrb[22].mxu1  ;;  %v5841_v57 = vpop.f32.mrb[23].mxu0 }
 0x25a   :  { %v5842_v36 = vadd.f32 %v5841_v57, %v5840_v47  ;;  %v5876_v58 = vpop.f32.mrb[23].mxu1  ;;  %7718 = vmatpush3.bf16.msra.mxu0 %v7717_v40  ;;  %v1810_v40 = vcombine.high %v12039_v52, %v12039_v52  ;;  %v1290_v47 = vld [vmem:[%s12644_s1 + $0x2728] sm:$0xff] }
 0x25b   :  { %v5877_v59 = vadd.f32 %v5876_v58, %v5875_v55  ;;  %7750 = vmatpush3.bf16.msra.mxu1 %v7749_v41  ;;  %7720 = vmatprep.subr.bf16.mxu0 %v7719_v43  ;;  %v7765_v41 = vpack.c.bf16 %v1256_v31, %v1255_v29  ;;  %v7797_v43 = vpack.c.bf16 %v1288_v21, %v1287_v30  ;;  %v1291_v58 = vld [vmem:[%s12644_s1 + $0x2730] sm:$0xff]  ;;  %v1265_v30 = vld [vmem:[%s12644_s1 + $0x2660] sm:$0xff] }
 0x25c   :  { %v3546_v2 = vadd.f32 %v5842_v36, %v11799_v20  ;;  %7752 = vmatprep.subr.bf16.mxu1 %v7751_v60  ;;  %v1302_v20 = vld [vmem:[%s12644_s1 + $0x2788] sm:$0xff]  ;;  %v1275_v60 = vld [vmem:[%s12644_s1 + $0x26b0] sm:$0xff]  ;;  %v7801_v57 = vpack.c.bf16 %v1290_v47, %v1289_v35  ;;  %v1260_v36 = vld [vmem:[%s12644_s1 + $0x2638] sm:$0xff]  ;;  %v7805_v1 = vpack.c.bf16 %v1292_v62, %v1291_v58  ;;  %v7813_v29 = vpack.c.bf16 %v1296_v19, %v1295_v18 }
 0x25d   :  { %v7791_v17 = vpack.c.bf16 %v1302_v20, %v1301_v61  ;;  %v7771_v56 = vpack.c.bf16 %v1276_v37, %v1275_v60  ;;  %v7773_v0 = vpack.c.bf16 %v1260_v36, %v1259_v45  ;;  %v1294_v61 = vld [vmem:[%s12644_s1 + $0x2748] sm:$0xff]  ;;  %v1279_v20 = vld [vmem:[%s12644_s1 + $0x26d0] sm:$0xff]  ;;  %v7783_v31 = vpack.c.bf16 %v1282_v26, %v1281_v42  ;;  %v1297_v21 = vld [vmem:[%s12644_s1 + $0x2760] sm:$0xff] }
 0x25e   :  { %v12009_v6 = vadd.f32 %v5877_v59, %v3546_v2  ;;  %7722 = vmatpush3.bf16.msra.mxu0 %v7721_v49  ;;  %v7803_v49 = vpack.c.bf16 %v1308_v54, %v1307_v39  ;;  %v1277_v59 = vld [vmem:[%s12644_s1 + $0x26c0] sm:$0xff]  ;;  %v7809_v15 = vpack.c.bf16 %v1294_v61, %v1293_v51  ;;  %v7779_v14 = vpack.c.bf16 %v1280_v11, %v1279_v20  ;;  %v1267_v39 = vld [vmem:[%s12644_s1 + $0x2670] sm:$0xff]  ;;  %v1268_v54 = vld [vmem:[%s12644_s1 + $0x2678] sm:$0xff] }
 0x25f   :  { %7754 = vmatpush3.bf16.msra.mxu1 %v7753_v7  ;;  %7724 = vmatprep.subr.bf16.mxu0 %v7723_v53  ;;  %v1278_v7 = vld [vmem:[%s12644_s1 + $0x26c8] sm:$0xff]  ;;  %v1309_v53 = vld [vmem:[%s12644_s1 + $0x27c0] sm:$0xff]  ;;  %v1300_v45 = vld [vmem:[%s12644_s1 + $0x2778] sm:$0xff] }
 0x260   :  { %7756 = vmatprep.subr.bf16.mxu1 %v7755_v3  ;;  %v7775_v2 = vpack.c.bf16 %v1278_v7, %v1277_v59  ;;  %v1261_v3 = vld [vmem:[%s12644_s1 + $0x2640] sm:$0xff]  ;;  %v7807_v5 = vpack.c.bf16 %v1310_v33, %v1309_v53  ;;  %v1334_v58 = vld [vmem:[%s12644_s1 + $0x2888] sm:$0xff]  ;;  %v7789_v7 = vpack.c.bf16 %v1268_v54, %v1267_v39  ;;  %v1335_v51 = vld [vmem:[%s12644_s1 + $0x2890] sm:$0xff] }
 0x261   :  { %v1333_v36 = vld [vmem:[%s12644_s1 + $0x2880] sm:$0xff]  ;;  %v1367_v20 = vld [vmem:[%s12644_s1 + $0x2990] sm:$0xff]  ;;  %v1368_v11 = vld [vmem:[%s12644_s1 + $0x2998] sm:$0xff] }
 0x262   :  { %7726 = vmatpush3.bf16.msra.mxu0 %v7725_v22  ;;  %v1311_v22 = vld [vmem:[%s12644_s1 + $0x27d0] sm:$0xff]  ;;  %v7823_v33 = vpack.c.bf16 %v1334_v58, %v1333_v36  ;;  %v7859_v18 = vpack.c.bf16 %v1368_v11, %v1367_v20  ;;  %v1337_v19 = vld [vmem:[%s12644_s1 + $0x28a0] sm:$0xff]  ;;  %v1338_v42 = vld [vmem:[%s12644_s1 + $0x28a8] sm:$0xff] }
 0x263   :  { %7758 = vmatpush3.bf16.msra.mxu1 %v7757_v63  ;;  %7760 = vmatprep.subr.bf16.mxu0 %v7759_v10  ;;  %v1312_v63 = vld [vmem:[%s12644_s1 + $0x27d8] sm:$0xff]  ;;  %v7777_v10 = vpack.c.bf16 %v1262_v4, %v1261_v3  ;;  %v1350_v4 = vld [vmem:[%s12644_s1 + $0x2908] sm:$0xff]  ;;  %v1357_v36 = vld [vmem:[%s12644_s1 + $0x2940] sm:$0xff] }
 0x264   :  { %7792 = vmatprep.subr.bf16.mxu1 %v7791_v17  ;;  %v1264_v17 = vld [vmem:[%s12644_s1 + $0x2658] sm:$0xff]  ;;  %v7811_v8 = vpack.c.bf16 %v1312_v63, %v1311_v22  ;;  %v1374_v39 = vld [vmem:[%s12644_s1 + $0x29c8] sm:$0xff]  ;;  %v1345_v20 = vld [vmem:[%s12644_s1 + $0x28e0] sm:$0xff] }
 0x265   :  { %4524 = vmatmul.mubr.f32.vlgmr.msra.gmra.mrb[36].mxu0 %v11820_v23  ;;  %v1257_v23 = vld [vmem:[%s12644_s1 + $0x2620] sm:$0xff]  ;;  %v1346_v11 = vld [vmem:[%s12644_s1 + $0x28e8] sm:$0xff] }
 0x266   :  { %4594 = vmatmul.mubr.f32.vlgmr.msra.gmra.mrb[36].mxu1 %v11829_v50  ;;  %7762 = vmatpush3.bf16.msra.mxu0 %v7761_v12  ;;  %v7799_v50 = vpack.c.bf16 %v1306_v38, %v1305_v27  ;;  %v7769_v55 = vpack.c.bf16 %v1258_v46, %v1257_v23  ;;  %v1313_v12 = vld [vmem:[%s12644_s1 + $0x27e0] sm:$0xff]  ;;  %v1283_v27 = vld [vmem:[%s12644_s1 + $0x26f0] sm:$0xff]  ;;  %v1284_v38 = vld [vmem:[%s12644_s1 + $0x26f8] sm:$0xff] }
 0x267   :  { %7794 = vmatpush3.bf16.msra.mxu1 %v7793_v25  ;;  %7764 = vmatprep.subr.bf16.mxu0 %v7763_v28  ;;  %v1314_v25 = vld [vmem:[%s12644_s1 + $0x27e8] sm:$0xff]  ;;  %v7781_v28 = vpack.c.bf16 %v1264_v17, %v1263_v16  ;;  %v7787_v37 = vpack.c.bf16 %v1284_v38, %v1283_v27  ;;  %v1320_v16 = vld [vmem:[%s12644_s1 + $0x2818] sm:$0xff]  ;;  %v1351_v17 = vld [vmem:[%s12644_s1 + $0x2910] sm:$0xff] }
 0x268   :  { %7796 = vmatprep.subr.bf16.mxu1 %v7795_v32  ;;  %4663 = vmatprep.mubr.f32.mxu0 %v1809_v24  ;;  %v1266_v32 = vld [vmem:[%s12644_s1 + $0x2668] sm:$0xff]  ;;  %v7815_v48 = vpack.c.bf16 %v1314_v25, %v1313_v12  ;;  %v1369_v12 = vld [vmem:[%s12644_s1 + $0x29a0] sm:$0xff]  ;;  %v1371_v27 = vld [vmem:[%s12644_s1 + $0x29b0] sm:$0xff] }
 0x269   :  { %4733 = vmatprep.mubr.f32.mxu1 %v1810_v40  ;;  %v1298_v24 = vld [vmem:[%s12644_s1 + $0x2768] sm:$0xff]  ;;  %v7785_v35 = vpack.c.bf16 %v1266_v32, %v1265_v30  ;;  %v7831_v30 = vpack.c.bf16 %v1338_v42, %v1337_v19  ;;  %v1372_v38 = vld [vmem:[%s12644_s1 + $0x29b8] sm:$0xff] }
 0x26a   :  { %7766 = vmatpush3.bf16.msra.mxu0 %v7765_v41  ;;  %v7817_v60 = vpack.c.bf16 %v1298_v24, %v1297_v21  ;;  %v1370_v25 = vld [vmem:[%s12644_s1 + $0x29a8] sm:$0xff]  ;;  %v1353_v21 = vld [vmem:[%s12644_s1 + $0x2920] sm:$0xff]  ;;  %v1340_v24 = vld [vmem:[%s12644_s1 + $0x28b8] sm:$0xff] }
 0x26b   :  { %7798 = vmatpush3.bf16.msra.mxu1 %v7797_v43  ;;  %7768 = vmatprep.subr.bf16.mxu0 %v7767_v44  ;;  %v1315_v43 = vld [vmem:[%s12644_s1 + $0x27f0] sm:$0xff]  ;;  %v1316_v44 = vld [vmem:[%s12644_s1 + $0x27f8] sm:$0xff]  ;;  %v1322_v32 = vld [vmem:[%s12644_s1 + $0x2828] sm:$0xff] }
 0x26c   :  { %7800 = vmatprep.subr.bf16.mxu1 %v7799_v50  ;;  %v35_v50 = vld [vmem:[%s12643_s0 + $0xa0] sm:$0xff] }
 0x26d   :  { %v1811_v62 = vcombine.high %v35_v50, %v35_v50  ;;  %v12240_v61 = vrot.slane %v35_v50, %v8185_v13  ;;  %v1356_v50 = vld [vmem:[%s12644_s1 + $0x2938] sm:$0xff] }
 0x26e   :  { %7770 = vmatpush3.bf16.msra.mxu0 %v7769_v55  ;;  %v1299_v55 = vld [vmem:[%s12644_s1 + $0x2770] sm:$0xff] }
 0x26f   :  { %7802 = vmatpush3.bf16.msra.mxu1 %v7801_v57  ;;  %7772 = vmatprep.subr.bf16.mxu0 %v7771_v56  ;;  %v7819_v56 = vpack.c.bf16 %v1316_v44, %v1315_v43  ;;  %v7821_v53 = vpack.c.bf16 %v1300_v45, %v1299_v55  ;;  %v12249_v22 = vrot.slane %v1811_v62, %v8185_v13  ;;  %v1323_v44 = vld [vmem:[%s12644_s1 + $0x2830] sm:$0xff]  ;;  %v1326_v45 = vld [vmem:[%s12644_s1 + $0x2848] sm:$0xff]  ;;  %v1344_v62 = vld [vmem:[%s12644_s1 + $0x28d8] sm:$0xff] }
 0x270   :  { %7804 = vmatprep.subr.bf16.mxu1 %v7803_v49  ;;  %v1365_v49 = vld [vmem:[%s12644_s1 + $0x2980] sm:$0xff]  ;;  %v1826_v26 = vcombine.high %v12240_v61, %v12240_v61 }
 0x272   :  { %7774 = vmatpush3.bf16.msra.mxu0 %v7773_v0  ;;  %v1317_v0 = vld [vmem:[%s12644_s1 + $0x2800] sm:$0xff] }
 0x273   :  { %7806 = vmatpush3.bf16.msra.mxu1 %v7805_v1  ;;  %7776 = vmatprep.subr.bf16.mxu0 %v7775_v2  ;;  %v1318_v1 = vld [vmem:[%s12644_s1 + $0x2808] sm:$0xff]  ;;  %v1349_v2 = vld [vmem:[%s12644_s1 + $0x2900] sm:$0xff] }
 0x274   :  { %7808 = vmatprep.subr.bf16.mxu1 %v7807_v5  ;;  %v1336_v5 = vld [vmem:[%s12644_s1 + $0x2898] sm:$0xff]  ;;  %v7825_v63 = vpack.c.bf16 %v1318_v1, %v1317_v0 }
 0x276   :  { %7778 = vmatpush3.bf16.msra.mxu0 %v7777_v10  ;;  %v7857_v10 = vpack.c.bf16 %v1350_v4, %v1349_v2  ;;  %v1327_v2 = vld [vmem:[%s12644_s1 + $0x2850] sm:$0xff] }
 0x277   :  { %7810 = vmatpush3.bf16.msra.mxu1 %v7809_v15  ;;  %7780 = vmatprep.subr.bf16.mxu0 %v7779_v14  ;;  %v7827_v15 = vpack.c.bf16 %v1336_v5, %v1335_v51  ;;  %v1319_v14 = vld [vmem:[%s12644_s1 + $0x2810] sm:$0xff]  ;;  %v1360_v5 = vld [vmem:[%s12644_s1 + $0x2958] sm:$0xff] }
 0x278   :  { %v5910_v34 = vpop.f32.mrb[24].mxu0  ;;  %7812 = vmatprep.subr.bf16.mxu1 %v7811_v8  ;;  %v1352_v8 = vld [vmem:[%s12644_s1 + $0x2918] sm:$0xff]  ;;  %v1359_v4 = vld [vmem:[%s12644_s1 + $0x2950] sm:$0xff] }
 0x279   :  { %v5945_v40 = vpop.f32.mrb[24].mxu1  ;;  %v5911_v41 = vpop.f32.mrb[25].mxu0 }
 0x27a   :  { %v5912_v23 = vadd.f32 %v5911_v41, %v5910_v34  ;;  %v5946_v46 = vpop.f32.mrb[25].mxu1  ;;  %7782 = vmatpush3.bf16.msra.mxu0 %v7781_v28  ;;  %v1827_v28 = vcombine.high %v12249_v22, %v12249_v22  ;;  %v1354_v34 = vld [vmem:[%s12644_s1 + $0x2928] sm:$0xff] }
 0x27b   :  { %v5947_v47 = vadd.f32 %v5946_v46, %v5945_v40  ;;  %7814 = vmatpush3.bf16.msra.mxu1 %v7813_v29  ;;  %7784 = vmatprep.subr.bf16.mxu0 %v7783_v31  ;;  %v7829_v29 = vpack.c.bf16 %v1320_v16, %v1319_v14  ;;  %v7861_v31 = vpack.c.bf16 %v1352_v8, %v1351_v17  ;;  %v1355_v46 = vld [vmem:[%s12644_s1 + $0x2930] sm:$0xff]  ;;  %v1329_v17 = vld [vmem:[%s12644_s1 + $0x2860] sm:$0xff] }
 0x27c   :  { %v3686_v57 = vadd.f32 %v5912_v23, %v12009_v6  ;;  %7816 = vmatprep.subr.bf16.mxu1 %v7815_v48  ;;  %v1366_v6 = vld [vmem:[%s12644_s1 + $0x2988] sm:$0xff]  ;;  %v1339_v48 = vld [vmem:[%s12644_s1 + $0x28b0] sm:$0xff]  ;;  %v7865_v41 = vpack.c.bf16 %v1354_v34, %v1353_v21  ;;  %v1324_v23 = vld [vmem:[%s12644_s1 + $0x2838] sm:$0xff]  ;;  %v7869_v55 = vpack.c.bf16 %v1356_v50, %v1355_v46  ;;  %v7877_v14 = vpack.c.bf16 %v1360_v5, %v1359_v4 }
 0x27d   :  { %v7855_v3 = vpack.c.bf16 %v1366_v6, %v1365_v49  ;;  %v7835_v43 = vpack.c.bf16 %v1340_v24, %v1339_v48  ;;  %v7837_v54 = vpack.c.bf16 %v1324_v23, %v1323_v44  ;;  %v1358_v49 = vld [vmem:[%s12644_s1 + $0x2948] sm:$0xff]  ;;  %v1343_v6 = vld [vmem:[%s12644_s1 + $0x28d0] sm:$0xff]  ;;  %v7847_v16 = vpack.c.bf16 %v1346_v11, %v1345_v20  ;;  %v1361_v8 = vld [vmem:[%s12644_s1 + $0x2960] sm:$0xff] }
 0x27e   :  { %v12219_v59 = vadd.f32 %v5947_v47, %v3686_v57  ;;  %7786 = vmatpush3.bf16.msra.mxu0 %v7785_v35  ;;  %v7867_v35 = vpack.c.bf16 %v1372_v38, %v1371_v27  ;;  %v1341_v47 = vld [vmem:[%s12644_s1 + $0x28c0] sm:$0xff]  ;;  %v7873_v0 = vpack.c.bf16 %v1358_v49, %v1357_v36  ;;  %v7843_v1 = vpack.c.bf16 %v1344_v62, %v1343_v6  ;;  %v1332_v27 = vld [vmem:[%s12644_s1 + $0x2878] sm:$0xff]  ;;  %v1363_v38 = vld [vmem:[%s12644_s1 + $0x2970] sm:$0xff] }
 0x27f   :  { %7818 = vmatpush3.bf16.msra.mxu1 %v7817_v60  ;;  %7788 = vmatprep.subr.bf16.mxu0 %v7787_v37  ;;  %v1342_v60 = vld [vmem:[%s12644_s1 + $0x28c8] sm:$0xff]  ;;  %v1373_v37 = vld [vmem:[%s12644_s1 + $0x29c0] sm:$0xff]  ;;  %v1383_v62 = vld [vmem:[%s12644_s1 + $0x2a10] sm:$0xff] }
 0x280   :  { %7820 = vmatprep.subr.bf16.mxu1 %v7819_v56  ;;  %v7839_v57 = vpack.c.bf16 %v1342_v60, %v1341_v47  ;;  %v1325_v56 = vld [vmem:[%s12644_s1 + $0x2840] sm:$0xff]  ;;  %v7871_v58 = vpack.c.bf16 %v1374_v39, %v1373_v37  ;;  %v1398_v23 = vld [vmem:[%s12644_s1 + $0x2a88] sm:$0xff] }
 0x281   :  { %v1397_v44 = vld [vmem:[%s12644_s1 + $0x2a80] sm:$0xff]  ;;  %v36_v46 = vld [vmem:[%s12643_s0 + $0xa8] sm:$0xff] }
 0x282   :  { %7790 = vmatpush3.bf16.msra.mxu0 %v7789_v7  ;;  %v1375_v7 = vld [vmem:[%s12644_s1 + $0x29d0] sm:$0xff]  ;;  %v7887_v60 = vpack.c.bf16 %v1398_v23, %v1397_v44  ;;  %v1381_v37 = vld [vmem:[%s12644_s1 + $0x2a00] sm:$0xff]  ;;  %v1382_v39 = vld [vmem:[%s12644_s1 + $0x2a08] sm:$0xff] }
 0x283   :  { %7822 = vmatpush3.bf16.msra.mxu1 %v7821_v53  ;;  %7824 = vmatprep.subr.bf16.mxu0 %v7823_v33  ;;  %v1376_v53 = vld [vmem:[%s12644_s1 + $0x29d8] sm:$0xff]  ;;  %v7841_v33 = vpack.c.bf16 %v1326_v45, %v1325_v56  ;;  %v12444_v45 = vrot.slane %v36_v46, %v8185_v13  ;;  %v1385_v20 = vld [vmem:[%s12644_s1 + $0x2a20] sm:$0xff] }
 0x284   :  { %7856 = vmatprep.subr.bf16.mxu1 %v7855_v3  ;;  %v1328_v3 = vld [vmem:[%s12644_s1 + $0x2858] sm:$0xff]  ;;  %v7875_v51 = vpack.c.bf16 %v1376_v53, %v1375_v7  ;;  %v1415_v53 = vld [vmem:[%s12644_s1 + $0x2b10] sm:$0xff]  ;;  %v1417_v11 = vld [vmem:[%s12644_s1 + $0x2b20] sm:$0xff] }
 0x285   :  { %4664 = vmatmul.mubr.f32.vlgmr.msra.gmra.mrb[38].mxu0 %v12030_v9  ;;  %v1321_v9 = vld [vmem:[%s12644_s1 + $0x2820] sm:$0xff]  ;;  %v1400_v56 = vld [vmem:[%s12644_s1 + $0x2a98] sm:$0xff] }
 0x286   :  { %4734 = vmatmul.mubr.f32.vlgmr.msra.gmra.mrb[38].mxu1 %v12039_v52  ;;  %7826 = vmatpush3.bf16.msra.mxu0 %v7825_v63  ;;  %v7863_v52 = vpack.c.bf16 %v1370_v25, %v1369_v12  ;;  %v7833_v40 = vpack.c.bf16 %v1322_v32, %v1321_v9  ;;  %v1377_v63 = vld [vmem:[%s12644_s1 + $0x29e0] sm:$0xff]  ;;  %v1347_v12 = vld [vmem:[%s12644_s1 + $0x28f0] sm:$0xff]  ;;  %v1348_v25 = vld [vmem:[%s12644_s1 + $0x28f8] sm:$0xff] }
 0x287   :  { %7858 = vmatpush3.bf16.msra.mxu1 %v7857_v10  ;;  %7828 = vmatprep.subr.bf16.mxu0 %v7827_v15  ;;  %v1378_v10 = vld [vmem:[%s12644_s1 + $0x29e8] sm:$0xff]  ;;  %v7845_v15 = vpack.c.bf16 %v1328_v3, %v1327_v2  ;;  %v7851_v24 = vpack.c.bf16 %v1348_v25, %v1347_v12  ;;  %v1384_v7 = vld [vmem:[%s12644_s1 + $0x2a18] sm:$0xff]  ;;  %v1843_v2 = vcombine.high %v12444_v45, %v12444_v45 }
 0x288   :  { %7860 = vmatprep.subr.bf16.mxu1 %v7859_v18  ;;  %4803 = vmatprep.mubr.f32.mxu0 %v1826_v26  ;;  %v1330_v18 = vld [vmem:[%s12644_s1 + $0x2868] sm:$0xff]  ;;  %v7879_v42 = vpack.c.bf16 %v1378_v10, %v1377_v63  ;;  %v7893_v4 = vpack.c.bf16 %v1384_v7, %v1383_v62  ;;  %v1403_v63 = vld [vmem:[%s12644_s1 + $0x2ab0] sm:$0xff]  ;;  %v1404_v10 = vld [vmem:[%s12644_s1 + $0x2ab8] sm:$0xff] }
 0x289   :  { %4873 = vmatprep.mubr.f32.mxu1 %v1827_v28  ;;  %v1362_v26 = vld [vmem:[%s12644_s1 + $0x2968] sm:$0xff]  ;;  %v7849_v21 = vpack.c.bf16 %v1330_v18, %v1329_v17  ;;  %v1387_v17 = vld [vmem:[%s12644_s1 + $0x2a30] sm:$0xff]  ;;  %v1388_v18 = vld [vmem:[%s12644_s1 + $0x2a38] sm:$0xff] }
 0x28a   :  { %7830 = vmatpush3.bf16.msra.mxu0 %v7829_v29  ;;  %v7881_v48 = vpack.c.bf16 %v1362_v26, %v1361_v8  ;;  %v1419_v8 = vld [vmem:[%s12644_s1 + $0x2b30] sm:$0xff]  ;;  %v1406_v26 = vld [vmem:[%s12644_s1 + $0x2ac8] sm:$0xff]  ;;  %v7901_v12 = vpack.c.bf16 %v1388_v18, %v1387_v17  ;;  %v1437_v17 = vld [vmem:[%s12644_s1 + $0x2bc0] sm:$0xff] }
 0x28b   :  { %7862 = vmatpush3.bf16.msra.mxu1 %v7861_v31  ;;  %7832 = vmatprep.subr.bf16.mxu0 %v7831_v30  ;;  %v1379_v31 = vld [vmem:[%s12644_s1 + $0x29f0] sm:$0xff]  ;;  %v1380_v30 = vld [vmem:[%s12644_s1 + $0x29f8] sm:$0xff]  ;;  %v1438_v18 = vld [vmem:[%s12644_s1 + $0x2bc8] sm:$0xff] }
 0x28c   :  { %7864 = vmatprep.subr.bf16.mxu1 %v7863_v52  ;;  %v1331_v52 = vld [vmem:[%s12644_s1 + $0x2870] sm:$0xff] }
 0x28d   :  { %v7853_v47 = vpack.c.bf16 %v1332_v27, %v1331_v52  ;;  %v1392_v27 = vld [vmem:[%s12644_s1 + $0x2a58] sm:$0xff] }
 0x28e   :  { %7834 = vmatpush3.bf16.msra.mxu0 %v7833_v40  ;;  %v1364_v40 = vld [vmem:[%s12644_s1 + $0x2978] sm:$0xff] }
 0x28f   :  { %7866 = vmatpush3.bf16.msra.mxu1 %v7865_v41  ;;  %7836 = vmatprep.subr.bf16.mxu0 %v7835_v43  ;;  %v7883_v43 = vpack.c.bf16 %v1380_v30, %v1379_v31  ;;  %v1390_v31 = vld [vmem:[%s12644_s1 + $0x2a48] sm:$0xff]  ;;  %v1421_v30 = vld [vmem:[%s12644_s1 + $0x2b40] sm:$0xff] }
 0x290   :  { %7868 = vmatprep.subr.bf16.mxu1 %v7867_v35  ;;  %v1828_v35 = vcombine.high %v36_v46, %v36_v46 }
 0x292   :  { %7838 = vmatpush3.bf16.msra.mxu0 %v7837_v54  ;;  %v1413_v54 = vld [vmem:[%s12644_s1 + $0x2b00] sm:$0xff]  ;;  %v12447_v36 = vrot.slane %v1828_v35, %v8185_v13  ;;  %v8012_v13 = vmov 0.0|0.0  }
 0x293   :  { %7870 = vmatpush3.bf16.msra.mxu1 %v7869_v55  ;;  %7840 = vmatprep.subr.bf16.mxu0 %v7839_v57  ;;  %v1414_v55 = vld [vmem:[%s12644_s1 + $0x2b08] sm:$0xff]  ;;  %v1399_v57 = vld [vmem:[%s12644_s1 + $0x2a90] sm:$0xff]  ;;  %v1393_v35 = vld [vmem:[%s12644_s1 + $0x2a60] sm:$0xff] }
 0x294   :  { %7872 = vmatprep.subr.bf16.mxu1 %v7871_v58  ;;  %v7889_v58 = vpack.c.bf16 %v1382_v39, %v1381_v37  ;;  %v7920_v49 = vpack.c.bf16 %v1414_v55, %v1413_v54  ;;  %v7891_v6 = vpack.c.bf16 %v1400_v56, %v1399_v57  ;;  %v1844_v3 = vcombine.high %v12447_v36, %v12447_v36  ;;  %v1426_v37 = vld [vmem:[%s12644_s1 + $0x2b68] sm:$0xff]  ;;  %v1411_v39 = vld [vmem:[%s12644_s1 + $0x2af0] sm:$0xff]  ;;  %v1412_v54 = vld [vmem:[%s12644_s1 + $0x2af8] sm:$0xff] }
 0x295   :  { %v7915_v7 = vpack.c.bf16 %v1412_v54, %v1411_v39 }
 0x296   :  { %7842 = vmatpush3.bf16.msra.mxu0 %v7841_v33  ;;  %v1416_v33 = vld [vmem:[%s12644_s1 + $0x2b18] sm:$0xff] }
 0x297   :  { %7874 = vmatpush3.bf16.msra.mxu1 %v7873_v0  ;;  %7844 = vmatprep.subr.bf16.mxu0 %v7843_v1  ;;  %v1401_v0 = vld [vmem:[%s12644_s1 + $0x2aa0] sm:$0xff]  ;;  %v1402_v1 = vld [vmem:[%s12644_s1 + $0x2aa8] sm:$0xff] }
 0x298   :  { %v5980_v19 = vpop.f32.mrb[26].mxu0  ;;  %7876 = vmatprep.subr.bf16.mxu1 %v7875_v51  ;;  %v7923_v51 = vpack.c.bf16 %v1416_v33, %v1415_v53  ;;  %v7895_v5 = vpack.c.bf16 %v1402_v1, %v1401_v0  ;;  %v1395_v53 = vld [vmem:[%s12644_s1 + $0x2a70] sm:$0xff]  ;;  %v1396_v33 = vld [vmem:[%s12644_s1 + $0x2a78] sm:$0xff] }
 0x299   :  { %v6015_v28 = vpop.f32.mrb[26].mxu1  ;;  %v5981_v29 = vpop.f32.mrb[27].mxu0  ;;  %v1427_v1 = vld [vmem:[%s12644_s1 + $0x2b70] sm:$0xff] }
 0x29a   :  { %v5982_v9 = vadd.f32 %v5981_v29, %v5980_v19  ;;  %v6016_v32 = vpop.f32.mrb[27].mxu1  ;;  %7846 = vmatpush3.bf16.msra.mxu0 %v7845_v15  ;;  %v1420_v19 = vld [vmem:[%s12644_s1 + $0x2b38] sm:$0xff]  ;;  %v1389_v29 = vld [vmem:[%s12644_s1 + $0x2a40] sm:$0xff] }
 0x29b   :  { %v6017_v34 = vadd.f32 %v6016_v32, %v6015_v28  ;;  %7878 = vmatpush3.bf16.msra.mxu1 %v7877_v14  ;;  %7848 = vmatprep.subr.bf16.mxu0 %v7847_v16  ;;  %v7899_v16 = vpack.c.bf16 %v1404_v10, %v1403_v63  ;;  %v7929_v25 = vpack.c.bf16 %v1420_v19, %v1419_v8  ;;  %v1407_v32 = vld [vmem:[%s12644_s1 + $0x2ad0] sm:$0xff]  ;;  %v1433_v63 = vld [vmem:[%s12644_s1 + $0x2ba0] sm:$0xff]  ;;  %v1434_v10 = vld [vmem:[%s12644_s1 + $0x2ba8] sm:$0xff] }
 0x29c   :  { %v3826_v41 = vadd.f32 %v5982_v9, %v12219_v59  ;;  %7880 = vmatprep.subr.bf16.mxu1 %v7879_v42  ;;  %v7885_v59 = vpack.c.bf16 %v1364_v40, %v1363_v38  ;;  %v1405_v42 = vld [vmem:[%s12644_s1 + $0x2ac0] sm:$0xff]  ;;  %v1422_v9 = vld [vmem:[%s12644_s1 + $0x2b48] sm:$0xff]  ;;  %v7905_v52 = vpack.c.bf16 %v1390_v31, %v1389_v29  ;;  %v1423_v38 = vld [vmem:[%s12644_s1 + $0x2b50] sm:$0xff]  ;;  %v7956_v8 = vpack.c.bf16 %v1438_v18, %v1437_v17 }
 0x29d   :  { %v7903_v28 = vpack.c.bf16 %v1406_v26, %v1405_v42  ;;  %v1424_v40 = vld [vmem:[%s12644_s1 + $0x2b58] sm:$0xff]  ;;  %v1439_v19 = vld [vmem:[%s12644_s1 + $0x2bd0] sm:$0xff] }
 0x29e   :  { %v12423_v50 = vadd.f32 %v6017_v34, %v3826_v41  ;;  %7850 = vmatpush3.bf16.msra.mxu0 %v7849_v21  ;;  %v1408_v21 = vld [vmem:[%s12644_s1 + $0x2ad8] sm:$0xff]  ;;  %v7932_v34 = vpack.c.bf16 %v1422_v9, %v1421_v30  ;;  %v1409_v41 = vld [vmem:[%s12644_s1 + $0x2ae0] sm:$0xff]  ;;  %v7935_v23 = vpack.c.bf16 %v1424_v40, %v1423_v38 }
 0x29f   :  { %7882 = vmatpush3.bf16.msra.mxu1 %v7881_v48  ;;  %7852 = vmatprep.subr.bf16.mxu0 %v7851_v24  ;;  %v7907_v48 = vpack.c.bf16 %v1408_v21, %v1407_v32  ;;  %v1391_v24 = vld [vmem:[%s12644_s1 + $0x2a50] sm:$0xff]  ;;  %v1440_v42 = vld [vmem:[%s12644_s1 + $0x2bd8] sm:$0xff]  ;;  %v8013_v32 = vmov 0.0   ;;  %v1441_v21 = vld [vmem:[%s12644_s1 + $0x2be0] sm:$0xf] }
 0x2a0   :  { %7884 = vmatprep.subr.bf16.mxu1 %v7883_v43  ;;  %v1410_v43 = vld [vmem:[%s12644_s1 + $0x2ae8] sm:$0xff]  ;;  %v7909_v44 = vpack.c.bf16 %v1392_v27, %v1391_v24  ;;  %v7959_v26 = vpack.c.bf16 %v1440_v42, %v1439_v19 }
 0x2a1   :  { %v7911_v46 = vpack.c.bf16 %v1410_v43, %v1409_v41 }
 0x2a2   :  { %7854 = vmatpush3.bf16.msra.mxu0 %v7853_v47  ;;  %v1394_v47 = vld [vmem:[%s12644_s1 + $0x2a68] sm:$0xff] }
 0x2a3   :  { %7886 = vmatpush3.bf16.msra.mxu1 %v7885_v59  ;;  %7888 = vmatprep.subr.bf16.mxu0 %v7887_v60  ;;  %v1425_v59 = vld [vmem:[%s12644_s1 + $0x2b60] sm:$0xff] }
 0x2a4   :  { %7919 = vmatprep.subr.bf16.mxu1 %v8012_v13  ;;  %v7938_v62 = vpack.c.bf16 %v1426_v37, %v1425_v59 }
 0x2a5   :  { %4804 = vmatmul.mubr.f32.vlgmr.msra.gmra.mrb[40].mxu0 %v12240_v61  ;;  %v1386_v61 = vld [vmem:[%s12644_s1 + $0x2a28] sm:$0xff] }
 0x2a6   :  { %4874 = vmatmul.mubr.f32.vlgmr.msra.gmra.mrb[40].mxu1 %v12249_v22  ;;  %7890 = vmatpush3.bf16.msra.mxu0 %v7889_v58  ;;  %v1418_v22 = vld [vmem:[%s12644_s1 + $0x2b28] sm:$0xff]  ;;  %v7897_v15 = vpack.c.bf16 %v1386_v61, %v1385_v20  ;;  %v1431_v61 = vld [vmem:[%s12644_s1 + $0x2b90] sm:$0xff] }
 0x2a7   :  { %7921 = vmatpush1.bf16.msra.mxu1 %v7920_v49  ;;  %7892 = vmatprep.subr.bf16.mxu0 %v7891_v6  ;;  %v7926_v14 = vpack.c.bf16 %v1418_v22, %v1417_v11  ;;  %v7913_v49 = vpack.c.bf16 %v1394_v47, %v1393_v35  ;;  %v1432_v11 = vld [vmem:[%s12644_s1 + $0x2b98] sm:$0xff] }
 0x2a8   :  { %7922 = vmatprep.subr.bf16.mxu1 %v8012_v13  ;;  %4943 = vmatprep.mubr.f32.mxu0 %v1843_v2  ;;  %v1428_v2 = vld [vmem:[%s12644_s1 + $0x2b78] sm:$0xff]  ;;  %v7947_v22 = vpack.c.bf16 %v1432_v11, %v1431_v61 }
 0x2a9   :  { %5037 = vmatprep.mubr.msk.f32.mxu1 %vm1932_vm0, %v1844_v3 }
 0x2aa   :  { %7894 = vmatpush3.bf16.msra.mxu0 %v7893_v4  ;;  %v7917_v4 = vpack.c.bf16 %v1396_v33, %v1395_v53 }
 0x2ab   :  { %7924 = vmatpush1.bf16.msra.mxu1 %v7923_v51  ;;  %7896 = vmatprep.subr.bf16.mxu0 %v7895_v5  ;;  %v7941_v51 = vpack.c.bf16 %v1428_v2, %v1427_v1  ;;  %v1430_v5 = vld [vmem:[%s12644_s1 + $0x2b88] sm:$0xff] }
 0x2ac   :  { %7925 = vmatprep.subr.bf16.mxu1 %v8012_v13 }
 0x2ae   :  { %7898 = vmatpush3.bf16.msra.mxu0 %v7897_v15  ;;  %v7950_v15 = vpack.c.bf16 %v1434_v10, %v1433_v63 }
 0x2af   :  { %7927 = vmatpush1.bf16.msra.mxu1 %v7926_v14  ;;  %7900 = vmatprep.subr.bf16.mxu0 %v7899_v16  ;;  %v1436_v14 = vld [vmem:[%s12644_s1 + $0x2bb8] sm:$0xff] }
 0x2b0   :  { %7928 = vmatprep.subr.bf16.mxu1 %v8012_v13 }
 0x2b2   :  { %7902 = vmatpush3.bf16.msra.mxu0 %v7901_v12 }
 0x2b3   :  { %7930 = vmatpush1.bf16.msra.mxu1 %v7929_v25  ;;  %7904 = vmatprep.subr.bf16.mxu0 %v7903_v28 }
 0x2b4   :  { %7931 = vmatprep.subr.bf16.mxu1 %v8012_v13 }
 0x2b6   :  { %7906 = vmatpush3.bf16.msra.mxu0 %v7905_v52 }
 0x2b7   :  { %7933 = vmatpush1.bf16.msra.mxu1 %v7932_v34  ;;  %7908 = vmatprep.subr.bf16.mxu0 %v7907_v48 }
 0x2b8   :  { %v6050_v60 = vpop.f32.mrb[28].mxu0  ;;  %7934 = vmatprep.subr.bf16.mxu1 %v8012_v13 }
 0x2b9   :  { %v6085_v55 = vpop.f32.mrb[28].mxu1  ;;  %v6051_v57 = vpop.f32.mrb[29].mxu0 }
 0x2ba   :  { %v6052_v56 = vadd.f32 %v6051_v57, %v6050_v60  ;;  %v6086_v58 = vpop.f32.mrb[29].mxu1  ;;  %7910 = vmatpush3.bf16.msra.mxu0 %v7909_v44 }
 0x2bb   :  { %v6087_v6 = vadd.f32 %v6086_v58, %v6085_v55  ;;  %7936 = vmatpush1.bf16.msra.mxu1 %v7935_v23  ;;  %7912 = vmatprep.subr.bf16.mxu0 %v7911_v46 }
 0x2bc   :  { %v3966_v0 = vadd.f32 %v6052_v56, %v12423_v50  ;;  %7937 = vmatprep.subr.bf16.mxu1 %v8012_v13  ;;  %v1429_v50 = vld [vmem:[%s12644_s1 + $0x2b80] sm:$0xff] }
 0x2bd   :  { %v7944_v20 = vpack.c.bf16 %v1430_v5, %v1429_v50 }
 0x2be   :  { %v4036_v3 = vadd.f32 %v6087_v6, %v3966_v0  ;;  %7914 = vmatpush3.bf16.msra.mxu0 %v7913_v49 }
 0x2bf   :  { %7939 = vmatpush1.bf16.msra.mxu1 %v7938_v62  ;;  %7916 = vmatprep.subr.bf16.mxu0 %v7915_v7 }
 0x2c0   :  { %7940 = vmatprep.subr.bf16.mxu1 %v8012_v13 }
 0x2c2   :  { %7918 = vmatpush3.bf16.msra.mxu0 %v7917_v4 }
 0x2c3   :  { %7942 = vmatpush1.bf16.msra.mxu1 %v7941_v51 }
 0x2c4   :  { %7943 = vmatprep.subr.bf16.mxu1 %v8012_v13 }
 0x2c5   :  { %4944 = vmatmul.mubr.f32.vlgmr.msra.gmra.mrb[42].mxu0 %v12444_v45  ;;  %v1435_v45 = vld [vmem:[%s12644_s1 + $0x2bb0] sm:$0xff]  ;;  %s8014_s1 = smov [#allocation2]  }
 0x2c6   :  { %v7953_v16 = vpack.c.bf16 %v1436_v14, %v1435_v45  ;;  %s5027_s18 = sshll.u32 %s8014_s1, 4  ;;  %s5028_s18 = int_to_ptr.vmem [resolvable:$true] %s5027_s18 }
 0x2c7   :  { %7945 = vmatpush1.bf16.msra.mxu1 %v7944_v20  ;;  %s7987_s19 = scalar_lea.vmem %s5028_s18, 32  ;;  %p7992_p1 = scmp.lt.s32.totalorder %s5028_s18, %s5028_s18 }
 0x2c8   :  { %7946 = vmatprep.subr.bf16.mxu1 %v8012_v13  ;;  %p7988_p0 = scmp.ne.s32.totalorder %s5028_s18, %s7987_s19  ;;  %p7993_p2 = scmp.lt.s32.totalorder %s7987_s19, %s7987_s19 }
 0x2ca   :  { %p7994_p3 = por %p7993_p2, %p7992_p1 }
 0x2cb   :  { %7948 = vmatpush1.bf16.msra.mxu1 %v7947_v22 }
 0x2cc   :  { %7949 = vmatprep.subr.bf16.mxu1 %v8012_v13  ;;  %p7995_p4 = pnand %p7994_p3, %p7988_p0 }
 0x2cf   :  { %7951 = vmatpush1.bf16.msra.mxu1 %v7950_v15 }
 0x2d0   :  { %7952 = vmatprep.subr.bf16.mxu1 %v8012_v13 }
 0x2d3   :  { %7954 = vmatpush1.bf16.msra.mxu1 %v7953_v16 }
 0x2d4   :  { %7955 = vmatprep.subr.bf16.mxu1 %v8012_v13 }
 0x2d7   :  { %7957 = vmatpush1.bf16.msra.mxu1 %v7956_v8 }
 0x2d8   :  { %v6120_v12 = vpop.f32.mrb[30].mxu0  ;;  %7958 = vmatprep.subr.bf16.mxu1 %v8012_v13 }
 0x2d9   :  { %v6155_v25 = vpop.f32.mrb[30].mxu1  ;;  %v6121_v28 = vpop.f32.mrb[31].mxu0 }
 0x2da   :  { %v6122_v29 = vadd.f32 %v6121_v28, %v6120_v12  ;;  %v6156_v31 = vpop.f32.mrb[31].mxu1 }
 0x2db   :  { %v6157_v30 = vadd.f32 %v6156_v31, %v6155_v25  ;;  %7960 = vmatpush1.bf16.msra.mxu1 %v7959_v26 }
 0x2dc   :  { %v4106_v9 = vadd.f32 %v6122_v29, %v4036_v3  ;;  %5005 = vmatprep.subr.mxu1 %v8013_v32 }
 0x2de   :  { %v4176_v52 = vadd.f32 %v6157_v30, %v4106_v9 }
 0x2df   :  { %5036 = vmatpush1.msk.msra.mxu1 %vm1935_vm1, %v1441_v21 }
 0x2e0   :  { %5014 = vmatmul.mubr.f32.vlgmr.msra.gmra.mrb[42].mxu1 %v12447_v36 }
 0x2f8   :  { %v6190_v34 = vpop.f32.mrb[32].mxu0 }
 0x2f9   :  { %v6225_v13 = vpop.f32.mrb[32].mxu1  ;;  %v6191_v48 = vpop.f32.mrb[33].mxu0 }
 0x2fa   :  { %v6192_v24 = vadd.f32 %v6191_v48, %v6190_v34  ;;  %v6226_v27 = vpop.f32.mrb[33].mxu1 }
 0x2fb   :  { %v6227_v38 = vadd.f32 %v6226_v27, %v6225_v13 }
 0x2fc   :  { %v4246_v40 = vadd.f32 %v6192_v24, %v4176_v52 }
 0x2fe   :  { %v4316_v41 = vadd.f32 %v6227_v38, %v4246_v40 }
 0x318   :  { %v6260_v43 = vpop.f32.mrb[34].mxu0 }
 0x319   :  { %v6295_v44 = vpop.f32.mrb[34].mxu1  ;;  %v6261_v23 = vpop.f32.mrb[35].mxu0 }
 0x31a   :  { %v6262_v46 = vadd.f32 %v6261_v23, %v6260_v43  ;;  %v6296_v35 = vpop.f32.mrb[35].mxu1 }
 0x31b   :  { %v6297_v47 = vadd.f32 %v6296_v35, %v6295_v44 }
 0x31c   :  { %v4386_v59 = vadd.f32 %v6262_v46, %v4316_v41 }
 0x31e   :  { %v4456_v60 = vadd.f32 %v6297_v47, %v4386_v59 }
 0x338   :  { %v6330_v37 = vpop.f32.mrb[36].mxu0 }
 0x339   :  { %v6365_v39 = vpop.f32.mrb[36].mxu1  ;;  %v6331_v54 = vpop.f32.mrb[37].mxu0 }
 0x33a   :  { %v6332_v36 = vadd.f32 %v6331_v54, %v6330_v37  ;;  %v6366_v55 = vpop.f32.mrb[37].mxu1 }
 0x33b   :  { %v6367_v57 = vadd.f32 %v6366_v55, %v6365_v39 }
 0x33c   :  { %v4526_v56 = vadd.f32 %v6332_v36, %v4456_v60 }
 0x33e   :  { %v4596_v58 = vadd.f32 %v6367_v57, %v4526_v56 }
 0x358   :  { %v6400_v49 = vpop.f32.mrb[38].mxu0 }
 0x359   :  { %v6435_v6 = vpop.f32.mrb[38].mxu1  ;;  %v6401_v62 = vpop.f32.mrb[39].mxu0 }
 0x35a   :  { %v6402_v7 = vadd.f32 %v6401_v62, %v6400_v49  ;;  %v6436_v53 = vpop.f32.mrb[39].mxu1 }
 0x35b   :  { %v6437_v33 = vadd.f32 %v6436_v53, %v6435_v6 }
 0x35c   :  { %v4666_v0 = vadd.f32 %v6402_v7, %v4596_v58 }
 0x35e   :  { %v4736_v1 = vadd.f32 %v6437_v33, %v4666_v0 }
 0x378   :  { %v6470_v2 = vpop.f32.mrb[40].mxu0 }
 0x379   :  { %v6505_v3 = vpop.f32.mrb[40].mxu1  ;;  %v6471_v4 = vpop.f32.mrb[41].mxu0 }
 0x37a   :  { %v6472_v51 = vadd.f32 %v6471_v4, %v6470_v2  ;;  %v6506_v50 = vpop.f32.mrb[41].mxu1 }
 0x37b   :  { %v6507_v5 = vadd.f32 %v6506_v50, %v6505_v3 }
 0x37c   :  { %v4806_v20 = vadd.f32 %v6472_v51, %v4736_v1 }
 0x37e   :  { %v4876_v61 = vadd.f32 %v6507_v5, %v4806_v20 }
 0x398   :  { %v6540_v11 = vpop.f32.mrb[42].mxu0 }
 0x399   :  { %v6541_v22 = vpop.f32.mrb[43].mxu0 }
 0x39a   :  { %v6542_v63 = vadd.f32 %v6541_v22, %v6540_v11 }
 0x39c   :  { %v4946_v10 = vadd.f32 %v6542_v63, %v4876_v61 }
 0x3b3   :  { %v5015_v15 = vpop.f32.mrb[42].mxu1 }
 0x3b4   :  { %v5016_v45 = vadd.f32 %v5015_v15, %v4946_v10  ;;  %v5017_v14 = vpop.f32.mrb[43].mxu1 }
 0x3b6   :  { %5020 = vst.msk [vmem:[#allocation2] sm:$0x3] %vm5019_vm2, %v5016_v45 }
 0x3b7   :  { %7998 = shalt.err (!%p7995_p4)
}
 0x3b8   :  { %s7999_s0 = scalar_lea.hbm %s12646_s3, 32 }
 0x3b9   :  { %p8000_p5 = scmp.ne.s32.totalorder %s12646_s3, %s7999_s0  ;;  %p8003_p6 = scmp.lt.u32.totalorder %s7999_s0, %s12646_s3 }
 0x3bb   :  { %p8005_p7 = pnand %p8003_p6, %p8000_p5 }
 0x3bd   :  { %8008 = shalt.err (!%p8005_p7)
}
 0x3be   :  { %5030 = dma.vmem_to_hbm [thread:$0]  %s5028_s18, 32, %s12646_s3, [#allocation3]  }
 0x3bf   :  { %8009 = dma.done.wait [#allocation3], 32  }
 0x3c0   :  { %8010 = vsyncadd [#allocation3], 4294967264 }
 0x3c1   :  { %5034 = vsyncpa [#allocation3], 1 }

</bundles_post_ra>
